<compile_context>
chip_gen: v7x
topology: tpu7x:2x2x1
jax: 0.10.0
libtpu: 0.0.40
codegen_flags: <defaults>
</compile_context>

<pallas_src>
import functools

import numpy as np
import jax
import jax.numpy as jnp
from jax.experimental import pallas as pl
from jax.experimental.pallas import tpu as pltpu


def _round_up(n, m):
    return ((n + m - 1) // m) * m


# ------------------------- host-side weight prep --------------------------- #
def _banded_weight(w, w_in, col_major_channel, kdim_pad, n_pad):
    """(Cin,Cout,k,k) ConvTranspose2d weight -> per-ky banded matrices (k, Kp, Np).

    B[ky, x*Cin+ci, ox*Cout+co] = w[ci, co, ky, ox-2x]   (0 if ox-2x outside [0,k))
    so  A(H, W*Cin) @ B[ky]  applies every kx tap and the stride-2 upsampling along
    W for kernel row ky in a single matmul.  col_major_channel=True orders columns
    (co, ox) instead of (ox, co) (last layer -> NCHW output without a transpose).
    Result is zero-padded to (kdim_pad, n_pad) so all kernel stores are lane-dense.
    """
    w = np.asarray(w, np.float32)
    cin, cout, k, _ = w.shape
    wo = (w_in - 1) * 2 + k
    wp = np.transpose(w, (2, 0, 3, 1))                # (ky, Cin, kx, Cout)
    b = np.zeros((k, w_in, cin, wo, cout), np.float32)
    for x in range(w_in):
        b[:, x, :, 2 * x:2 * x + k, :] = wp
    if col_major_channel:
        b = np.transpose(b, (0, 1, 2, 4, 3))          # (ky, W, Cin, Cout, Wo)
        b = b.reshape(k, w_in * cin, cout * wo)
    else:
        b = b.reshape(k, w_in * cin, wo * cout)
    assert kdim_pad >= b.shape[1] and n_pad >= b.shape[2]
    out = np.zeros((k, kdim_pad, n_pad), np.float32)
    out[:, :b.shape[1], :b.shape[2]] = b
    return out


def _scatter_matrix(h_in, k, h_in_pad, h_out_pad):
    """0/1 matrix (Ho_pad, k*H_pad): out[2y+ky] += T[ky*H_pad + y] (stride-2 overlap-add).

    Columns for padded rows (y >= h_in) and rows beyond the true output height are
    zero, so padded garbage never leaks into valid outputs.
    """
    s = np.zeros((h_out_pad, k, h_in_pad), np.float32)
    for ky in range(k):
        for y in range(h_in):
            s[2 * y + ky, ky, y] = 1.0
    return s.reshape(h_out_pad, k * h_in_pad)


def prepare_params(params):
    """One-time host-side transform (fold / band / pad) of the PyTorch params."""
    lin_w = np.asarray(params["lin_w"], np.float32)   # (32d, latent)
    lin_b = np.asarray(params["lin_b"], np.float32)   # (32d,)
    w1 = np.asarray(params["w1"], np.float32)         # (32d, 4d, 5, 5)
    b1 = np.asarray(params["b1"], np.float32)
    k1, c1 = w1.shape[2], w1.shape[1]
    latent = lin_w.shape[1]

    # Fold Linear + ConvTranspose#1 (1x1 spatial input, no activation in between):
    #   a1[y, kx*c1+c] = relu( x @ w1c[y] + b1c[y] )
    w1r = np.transpose(w1, (2, 0, 3, 1)).reshape(k1, w1.shape[0], k1 * c1)
    w1c = np.einsum("cl,kcn->kln", lin_w, w1r)                  # (k1, latent, k1*c1)
    b1c = np.einsum("c,kcn->kn", lin_b, w1r) + np.tile(b1, k1)[None, :]

    n1 = k1 * c1
    n1p = _round_up(n1, 128)
    k1p = _round_up(k1 * latent + k1, 128)
    # Stacked + bias-augmented layer-1 weight: the wrapper builds a block-diagonal
    # x operand with 1.0 indicator columns, so ONE matmul yields all k1 output rows
    # (pad rows are exactly zero).
    w1s = np.zeros((k1p, n1p), np.float32)
    for y in range(k1):
        w1s[y * latent:(y + 1) * latent, :n1] = w1c[y]
        w1s[k1 * latent + y, :n1] = b1c[y]
    prep = {"w1s": jnp.asarray(w1s, jnp.bfloat16)}

    h = k1                        # spatial size after layer 1
    hp = _round_up(h, 16)         # padded rows per sample (bf16 sublane tile = 16)
    kdim_p = n1p                  # K of the next banded matmul == padded N of this one
    for i, (wk, bk) in enumerate([(params["w2"], params["b2"]),
                                  (params["w3"], params["b3"]),
                                  (params["w4"], params["b4"])], start=2):
        wk = np.asarray(wk, np.float32)
        bk = np.asarray(bk, np.float32)
        k = wk.shape[2]
        cout = wk.shape[1]
        wo = (h - 1) * 2 + k
        ho = wo
        last = (i == 4)
        n = (cout * wo) if last else (wo * cout)
        npad = _round_up(n, 128)
        hop = ho if last else _round_up(ho, 16)
        prep[f"B{i}"] = jnp.asarray(
            _banded_weight(wk, h, last, kdim_p, npad), jnp.bfloat16)
        prep[f"S{i}"] = jnp.asarray(
            _scatter_matrix(h, k, hp, hop), jnp.bfloat16)        # 0/1 -> exact in bf16
        brow = np.zeros((1, npad), np.float32)
        brow[0, :n] = np.repeat(bk, wo) if last else np.tile(bk, wo)
        prep[f"bias{i}"] = jnp.asarray(brow, jnp.float32)
        h, hp, kdim_p = ho, hop, npad
    return prep


# ------------------------------- kernel ------------------------------------ #
def _deconv_layer(a_ref, b_ref, s_ref, bias_ref, t_ref, bblk, write_out):
    """One ConvTranspose2d(stride=2, pad=0) over a block of `bblk` samples.

    a_ref   : (bblk*Hin_pad, K)      bf16  input rows, Hin_pad rows per sample
    b_ref   : (k, K, N)              bf16  banded weights (all kx taps + W upsample)
    s_ref   : (Hout_pad, k*Hin_pad)  bf16  0/1 stride-2 overlap-add along H
    bias_ref: (1, N)                 f32
    t_ref   : (k*bblk*Hin_pad, N)    bf16  scratch, ky-major row blocks
    write_out(sample, o_f32) consumes one sample's (Hout_pad, N) result.
    """
    k = b_ref.shape[0]
    bhp = t_ref.shape[0] // k            # bblk * Hin_pad
    hp = bhp // bblk                     # Hin_pad (multiple of 16)
    a = a_ref[...]
    for ky in range(k):                  # k banded matmuls, M = bblk*Hin_pad
        t_ref[ky * bhp:(ky + 1) * bhp, :] = jnp.dot(
            a, b_ref[ky], preferred_element_type=jnp.float32).astype(jnp.bfloat16)
    s_mat = s_ref[...]
    bias = bias_ref[...]
    for smp in range(bblk):              # stride-2 overlap-add: one matmul / sample
        t_s = jnp.concatenate(
            [t_ref[ky * bhp + smp * hp: ky * bhp + (smp + 1) * hp, :]
             for ky in range(k)], axis=0)                       # (k*Hin_pad, N)
        o = jnp.dot(s_mat, t_s, preferred_element_type=jnp.float32) + bias
        write_out(smp, o)


def _decoder_kernel(x_ref, w1_ref,
                    b2_ref, s2_ref, bias2_ref,
                    b3_ref, s3_ref, bias3_ref,
                    b4_ref, s4_ref, bias4_ref,
                    o_ref,
                    a1_ref, t2_ref, a2_ref, t3_ref, a3_ref, t4_ref):
    bblk = o_ref.shape[0]

    # ---- Linear + ConvTranspose#1 (folded, bias via indicator columns): ONE matmul.
    a1_ref[...] = jnp.maximum(
        jnp.dot(x_ref[...], w1_ref[...], preferred_element_type=jnp.float32),
        0.0).astype(jnp.bfloat16)

    # ---- ConvTranspose #2..#4; activations never leave VMEM.
    hp3 = s2_ref.shape[0]

    def write_a2(smp, o):
        a2_ref[smp * hp3:(smp + 1) * hp3, :] = (
            jnp.maximum(o, 0.0).astype(jnp.bfloat16))

    _deconv_layer(a1_ref, b2_ref, s2_ref, bias2_ref, t2_ref, bblk, write_a2)

    hp4 = s3_ref.shape[0]

    def write_a3(smp, o):
        a3_ref[smp * hp4:(smp + 1) * hp4, :] = (
            jnp.maximum(o, 0.0).astype(jnp.bfloat16))

    _deconv_layer(a2_ref, b3_ref, s3_ref, bias3_ref, t3_ref, bblk, write_a3)

    def write_o(smp, o):
        o_ref[smp] = o                   # last layer: no ReLU, f32, lane-dense (256)

    _deconv_layer(a3_ref, b4_ref, s4_ref, bias4_ref, t4_ref, bblk, write_o)


# ------------------------------- forward ----------------------------------- #
def conv_decoder_forward(prep, x, shape=(3, 64, 64), bblk=8, k1=5):
    orig_lead = x.shape[:-1]
    latent = x.shape[-1]
    xf = x.reshape(-1, latent).astype(jnp.float32)
    bsz = xf.shape[0]

    # ---- static geometry, derived from the prepared weights ----
    k1p, n1p = prep["w1s"].shape
    k2, _, n2p = prep["B2"].shape
    hp3, khp2 = prep["S2"].shape
    hp2 = khp2 // k2                       # padded rows of the layer-1 output (16)
    k3, _, n3p = prep["B3"].shape
    hp4, _ = prep["S3"].shape
    k4, _, n4p = prep["B4"].shape
    ho4, _ = prep["S4"].shape
    c_out, _, wo4 = shape

    # ---- sample block per grid step (keep the grid >= 2 steps for v7x's 2 TCs) ----
    if bsz >= 2 * bblk:
        bblk_eff = bblk
    else:
        bblk_eff = max(1, (bsz + 1) // 2)
    grid_b = -(-bsz // bblk_eff)
    bp = grid_b * bblk_eff

    # ---- expand x into the block-diagonal, bias-augmented layer-1 operand ----
    xpad = jnp.pad(xf, ((0, bp - bsz), (0, 0)))
    eye = jnp.eye(k1, dtype=jnp.float32)
    xe = xpad[:, None, None, :] * eye[None, :, :, None]          # (bp,k1,k1,latent)
    xe = xe.reshape(bp, k1, k1 * latent)
    xe = jnp.concatenate([xe, jnp.broadcast_to(eye, (bp, k1, k1))], axis=-1)
    xe = jnp.pad(xe, ((0, 0), (0, hp2 - k1), (0, k1p - (k1 * latent + k1))))
    xe = xe.reshape(bp * hp2, k1p).astype(jnp.bfloat16)

    def const_spec(arr):
        nd = arr.ndim
        return pl.BlockSpec(arr.shape, lambda b, _n=nd: (0,) * _n)

    weights = (prep["w1s"],
               prep["B2"], prep["S2"], prep["bias2"],
               prep["B3"], prep["S3"], prep["bias3"],
               prep["B4"], prep["S4"], prep["bias4"])

    out = pl.pallas_call(
        _decoder_kernel,
        out_shape=jax.ShapeDtypeStruct((bp, ho4, n4p), jnp.float32),
        grid_spec=pltpu.PrefetchScalarGridSpec(
            num_scalar_prefetch=0,
            grid=(grid_b,),
            in_specs=[pl.BlockSpec((bblk_eff * hp2, k1p), lambda b: (b, 0))]
                     + [const_spec(w) for w in weights],
            out_specs=pl.BlockSpec((bblk_eff, ho4, n4p), lambda b: (b, 0, 0)),
            scratch_shapes=[
                pltpu.VMEM((bblk_eff * hp2, n1p), jnp.bfloat16),        # A1
                pltpu.VMEM((k2 * bblk_eff * hp2, n2p), jnp.bfloat16),   # T2
                pltpu.VMEM((bblk_eff * hp3, n2p), jnp.bfloat16),        # A2
                pltpu.VMEM((k3 * bblk_eff * hp3, n3p), jnp.bfloat16),   # T3
                pltpu.VMEM((bblk_eff * hp4, n3p), jnp.bfloat16),        # A3
                pltpu.VMEM((k4 * bblk_eff * hp4, n4p), jnp.bfloat16),   # T4
            ]),
        compiler_params=pltpu.CompilerParams(
            dimension_semantics=("parallel",),
            vmem_limit_bytes=32 * 1024 * 1024),
    )(xe, *weights)

    # (bp, Ho, Cout*Wo + pad) -> NCHW: one tiny XLA slice + transpose outside.
    out = out[:bsz, :, :c_out * wo4]
    out = out.reshape(bsz, ho4, c_out, wo4).transpose(0, 2, 1, 3)
    return out.reshape(tuple(orig_lead) + tuple(shape))


# ------------------------------- parameters -------------------------------- #
def init_params(key, latent_dim, depth, shape):
    c_out = shape[0]

    def u(k, shp, fan_in):
        bound = 1.0 / jnp.sqrt(jnp.float32(fan_in))
        return jax.random.uniform(k, shp, jnp.float32, -bound, bound)

    ks = jax.random.split(key, 10)
    return {
        # nn.Linear: weight (out, in), bias (out,)
        "lin_w": u(ks[0], (32 * depth, latent_dim), latent_dim),
        "lin_b": u(ks[1], (32 * depth,), latent_dim),
        # nn.ConvTranspose2d: weight (Cin, Cout, k, k), bias (Cout,)
        "w1": u(ks[2], (32 * depth, 4 * depth, 5, 5), 32 * depth * 25),
        "b1": u(ks[3], (4 * depth,), 32 * depth * 25),
        "w2": u(ks[4], (4 * depth, 2 * depth, 5, 5), 4 * depth * 25),
        "b2": u(ks[5], (2 * depth,), 4 * depth * 25),
        "w3": u(ks[6], (2 * depth, depth, 6, 6), 2 * depth * 36),
        "b3": u(ks[7], (depth,), 2 * depth * 36),
        "w4": u(ks[8], (depth, c_out, 6, 6), depth * 36),
        "b4": u(ks[9], (c_out,), depth * 36),
    }


# ------------------------- pure-JAX reference check ------------------------ #
def ref_forward(params, x, shape):
    latent_dim = x.shape[-1]
    h = x.reshape(-1, latent_dim).astype(jnp.float32)
    h = h @ params["lin_w"].T + params["lin_b"]
    h = h.reshape(h.shape[0], 1, 1, -1)

    def ct(h, w, b, stride, relu):
        k = w.shape[2]
        wf = jnp.transpose(w[:, :, ::-1, ::-1], (2, 3, 0, 1))  # HWIO
        out = jax.lax.conv_general_dilated(
            h, wf, window_strides=(1, 1),
            padding=[(k - 1, k - 1), (k - 1, k - 1)],
            lhs_dilation=(stride, stride),
            dimension_numbers=("NHWC", "HWIO", "NHWC"),
        ) + b.reshape(1, 1, 1, -1)
        return jnp.maximum(out, 0.0) if relu else out

    h = ct(h, params["w1"], params["b1"], 2, True)
    h = ct(h, params["w2"], params["b2"], 2, True)
    h = ct(h, params["w3"], params["b3"], 2, True)
    h = ct(h, params["w4"], params["b4"], 2, False)
    h = jnp.transpose(h, (0, 3, 1, 2))
    return h.reshape(x.shape[:-1] + tuple(shape))


if __name__ == "__main__":
    latent_dim, depth, shape = 32, 8, (3, 64, 64)   # spatial chain 1->5->13->30->64
    batch = 16                                      # -> grid of 2 blocks of 8 samples

    key = jax.random.PRNGKey(0)
    kp, kx = jax.random.split(key)
    params = init_params(kp, latent_dim, depth, shape)
    x = jax.random.normal(kx, (batch, latent_dim), jnp.float32)

    prep = prepare_params(params)                   # one-time weight transform
    fwd = jax.jit(functools.partial(conv_decoder_forward, shape=shape))
    out = jax.block_until_ready(fwd(prep, x))

    assert out.shape == (batch,) + shape, out.shape
    assert out.dtype == jnp.float32

    ref = ref_forward(params, x, shape)
    rel = float(jnp.linalg.norm(out - ref)) / (float(jnp.linalg.norm(ref)) + 1e-12)
    # bf16 weights / activations / T scratch with f32 accumulation -> relaxed check.
    assert rel < 3e-2, f"relative error vs reference too large: {rel}"

    print("KERNEL_OK")
</pallas_src>

<mosaic_0001>
module attributes {stable_mosaic.version = 11 : i64} {
  func.func @_decoder_kernel(%arg0: i32, %arg1: memref<128x256xbf16, #tpu.memory_space<vmem>>, %arg2: memref<256x256xbf16, #tpu.memory_space<vmem>>, %arg3: memref<5x256x256xbf16, #tpu.memory_space<vmem>>, %arg4: memref<16x80xbf16, #tpu.memory_space<vmem>>, %arg5: memref<1x256xf32, #tpu.memory_space<vmem>>, %arg6: memref<6x256x256xbf16, #tpu.memory_space<vmem>>, %arg7: memref<32x96xbf16, #tpu.memory_space<vmem>>, %arg8: memref<1x256xf32, #tpu.memory_space<vmem>>, %arg9: memref<6x256x256xbf16, #tpu.memory_space<vmem>>, %arg10: memref<64x192xbf16, #tpu.memory_space<vmem>>, %arg11: memref<1x256xf32, #tpu.memory_space<vmem>>, %arg12: memref<8x64x256xf32, #tpu.memory_space<vmem>>, %arg13: memref<128x256xbf16, #tpu.memory_space<vmem>>, %arg14: memref<640x256xbf16, #tpu.memory_space<vmem>>, %arg15: memref<128x256xbf16, #tpu.memory_space<vmem>>, %arg16: memref<768x256xbf16, #tpu.memory_space<vmem>>, %arg17: memref<256x256xbf16, #tpu.memory_space<vmem>>, %arg18: memref<1536x256xbf16, #tpu.memory_space<vmem>>) attributes {dimension_semantics = [#tpu.dimension_semantics<parallel>], iteration_bounds = array<i64: 2>, scalar_prefetch = 0 : i64, scratch_operands = 6 : i64, tpu.core_type = #tpu.core_type<tc>, window_params = [{transform_indices = @transform_0, window_bounds = array<i64: 128, 256>}, {pipeline_mode = #tpu.pipeline_mode<synchronous>, transform_indices = @transform_1, window_bounds = array<i64: 256, 256>}, {pipeline_mode = #tpu.pipeline_mode<synchronous>, transform_indices = @transform_2, window_bounds = array<i64: 5, 256, 256>}, {pipeline_mode = #tpu.pipeline_mode<synchronous>, transform_indices = @transform_3, window_bounds = array<i64: 16, 80>}, {pipeline_mode = #tpu.pipeline_mode<synchronous>, transform_indices = @transform_4, window_bounds = array<i64: 1, 256>}, {pipeline_mode = #tpu.pipeline_mode<synchronous>, transform_indices = @transform_5, window_bounds = array<i64: 6, 256, 256>}, {pipeline_mode = #tpu.pipeline_mode<synchronous>, transform_indices = @transform_6, window_bounds = array<i64: 32, 96>}, {pipeline_mode = #tpu.pipeline_mode<synchronous>, transform_indices = @transform_7, window_bounds = array<i64: 1, 256>}, {pipeline_mode = #tpu.pipeline_mode<synchronous>, transform_indices = @transform_8, window_bounds = array<i64: 6, 256, 256>}, {pipeline_mode = #tpu.pipeline_mode<synchronous>, transform_indices = @transform_9, window_bounds = array<i64: 64, 192>}, {pipeline_mode = #tpu.pipeline_mode<synchronous>, transform_indices = @transform_10, window_bounds = array<i64: 1, 256>}, {transform_indices = @transform_11, window_bounds = array<i64: 8, 64, 256>}]} {
    %c0 = arith.constant 0 : index
    %c0_0 = arith.constant 0 : index
    %0 = vector.load %arg1[%c0, %c0_0] : memref<128x256xbf16, #tpu.memory_space<vmem>>, vector<128x256xbf16>
    %c0_1 = arith.constant 0 : index
    %c0_2 = arith.constant 0 : index
    %1 = vector.load %arg2[%c0_1, %c0_2] : memref<256x256xbf16, #tpu.memory_space<vmem>>, vector<256x256xbf16>
    %cst = arith.constant dense<0.000000e+00> : vector<128x256xf32>
    %2 = tpu.matmul %0, %1, %cst {dimension_numbers = #tpu.dot_dimension_numbers<[1], [0], [0], [1], [0, 0, 1, 1], [], []>} : vector<128x256xbf16>, vector<256x256xbf16>, vector<128x256xf32> -> vector<128x256xf32>
    %cst_3 = arith.constant 0.000000e+00 : f32
    %3 = vector.broadcast %cst_3 : f32 to vector<128x256xf32>
    %4 = arith.maximumf %2, %3 : vector<128x256xf32>
    %5 = arith.truncf %4 : vector<128x256xf32> to vector<128x256xbf16>
    %c0_4 = arith.constant 0 : index
    %c0_5 = arith.constant 0 : index
    %6 = vector.load %arg13[%c0_4, %c0_5] : memref<128x256xbf16, #tpu.memory_space<vmem>>, vector<128x256xbf16>
    tpu.vector_store %arg13[%c0_4, %c0_5], %5 {strides = array<i32>} : memref<128x256xbf16, #tpu.memory_space<vmem>>, vector<128x256xbf16>,
    %c0_6 = arith.constant 0 : index
    %c0_7 = arith.constant 0 : index
    %7 = vector.load %arg13[%c0_6, %c0_7] : memref<128x256xbf16, #tpu.memory_space<vmem>>, vector<128x256xbf16>
    %c0_8 = arith.constant 0 : index
    %c0_9 = arith.constant 0 : index
    %c0_10 = arith.constant 0 : index
    %8 = vector.load %arg3[%c0_8, %c0_9, %c0_10] : memref<5x256x256xbf16, #tpu.memory_space<vmem>>, vector<1x256x256xbf16>
    %9 = vector.shape_cast %8 : vector<1x256x256xbf16> to vector<256x256xbf16>
    %cst_11 = arith.constant dense<0.000000e+00> : vector<128x256xf32>
    %10 = tpu.matmul %7, %9, %cst_11 {dimension_numbers = #tpu.dot_dimension_numbers<[1], [0], [0], [1], [0, 0, 1, 1], [], []>} : vector<128x256xbf16>, vector<256x256xbf16>, vector<128x256xf32> -> vector<128x256xf32>
    %11 = arith.truncf %10 : vector<128x256xf32> to vector<128x256xbf16>
    %c0_12 = arith.constant 0 : index
    %c0_13 = arith.constant 0 : index
    %12 = vector.load %arg14[%c0_12, %c0_13] : memref<640x256xbf16, #tpu.memory_space<vmem>>, vector<128x256xbf16>
    tpu.vector_store %arg14[%c0_12, %c0_13], %11 {strides = array<i32>} : memref<640x256xbf16, #tpu.memory_space<vmem>>, vector<128x256xbf16>,
    %c1 = arith.constant 1 : index
    %c0_14 = arith.constant 0 : index
    %c0_15 = arith.constant 0 : index
    %13 = vector.load %arg3[%c1, %c0_14, %c0_15] : memref<5x256x256xbf16, #tpu.memory_space<vmem>>, vector<1x256x256xbf16>
    %14 = vector.shape_cast %13 : vector<1x256x256xbf16> to vector<256x256xbf16>
    %cst_16 = arith.constant dense<0.000000e+00> : vector<128x256xf32>
    %15 = tpu.matmul %7, %14, %cst_16 {dimension_numbers = #tpu.dot_dimension_numbers<[1], [0], [0], [1], [0, 0, 1, 1], [], []>} : vector<128x256xbf16>, vector<256x256xbf16>, vector<128x256xf32> -> vector<128x256xf32>
    %16 = arith.truncf %15 : vector<128x256xf32> to vector<128x256xbf16>
    %c128 = arith.constant 128 : index
    %c0_17 = arith.constant 0 : index
    %17 = vector.load %arg14[%c128, %c0_17] : memref<640x256xbf16, #tpu.memory_space<vmem>>, vector<128x256xbf16>
    tpu.vector_store %arg14[%c128, %c0_17], %16 {strides = array<i32>} : memref<640x256xbf16, #tpu.memory_space<vmem>>, vector<128x256xbf16>,
    %c2 = arith.constant 2 : index
    %c0_18 = arith.constant 0 : index
    %c0_19 = arith.constant 0 : index
    %18 = vector.load %arg3[%c2, %c0_18, %c0_19] : memref<5x256x256xbf16, #tpu.memory_space<vmem>>, vector<1x256x256xbf16>
    %19 = vector.shape_cast %18 : vector<1x256x256xbf16> to vector<256x256xbf16>
    %cst_20 = arith.constant dense<0.000000e+00> : vector<128x256xf32>
    %20 = tpu.matmul %7, %19, %cst_20 {dimension_numbers = #tpu.dot_dimension_numbers<[1], [0], [0], [1], [0, 0, 1, 1], [], []>} : vector<128x256xbf16>, vector<256x256xbf16>, vector<128x256xf32> -> vector<128x256xf32>
    %21 = arith.truncf %20 : vector<128x256xf32> to vector<128x256xbf16>
    %c256 = arith.constant 256 : index
    %c0_21 = arith.constant 0 : index
    %22 = vector.load %arg14[%c256, %c0_21] : memref<640x256xbf16, #tpu.memory_space<vmem>>, vector<128x256xbf16>
    tpu.vector_store %arg14[%c256, %c0_21], %21 {strides = array<i32>} : memref<640x256xbf16, #tpu.memory_space<vmem>>, vector<128x256xbf16>,
    %c3 = arith.constant 3 : index
    %c0_22 = arith.constant 0 : index
    %c0_23 = arith.constant 0 : index
    %23 = vector.load %arg3[%c3, %c0_22, %c0_23] : memref<5x256x256xbf16, #tpu.memory_space<vmem>>, vector<1x256x256xbf16>
    %24 = vector.shape_cast %23 : vector<1x256x256xbf16> to vector<256x256xbf16>
    %cst_24 = arith.constant dense<0.000000e+00> : vector<128x256xf32>
    %25 = tpu.matmul %7, %24, %cst_24 {dimension_numbers = #tpu.dot_dimension_numbers<[1], [0], [0], [1], [0, 0, 1, 1], [], []>} : vector<128x256xbf16>, vector<256x256xbf16>, vector<128x256xf32> -> vector<128x256xf32>
    %26 = arith.truncf %25 : vector<128x256xf32> to vector<128x256xbf16>
    %c384 = arith.constant 384 : index
    %c0_25 = arith.constant 0 : index
    %27 = vector.load %arg14[%c384, %c0_25] : memref<640x256xbf16, #tpu.memory_space<vmem>>, vector<128x256xbf16>
    tpu.vector_store %arg14[%c384, %c0_25], %26 {strides = array<i32>} : memref<640x256xbf16, #tpu.memory_space<vmem>>, vector<128x256xbf16>,
    %c4 = arith.constant 4 : index
    %c0_26 = arith.constant 0 : index
    %c0_27 = arith.constant 0 : index
    %28 = vector.load %arg3[%c4, %c0_26, %c0_27] : memref<5x256x256xbf16, #tpu.memory_space<vmem>>, vector<1x256x256xbf16>
    %29 = vector.shape_cast %28 : vector<1x256x256xbf16> to vector<256x256xbf16>
    %cst_28 = arith.constant dense<0.000000e+00> : vector<128x256xf32>
    %30 = tpu.matmul %7, %29, %cst_28 {dimension_numbers = #tpu.dot_dimension_numbers<[1], [0], [0], [1], [0, 0, 1, 1], [], []>} : vector<128x256xbf16>, vector<256x256xbf16>, vector<128x256xf32> -> vector<128x256xf32>
    %31 = arith.truncf %30 : vector<128x256xf32> to vector<128x256xbf16>
    %c512 = arith.constant 512 : index
    %c0_29 = arith.constant 0 : index
    %32 = vector.load %arg14[%c512, %c0_29] : memref<640x256xbf16, #tpu.memory_space<vmem>>, vector<128x256xbf16>
    tpu.vector_store %arg14[%c512, %c0_29], %31 {strides = array<i32>} : memref<640x256xbf16, #tpu.memory_space<vmem>>, vector<128x256xbf16>,
    %c0_30 = arith.constant 0 : index
    %c0_31 = arith.constant 0 : index
    %33 = vector.load %arg4[%c0_30, %c0_31] : memref<16x80xbf16, #tpu.memory_space<vmem>>, vector<16x80xbf16>
    %c0_32 = arith.constant 0 : index
    %c0_33 = arith.constant 0 : index
    %34 = vector.load %arg5[%c0_32, %c0_33] : memref<1x256xf32, #tpu.memory_space<vmem>>, vector<1x256xf32>
    %c0_34 = arith.constant 0 : index
    %c0_35 = arith.constant 0 : index
    %35 = vector.load %arg14[%c0_34, %c0_35] : memref<640x256xbf16, #tpu.memory_space<vmem>>, vector<16x256xbf16>
    %c128_36 = arith.constant 128 : index
    %c0_37 = arith.constant 0 : index
    %36 = vector.load %arg14[%c128_36, %c0_37] : memref<640x256xbf16, #tpu.memory_space<vmem>>, vector<16x256xbf16>
    %c256_38 = arith.constant 256 : index
    %c0_39 = arith.constant 0 : index
    %37 = vector.load %arg14[%c256_38, %c0_39] : memref<640x256xbf16, #tpu.memory_space<vmem>>, vector<16x256xbf16>
    %c384_40 = arith.constant 384 : index
    %c0_41 = arith.constant 0 : index
    %38 = vector.load %arg14[%c384_40, %c0_41] : memref<640x256xbf16, #tpu.memory_space<vmem>>, vector<16x256xbf16>
    %c512_42 = arith.constant 512 : index
    %c0_43 = arith.constant 0 : index
    %39 = vector.load %arg14[%c512_42, %c0_43] : memref<640x256xbf16, #tpu.memory_space<vmem>>, vector<16x256xbf16>
    %40 = tpu.concatenate %35, %36, %37, %38, %39 in 0 : vector<16x256xbf16>, vector<16x256xbf16>, vector<16x256xbf16>, vector<16x256xbf16>, vector<16x256xbf16> -> vector<80x256xbf16>
    %cst_44 = arith.constant dense<0.000000e+00> : vector<16x256xf32>
    %41 = tpu.matmul %33, %40, %cst_44 {dimension_numbers = #tpu.dot_dimension_numbers<[1], [0], [0], [1], [0, 0, 1, 1], [], []>} : vector<16x80xbf16>, vector<80x256xbf16>, vector<16x256xf32> -> vector<16x256xf32>
    %42 = vector.broadcast %34 : vector<1x256xf32> to vector<16x256xf32>
    %43 = arith.addf %41, %42 : vector<16x256xf32>
    %cst_45 = arith.constant 0.000000e+00 : f32
    %44 = vector.broadcast %cst_45 : f32 to vector<16x256xf32>
    %45 = arith.maximumf %43, %44 : vector<16x256xf32>
    %46 = arith.truncf %45 : vector<16x256xf32> to vector<16x256xbf16>
    %c0_46 = arith.constant 0 : index
    %c0_47 = arith.constant 0 : index
    %47 = vector.load %arg15[%c0_46, %c0_47] : memref<128x256xbf16, #tpu.memory_space<vmem>>, vector<16x256xbf16>
    tpu.vector_store %arg15[%c0_46, %c0_47], %46 {strides = array<i32>} : memref<128x256xbf16, #tpu.memory_space<vmem>>, vector<16x256xbf16>,
    %c16 = arith.constant 16 : index
    %c0_48 = arith.constant 0 : index
    %48 = vector.load %arg14[%c16, %c0_48] : memref<640x256xbf16, #tpu.memory_space<vmem>>, vector<16x256xbf16>
    %c144 = arith.constant 144 : index
    %c0_49 = arith.constant 0 : index
    %49 = vector.load %arg14[%c144, %c0_49] : memref<640x256xbf16, #tpu.memory_space<vmem>>, vector<16x256xbf16>
    %c272 = arith.constant 272 : index
    %c0_50 = arith.constant 0 : index
    %50 = vector.load %arg14[%c272, %c0_50] : memref<640x256xbf16, #tpu.memory_space<vmem>>, vector<16x256xbf16>
    %c400 = arith.constant 400 : index
    %c0_51 = arith.constant 0 : index
    %51 = vector.load %arg14[%c400, %c0_51] : memref<640x256xbf16, #tpu.memory_space<vmem>>, vector<16x256xbf16>
    %c528 = arith.constant 528 : index
    %c0_52 = arith.constant 0 : index
    %52 = vector.load %arg14[%c528, %c0_52] : memref<640x256xbf16, #tpu.memory_space<vmem>>, vector<16x256xbf16>
    %53 = tpu.concatenate %48, %49, %50, %51, %52 in 0 : vector<16x256xbf16>, vector<16x256xbf16>, vector<16x256xbf16>, vector<16x256xbf16>, vector<16x256xbf16> -> vector<80x256xbf16>
    %cst_53 = arith.constant dense<0.000000e+00> : vector<16x256xf32>
    %54 = tpu.matmul %33, %53, %cst_53 {dimension_numbers = #tpu.dot_dimension_numbers<[1], [0], [0], [1], [0, 0, 1, 1], [], []>} : vector<16x80xbf16>, vector<80x256xbf16>, vector<16x256xf32> -> vector<16x256xf32>
    %55 = vector.broadcast %34 : vector<1x256xf32> to vector<16x256xf32>
    %56 = arith.addf %54, %55 : vector<16x256xf32>
    %cst_54 = arith.constant 0.000000e+00 : f32
    %57 = vector.broadcast %cst_54 : f32 to vector<16x256xf32>
    %58 = arith.maximumf %56, %57 : vector<16x256xf32>
    %59 = arith.truncf %58 : vector<16x256xf32> to vector<16x256xbf16>
    %c16_55 = arith.constant 16 : index
    %c0_56 = arith.constant 0 : index
    %60 = vector.load %arg15[%c16_55, %c0_56] : memref<128x256xbf16, #tpu.memory_space<vmem>>, vector<16x256xbf16>
    tpu.vector_store %arg15[%c16_55, %c0_56], %59 {strides = array<i32>} : memref<128x256xbf16, #tpu.memory_space<vmem>>, vector<16x256xbf16>,
    %c32 = arith.constant 32 : index
    %c0_57 = arith.constant 0 : index
    %61 = vector.load %arg14[%c32, %c0_57] : memref<640x256xbf16, #tpu.memory_space<vmem>>, vector<16x256xbf16>
    %c160 = arith.constant 160 : index
    %c0_58 = arith.constant 0 : index
    %62 = vector.load %arg14[%c160, %c0_58] : memref<640x256xbf16, #tpu.memory_space<vmem>>, vector<16x256xbf16>
    %c288 = arith.constant 288 : index
    %c0_59 = arith.constant 0 : index
    %63 = vector.load %arg14[%c288, %c0_59] : memref<640x256xbf16, #tpu.memory_space<vmem>>, vector<16x256xbf16>
    %c416 = arith.constant 416 : index
    %c0_60 = arith.constant 0 : index
    %64 = vector.load %arg14[%c416, %c0_60] : memref<640x256xbf16, #tpu.memory_space<vmem>>, vector<16x256xbf16>
    %c544 = arith.constant 544 : index
    %c0_61 = arith.constant 0 : index
    %65 = vector.load %arg14[%c544, %c0_61] : memref<640x256xbf16, #tpu.memory_space<vmem>>, vector<16x256xbf16>
    %66 = tpu.concatenate %61, %62, %63, %64, %65 in 0 : vector<16x256xbf16>, vector<16x256xbf16>, vector<16x256xbf16>, vector<16x256xbf16>, vector<16x256xbf16> -> vector<80x256xbf16>
    %cst_62 = arith.constant dense<0.000000e+00> : vector<16x256xf32>
    %67 = tpu.matmul %33, %66, %cst_62 {dimension_numbers = #tpu.dot_dimension_numbers<[1], [0], [0], [1], [0, 0, 1, 1], [], []>} : vector<16x80xbf16>, vector<80x256xbf16>, vector<16x256xf32> -> vector<16x256xf32>
    %68 = vector.broadcast %34 : vector<1x256xf32> to vector<16x256xf32>
    %69 = arith.addf %67, %68 : vector<16x256xf32>
    %cst_63 = arith.constant 0.000000e+00 : f32
    %70 = vector.broadcast %cst_63 : f32 to vector<16x256xf32>
    %71 = arith.maximumf %69, %70 : vector<16x256xf32>
    %72 = arith.truncf %71 : vector<16x256xf32> to vector<16x256xbf16>
    %c32_64 = arith.constant 32 : index
    %c0_65 = arith.constant 0 : index
    %73 = vector.load %arg15[%c32_64, %c0_65] : memref<128x256xbf16, #tpu.memory_space<vmem>>, vector<16x256xbf16>
    tpu.vector_store %arg15[%c32_64, %c0_65], %72 {strides = array<i32>} : memref<128x256xbf16, #tpu.memory_space<vmem>>, vector<16x256xbf16>,
    %c48 = arith.constant 48 : index
    %c0_66 = arith.constant 0 : index
    %74 = vector.load %arg14[%c48, %c0_66] : memref<640x256xbf16, #tpu.memory_space<vmem>>, vector<16x256xbf16>
    %c176 = arith.constant 176 : index
    %c0_67 = arith.constant 0 : index
    %75 = vector.load %arg14[%c176, %c0_67] : memref<640x256xbf16, #tpu.memory_space<vmem>>, vector<16x256xbf16>
    %c304 = arith.constant 304 : index
    %c0_68 = arith.constant 0 : index
    %76 = vector.load %arg14[%c304, %c0_68] : memref<640x256xbf16, #tpu.memory_space<vmem>>, vector<16x256xbf16>
    %c432 = arith.constant 432 : index
    %c0_69 = arith.constant 0 : index
    %77 = vector.load %arg14[%c432, %c0_69] : memref<640x256xbf16, #tpu.memory_space<vmem>>, vector<16x256xbf16>
    %c560 = arith.constant 560 : index
    %c0_70 = arith.constant 0 : index
    %78 = vector.load %arg14[%c560, %c0_70] : memref<640x256xbf16, #tpu.memory_space<vmem>>, vector<16x256xbf16>
    %79 = tpu.concatenate %74, %75, %76, %77, %78 in 0 : vector<16x256xbf16>, vector<16x256xbf16>, vector<16x256xbf16>, vector<16x256xbf16>, vector<16x256xbf16> -> vector<80x256xbf16>
    %cst_71 = arith.constant dense<0.000000e+00> : vector<16x256xf32>
    %80 = tpu.matmul %33, %79, %cst_71 {dimension_numbers = #tpu.dot_dimension_numbers<[1], [0], [0], [1], [0, 0, 1, 1], [], []>} : vector<16x80xbf16>, vector<80x256xbf16>, vector<16x256xf32> -> vector<16x256xf32>
    %81 = vector.broadcast %34 : vector<1x256xf32> to vector<16x256xf32>
    %82 = arith.addf %80, %81 : vector<16x256xf32>
    %cst_72 = arith.constant 0.000000e+00 : f32
    %83 = vector.broadcast %cst_72 : f32 to vector<16x256xf32>
    %84 = arith.maximumf %82, %83 : vector<16x256xf32>
    %85 = arith.truncf %84 : vector<16x256xf32> to vector<16x256xbf16>
    %c48_73 = arith.constant 48 : index
    %c0_74 = arith.constant 0 : index
    %86 = vector.load %arg15[%c48_73, %c0_74] : memref<128x256xbf16, #tpu.memory_space<vmem>>, vector<16x256xbf16>
    tpu.vector_store %arg15[%c48_73, %c0_74], %85 {strides = array<i32>} : memref<128x256xbf16, #tpu.memory_space<vmem>>, vector<16x256xbf16>,
    %c64 = arith.constant 64 : index
    %c0_75 = arith.constant 0 : index
    %87 = vector.load %arg14[%c64, %c0_75] : memref<640x256xbf16, #tpu.memory_space<vmem>>, vector<16x256xbf16>
    %c192 = arith.constant 192 : index
    %c0_76 = arith.constant 0 : index
    %88 = vector.load %arg14[%c192, %c0_76] : memref<640x256xbf16, #tpu.memory_space<vmem>>, vector<16x256xbf16>
    %c320 = arith.constant 320 : index
    %c0_77 = arith.constant 0 : index
    %89 = vector.load %arg14[%c320, %c0_77] : memref<640x256xbf16, #tpu.memory_space<vmem>>, vector<16x256xbf16>
    %c448 = arith.constant 448 : index
    %c0_78 = arith.constant 0 : index
    %90 = vector.load %arg14[%c448, %c0_78] : memref<640x256xbf16, #tpu.memory_space<vmem>>, vector<16x256xbf16>
    %c576 = arith.constant 576 : index
    %c0_79 = arith.constant 0 : index
    %91 = vector.load %arg14[%c576, %c0_79] : memref<640x256xbf16, #tpu.memory_space<vmem>>, vector<16x256xbf16>
    %92 = tpu.concatenate %87, %88, %89, %90, %91 in 0 : vector<16x256xbf16>, vector<16x256xbf16>, vector<16x256xbf16>, vector<16x256xbf16>, vector<16x256xbf16> -> vector<80x256xbf16>
    %cst_80 = arith.constant dense<0.000000e+00> : vector<16x256xf32>
    %93 = tpu.matmul %33, %92, %cst_80 {dimension_numbers = #tpu.dot_dimension_numbers<[1], [0], [0], [1], [0, 0, 1, 1], [], []>} : vector<16x80xbf16>, vector<80x256xbf16>, vector<16x256xf32> -> vector<16x256xf32>
    %94 = vector.broadcast %34 : vector<1x256xf32> to vector<16x256xf32>
    %95 = arith.addf %93, %94 : vector<16x256xf32>
    %cst_81 = arith.constant 0.000000e+00 : f32
    %96 = vector.broadcast %cst_81 : f32 to vector<16x256xf32>
    %97 = arith.maximumf %95, %96 : vector<16x256xf32>
    %98 = arith.truncf %97 : vector<16x256xf32> to vector<16x256xbf16>
    %c64_82 = arith.constant 64 : index
    %c0_83 = arith.constant 0 : index
    %99 = vector.load %arg15[%c64_82, %c0_83] : memref<128x256xbf16, #tpu.memory_space<vmem>>, vector<16x256xbf16>
    tpu.vector_store %arg15[%c64_82, %c0_83], %98 {strides = array<i32>} : memref<128x256xbf16, #tpu.memory_space<vmem>>, vector<16x256xbf16>,
    %c80 = arith.constant 80 : index
    %c0_84 = arith.constant 0 : index
    %100 = vector.load %arg14[%c80, %c0_84] : memref<640x256xbf16, #tpu.memory_space<vmem>>, vector<16x256xbf16>
    %c208 = arith.constant 208 : index
    %c0_85 = arith.constant 0 : index
    %101 = vector.load %arg14[%c208, %c0_85] : memref<640x256xbf16, #tpu.memory_space<vmem>>, vector<16x256xbf16>
    %c336 = arith.constant 336 : index
    %c0_86 = arith.constant 0 : index
    %102 = vector.load %arg14[%c336, %c0_86] : memref<640x256xbf16, #tpu.memory_space<vmem>>, vector<16x256xbf16>
    %c464 = arith.constant 464 : index
    %c0_87 = arith.constant 0 : index
    %103 = vector.load %arg14[%c464, %c0_87] : memref<640x256xbf16, #tpu.memory_space<vmem>>, vector<16x256xbf16>
    %c592 = arith.constant 592 : index
    %c0_88 = arith.constant 0 : index
    %104 = vector.load %arg14[%c592, %c0_88] : memref<640x256xbf16, #tpu.memory_space<vmem>>, vector<16x256xbf16>
    %105 = tpu.concatenate %100, %101, %102, %103, %104 in 0 : vector<16x256xbf16>, vector<16x256xbf16>, vector<16x256xbf16>, vector<16x256xbf16>, vector<16x256xbf16> -> vector<80x256xbf16>
    %cst_89 = arith.constant dense<0.000000e+00> : vector<16x256xf32>
    %106 = tpu.matmul %33, %105, %cst_89 {dimension_numbers = #tpu.dot_dimension_numbers<[1], [0], [0], [1], [0, 0, 1, 1], [], []>} : vector<16x80xbf16>, vector<80x256xbf16>, vector<16x256xf32> -> vector<16x256xf32>
    %107 = vector.broadcast %34 : vector<1x256xf32> to vector<16x256xf32>
    %108 = arith.addf %106, %107 : vector<16x256xf32>
    %cst_90 = arith.constant 0.000000e+00 : f32
    %109 = vector.broadcast %cst_90 : f32 to vector<16x256xf32>
    %110 = arith.maximumf %108, %109 : vector<16x256xf32>
    %111 = arith.truncf %110 : vector<16x256xf32> to vector<16x256xbf16>
    %c80_91 = arith.constant 80 : index
    %c0_92 = arith.constant 0 : index
    %112 = vector.load %arg15[%c80_91, %c0_92] : memref<128x256xbf16, #tpu.memory_space<vmem>>, vector<16x256xbf16>
    tpu.vector_store %arg15[%c80_91, %c0_92], %111 {strides = array<i32>} : memref<128x256xbf16, #tpu.memory_space<vmem>>, vector<16x256xbf16>,
    %c96 = arith.constant 96 : index
    %c0_93 = arith.constant 0 : index
    %113 = vector.load %arg14[%c96, %c0_93] : memref<640x256xbf16, #tpu.memory_space<vmem>>, vector<16x256xbf16>
    %c224 = arith.constant 224 : index
    %c0_94 = arith.constant 0 : index
    %114 = vector.load %arg14[%c224, %c0_94] : memref<640x256xbf16, #tpu.memory_space<vmem>>, vector<16x256xbf16>
    %c352 = arith.constant 352 : index
    %c0_95 = arith.constant 0 : index
    %115 = vector.load %arg14[%c352, %c0_95] : memref<640x256xbf16, #tpu.memory_space<vmem>>, vector<16x256xbf16>
    %c480 = arith.constant 480 : index
    %c0_96 = arith.constant 0 : index
    %116 = vector.load %arg14[%c480, %c0_96] : memref<640x256xbf16, #tpu.memory_space<vmem>>, vector<16x256xbf16>
    %c608 = arith.constant 608 : index
    %c0_97 = arith.constant 0 : index
    %117 = vector.load %arg14[%c608, %c0_97] : memref<640x256xbf16, #tpu.memory_space<vmem>>, vector<16x256xbf16>
    %118 = tpu.concatenate %113, %114, %115, %116, %117 in 0 : vector<16x256xbf16>, vector<16x256xbf16>, vector<16x256xbf16>, vector<16x256xbf16>, vector<16x256xbf16> -> vector<80x256xbf16>
    %cst_98 = arith.constant dense<0.000000e+00> : vector<16x256xf32>
    %119 = tpu.matmul %33, %118, %cst_98 {dimension_numbers = #tpu.dot_dimension_numbers<[1], [0], [0], [1], [0, 0, 1, 1], [], []>} : vector<16x80xbf16>, vector<80x256xbf16>, vector<16x256xf32> -> vector<16x256xf32>
    %120 = vector.broadcast %34 : vector<1x256xf32> to vector<16x256xf32>
    %121 = arith.addf %119, %120 : vector<16x256xf32>
    %cst_99 = arith.constant 0.000000e+00 : f32
    %122 = vector.broadcast %cst_99 : f32 to vector<16x256xf32>
    %123 = arith.maximumf %121, %122 : vector<16x256xf32>
    %124 = arith.truncf %123 : vector<16x256xf32> to vector<16x256xbf16>
    %c96_100 = arith.constant 96 : index
    %c0_101 = arith.constant 0 : index
    %125 = vector.load %arg15[%c96_100, %c0_101] : memref<128x256xbf16, #tpu.memory_space<vmem>>, vector<16x256xbf16>
    tpu.vector_store %arg15[%c96_100, %c0_101], %124 {strides = array<i32>} : memref<128x256xbf16, #tpu.memory_space<vmem>>, vector<16x256xbf16>,
    %c112 = arith.constant 112 : index
    %c0_102 = arith.constant 0 : index
    %126 = vector.load %arg14[%c112, %c0_102] : memref<640x256xbf16, #tpu.memory_space<vmem>>, vector<16x256xbf16>
    %c240 = arith.constant 240 : index
    %c0_103 = arith.constant 0 : index
    %127 = vector.load %arg14[%c240, %c0_103] : memref<640x256xbf16, #tpu.memory_space<vmem>>, vector<16x256xbf16>
    %c368 = arith.constant 368 : index
    %c0_104 = arith.constant 0 : index
    %128 = vector.load %arg14[%c368, %c0_104] : memref<640x256xbf16, #tpu.memory_space<vmem>>, vector<16x256xbf16>
    %c496 = arith.constant 496 : index
    %c0_105 = arith.constant 0 : index
    %129 = vector.load %arg14[%c496, %c0_105] : memref<640x256xbf16, #tpu.memory_space<vmem>>, vector<16x256xbf16>
    %c624 = arith.constant 624 : index
    %c0_106 = arith.constant 0 : index
    %130 = vector.load %arg14[%c624, %c0_106] : memref<640x256xbf16, #tpu.memory_space<vmem>>, vector<16x256xbf16>
    %131 = tpu.concatenate %126, %127, %128, %129, %130 in 0 : vector<16x256xbf16>, vector<16x256xbf16>, vector<16x256xbf16>, vector<16x256xbf16>, vector<16x256xbf16> -> vector<80x256xbf16>
    %cst_107 = arith.constant dense<0.000000e+00> : vector<16x256xf32>
    %132 = tpu.matmul %33, %131, %cst_107 {dimension_numbers = #tpu.dot_dimension_numbers<[1], [0], [0], [1], [0, 0, 1, 1], [], []>} : vector<16x80xbf16>, vector<80x256xbf16>, vector<16x256xf32> -> vector<16x256xf32>
    %133 = vector.broadcast %34 : vector<1x256xf32> to vector<16x256xf32>
    %134 = arith.addf %132, %133 : vector<16x256xf32>
    %cst_108 = arith.constant 0.000000e+00 : f32
    %135 = vector.broadcast %cst_108 : f32 to vector<16x256xf32>
    %136 = arith.maximumf %134, %135 : vector<16x256xf32>
    %137 = arith.truncf %136 : vector<16x256xf32> to vector<16x256xbf16>
    %c112_109 = arith.constant 112 : index
    %c0_110 = arith.constant 0 : index
    %138 = vector.load %arg15[%c112_109, %c0_110] : memref<128x256xbf16, #tpu.memory_space<vmem>>, vector<16x256xbf16>
    tpu.vector_store %arg15[%c112_109, %c0_110], %137 {strides = array<i32>} : memref<128x256xbf16, #tpu.memory_space<vmem>>, vector<16x256xbf16>,
    %c0_111 = arith.constant 0 : index
    %c0_112 = arith.constant 0 : index
    %139 = vector.load %arg15[%c0_111, %c0_112] : memref<128x256xbf16, #tpu.memory_space<vmem>>, vector<128x256xbf16>
    %c0_113 = arith.constant 0 : index
    %c0_114 = arith.constant 0 : index
    %c0_115 = arith.constant 0 : index
    %140 = vector.load %arg6[%c0_113, %c0_114, %c0_115] : memref<6x256x256xbf16, #tpu.memory_space<vmem>>, vector<1x256x256xbf16>
    %141 = vector.shape_cast %140 : vector<1x256x256xbf16> to vector<256x256xbf16>
    %cst_116 = arith.constant dense<0.000000e+00> : vector<128x256xf32>
    %142 = tpu.matmul %139, %141, %cst_116 {dimension_numbers = #tpu.dot_dimension_numbers<[1], [0], [0], [1], [0, 0, 1, 1], [], []>} : vector<128x256xbf16>, vector<256x256xbf16>, vector<128x256xf32> -> vector<128x256xf32>
    %143 = arith.truncf %142 : vector<128x256xf32> to vector<128x256xbf16>
    %c0_117 = arith.constant 0 : index
    %c0_118 = arith.constant 0 : index
    %144 = vector.load %arg16[%c0_117, %c0_118] : memref<768x256xbf16, #tpu.memory_space<vmem>>, vector<128x256xbf16>
    tpu.vector_store %arg16[%c0_117, %c0_118], %143 {strides = array<i32>} : memref<768x256xbf16, #tpu.memory_space<vmem>>, vector<128x256xbf16>,
    %c1_119 = arith.constant 1 : index
    %c0_120 = arith.constant 0 : index
    %c0_121 = arith.constant 0 : index
    %145 = vector.load %arg6[%c1_119, %c0_120, %c0_121] : memref<6x256x256xbf16, #tpu.memory_space<vmem>>, vector<1x256x256xbf16>
    %146 = vector.shape_cast %145 : vector<1x256x256xbf16> to vector<256x256xbf16>
    %cst_122 = arith.constant dense<0.000000e+00> : vector<128x256xf32>
    %147 = tpu.matmul %139, %146, %cst_122 {dimension_numbers = #tpu.dot_dimension_numbers<[1], [0], [0], [1], [0, 0, 1, 1], [], []>} : vector<128x256xbf16>, vector<256x256xbf16>, vector<128x256xf32> -> vector<128x256xf32>
    %148 = arith.truncf %147 : vector<128x256xf32> to vector<128x256xbf16>
    %c128_123 = arith.constant 128 : index
    %c0_124 = arith.constant 0 : index
    %149 = vector.load %arg16[%c128_123, %c0_124] : memref<768x256xbf16, #tpu.memory_space<vmem>>, vector<128x256xbf16>
    tpu.vector_store %arg16[%c128_123, %c0_124], %148 {strides = array<i32>} : memref<768x256xbf16, #tpu.memory_space<vmem>>, vector<128x256xbf16>,
    %c2_125 = arith.constant 2 : index
    %c0_126 = arith.constant 0 : index
    %c0_127 = arith.constant 0 : index
    %150 = vector.load %arg6[%c2_125, %c0_126, %c0_127] : memref<6x256x256xbf16, #tpu.memory_space<vmem>>, vector<1x256x256xbf16>
    %151 = vector.shape_cast %150 : vector<1x256x256xbf16> to vector<256x256xbf16>
    %cst_128 = arith.constant dense<0.000000e+00> : vector<128x256xf32>
    %152 = tpu.matmul %139, %151, %cst_128 {dimension_numbers = #tpu.dot_dimension_numbers<[1], [0], [0], [1], [0, 0, 1, 1], [], []>} : vector<128x256xbf16>, vector<256x256xbf16>, vector<128x256xf32> -> vector<128x256xf32>
    %153 = arith.truncf %152 : vector<128x256xf32> to vector<128x256xbf16>
    %c256_129 = arith.constant 256 : index
    %c0_130 = arith.constant 0 : index
    %154 = vector.load %arg16[%c256_129, %c0_130] : memref<768x256xbf16, #tpu.memory_space<vmem>>, vector<128x256xbf16>
    tpu.vector_store %arg16[%c256_129, %c0_130], %153 {strides = array<i32>} : memref<768x256xbf16, #tpu.memory_space<vmem>>, vector<128x256xbf16>,
    %c3_131 = arith.constant 3 : index
    %c0_132 = arith.constant 0 : index
    %c0_133 = arith.constant 0 : index
    %155 = vector.load %arg6[%c3_131, %c0_132, %c0_133] : memref<6x256x256xbf16, #tpu.memory_space<vmem>>, vector<1x256x256xbf16>
    %156 = vector.shape_cast %155 : vector<1x256x256xbf16> to vector<256x256xbf16>
    %cst_134 = arith.constant dense<0.000000e+00> : vector<128x256xf32>
    %157 = tpu.matmul %139, %156, %cst_134 {dimension_numbers = #tpu.dot_dimension_numbers<[1], [0], [0], [1], [0, 0, 1, 1], [], []>} : vector<128x256xbf16>, vector<256x256xbf16>, vector<128x256xf32> -> vector<128x256xf32>
    %158 = arith.truncf %157 : vector<128x256xf32> to vector<128x256xbf16>
    %c384_135 = arith.constant 384 : index
    %c0_136 = arith.constant 0 : index
    %159 = vector.load %arg16[%c384_135, %c0_136] : memref<768x256xbf16, #tpu.memory_space<vmem>>, vector<128x256xbf16>
    tpu.vector_store %arg16[%c384_135, %c0_136], %158 {strides = array<i32>} : memref<768x256xbf16, #tpu.memory_space<vmem>>, vector<128x256xbf16>,
    %c4_137 = arith.constant 4 : index
    %c0_138 = arith.constant 0 : index
    %c0_139 = arith.constant 0 : index
    %160 = vector.load %arg6[%c4_137, %c0_138, %c0_139] : memref<6x256x256xbf16, #tpu.memory_space<vmem>>, vector<1x256x256xbf16>
    %161 = vector.shape_cast %160 : vector<1x256x256xbf16> to vector<256x256xbf16>
    %cst_140 = arith.constant dense<0.000000e+00> : vector<128x256xf32>
    %162 = tpu.matmul %139, %161, %cst_140 {dimension_numbers = #tpu.dot_dimension_numbers<[1], [0], [0], [1], [0, 0, 1, 1], [], []>} : vector<128x256xbf16>, vector<256x256xbf16>, vector<128x256xf32> -> vector<128x256xf32>
    %163 = arith.truncf %162 : vector<128x256xf32> to vector<128x256xbf16>
    %c512_141 = arith.constant 512 : index
    %c0_142 = arith.constant 0 : index
    %164 = vector.load %arg16[%c512_141, %c0_142] : memref<768x256xbf16, #tpu.memory_space<vmem>>, vector<128x256xbf16>
    tpu.vector_store %arg16[%c512_141, %c0_142], %163 {strides = array<i32>} : memref<768x256xbf16, #tpu.memory_space<vmem>>, vector<128x256xbf16>,
    %c5 = arith.constant 5 : index
    %c0_143 = arith.constant 0 : index
    %c0_144 = arith.constant 0 : index
    %165 = vector.load %arg6[%c5, %c0_143, %c0_144] : memref<6x256x256xbf16, #tpu.memory_space<vmem>>, vector<1x256x256xbf16>
    %166 = vector.shape_cast %165 : vector<1x256x256xbf16> to vector<256x256xbf16>
    %cst_145 = arith.constant dense<0.000000e+00> : vector<128x256xf32>
    %167 = tpu.matmul %139, %166, %cst_145 {dimension_numbers = #tpu.dot_dimension_numbers<[1], [0], [0], [1], [0, 0, 1, 1], [], []>} : vector<128x256xbf16>, vector<256x256xbf16>, vector<128x256xf32> -> vector<128x256xf32>
    %168 = arith.truncf %167 : vector<128x256xf32> to vector<128x256xbf16>
    %c640 = arith.constant 640 : index
    %c0_146 = arith.constant 0 : index
    %169 = vector.load %arg16[%c640, %c0_146] : memref<768x256xbf16, #tpu.memory_space<vmem>>, vector<128x256xbf16>
    tpu.vector_store %arg16[%c640, %c0_146], %168 {strides = array<i32>} : memref<768x256xbf16, #tpu.memory_space<vmem>>, vector<128x256xbf16>,
    %c0_147 = arith.constant 0 : index
    %c0_148 = arith.constant 0 : index
    %170 = vector.load %arg7[%c0_147, %c0_148] : memref<32x96xbf16, #tpu.memory_space<vmem>>, vector<32x96xbf16>
    %c0_149 = arith.constant 0 : index
    %c0_150 = arith.constant 0 : index
    %171 = vector.load %arg8[%c0_149, %c0_150] : memref<1x256xf32, #tpu.memory_space<vmem>>, vector<1x256xf32>
    %c0_151 = arith.constant 0 : index
    %c0_152 = arith.constant 0 : index
    %172 = vector.load %arg16[%c0_151, %c0_152] : memref<768x256xbf16, #tpu.memory_space<vmem>>, vector<16x256xbf16>
    %c128_153 = arith.constant 128 : index
    %c0_154 = arith.constant 0 : index
    %173 = vector.load %arg16[%c128_153, %c0_154] : memref<768x256xbf16, #tpu.memory_space<vmem>>, vector<16x256xbf16>
    %c256_155 = arith.constant 256 : index
    %c0_156 = arith.constant 0 : index
    %174 = vector.load %arg16[%c256_155, %c0_156] : memref<768x256xbf16, #tpu.memory_space<vmem>>, vector<16x256xbf16>
    %c384_157 = arith.constant 384 : index
    %c0_158 = arith.constant 0 : index
    %175 = vector.load %arg16[%c384_157, %c0_158] : memref<768x256xbf16, #tpu.memory_space<vmem>>, vector<16x256xbf16>
    %c512_159 = arith.constant 512 : index
    %c0_160 = arith.constant 0 : index
    %176 = vector.load %arg16[%c512_159, %c0_160] : memref<768x256xbf16, #tpu.memory_space<vmem>>, vector<16x256xbf16>
    %c640_161 = arith.constant 640 : index
    %c0_162 = arith.constant 0 : index
    %177 = vector.load %arg16[%c640_161, %c0_162] : memref<768x256xbf16, #tpu.memory_space<vmem>>, vector<16x256xbf16>
    %178 = tpu.concatenate %172, %173, %174, %175, %176, %177 in 0 : vector<16x256xbf16>, vector<16x256xbf16>, vector<16x256xbf16>, vector<16x256xbf16>, vector<16x256xbf16>, vector<16x256xbf16> -> vector<96x256xbf16>
    %cst_163 = arith.constant dense<0.000000e+00> : vector<32x256xf32>
    %179 = tpu.matmul %170, %178, %cst_163 {dimension_numbers = #tpu.dot_dimension_numbers<[1], [0], [0], [1], [0, 0, 1, 1], [], []>} : vector<32x96xbf16>, vector<96x256xbf16>, vector<32x256xf32> -> vector<32x256xf32>
    %180 = vector.broadcast %171 : vector<1x256xf32> to vector<32x256xf32>
    %181 = arith.addf %179, %180 : vector<32x256xf32>
    %cst_164 = arith.constant 0.000000e+00 : f32
    %182 = vector.broadcast %cst_164 : f32 to vector<32x256xf32>
    %183 = arith.maximumf %181, %182 : vector<32x256xf32>
    %184 = arith.truncf %183 : vector<32x256xf32> to vector<32x256xbf16>
    %c0_165 = arith.constant 0 : index
    %c0_166 = arith.constant 0 : index
    %185 = vector.load %arg17[%c0_165, %c0_166] : memref<256x256xbf16, #tpu.memory_space<vmem>>, vector<32x256xbf16>
    tpu.vector_store %arg17[%c0_165, %c0_166], %184 {strides = array<i32>} : memref<256x256xbf16, #tpu.memory_space<vmem>>, vector<32x256xbf16>,
    %c16_167 = arith.constant 16 : index
    %c0_168 = arith.constant 0 : index
    %186 = vector.load %arg16[%c16_167, %c0_168] : memref<768x256xbf16, #tpu.memory_space<vmem>>, vector<16x256xbf16>
    %c144_169 = arith.constant 144 : index
    %c0_170 = arith.constant 0 : index
    %187 = vector.load %arg16[%c144_169, %c0_170] : memref<768x256xbf16, #tpu.memory_space<vmem>>, vector<16x256xbf16>
    %c272_171 = arith.constant 272 : index
    %c0_172 = arith.constant 0 : index
    %188 = vector.load %arg16[%c272_171, %c0_172] : memref<768x256xbf16, #tpu.memory_space<vmem>>, vector<16x256xbf16>
    %c400_173 = arith.constant 400 : index
    %c0_174 = arith.constant 0 : index
    %189 = vector.load %arg16[%c400_173, %c0_174] : memref<768x256xbf16, #tpu.memory_space<vmem>>, vector<16x256xbf16>
    %c528_175 = arith.constant 528 : index
    %c0_176 = arith.constant 0 : index
    %190 = vector.load %arg16[%c528_175, %c0_176] : memref<768x256xbf16, #tpu.memory_space<vmem>>, vector<16x256xbf16>
    %c656 = arith.constant 656 : index
    %c0_177 = arith.constant 0 : index
    %191 = vector.load %arg16[%c656, %c0_177] : memref<768x256xbf16, #tpu.memory_space<vmem>>, vector<16x256xbf16>
    %192 = tpu.concatenate %186, %187, %188, %189, %190, %191 in 0 : vector<16x256xbf16>, vector<16x256xbf16>, vector<16x256xbf16>, vector<16x256xbf16>, vector<16x256xbf16>, vector<16x256xbf16> -> vector<96x256xbf16>
    %cst_178 = arith.constant dense<0.000000e+00> : vector<32x256xf32>
    %193 = tpu.matmul %170, %192, %cst_178 {dimension_numbers = #tpu.dot_dimension_numbers<[1], [0], [0], [1], [0, 0, 1, 1], [], []>} : vector<32x96xbf16>, vector<96x256xbf16>, vector<32x256xf32> -> vector<32x256xf32>
    %194 = vector.broadcast %171 : vector<1x256xf32> to vector<32x256xf32>
    %195 = arith.addf %193, %194 : vector<32x256xf32>
    %cst_179 = arith.constant 0.000000e+00 : f32
    %196 = vector.broadcast %cst_179 : f32 to vector<32x256xf32>
    %197 = arith.maximumf %195, %196 : vector<32x256xf32>
    %198 = arith.truncf %197 : vector<32x256xf32> to vector<32x256xbf16>
    %c32_180 = arith.constant 32 : index
    %c0_181 = arith.constant 0 : index
    %199 = vector.load %arg17[%c32_180, %c0_181] : memref<256x256xbf16, #tpu.memory_space<vmem>>, vector<32x256xbf16>
    tpu.vector_store %arg17[%c32_180, %c0_181], %198 {strides = array<i32>} : memref<256x256xbf16, #tpu.memory_space<vmem>>, vector<32x256xbf16>,
    %c32_182 = arith.constant 32 : index
    %c0_183 = arith.constant 0 : index
    %200 = vector.load %arg16[%c32_182, %c0_183] : memref<768x256xbf16, #tpu.memory_space<vmem>>, vector<16x256xbf16>
    %c160_184 = arith.constant 160 : index
    %c0_185 = arith.constant 0 : index
    %201 = vector.load %arg16[%c160_184, %c0_185] : memref<768x256xbf16, #tpu.memory_space<vmem>>, vector<16x256xbf16>
    %c288_186 = arith.constant 288 : index
    %c0_187 = arith.constant 0 : index
    %202 = vector.load %arg16[%c288_186, %c0_187] : memref<768x256xbf16, #tpu.memory_space<vmem>>, vector<16x256xbf16>
    %c416_188 = arith.constant 416 : index
    %c0_189 = arith.constant 0 : index
    %203 = vector.load %arg16[%c416_188, %c0_189] : memref<768x256xbf16, #tpu.memory_space<vmem>>, vector<16x256xbf16>
    %c544_190 = arith.constant 544 : index
    %c0_191 = arith.constant 0 : index
    %204 = vector.load %arg16[%c544_190, %c0_191] : memref<768x256xbf16, #tpu.memory_space<vmem>>, vector<16x256xbf16>
    %c672 = arith.constant 672 : index
    %c0_192 = arith.constant 0 : index
    %205 = vector.load %arg16[%c672, %c0_192] : memref<768x256xbf16, #tpu.memory_space<vmem>>, vector<16x256xbf16>
    %206 = tpu.concatenate %200, %201, %202, %203, %204, %205 in 0 : vector<16x256xbf16>, vector<16x256xbf16>, vector<16x256xbf16>, vector<16x256xbf16>, vector<16x256xbf16>, vector<16x256xbf16> -> vector<96x256xbf16>
    %cst_193 = arith.constant dense<0.000000e+00> : vector<32x256xf32>
    %207 = tpu.matmul %170, %206, %cst_193 {dimension_numbers = #tpu.dot_dimension_numbers<[1], [0], [0], [1], [0, 0, 1, 1], [], []>} : vector<32x96xbf16>, vector<96x256xbf16>, vector<32x256xf32> -> vector<32x256xf32>
    %208 = vector.broadcast %171 : vector<1x256xf32> to vector<32x256xf32>
    %209 = arith.addf %207, %208 : vector<32x256xf32>
    %cst_194 = arith.constant 0.000000e+00 : f32
    %210 = vector.broadcast %cst_194 : f32 to vector<32x256xf32>
    %211 = arith.maximumf %209, %210 : vector<32x256xf32>
    %212 = arith.truncf %211 : vector<32x256xf32> to vector<32x256xbf16>
    %c64_195 = arith.constant 64 : index
    %c0_196 = arith.constant 0 : index
    %213 = vector.load %arg17[%c64_195, %c0_196] : memref<256x256xbf16, #tpu.memory_space<vmem>>, vector<32x256xbf16>
    tpu.vector_store %arg17[%c64_195, %c0_196], %212 {strides = array<i32>} : memref<256x256xbf16, #tpu.memory_space<vmem>>, vector<32x256xbf16>,
    %c48_197 = arith.constant 48 : index
    %c0_198 = arith.constant 0 : index
    %214 = vector.load %arg16[%c48_197, %c0_198] : memref<768x256xbf16, #tpu.memory_space<vmem>>, vector<16x256xbf16>
    %c176_199 = arith.constant 176 : index
    %c0_200 = arith.constant 0 : index
    %215 = vector.load %arg16[%c176_199, %c0_200] : memref<768x256xbf16, #tpu.memory_space<vmem>>, vector<16x256xbf16>
    %c304_201 = arith.constant 304 : index
    %c0_202 = arith.constant 0 : index
    %216 = vector.load %arg16[%c304_201, %c0_202] : memref<768x256xbf16, #tpu.memory_space<vmem>>, vector<16x256xbf16>
    %c432_203 = arith.constant 432 : index
    %c0_204 = arith.constant 0 : index
    %217 = vector.load %arg16[%c432_203, %c0_204] : memref<768x256xbf16, #tpu.memory_space<vmem>>, vector<16x256xbf16>
    %c560_205 = arith.constant 560 : index
    %c0_206 = arith.constant 0 : index
    %218 = vector.load %arg16[%c560_205, %c0_206] : memref<768x256xbf16, #tpu.memory_space<vmem>>, vector<16x256xbf16>
    %c688 = arith.constant 688 : index
    %c0_207 = arith.constant 0 : index
    %219 = vector.load %arg16[%c688, %c0_207] : memref<768x256xbf16, #tpu.memory_space<vmem>>, vector<16x256xbf16>
    %220 = tpu.concatenate %214, %215, %216, %217, %218, %219 in 0 : vector<16x256xbf16>, vector<16x256xbf16>, vector<16x256xbf16>, vector<16x256xbf16>, vector<16x256xbf16>, vector<16x256xbf16> -> vector<96x256xbf16>
    %cst_208 = arith.constant dense<0.000000e+00> : vector<32x256xf32>
    %221 = tpu.matmul %170, %220, %cst_208 {dimension_numbers = #tpu.dot_dimension_numbers<[1], [0], [0], [1], [0, 0, 1, 1], [], []>} : vector<32x96xbf16>, vector<96x256xbf16>, vector<32x256xf32> -> vector<32x256xf32>
    %222 = vector.broadcast %171 : vector<1x256xf32> to vector<32x256xf32>
    %223 = arith.addf %221, %222 : vector<32x256xf32>
    %cst_209 = arith.constant 0.000000e+00 : f32
    %224 = vector.broadcast %cst_209 : f32 to vector<32x256xf32>
    %225 = arith.maximumf %223, %224 : vector<32x256xf32>
    %226 = arith.truncf %225 : vector<32x256xf32> to vector<32x256xbf16>
    %c96_210 = arith.constant 96 : index
    %c0_211 = arith.constant 0 : index
    %227 = vector.load %arg17[%c96_210, %c0_211] : memref<256x256xbf16, #tpu.memory_space<vmem>>, vector<32x256xbf16>
    tpu.vector_store %arg17[%c96_210, %c0_211], %226 {strides = array<i32>} : memref<256x256xbf16, #tpu.memory_space<vmem>>, vector<32x256xbf16>,
    %c64_212 = arith.constant 64 : index
    %c0_213 = arith.constant 0 : index
    %228 = vector.load %arg16[%c64_212, %c0_213] : memref<768x256xbf16, #tpu.memory_space<vmem>>, vector<16x256xbf16>
    %c192_214 = arith.constant 192 : index
    %c0_215 = arith.constant 0 : index
    %229 = vector.load %arg16[%c192_214, %c0_215] : memref<768x256xbf16, #tpu.memory_space<vmem>>, vector<16x256xbf16>
    %c320_216 = arith.constant 320 : index
    %c0_217 = arith.constant 0 : index
    %230 = vector.load %arg16[%c320_216, %c0_217] : memref<768x256xbf16, #tpu.memory_space<vmem>>, vector<16x256xbf16>
    %c448_218 = arith.constant 448 : index
    %c0_219 = arith.constant 0 : index
    %231 = vector.load %arg16[%c448_218, %c0_219] : memref<768x256xbf16, #tpu.memory_space<vmem>>, vector<16x256xbf16>
    %c576_220 = arith.constant 576 : index
    %c0_221 = arith.constant 0 : index
    %232 = vector.load %arg16[%c576_220, %c0_221] : memref<768x256xbf16, #tpu.memory_space<vmem>>, vector<16x256xbf16>
    %c704 = arith.constant 704 : index
    %c0_222 = arith.constant 0 : index
    %233 = vector.load %arg16[%c704, %c0_222] : memref<768x256xbf16, #tpu.memory_space<vmem>>, vector<16x256xbf16>
    %234 = tpu.concatenate %228, %229, %230, %231, %232, %233 in 0 : vector<16x256xbf16>, vector<16x256xbf16>, vector<16x256xbf16>, vector<16x256xbf16>, vector<16x256xbf16>, vector<16x256xbf16> -> vector<96x256xbf16>
    %cst_223 = arith.constant dense<0.000000e+00> : vector<32x256xf32>
    %235 = tpu.matmul %170, %234, %cst_223 {dimension_numbers = #tpu.dot_dimension_numbers<[1], [0], [0], [1], [0, 0, 1, 1], [], []>} : vector<32x96xbf16>, vector<96x256xbf16>, vector<32x256xf32> -> vector<32x256xf32>
    %236 = vector.broadcast %171 : vector<1x256xf32> to vector<32x256xf32>
    %237 = arith.addf %235, %236 : vector<32x256xf32>
    %cst_224 = arith.constant 0.000000e+00 : f32
    %238 = vector.broadcast %cst_224 : f32 to vector<32x256xf32>
    %239 = arith.maximumf %237, %238 : vector<32x256xf32>
    %240 = arith.truncf %239 : vector<32x256xf32> to vector<32x256xbf16>
    %c128_225 = arith.constant 128 : index
    %c0_226 = arith.constant 0 : index
    %241 = vector.load %arg17[%c128_225, %c0_226] : memref<256x256xbf16, #tpu.memory_space<vmem>>, vector<32x256xbf16>
    tpu.vector_store %arg17[%c128_225, %c0_226], %240 {strides = array<i32>} : memref<256x256xbf16, #tpu.memory_space<vmem>>, vector<32x256xbf16>,
    %c80_227 = arith.constant 80 : index
    %c0_228 = arith.constant 0 : index
    %242 = vector.load %arg16[%c80_227, %c0_228] : memref<768x256xbf16, #tpu.memory_space<vmem>>, vector<16x256xbf16>
    %c208_229 = arith.constant 208 : index
    %c0_230 = arith.constant 0 : index
    %243 = vector.load %arg16[%c208_229, %c0_230] : memref<768x256xbf16, #tpu.memory_space<vmem>>, vector<16x256xbf16>
    %c336_231 = arith.constant 336 : index
    %c0_232 = arith.constant 0 : index
    %244 = vector.load %arg16[%c336_231, %c0_232] : memref<768x256xbf16, #tpu.memory_space<vmem>>, vector<16x256xbf16>
    %c464_233 = arith.constant 464 : index
    %c0_234 = arith.constant 0 : index
    %245 = vector.load %arg16[%c464_233, %c0_234] : memref<768x256xbf16, #tpu.memory_space<vmem>>, vector<16x256xbf16>
    %c592_235 = arith.constant 592 : index
    %c0_236 = arith.constant 0 : index
    %246 = vector.load %arg16[%c592_235, %c0_236] : memref<768x256xbf16, #tpu.memory_space<vmem>>, vector<16x256xbf16>
    %c720 = arith.constant 720 : index
    %c0_237 = arith.constant 0 : index
    %247 = vector.load %arg16[%c720, %c0_237] : memref<768x256xbf16, #tpu.memory_space<vmem>>, vector<16x256xbf16>
    %248 = tpu.concatenate %242, %243, %244, %245, %246, %247 in 0 : vector<16x256xbf16>, vector<16x256xbf16>, vector<16x256xbf16>, vector<16x256xbf16>, vector<16x256xbf16>, vector<16x256xbf16> -> vector<96x256xbf16>
    %cst_238 = arith.constant dense<0.000000e+00> : vector<32x256xf32>
    %249 = tpu.matmul %170, %248, %cst_238 {dimension_numbers = #tpu.dot_dimension_numbers<[1], [0], [0], [1], [0, 0, 1, 1], [], []>} : vector<32x96xbf16>, vector<96x256xbf16>, vector<32x256xf32> -> vector<32x256xf32>
    %250 = vector.broadcast %171 : vector<1x256xf32> to vector<32x256xf32>
    %251 = arith.addf %249, %250 : vector<32x256xf32>
    %cst_239 = arith.constant 0.000000e+00 : f32
    %252 = vector.broadcast %cst_239 : f32 to vector<32x256xf32>
    %253 = arith.maximumf %251, %252 : vector<32x256xf32>
    %254 = arith.truncf %253 : vector<32x256xf32> to vector<32x256xbf16>
    %c160_240 = arith.constant 160 : index
    %c0_241 = arith.constant 0 : index
    %255 = vector.load %arg17[%c160_240, %c0_241] : memref<256x256xbf16, #tpu.memory_space<vmem>>, vector<32x256xbf16>
    tpu.vector_store %arg17[%c160_240, %c0_241], %254 {strides = array<i32>} : memref<256x256xbf16, #tpu.memory_space<vmem>>, vector<32x256xbf16>,
    %c96_242 = arith.constant 96 : index
    %c0_243 = arith.constant 0 : index
    %256 = vector.load %arg16[%c96_242, %c0_243] : memref<768x256xbf16, #tpu.memory_space<vmem>>, vector<16x256xbf16>
    %c224_244 = arith.constant 224 : index
    %c0_245 = arith.constant 0 : index
    %257 = vector.load %arg16[%c224_244, %c0_245] : memref<768x256xbf16, #tpu.memory_space<vmem>>, vector<16x256xbf16>
    %c352_246 = arith.constant 352 : index
    %c0_247 = arith.constant 0 : index
    %258 = vector.load %arg16[%c352_246, %c0_247] : memref<768x256xbf16, #tpu.memory_space<vmem>>, vector<16x256xbf16>
    %c480_248 = arith.constant 480 : index
    %c0_249 = arith.constant 0 : index
    %259 = vector.load %arg16[%c480_248, %c0_249] : memref<768x256xbf16, #tpu.memory_space<vmem>>, vector<16x256xbf16>
    %c608_250 = arith.constant 608 : index
    %c0_251 = arith.constant 0 : index
    %260 = vector.load %arg16[%c608_250, %c0_251] : memref<768x256xbf16, #tpu.memory_space<vmem>>, vector<16x256xbf16>
    %c736 = arith.constant 736 : index
    %c0_252 = arith.constant 0 : index
    %261 = vector.load %arg16[%c736, %c0_252] : memref<768x256xbf16, #tpu.memory_space<vmem>>, vector<16x256xbf16>
    %262 = tpu.concatenate %256, %257, %258, %259, %260, %261 in 0 : vector<16x256xbf16>, vector<16x256xbf16>, vector<16x256xbf16>, vector<16x256xbf16>, vector<16x256xbf16>, vector<16x256xbf16> -> vector<96x256xbf16>
    %cst_253 = arith.constant dense<0.000000e+00> : vector<32x256xf32>
    %263 = tpu.matmul %170, %262, %cst_253 {dimension_numbers = #tpu.dot_dimension_numbers<[1], [0], [0], [1], [0, 0, 1, 1], [], []>} : vector<32x96xbf16>, vector<96x256xbf16>, vector<32x256xf32> -> vector<32x256xf32>
    %264 = vector.broadcast %171 : vector<1x256xf32> to vector<32x256xf32>
    %265 = arith.addf %263, %264 : vector<32x256xf32>
    %cst_254 = arith.constant 0.000000e+00 : f32
    %266 = vector.broadcast %cst_254 : f32 to vector<32x256xf32>
    %267 = arith.maximumf %265, %266 : vector<32x256xf32>
    %268 = arith.truncf %267 : vector<32x256xf32> to vector<32x256xbf16>
    %c192_255 = arith.constant 192 : index
    %c0_256 = arith.constant 0 : index
    %269 = vector.load %arg17[%c192_255, %c0_256] : memref<256x256xbf16, #tpu.memory_space<vmem>>, vector<32x256xbf16>
    tpu.vector_store %arg17[%c192_255, %c0_256], %268 {strides = array<i32>} : memref<256x256xbf16, #tpu.memory_space<vmem>>, vector<32x256xbf16>,
    %c112_257 = arith.constant 112 : index
    %c0_258 = arith.constant 0 : index
    %270 = vector.load %arg16[%c112_257, %c0_258] : memref<768x256xbf16, #tpu.memory_space<vmem>>, vector<16x256xbf16>
    %c240_259 = arith.constant 240 : index
    %c0_260 = arith.constant 0 : index
    %271 = vector.load %arg16[%c240_259, %c0_260] : memref<768x256xbf16, #tpu.memory_space<vmem>>, vector<16x256xbf16>
    %c368_261 = arith.constant 368 : index
    %c0_262 = arith.constant 0 : index
    %272 = vector.load %arg16[%c368_261, %c0_262] : memref<768x256xbf16, #tpu.memory_space<vmem>>, vector<16x256xbf16>
    %c496_263 = arith.constant 496 : index
    %c0_264 = arith.constant 0 : index
    %273 = vector.load %arg16[%c496_263, %c0_264] : memref<768x256xbf16, #tpu.memory_space<vmem>>, vector<16x256xbf16>
    %c624_265 = arith.constant 624 : index
    %c0_266 = arith.constant 0 : index
    %274 = vector.load %arg16[%c624_265, %c0_266] : memref<768x256xbf16, #tpu.memory_space<vmem>>, vector<16x256xbf16>
    %c752 = arith.constant 752 : index
    %c0_267 = arith.constant 0 : index
    %275 = vector.load %arg16[%c752, %c0_267] : memref<768x256xbf16, #tpu.memory_space<vmem>>, vector<16x256xbf16>
    %276 = tpu.concatenate %270, %271, %272, %273, %274, %275 in 0 : vector<16x256xbf16>, vector<16x256xbf16>, vector<16x256xbf16>, vector<16x256xbf16>, vector<16x256xbf16>, vector<16x256xbf16> -> vector<96x256xbf16>
    %cst_268 = arith.constant dense<0.000000e+00> : vector<32x256xf32>
    %277 = tpu.matmul %170, %276, %cst_268 {dimension_numbers = #tpu.dot_dimension_numbers<[1], [0], [0], [1], [0, 0, 1, 1], [], []>} : vector<32x96xbf16>, vector<96x256xbf16>, vector<32x256xf32> -> vector<32x256xf32>
    %278 = vector.broadcast %171 : vector<1x256xf32> to vector<32x256xf32>
    %279 = arith.addf %277, %278 : vector<32x256xf32>
    %cst_269 = arith.constant 0.000000e+00 : f32
    %280 = vector.broadcast %cst_269 : f32 to vector<32x256xf32>
    %281 = arith.maximumf %279, %280 : vector<32x256xf32>
    %282 = arith.truncf %281 : vector<32x256xf32> to vector<32x256xbf16>
    %c224_270 = arith.constant 224 : index
    %c0_271 = arith.constant 0 : index
    %283 = vector.load %arg17[%c224_270, %c0_271] : memref<256x256xbf16, #tpu.memory_space<vmem>>, vector<32x256xbf16>
    tpu.vector_store %arg17[%c224_270, %c0_271], %282 {strides = array<i32>} : memref<256x256xbf16, #tpu.memory_space<vmem>>, vector<32x256xbf16>,
    %c0_272 = arith.constant 0 : index
    %c0_273 = arith.constant 0 : index
    %284 = vector.load %arg17[%c0_272, %c0_273] : memref<256x256xbf16, #tpu.memory_space<vmem>>, vector<256x256xbf16>
    %c0_274 = arith.constant 0 : index
    %c0_275 = arith.constant 0 : index
    %c0_276 = arith.constant 0 : index
    %285 = vector.load %arg9[%c0_274, %c0_275, %c0_276] : memref<6x256x256xbf16, #tpu.memory_space<vmem>>, vector<1x256x256xbf16>
    %286 = vector.shape_cast %285 : vector<1x256x256xbf16> to vector<256x256xbf16>
    %cst_277 = arith.constant dense<0.000000e+00> : vector<256x256xf32>
    %287 = tpu.matmul %284, %286, %cst_277 {dimension_numbers = #tpu.dot_dimension_numbers<[1], [0], [0], [1], [0, 0, 1, 1], [], []>} : vector<256x256xbf16>, vector<256x256xbf16>, vector<256x256xf32> -> vector<256x256xf32>
    %288 = arith.truncf %287 : vector<256x256xf32> to vector<256x256xbf16>
    %c0_278 = arith.constant 0 : index
    %c0_279 = arith.constant 0 : index
    %289 = vector.load %arg18[%c0_278, %c0_279] : memref<1536x256xbf16, #tpu.memory_space<vmem>>, vector<256x256xbf16>
    tpu.vector_store %arg18[%c0_278, %c0_279], %288 {strides = array<i32>} : memref<1536x256xbf16, #tpu.memory_space<vmem>>, vector<256x256xbf16>,
    %c1_280 = arith.constant 1 : index
    %c0_281 = arith.constant 0 : index
    %c0_282 = arith.constant 0 : index
    %290 = vector.load %arg9[%c1_280, %c0_281, %c0_282] : memref<6x256x256xbf16, #tpu.memory_space<vmem>>, vector<1x256x256xbf16>
    %291 = vector.shape_cast %290 : vector<1x256x256xbf16> to vector<256x256xbf16>
    %cst_283 = arith.constant dense<0.000000e+00> : vector<256x256xf32>
    %292 = tpu.matmul %284, %291, %cst_283 {dimension_numbers = #tpu.dot_dimension_numbers<[1], [0], [0], [1], [0, 0, 1, 1], [], []>} : vector<256x256xbf16>, vector<256x256xbf16>, vector<256x256xf32> -> vector<256x256xf32>
    %293 = arith.truncf %292 : vector<256x256xf32> to vector<256x256xbf16>
    %c256_284 = arith.constant 256 : index
    %c0_285 = arith.constant 0 : index
    %294 = vector.load %arg18[%c256_284, %c0_285] : memref<1536x256xbf16, #tpu.memory_space<vmem>>, vector<256x256xbf16>
    tpu.vector_store %arg18[%c256_284, %c0_285], %293 {strides = array<i32>} : memref<1536x256xbf16, #tpu.memory_space<vmem>>, vector<256x256xbf16>,
    %c2_286 = arith.constant 2 : index
    %c0_287 = arith.constant 0 : index
    %c0_288 = arith.constant 0 : index
    %295 = vector.load %arg9[%c2_286, %c0_287, %c0_288] : memref<6x256x256xbf16, #tpu.memory_space<vmem>>, vector<1x256x256xbf16>
    %296 = vector.shape_cast %295 : vector<1x256x256xbf16> to vector<256x256xbf16>
    %cst_289 = arith.constant dense<0.000000e+00> : vector<256x256xf32>
    %297 = tpu.matmul %284, %296, %cst_289 {dimension_numbers = #tpu.dot_dimension_numbers<[1], [0], [0], [1], [0, 0, 1, 1], [], []>} : vector<256x256xbf16>, vector<256x256xbf16>, vector<256x256xf32> -> vector<256x256xf32>
    %298 = arith.truncf %297 : vector<256x256xf32> to vector<256x256xbf16>
    %c512_290 = arith.constant 512 : index
    %c0_291 = arith.constant 0 : index
    %299 = vector.load %arg18[%c512_290, %c0_291] : memref<1536x256xbf16, #tpu.memory_space<vmem>>, vector<256x256xbf16>
    tpu.vector_store %arg18[%c512_290, %c0_291], %298 {strides = array<i32>} : memref<1536x256xbf16, #tpu.memory_space<vmem>>, vector<256x256xbf16>,
    %c3_292 = arith.constant 3 : index
    %c0_293 = arith.constant 0 : index
    %c0_294 = arith.constant 0 : index
    %300 = vector.load %arg9[%c3_292, %c0_293, %c0_294] : memref<6x256x256xbf16, #tpu.memory_space<vmem>>, vector<1x256x256xbf16>
    %301 = vector.shape_cast %300 : vector<1x256x256xbf16> to vector<256x256xbf16>
    %cst_295 = arith.constant dense<0.000000e+00> : vector<256x256xf32>
    %302 = tpu.matmul %284, %301, %cst_295 {dimension_numbers = #tpu.dot_dimension_numbers<[1], [0], [0], [1], [0, 0, 1, 1], [], []>} : vector<256x256xbf16>, vector<256x256xbf16>, vector<256x256xf32> -> vector<256x256xf32>
    %303 = arith.truncf %302 : vector<256x256xf32> to vector<256x256xbf16>
    %c768 = arith.constant 768 : index
    %c0_296 = arith.constant 0 : index
    %304 = vector.load %arg18[%c768, %c0_296] : memref<1536x256xbf16, #tpu.memory_space<vmem>>, vector<256x256xbf16>
    tpu.vector_store %arg18[%c768, %c0_296], %303 {strides = array<i32>} : memref<1536x256xbf16, #tpu.memory_space<vmem>>, vector<256x256xbf16>,
    %c4_297 = arith.constant 4 : index
    %c0_298 = arith.constant 0 : index
    %c0_299 = arith.constant 0 : index
    %305 = vector.load %arg9[%c4_297, %c0_298, %c0_299] : memref<6x256x256xbf16, #tpu.memory_space<vmem>>, vector<1x256x256xbf16>
    %306 = vector.shape_cast %305 : vector<1x256x256xbf16> to vector<256x256xbf16>
    %cst_300 = arith.constant dense<0.000000e+00> : vector<256x256xf32>
    %307 = tpu.matmul %284, %306, %cst_300 {dimension_numbers = #tpu.dot_dimension_numbers<[1], [0], [0], [1], [0, 0, 1, 1], [], []>} : vector<256x256xbf16>, vector<256x256xbf16>, vector<256x256xf32> -> vector<256x256xf32>
    %308 = arith.truncf %307 : vector<256x256xf32> to vector<256x256xbf16>
    %c1024 = arith.constant 1024 : index
    %c0_301 = arith.constant 0 : index
    %309 = vector.load %arg18[%c1024, %c0_301] : memref<1536x256xbf16, #tpu.memory_space<vmem>>, vector<256x256xbf16>
    tpu.vector_store %arg18[%c1024, %c0_301], %308 {strides = array<i32>} : memref<1536x256xbf16, #tpu.memory_space<vmem>>, vector<256x256xbf16>,
    %c5_302 = arith.constant 5 : index
    %c0_303 = arith.constant 0 : index
    %c0_304 = arith.constant 0 : index
    %310 = vector.load %arg9[%c5_302, %c0_303, %c0_304] : memref<6x256x256xbf16, #tpu.memory_space<vmem>>, vector<1x256x256xbf16>
    %311 = vector.shape_cast %310 : vector<1x256x256xbf16> to vector<256x256xbf16>
    %cst_305 = arith.constant dense<0.000000e+00> : vector<256x256xf32>
    %312 = tpu.matmul %284, %311, %cst_305 {dimension_numbers = #tpu.dot_dimension_numbers<[1], [0], [0], [1], [0, 0, 1, 1], [], []>} : vector<256x256xbf16>, vector<256x256xbf16>, vector<256x256xf32> -> vector<256x256xf32>
    %313 = arith.truncf %312 : vector<256x256xf32> to vector<256x256xbf16>
    %c1280 = arith.constant 1280 : index
    %c0_306 = arith.constant 0 : index
    %314 = vector.load %arg18[%c1280, %c0_306] : memref<1536x256xbf16, #tpu.memory_space<vmem>>, vector<256x256xbf16>
    tpu.vector_store %arg18[%c1280, %c0_306], %313 {strides = array<i32>} : memref<1536x256xbf16, #tpu.memory_space<vmem>>, vector<256x256xbf16>,
    %c0_307 = arith.constant 0 : index
    %c0_308 = arith.constant 0 : index
    %315 = vector.load %arg10[%c0_307, %c0_308] : memref<64x192xbf16, #tpu.memory_space<vmem>>, vector<64x192xbf16>
    %c0_309 = arith.constant 0 : index
    %c0_310 = arith.constant 0 : index
    %316 = vector.load %arg11[%c0_309, %c0_310] : memref<1x256xf32, #tpu.memory_space<vmem>>, vector<1x256xf32>
    %c0_311 = arith.constant 0 : index
    %c0_312 = arith.constant 0 : index
    %317 = vector.load %arg18[%c0_311, %c0_312] : memref<1536x256xbf16, #tpu.memory_space<vmem>>, vector<32x256xbf16>
    %c256_313 = arith.constant 256 : index
    %c0_314 = arith.constant 0 : index
    %318 = vector.load %arg18[%c256_313, %c0_314] : memref<1536x256xbf16, #tpu.memory_space<vmem>>, vector<32x256xbf16>
    %c512_315 = arith.constant 512 : index
    %c0_316 = arith.constant 0 : index
    %319 = vector.load %arg18[%c512_315, %c0_316] : memref<1536x256xbf16, #tpu.memory_space<vmem>>, vector<32x256xbf16>
    %c768_317 = arith.constant 768 : index
    %c0_318 = arith.constant 0 : index
    %320 = vector.load %arg18[%c768_317, %c0_318] : memref<1536x256xbf16, #tpu.memory_space<vmem>>, vector<32x256xbf16>
    %c1024_319 = arith.constant 1024 : index
    %c0_320 = arith.constant 0 : index
    %321 = vector.load %arg18[%c1024_319, %c0_320] : memref<1536x256xbf16, #tpu.memory_space<vmem>>, vector<32x256xbf16>
    %c1280_321 = arith.constant 1280 : index
    %c0_322 = arith.constant 0 : index
    %322 = vector.load %arg18[%c1280_321, %c0_322] : memref<1536x256xbf16, #tpu.memory_space<vmem>>, vector<32x256xbf16>
    %323 = tpu.concatenate %317, %318, %319, %320, %321, %322 in 0 : vector<32x256xbf16>, vector<32x256xbf16>, vector<32x256xbf16>, vector<32x256xbf16>, vector<32x256xbf16>, vector<32x256xbf16> -> vector<192x256xbf16>
    %cst_323 = arith.constant dense<0.000000e+00> : vector<64x256xf32>
    %324 = tpu.matmul %315, %323, %cst_323 {dimension_numbers = #tpu.dot_dimension_numbers<[1], [0], [0], [1], [0, 0, 1, 1], [], []>} : vector<64x192xbf16>, vector<192x256xbf16>, vector<64x256xf32> -> vector<64x256xf32>
    %325 = vector.broadcast %316 : vector<1x256xf32> to vector<64x256xf32>
    %326 = arith.addf %324, %325 : vector<64x256xf32>
    %c0_324 = arith.constant 0 : index
    %c0_325 = arith.constant 0 : index
    %c0_326 = arith.constant 0 : index
    %327 = vector.load %arg12[%c0_324, %c0_325, %c0_326] : memref<8x64x256xf32, #tpu.memory_space<vmem>>, vector<1x64x256xf32>
    %328 = vector.shape_cast %327 : vector<1x64x256xf32> to vector<64x256xf32>
    %329 = vector.shape_cast %326 : vector<64x256xf32> to vector<1x64x256xf32>
    tpu.vector_store %arg12[%c0_324, %c0_325, %c0_326], %329 {strides = array<i32>} : memref<8x64x256xf32, #tpu.memory_space<vmem>>, vector<1x64x256xf32>,
    %c32_327 = arith.constant 32 : index
    %c0_328 = arith.constant 0 : index
    %330 = vector.load %arg18[%c32_327, %c0_328] : memref<1536x256xbf16, #tpu.memory_space<vmem>>, vector<32x256xbf16>
    %c288_329 = arith.constant 288 : index
    %c0_330 = arith.constant 0 : index
    %331 = vector.load %arg18[%c288_329, %c0_330] : memref<1536x256xbf16, #tpu.memory_space<vmem>>, vector<32x256xbf16>
    %c544_331 = arith.constant 544 : index
    %c0_332 = arith.constant 0 : index
    %332 = vector.load %arg18[%c544_331, %c0_332] : memref<1536x256xbf16, #tpu.memory_space<vmem>>, vector<32x256xbf16>
    %c800 = arith.constant 800 : index
    %c0_333 = arith.constant 0 : index
    %333 = vector.load %arg18[%c800, %c0_333] : memref<1536x256xbf16, #tpu.memory_space<vmem>>, vector<32x256xbf16>
    %c1056 = arith.constant 1056 : index
    %c0_334 = arith.constant 0 : index
    %334 = vector.load %arg18[%c1056, %c0_334] : memref<1536x256xbf16, #tpu.memory_space<vmem>>, vector<32x256xbf16>
    %c1312 = arith.constant 1312 : index
    %c0_335 = arith.constant 0 : index
    %335 = vector.load %arg18[%c1312, %c0_335] : memref<1536x256xbf16, #tpu.memory_space<vmem>>, vector<32x256xbf16>
    %336 = tpu.concatenate %330, %331, %332, %333, %334, %335 in 0 : vector<32x256xbf16>, vector<32x256xbf16>, vector<32x256xbf16>, vector<32x256xbf16>, vector<32x256xbf16>, vector<32x256xbf16> -> vector<192x256xbf16>
    %cst_336 = arith.constant dense<0.000000e+00> : vector<64x256xf32>
    %337 = tpu.matmul %315, %336, %cst_336 {dimension_numbers = #tpu.dot_dimension_numbers<[1], [0], [0], [1], [0, 0, 1, 1], [], []>} : vector<64x192xbf16>, vector<192x256xbf16>, vector<64x256xf32> -> vector<64x256xf32>
    %338 = vector.broadcast %316 : vector<1x256xf32> to vector<64x256xf32>
    %339 = arith.addf %337, %338 : vector<64x256xf32>
    %c1_337 = arith.constant 1 : index
    %c0_338 = arith.constant 0 : index
    %c0_339 = arith.constant 0 : index
    %340 = vector.load %arg12[%c1_337, %c0_338, %c0_339] : memref<8x64x256xf32, #tpu.memory_space<vmem>>, vector<1x64x256xf32>
    %341 = vector.shape_cast %340 : vector<1x64x256xf32> to vector<64x256xf32>
    %342 = vector.shape_cast %339 : vector<64x256xf32> to vector<1x64x256xf32>
    tpu.vector_store %arg12[%c1_337, %c0_338, %c0_339], %342 {strides = array<i32>} : memref<8x64x256xf32, #tpu.memory_space<vmem>>, vector<1x64x256xf32>,
    %c64_340 = arith.constant 64 : index
    %c0_341 = arith.constant 0 : index
    %343 = vector.load %arg18[%c64_340, %c0_341] : memref<1536x256xbf16, #tpu.memory_space<vmem>>, vector<32x256xbf16>
    %c320_342 = arith.constant 320 : index
    %c0_343 = arith.constant 0 : index
    %344 = vector.load %arg18[%c320_342, %c0_343] : memref<1536x256xbf16, #tpu.memory_space<vmem>>, vector<32x256xbf16>
    %c576_344 = arith.constant 576 : index
    %c0_345 = arith.constant 0 : index
    %345 = vector.load %arg18[%c576_344, %c0_345] : memref<1536x256xbf16, #tpu.memory_space<vmem>>, vector<32x256xbf16>
    %c832 = arith.constant 832 : index
    %c0_346 = arith.constant 0 : index
    %346 = vector.load %arg18[%c832, %c0_346] : memref<1536x256xbf16, #tpu.memory_space<vmem>>, vector<32x256xbf16>
    %c1088 = arith.constant 1088 : index
    %c0_347 = arith.constant 0 : index
    %347 = vector.load %arg18[%c1088, %c0_347] : memref<1536x256xbf16, #tpu.memory_space<vmem>>, vector<32x256xbf16>
    %c1344 = arith.constant 1344 : index
    %c0_348 = arith.constant 0 : index
    %348 = vector.load %arg18[%c1344, %c0_348] : memref<1536x256xbf16, #tpu.memory_space<vmem>>, vector<32x256xbf16>
    %349 = tpu.concatenate %343, %344, %345, %346, %347, %348 in 0 : vector<32x256xbf16>, vector<32x256xbf16>, vector<32x256xbf16>, vector<32x256xbf16>, vector<32x256xbf16>, vector<32x256xbf16> -> vector<192x256xbf16>
    %cst_349 = arith.constant dense<0.000000e+00> : vector<64x256xf32>
    %350 = tpu.matmul %315, %349, %cst_349 {dimension_numbers = #tpu.dot_dimension_numbers<[1], [0], [0], [1], [0, 0, 1, 1], [], []>} : vector<64x192xbf16>, vector<192x256xbf16>, vector<64x256xf32> -> vector<64x256xf32>
    %351 = vector.broadcast %316 : vector<1x256xf32> to vector<64x256xf32>
    %352 = arith.addf %350, %351 : vector<64x256xf32>
    %c2_350 = arith.constant 2 : index
    %c0_351 = arith.constant 0 : index
    %c0_352 = arith.constant 0 : index
    %353 = vector.load %arg12[%c2_350, %c0_351, %c0_352] : memref<8x64x256xf32, #tpu.memory_space<vmem>>, vector<1x64x256xf32>
    %354 = vector.shape_cast %353 : vector<1x64x256xf32> to vector<64x256xf32>
    %355 = vector.shape_cast %352 : vector<64x256xf32> to vector<1x64x256xf32>
    tpu.vector_store %arg12[%c2_350, %c0_351, %c0_352], %355 {strides = array<i32>} : memref<8x64x256xf32, #tpu.memory_space<vmem>>, vector<1x64x256xf32>,
    %c96_353 = arith.constant 96 : index
    %c0_354 = arith.constant 0 : index
    %356 = vector.load %arg18[%c96_353, %c0_354] : memref<1536x256xbf16, #tpu.memory_space<vmem>>, vector<32x256xbf16>
    %c352_355 = arith.constant 352 : index
    %c0_356 = arith.constant 0 : index
    %357 = vector.load %arg18[%c352_355, %c0_356] : memref<1536x256xbf16, #tpu.memory_space<vmem>>, vector<32x256xbf16>
    %c608_357 = arith.constant 608 : index
    %c0_358 = arith.constant 0 : index
    %358 = vector.load %arg18[%c608_357, %c0_358] : memref<1536x256xbf16, #tpu.memory_space<vmem>>, vector<32x256xbf16>
    %c864 = arith.constant 864 : index
    %c0_359 = arith.constant 0 : index
    %359 = vector.load %arg18[%c864, %c0_359] : memref<1536x256xbf16, #tpu.memory_space<vmem>>, vector<32x256xbf16>
    %c1120 = arith.constant 1120 : index
    %c0_360 = arith.constant 0 : index
    %360 = vector.load %arg18[%c1120, %c0_360] : memref<1536x256xbf16, #tpu.memory_space<vmem>>, vector<32x256xbf16>
    %c1376 = arith.constant 1376 : index
    %c0_361 = arith.constant 0 : index
    %361 = vector.load %arg18[%c1376, %c0_361] : memref<1536x256xbf16, #tpu.memory_space<vmem>>, vector<32x256xbf16>
    %362 = tpu.concatenate %356, %357, %358, %359, %360, %361 in 0 : vector<32x256xbf16>, vector<32x256xbf16>, vector<32x256xbf16>, vector<32x256xbf16>, vector<32x256xbf16>, vector<32x256xbf16> -> vector<192x256xbf16>
    %cst_362 = arith.constant dense<0.000000e+00> : vector<64x256xf32>
    %363 = tpu.matmul %315, %362, %cst_362 {dimension_numbers = #tpu.dot_dimension_numbers<[1], [0], [0], [1], [0, 0, 1, 1], [], []>} : vector<64x192xbf16>, vector<192x256xbf16>, vector<64x256xf32> -> vector<64x256xf32>
    %364 = vector.broadcast %316 : vector<1x256xf32> to vector<64x256xf32>
    %365 = arith.addf %363, %364 : vector<64x256xf32>
    %c3_363 = arith.constant 3 : index
    %c0_364 = arith.constant 0 : index
    %c0_365 = arith.constant 0 : index
    %366 = vector.load %arg12[%c3_363, %c0_364, %c0_365] : memref<8x64x256xf32, #tpu.memory_space<vmem>>, vector<1x64x256xf32>
    %367 = vector.shape_cast %366 : vector<1x64x256xf32> to vector<64x256xf32>
    %368 = vector.shape_cast %365 : vector<64x256xf32> to vector<1x64x256xf32>
    tpu.vector_store %arg12[%c3_363, %c0_364, %c0_365], %368 {strides = array<i32>} : memref<8x64x256xf32, #tpu.memory_space<vmem>>, vector<1x64x256xf32>,
    %c128_366 = arith.constant 128 : index
    %c0_367 = arith.constant 0 : index
    %369 = vector.load %arg18[%c128_366, %c0_367] : memref<1536x256xbf16, #tpu.memory_space<vmem>>, vector<32x256xbf16>
    %c384_368 = arith.constant 384 : index
    %c0_369 = arith.constant 0 : index
    %370 = vector.load %arg18[%c384_368, %c0_369] : memref<1536x256xbf16, #tpu.memory_space<vmem>>, vector<32x256xbf16>
    %c640_370 = arith.constant 640 : index
    %c0_371 = arith.constant 0 : index
    %371 = vector.load %arg18[%c640_370, %c0_371] : memref<1536x256xbf16, #tpu.memory_space<vmem>>, vector<32x256xbf16>
    %c896 = arith.constant 896 : index
    %c0_372 = arith.constant 0 : index
    %372 = vector.load %arg18[%c896, %c0_372] : memref<1536x256xbf16, #tpu.memory_space<vmem>>, vector<32x256xbf16>
    %c1152 = arith.constant 1152 : index
    %c0_373 = arith.constant 0 : index
    %373 = vector.load %arg18[%c1152, %c0_373] : memref<1536x256xbf16, #tpu.memory_space<vmem>>, vector<32x256xbf16>
    %c1408 = arith.constant 1408 : index
    %c0_374 = arith.constant 0 : index
    %374 = vector.load %arg18[%c1408, %c0_374] : memref<1536x256xbf16, #tpu.memory_space<vmem>>, vector<32x256xbf16>
    %375 = tpu.concatenate %369, %370, %371, %372, %373, %374 in 0 : vector<32x256xbf16>, vector<32x256xbf16>, vector<32x256xbf16>, vector<32x256xbf16>, vector<32x256xbf16>, vector<32x256xbf16> -> vector<192x256xbf16>
    %cst_375 = arith.constant dense<0.000000e+00> : vector<64x256xf32>
    %376 = tpu.matmul %315, %375, %cst_375 {dimension_numbers = #tpu.dot_dimension_numbers<[1], [0], [0], [1], [0, 0, 1, 1], [], []>} : vector<64x192xbf16>, vector<192x256xbf16>, vector<64x256xf32> -> vector<64x256xf32>
    %377 = vector.broadcast %316 : vector<1x256xf32> to vector<64x256xf32>
    %378 = arith.addf %376, %377 : vector<64x256xf32>
    %c4_376 = arith.constant 4 : index
    %c0_377 = arith.constant 0 : index
    %c0_378 = arith.constant 0 : index
    %379 = vector.load %arg12[%c4_376, %c0_377, %c0_378] : memref<8x64x256xf32, #tpu.memory_space<vmem>>, vector<1x64x256xf32>
    %380 = vector.shape_cast %379 : vector<1x64x256xf32> to vector<64x256xf32>
    %381 = vector.shape_cast %378 : vector<64x256xf32> to vector<1x64x256xf32>
    tpu.vector_store %arg12[%c4_376, %c0_377, %c0_378], %381 {strides = array<i32>} : memref<8x64x256xf32, #tpu.memory_space<vmem>>, vector<1x64x256xf32>,
    %c160_379 = arith.constant 160 : index
    %c0_380 = arith.constant 0 : index
    %382 = vector.load %arg18[%c160_379, %c0_380] : memref<1536x256xbf16, #tpu.memory_space<vmem>>, vector<32x256xbf16>
    %c416_381 = arith.constant 416 : index
    %c0_382 = arith.constant 0 : index
    %383 = vector.load %arg18[%c416_381, %c0_382] : memref<1536x256xbf16, #tpu.memory_space<vmem>>, vector<32x256xbf16>
    %c672_383 = arith.constant 672 : index
    %c0_384 = arith.constant 0 : index
    %384 = vector.load %arg18[%c672_383, %c0_384] : memref<1536x256xbf16, #tpu.memory_space<vmem>>, vector<32x256xbf16>
    %c928 = arith.constant 928 : index
    %c0_385 = arith.constant 0 : index
    %385 = vector.load %arg18[%c928, %c0_385] : memref<1536x256xbf16, #tpu.memory_space<vmem>>, vector<32x256xbf16>
    %c1184 = arith.constant 1184 : index
    %c0_386 = arith.constant 0 : index
    %386 = vector.load %arg18[%c1184, %c0_386] : memref<1536x256xbf16, #tpu.memory_space<vmem>>, vector<32x256xbf16>
    %c1440 = arith.constant 1440 : index
    %c0_387 = arith.constant 0 : index
    %387 = vector.load %arg18[%c1440, %c0_387] : memref<1536x256xbf16, #tpu.memory_space<vmem>>, vector<32x256xbf16>
    %388 = tpu.concatenate %382, %383, %384, %385, %386, %387 in 0 : vector<32x256xbf16>, vector<32x256xbf16>, vector<32x256xbf16>, vector<32x256xbf16>, vector<32x256xbf16>, vector<32x256xbf16> -> vector<192x256xbf16>
    %cst_388 = arith.constant dense<0.000000e+00> : vector<64x256xf32>
    %389 = tpu.matmul %315, %388, %cst_388 {dimension_numbers = #tpu.dot_dimension_numbers<[1], [0], [0], [1], [0, 0, 1, 1], [], []>} : vector<64x192xbf16>, vector<192x256xbf16>, vector<64x256xf32> -> vector<64x256xf32>
    %390 = vector.broadcast %316 : vector<1x256xf32> to vector<64x256xf32>
    %391 = arith.addf %389, %390 : vector<64x256xf32>
    %c5_389 = arith.constant 5 : index
    %c0_390 = arith.constant 0 : index
    %c0_391 = arith.constant 0 : index
    %392 = vector.load %arg12[%c5_389, %c0_390, %c0_391] : memref<8x64x256xf32, #tpu.memory_space<vmem>>, vector<1x64x256xf32>
    %393 = vector.shape_cast %392 : vector<1x64x256xf32> to vector<64x256xf32>
    %394 = vector.shape_cast %391 : vector<64x256xf32> to vector<1x64x256xf32>
    tpu.vector_store %arg12[%c5_389, %c0_390, %c0_391], %394 {strides = array<i32>} : memref<8x64x256xf32, #tpu.memory_space<vmem>>, vector<1x64x256xf32>,
    %c192_392 = arith.constant 192 : index
    %c0_393 = arith.constant 0 : index
    %395 = vector.load %arg18[%c192_392, %c0_393] : memref<1536x256xbf16, #tpu.memory_space<vmem>>, vector<32x256xbf16>
    %c448_394 = arith.constant 448 : index
    %c0_395 = arith.constant 0 : index
    %396 = vector.load %arg18[%c448_394, %c0_395] : memref<1536x256xbf16, #tpu.memory_space<vmem>>, vector<32x256xbf16>
    %c704_396 = arith.constant 704 : index
    %c0_397 = arith.constant 0 : index
    %397 = vector.load %arg18[%c704_396, %c0_397] : memref<1536x256xbf16, #tpu.memory_space<vmem>>, vector<32x256xbf16>
    %c960 = arith.constant 960 : index
    %c0_398 = arith.constant 0 : index
    %398 = vector.load %arg18[%c960, %c0_398] : memref<1536x256xbf16, #tpu.memory_space<vmem>>, vector<32x256xbf16>
    %c1216 = arith.constant 1216 : index
    %c0_399 = arith.constant 0 : index
    %399 = vector.load %arg18[%c1216, %c0_399] : memref<1536x256xbf16, #tpu.memory_space<vmem>>, vector<32x256xbf16>
    %c1472 = arith.constant 1472 : index
    %c0_400 = arith.constant 0 : index
    %400 = vector.load %arg18[%c1472, %c0_400] : memref<1536x256xbf16, #tpu.memory_space<vmem>>, vector<32x256xbf16>
    %401 = tpu.concatenate %395, %396, %397, %398, %399, %400 in 0 : vector<32x256xbf16>, vector<32x256xbf16>, vector<32x256xbf16>, vector<32x256xbf16>, vector<32x256xbf16>, vector<32x256xbf16> -> vector<192x256xbf16>
    %cst_401 = arith.constant dense<0.000000e+00> : vector<64x256xf32>
    %402 = tpu.matmul %315, %401, %cst_401 {dimension_numbers = #tpu.dot_dimension_numbers<[1], [0], [0], [1], [0, 0, 1, 1], [], []>} : vector<64x192xbf16>, vector<192x256xbf16>, vector<64x256xf32> -> vector<64x256xf32>
    %403 = vector.broadcast %316 : vector<1x256xf32> to vector<64x256xf32>
    %404 = arith.addf %402, %403 : vector<64x256xf32>
    %c6 = arith.constant 6 : index
    %c0_402 = arith.constant 0 : index
    %c0_403 = arith.constant 0 : index
    %405 = vector.load %arg12[%c6, %c0_402, %c0_403] : memref<8x64x256xf32, #tpu.memory_space<vmem>>, vector<1x64x256xf32>
    %406 = vector.shape_cast %405 : vector<1x64x256xf32> to vector<64x256xf32>
    %407 = vector.shape_cast %404 : vector<64x256xf32> to vector<1x64x256xf32>
    tpu.vector_store %arg12[%c6, %c0_402, %c0_403], %407 {strides = array<i32>} : memref<8x64x256xf32, #tpu.memory_space<vmem>>, vector<1x64x256xf32>,
    %c224_404 = arith.constant 224 : index
    %c0_405 = arith.constant 0 : index
    %408 = vector.load %arg18[%c224_404, %c0_405] : memref<1536x256xbf16, #tpu.memory_space<vmem>>, vector<32x256xbf16>
    %c480_406 = arith.constant 480 : index
    %c0_407 = arith.constant 0 : index
    %409 = vector.load %arg18[%c480_406, %c0_407] : memref<1536x256xbf16, #tpu.memory_space<vmem>>, vector<32x256xbf16>
    %c736_408 = arith.constant 736 : index
    %c0_409 = arith.constant 0 : index
    %410 = vector.load %arg18[%c736_408, %c0_409] : memref<1536x256xbf16, #tpu.memory_space<vmem>>, vector<32x256xbf16>
    %c992 = arith.constant 992 : index
    %c0_410 = arith.constant 0 : index
    %411 = vector.load %arg18[%c992, %c0_410] : memref<1536x256xbf16, #tpu.memory_space<vmem>>, vector<32x256xbf16>
    %c1248 = arith.constant 1248 : index
    %c0_411 = arith.constant 0 : index
    %412 = vector.load %arg18[%c1248, %c0_411] : memref<1536x256xbf16, #tpu.memory_space<vmem>>, vector<32x256xbf16>
    %c1504 = arith.constant 1504 : index
    %c0_412 = arith.constant 0 : index
    %413 = vector.load %arg18[%c1504, %c0_412] : memref<1536x256xbf16, #tpu.memory_space<vmem>>, vector<32x256xbf16>
    %414 = tpu.concatenate %408, %409, %410, %411, %412, %413 in 0 : vector<32x256xbf16>, vector<32x256xbf16>, vector<32x256xbf16>, vector<32x256xbf16>, vector<32x256xbf16>, vector<32x256xbf16> -> vector<192x256xbf16>
    %cst_413 = arith.constant dense<0.000000e+00> : vector<64x256xf32>
    %415 = tpu.matmul %315, %414, %cst_413 {dimension_numbers = #tpu.dot_dimension_numbers<[1], [0], [0], [1], [0, 0, 1, 1], [], []>} : vector<64x192xbf16>, vector<192x256xbf16>, vector<64x256xf32> -> vector<64x256xf32>
    %416 = vector.broadcast %316 : vector<1x256xf32> to vector<64x256xf32>
    %417 = arith.addf %415, %416 : vector<64x256xf32>
    %c7 = arith.constant 7 : index
    %c0_414 = arith.constant 0 : index
    %c0_415 = arith.constant 0 : index
    %418 = vector.load %arg12[%c7, %c0_414, %c0_415] : memref<8x64x256xf32, #tpu.memory_space<vmem>>, vector<1x64x256xf32>
    %419 = vector.shape_cast %418 : vector<1x64x256xf32> to vector<64x256xf32>
    %420 = vector.shape_cast %417 : vector<64x256xf32> to vector<1x64x256xf32>
    tpu.vector_store %arg12[%c7, %c0_414, %c0_415], %420 {strides = array<i32>} : memref<8x64x256xf32, #tpu.memory_space<vmem>>, vector<1x64x256xf32>,
    return
  }
  func.func @transform_0(%arg0: i32) -> (i32, i32) {
    %c0_i32 = arith.constant 0 : i32
    %c0_i32_0 = arith.constant 0 : i32
    return %arg0, %c0_i32 : i32, i32
  }
  func.func @transform_1(%arg0: i32) -> (i32, i32) {
    %c0_i32 = arith.constant 0 : i32
    %c0_i32_0 = arith.constant 0 : i32
    %c0_i32_1 = arith.constant 0 : i32
    return %c0_i32, %c0_i32_0 : i32, i32
  }
  func.func @transform_2(%arg0: i32) -> (i32, i32, i32) {
    %c0_i32 = arith.constant 0 : i32
    %c0_i32_0 = arith.constant 0 : i32
    %c0_i32_1 = arith.constant 0 : i32
    %c0_i32_2 = arith.constant 0 : i32
    return %c0_i32, %c0_i32_0, %c0_i32_1 : i32, i32, i32
  }
  func.func @transform_3(%arg0: i32) -> (i32, i32) {
    %c0_i32 = arith.constant 0 : i32
    %c0_i32_0 = arith.constant 0 : i32
    %c0_i32_1 = arith.constant 0 : i32
    return %c0_i32, %c0_i32_0 : i32, i32
  }
  func.func @transform_4(%arg0: i32) -> (i32, i32) {
    %c0_i32 = arith.constant 0 : i32
    %c0_i32_0 = arith.constant 0 : i32
    %c0_i32_1 = arith.constant 0 : i32
    return %c0_i32, %c0_i32_0 : i32, i32
  }
  func.func @transform_5(%arg0: i32) -> (i32, i32, i32) {
    %c0_i32 = arith.constant 0 : i32
    %c0_i32_0 = arith.constant 0 : i32
    %c0_i32_1 = arith.constant 0 : i32
    %c0_i32_2 = arith.constant 0 : i32
    return %c0_i32, %c0_i32_0, %c0_i32_1 : i32, i32, i32
  }
  func.func @transform_6(%arg0: i32) -> (i32, i32) {
    %c0_i32 = arith.constant 0 : i32
    %c0_i32_0 = arith.constant 0 : i32
    %c0_i32_1 = arith.constant 0 : i32
    return %c0_i32, %c0_i32_0 : i32, i32
  }
  func.func @transform_7(%arg0: i32) -> (i32, i32) {
    %c0_i32 = arith.constant 0 : i32
    %c0_i32_0 = arith.constant 0 : i32
    %c0_i32_1 = arith.constant 0 : i32
    return %c0_i32, %c0_i32_0 : i32, i32
  }
  func.func @transform_8(%arg0: i32) -> (i32, i32, i32) {
    %c0_i32 = arith.constant 0 : i32
    %c0_i32_0 = arith.constant 0 : i32
    %c0_i32_1 = arith.constant 0 : i32
    %c0_i32_2 = arith.constant 0 : i32
    return %c0_i32, %c0_i32_0, %c0_i32_1 : i32, i32, i32
  }
  func.func @transform_9(%arg0: i32) -> (i32, i32) {
    %c0_i32 = arith.constant 0 : i32
    %c0_i32_0 = arith.constant 0 : i32
    %c0_i32_1 = arith.constant 0 : i32
    return %c0_i32, %c0_i32_0 : i32, i32
  }
  func.func @transform_10(%arg0: i32) -> (i32, i32) {
    %c0_i32 = arith.constant 0 : i32
    %c0_i32_0 = arith.constant 0 : i32
    %c0_i32_1 = arith.constant 0 : i32
    return %c0_i32, %c0_i32_0 : i32, i32
  }
  func.func @transform_11(%arg0: i32) -> (i32, i32, i32) {
    %c0_i32 = arith.constant 0 : i32
    %c0_i32_0 = arith.constant 0 : i32
    %c0_i32_1 = arith.constant 0 : i32
    return %arg0, %c0_i32, %c0_i32_0 : i32, i32, i32
  }
}

</mosaic_0001>

<bundles_post_ra>
// kernel: conv_decoder_forward.1
= control target key start
LH: loop header
LB: loop body
LE: loop exit
PB: predicated region body
PF: predicated region fallthrough
CT: control target
= control target key end

     0   :  { %s15643_s0 = inlined_call_operand.vmem [shape: bf16[256,256], index: 0, kind: input, shape index: {}]   ;;  %s15644_s1 = inlined_call_operand.hbm [shape: bf16[256,256], index: 1, kind: input, shape index: {}]   ;;  %s15645_s2 = inlined_call_operand.hbm [shape: bf16[5,256,256], index: 2, kind: input, shape index: {}]   ;;  %s15646_s3 = inlined_call_operand.hbm [shape: bf16[16,80], index: 3, kind: input, shape index: {}]   ;;  %s15647_s4 = inlined_call_operand.hbm [shape: f32[1,256], index: 4, kind: input, shape index: {}]   ;;  %s15648_s5 = inlined_call_operand.hbm [shape: bf16[6,256,256], index: 5, kind: input, shape index: {}]   ;;  %s15649_s6 = inlined_call_operand.hbm [shape: bf16[32,96], index: 6, kind: input, shape index: {}]   ;;  %s15650_s7 = inlined_call_operand.hbm [shape: f32[1,256], index: 7, kind: input, shape index: {}]   ;;  %s15651_s8 = inlined_call_operand.hbm [shape: bf16[6,256,256], index: 8, kind: input, shape index: {}]   ;;  %s15652_s9 = inlined_call_operand.hbm [shape: bf16[64,192], index: 9, kind: input, shape index: {}]   ;;  %s15653_s10 = inlined_call_operand.hbm [shape: f32[1,256], index: 10, kind: input, shape index: {}]   ;;  %s15654_s11 = inlined_call_operand.vmem [shape: f32[16,64,256], index: 11, kind: output, shape index: {}]  }
   0x1   :  { %15932 = sst [smem:[#allocation185_spill]] %s15644_s1 }
   0x2   :  { %15933 = sst [smem:[#allocation186_spill]] %s15645_s2 }
   0x3   :  { %16 = vsyncpa [#allocation9], 0 }
   0x4   :  { %17 = vsyncpa [#allocation11], 0 }
   0x5   :  { %18 = vsyncpa [#allocation14], 0 }
   0x6   :  { %19 = vsyncpa [#allocation17], 0 }
   0x7   :  { %20 = vsyncpa [#allocation20], 0 }
   0x8   :  { %21 = vsyncpa [#allocation23], 0  ;;  %s12019_s17 = smov 0  }
   0x9 LB: > { %s12025_s18 = sadd.s32 4294967295, %s11942_s17   ;;  %p9810_p0 = scmp.ge.s32.totalorder %s11942_s17, 1  ;;  %s11942_s17 = sphi %s12019_s17, %s27_s17  }
   0xa   : > { %p294_p1 = scmp.lt.s32.totalorder %s11942_s17, 3  ;;  %p15657_p2 = scmp.eq.s32.totalorder %s12025_s18, 0 }
   0xb   : > { %s11944_s20 = smov [#allocation10]   ;;  %s11945_s22 = smov [#allocation13]  }
   0xc   : > { %p12030_p3 = pnand %p9810_p0, %p294_p1  ;;  %s319_s21 = sshll.u32 %s11944_s20, 4  ;;  %s12034_s21 = int_to_ptr.vmem [resolvable:$true] %s319_s21 }
   0xd   : > { %s346_s23 = sshll.u32 %s11945_s22, 4  ;;  %s11946_s25 = smov [#allocation16]   ;;  %s12038_s23 = int_to_ptr.vmem [resolvable:$true] %s346_s23 }
   0xe   : > { %s15934_s19 = scalar_select %p12030_p3, 1, 0 }
   0xf   : > { %p10654_p4 = pneg %p12030_p3  ;;  %s12046_s26 = sshll.u32 %s11946_s25, 4  ;;  %s370_s26 = int_to_ptr.vmem [resolvable:$true] %s12046_s26 }
  0x10   : > { %s15936_s2 = sld [smem:[#allocation186_spill]] }
  0x11   : > { %p12042_p5 = pnand %p15657_p2, %p10654_p4 }
  0x13   : > { %p12056_p7 = pneg %p12042_p5 }
  0x16   : > { %s11632_s29 = scalar_lea.hbm %s15936_s2, 20480 }
  0x17   : > { %p11633_p6 = scmp.ne.s32.totalorder %s15936_s2, %s11632_s29  ;;  %p11639_p10 = scmp.lt.u32.totalorder %s11632_s29, %s15936_s2 }
  0x19   : > { %p11635_p8 = pnand %p12056_p7, %p11633_p6 }
  0x1b   : > { %p11636_p9 = pneg %p11635_p8 }
  0x1d   : > { %p11641_p11 = pnand %p11639_p10, %p11636_p9 }
  0x1f   : > { %11644 = shalt.err (!%p11641_p11)
}
  0x20   : > { %s11645_s16 = scalar_lea.vmem %s12034_s21, 20480  ;;  %p11653_p1 = scmp.lt.s32.totalorder %s12034_s21, %s12034_s21 }
  0x21   : > { %p11646_p12 = scmp.ne.s32.totalorder %s12034_s21, %s11645_s16  ;;  %p11654_p4 = scmp.lt.s32.totalorder %s11645_s16, %s11645_s16 }
  0x23   : > { %p11648_p13 = pnand %p11646_p12, %p12056_p7  ;;  %p11655_p6 = por %p11654_p4, %p11653_p1 }
  0x25   : > { %p11649_p0 = pneg %p11648_p13 }
  0x27   : > { %p11656_p8 = pnand %p11655_p6, %p11649_p0 }
  0x29   : > { %11659 = shalt.err (!%p11656_p8)
}
  0x2a   : > { %s15655_s20 = smov 128   ;;  %s15661_s22 = smov 8  }
  0x2b   : > { %10660 = dma.hbm_to_vmem [thread:$0]  (!%p12042_p5), %s15936_s2, 20480, %s12034_s21, [#allocation11], %s15655_s20, %s15655_s20, %s15661_s22  }
  0x2c   : > { %s11660_s30 = scalar_lea.hbm %s15647_s4, 32 }
  0x2d   : > { %p11661_p9 = scmp.ne.s32.totalorder %s15647_s4, %s11660_s30  ;;  %p11667_p12 = scmp.lt.u32.totalorder %s11660_s30, %s15647_s4 }
  0x2f   : > { %p11663_p10 = pnand %p11661_p9, %p12056_p7 }
  0x31   : > { %p11664_p11 = pneg %p11663_p10 }
  0x33   : > { %p11669_p13 = pnand %p11667_p12, %p11664_p11 }
  0x35   : > { %11672 = shalt.err (!%p11669_p13)
}
  0x36   : > { %s11673_s21 = scalar_lea.vmem %s12038_s23, 32  ;;  %p11681_p6 = scmp.lt.s32.totalorder %s12038_s23, %s12038_s23 }
  0x37   : > { %p11674_p0 = scmp.ne.s32.totalorder %s12038_s23, %s11673_s21  ;;  %p11682_p8 = scmp.lt.s32.totalorder %s11673_s21, %s11673_s21 }
  0x39   : > { %p11676_p1 = pnand %p11674_p0, %p12056_p7  ;;  %p11683_p9 = por %p11682_p8, %p11681_p6 }
  0x3b   : > { %p11677_p4 = pneg %p11676_p1 }
  0x3d   : > { %p11684_p10 = pnand %p11683_p9, %p11677_p4 }
  0x3f   : > { %11687 = shalt.err (!%p11684_p10)
}
  0x40   : > { %10666 = dma.hbm_to_vmem [thread:$0]  (!%p12042_p5), %s15647_s4, 32, %s12038_s23, [#allocation14]  }
  0x41   : > { %s11949_s28 = smov [#allocation19]   ;;  %s11688_s14 = scalar_lea.hbm %s15649_s6, 256 }
  0x42   : > { %s393_s29 = sshll.u32 %s11949_s28, 4  ;;  %p11689_p11 = scmp.ne.s32.totalorder %s15649_s6, %s11688_s14  ;;  %s394_s29 = int_to_ptr.vmem [resolvable:$true] %s393_s29 }
  0x43   : > { %p11695_p0 = scmp.lt.u32.totalorder %s11688_s14, %s15649_s6 }
  0x44   : > { %p11691_p12 = pnand %p11689_p11, %p12056_p7 }
  0x46   : > { %p11692_p13 = pneg %p11691_p12 }
  0x48   : > { %p11697_p1 = pnand %p11695_p0, %p11692_p13 }
  0x4a   : > { %11700 = shalt.err (!%p11697_p1)
}
  0x4b   : > { %s11701_s23 = scalar_lea.vmem %s370_s26, 256  ;;  %p11709_p9 = scmp.lt.s32.totalorder %s370_s26, %s370_s26 }
  0x4c   : > { %p11702_p4 = scmp.ne.s32.totalorder %s370_s26, %s11701_s23  ;;  %p11710_p10 = scmp.lt.s32.totalorder %s11701_s23, %s11701_s23 }
  0x4e   : > { %p11704_p6 = pnand %p11702_p4, %p12056_p7  ;;  %p11711_p2 = por %p11710_p10, %p11709_p9 }
  0x50   : > { %p11705_p8 = pneg %p11704_p6 }
  0x52   : > { %p11712_p3 = pnand %p11711_p2, %p11705_p8 }
  0x54   : > { %11715 = shalt.err (!%p11712_p3)
}
  0x55   : > { %s15659_s25 = smov 64   ;;  %s15660_s27 = smov 4  }
  0x56   : > { %10672 = dma.hbm_to_vmem [thread:$0]  (!%p12042_p5), %s15649_s6, 256, %s370_s26, [#allocation17], %s15659_s25, %s15659_s25, %s15660_s27  }
  0x57   : > { %s11716_s14 = scalar_lea.hbm %s15651_s8, 24576 }
  0x58   : > { %p11717_p2 = scmp.ne.s32.totalorder %s15651_s8, %s11716_s14  ;;  %p11723_p12 = scmp.lt.u32.totalorder %s11716_s14, %s15651_s8 }
  0x5a   : > { %p11719_p3 = pnand %p11717_p2, %p12056_p7 }
  0x5c   : > { %p11720_p11 = pneg %p11719_p3 }
  0x5e   : > { %p11725_p13 = pnand %p11723_p12, %p11720_p11 }
  0x60   : > { %11728 = shalt.err (!%p11725_p13)
}
  0x61   : > { %s11729_s20 = scalar_lea.vmem %s394_s29, 24576  ;;  %p11737_p6 = scmp.lt.s32.totalorder %s394_s29, %s394_s29 }
  0x62   : > { %p11730_p0 = scmp.ne.s32.totalorder %s394_s29, %s11729_s20  ;;  %p11738_p8 = scmp.lt.s32.totalorder %s11729_s20, %s11729_s20 }
  0x64   : > { %p11732_p1 = pnand %p11730_p0, %p12056_p7  ;;  %p11739_p9 = por %p11738_p8, %p11737_p6 }
  0x66   : > { %p11733_p4 = pneg %p11732_p1 }
  0x68   : > { %p11740_p10 = pnand %p11739_p9, %p11733_p4 }
  0x6a   : > { %11743 = shalt.err (!%p11740_p10)
}
  0x6b   : > { %s15938_s26 = smov 128   ;;  %s11952_s12 = smov [#allocation8]  }
  0x6c   : > { %10678 = dma.hbm_to_vmem [thread:$0]  (!%p12042_p5), %s15651_s8, 24576, %s394_s29, [#allocation20], %s15938_s26, %s15938_s26, %s15661_s22  }
  0x6d   : > { %s306_s14 = sshll.u32 %s11952_s12, 4  ;;  %s11953_s15 = smov [#allocation12]   ;;  %s307_s14 = int_to_ptr.vmem [resolvable:$true] %s306_s14 }
  0x6e   : > { %s332_s16 = sshll.u32 %s11953_s15, 4  ;;  %s15939_s1 = sld [smem:[#allocation185_spill]]  ;;  %s333_s16 = int_to_ptr.vmem [resolvable:$true] %s332_s16 }
  0x74   : > { %s11744_s20 = scalar_lea.hbm %s15939_s1, 4096 }
  0x75   : > { %p11745_p2 = scmp.ne.s32.totalorder %s15939_s1, %s11744_s20  ;;  %p11751_p12 = scmp.lt.u32.totalorder %s11744_s20, %s15939_s1 }
  0x77   : > { %p11747_p3 = pnand %p11745_p2, %p12056_p7 }
  0x79   : > { %p11748_p11 = pneg %p11747_p3 }
  0x7b   : > { %p11753_p13 = pnand %p11751_p12, %p11748_p11 }
  0x7d   : > { %11756 = shalt.err (!%p11753_p13)
}
  0x7e   : > { %s11757_s29 = scalar_lea.vmem %s307_s14, 4096  ;;  %p11765_p6 = scmp.lt.s32.totalorder %s307_s14, %s307_s14 }
  0x7f   : > { %p11758_p0 = scmp.ne.s32.totalorder %s307_s14, %s11757_s29  ;;  %p11766_p8 = scmp.lt.s32.totalorder %s11757_s29, %s11757_s29 }
  0x81   : > { %p11760_p1 = pnand %p11758_p0, %p12056_p7  ;;  %p11767_p9 = por %p11766_p8, %p11765_p6 }
  0x83   : > { %p11761_p4 = pneg %p11760_p1 }
  0x85   : > { %p11768_p10 = pnand %p11767_p9, %p11761_p4 }
  0x87   : > { %11771 = shalt.err (!%p11768_p10)
}
  0x88   : > { %10657 = dma.hbm_to_vmem [thread:$0]  (!%p12042_p5), %s15939_s1, 4096, %s307_s14, [#allocation9], %s15938_s26, %s15938_s26, %s15661_s22  }
  0x89   : > { %s11772_s12 = scalar_lea.hbm %s15646_s3, 128 }
  0x8a   : > { %p11773_p2 = scmp.ne.s32.totalorder %s15646_s3, %s11772_s12  ;;  %p11779_p12 = scmp.lt.u32.totalorder %s11772_s12, %s15646_s3 }
  0x8c   : > { %p11775_p3 = pnand %p11773_p2, %p12056_p7 }
  0x8e   : > { %p11776_p11 = pneg %p11775_p3 }
  0x90   : > { %p11781_p13 = pnand %p11779_p12, %p11776_p11 }
  0x92   : > { %11784 = shalt.err (!%p11781_p13)
}
  0x93   : > { %s11785_s28 = scalar_lea.vmem %s333_s16, 128  ;;  %p11793_p6 = scmp.lt.s32.totalorder %s333_s16, %s333_s16 }
  0x94   : > { %p11786_p0 = scmp.ne.s32.totalorder %s333_s16, %s11785_s28  ;;  %p11794_p8 = scmp.lt.s32.totalorder %s11785_s28, %s11785_s28 }
  0x96   : > { %p11788_p1 = pnand %p11786_p0, %p12056_p7  ;;  %p11795_p9 = por %p11794_p8, %p11793_p6 }
  0x98   : > { %p11789_p4 = pneg %p11788_p1 }
  0x9a   : > { %p11796_p10 = pnand %p11795_p9, %p11789_p4 }
  0x9c   : > { %11799 = shalt.err (!%p11796_p10)
}
  0x9d   : > { %s15940_s14 = smov 4   ;;  %s15941_s29 = smov 64  }
  0x9e   : > { %10663 = dma.hbm_to_vmem [thread:$0]  (!%p12042_p5), %s15646_s3, 128, %s333_s16, [#allocation11], %s15941_s29, %s15941_s29, %s15940_s14  }
  0x9f   : > { %s11954_s27 = smov [#allocation15]   ;;  %s11955_s12 = smov [#allocation18]  }
  0xa0   : > { %s356_s30 = sshll.u32 %s11954_s27, 4  ;;  %s383_s15 = sshll.u32 %s11955_s12, 4  ;;  %s357_s30 = int_to_ptr.vmem [resolvable:$true] %s356_s30  ;;  %s384_s15 = int_to_ptr.vmem [resolvable:$true] %s383_s15 }
  0xa1   : > { %s11800_s20 = scalar_lea.hbm %s15648_s5, 24576 }
  0xa2   : > { %p11801_p2 = scmp.ne.s32.totalorder %s15648_s5, %s11800_s20  ;;  %p11807_p12 = scmp.lt.u32.totalorder %s11800_s20, %s15648_s5 }
  0xa4   : > { %p11803_p3 = pnand %p11801_p2, %p12056_p7 }
  0xa6   : > { %p11804_p11 = pneg %p11803_p3 }
  0xa8   : > { %p11809_p13 = pnand %p11807_p12, %p11804_p11 }
  0xaa   : > { %11812 = shalt.err (!%p11809_p13)
}
  0xab   : > { %s11813_s16 = scalar_lea.vmem %s357_s30, 24576  ;;  %p11821_p6 = scmp.lt.s32.totalorder %s357_s30, %s357_s30 }
  0xac   : > { %p11814_p0 = scmp.ne.s32.totalorder %s357_s30, %s11813_s16  ;;  %p11822_p8 = scmp.lt.s32.totalorder %s11813_s16, %s11813_s16 }
  0xae   : > { %p11816_p1 = pnand %p11814_p0, %p12056_p7  ;;  %p11823_p9 = por %p11822_p8, %p11821_p6 }
  0xb0   : > { %p11817_p4 = pneg %p11816_p1 }
  0xb2   : > { %p11824_p10 = pnand %p11823_p9, %p11817_p4 }
  0xb4   : > { %11827 = shalt.err (!%p11824_p10)
}
  0xb5   : > { %s15942_s22 = smov 8   ;;  %s11828_s27 = scalar_lea.hbm %s15650_s7, 32 }
  0xb6   : > { %10669 = dma.hbm_to_vmem [thread:$0]  (!%p12042_p5), %s15648_s5, 24576, %s357_s30, [#allocation14], %s15938_s26, %s15938_s26, %s15942_s22  }
  0xb7   : > { %p11829_p2 = scmp.ne.s32.totalorder %s15650_s7, %s11828_s27  ;;  %p11835_p12 = scmp.lt.u32.totalorder %s11828_s27, %s15650_s7 }
  0xb9   : > { %p11831_p3 = pnand %p11829_p2, %p12056_p7 }
  0xbb   : > { %p11832_p11 = pneg %p11831_p3 }
  0xbd   : > { %p11837_p13 = pnand %p11835_p12, %p11832_p11 }
  0xbf   : > { %11840 = shalt.err (!%p11837_p13)
}
  0xc0   : > { %s11841_s28 = scalar_lea.vmem %s384_s15, 32  ;;  %p11849_p6 = scmp.lt.s32.totalorder %s384_s15, %s384_s15 }
  0xc1   : > { %p11842_p0 = scmp.ne.s32.totalorder %s384_s15, %s11841_s28  ;;  %p11850_p8 = scmp.lt.s32.totalorder %s11841_s28, %s11841_s28 }
  0xc3   : > { %p11844_p1 = pnand %p11842_p0, %p12056_p7  ;;  %p11851_p9 = por %p11850_p8, %p11849_p6 }
  0xc5   : > { %p11845_p4 = pneg %p11844_p1 }
  0xc7   : > { %p11852_p10 = pnand %p11851_p9, %p11845_p4 }
  0xc9   : > { %11855 = shalt.err (!%p11852_p10)
}
  0xca   : > { %10675 = dma.hbm_to_vmem [thread:$0]  (!%p12042_p5), %s15650_s7, 32, %s384_s15, [#allocation17]  }
  0xcb   : > { %s11956_s16 = smov [#allocation21]   ;;  %s11957_s14 = smov [#allocation22]  }
  0xcc   : > { %s406_s1 = sshll.u32 %s11956_s16, 4  ;;  %s420_s29 = sshll.u32 %s11957_s14, 4  ;;  %s407_s1 = int_to_ptr.vmem [resolvable:$true] %s406_s1  ;;  %s421_s29 = int_to_ptr.vmem [resolvable:$true] %s420_s29 }
  0xcd   : > { %s11856_s12 = scalar_lea.hbm %s15652_s9, 1024 }
  0xce   : > { %p11857_p2 = scmp.ne.s32.totalorder %s15652_s9, %s11856_s12  ;;  %p11863_p12 = scmp.lt.u32.totalorder %s11856_s12, %s15652_s9 }
  0xd0   : > { %p11859_p3 = pnand %p11857_p2, %p12056_p7 }
  0xd2   : > { %p11860_p11 = pneg %p11859_p3 }
  0xd4   : > { %p11865_p13 = pnand %p11863_p12, %p11860_p11 }
  0xd6   : > { %11868 = shalt.err (!%p11865_p13)
}
  0xd7   : > { %s11869_s15 = scalar_lea.vmem %s407_s1, 1024  ;;  %p11877_p6 = scmp.lt.s32.totalorder %s407_s1, %s407_s1 }
  0xd8   : > { %p11870_p0 = scmp.ne.s32.totalorder %s407_s1, %s11869_s15  ;;  %p11878_p8 = scmp.lt.s32.totalorder %s11869_s15, %s11869_s15 }
  0xda   : > { %p11872_p1 = pnand %p11870_p0, %p12056_p7  ;;  %p11879_p9 = por %p11878_p8, %p11877_p6 }
  0xdc   : > { %p11873_p4 = pneg %p11872_p1 }
  0xde   : > { %p11880_p10 = pnand %p11879_p9, %p11873_p4 }
  0xe0   : > { %11883 = shalt.err (!%p11880_p10)
}
  0xe1   : > { %10681 = dma.hbm_to_vmem [thread:$0]  (!%p12042_p5), %s15652_s9, 1024, %s407_s1, [#allocation20], %s15938_s26, %s15938_s26, %s15942_s22  }
  0xe2   : > { %s11884_s25 = scalar_lea.hbm %s15653_s10, 32 }
  0xe3   : > { %p11885_p2 = scmp.ne.s32.totalorder %s15653_s10, %s11884_s25  ;;  %p11891_p12 = scmp.lt.u32.totalorder %s11884_s25, %s15653_s10 }
  0xe5   : > { %p11887_p3 = pnand %p11885_p2, %p12056_p7 }
  0xe7   : > { %p11888_p11 = pneg %p11887_p3 }
  0xe9   : > { %p11893_p13 = pnand %p11891_p12, %p11888_p11 }
  0xeb   : > { %11896 = shalt.err (!%p11893_p13)
}
  0xec   : > { %s11897_s20 = scalar_lea.vmem %s421_s29, 32  ;;  %p11905_p6 = scmp.lt.s32.totalorder %s421_s29, %s421_s29 }
  0xed   : > { %p11898_p0 = scmp.ne.s32.totalorder %s421_s29, %s11897_s20  ;;  %p11906_p8 = scmp.lt.s32.totalorder %s11897_s20, %s11897_s20 }
  0xef   : > { %p11900_p1 = pnand %p11898_p0, %p12056_p7  ;;  %p11907_p9 = por %p11906_p8, %p11905_p6 }
  0xf1   : > { %p11901_p4 = pneg %p11900_p1 }
  0xf3   : > { %p11908_p10 = pnand %p11907_p9, %p11901_p4 }
  0xf5   : > { %11911 = shalt.err (!%p11908_p10)
}
  0xf6   : > { %10684 = dma.hbm_to_vmem [thread:$0]  (!%p12042_p5), %s15653_s10, 32, %s421_s29, [#allocation23]  }
  0xf7   : > { %p15943_p2 = scmp.ne.s32.totalorder %s15934_s19, 0 }
  0xf9   : > { %443 = sbr.rel (%p15943_p2) target bundleno = 2614 (0xa36), region = 64 }
 0x100   : > { %p15944_p3 = scmp.eq.s32.totalorder %s12025_s18, 0 }
 0x102   : > { %11917 = dma.done.wait (%p15944_p3), [#allocation9], 4096   ;;  %p15945_p7 = pmov %p15944_p3 }
 0x103   : > { %p15946_p11 = pmov %p15944_p3 }
 0x104   : > { %11919 = vsyncadd (%p15945_p7), [#allocation9], 4294963200 }
 0x105   : > { %11921 = dma.done.wait (%p15946_p11), [#allocation11], 20608   ;;  %p15947_p12 = pmov %p15944_p3 }
 0x106   : > { %p15948_p13 = pmov %p15944_p3 }
 0x107   : > { %11923 = vsyncadd (%p15947_p12), [#allocation11], 4294946688 }
 0x108   : > { %11925 = dma.done.wait (%p15948_p13), [#allocation14], 24608   ;;  %p15949_p5 = pmov %p15944_p3 }
 0x109   : > { %p15950_p0 = pmov %p15944_p3 }
 0x10a   : > { %11927 = vsyncadd (%p15949_p5), [#allocation14], 4294942688 }
 0x10b   : > { %11929 = dma.done.wait (%p15950_p0), [#allocation17], 288   ;;  %p15951_p1 = pmov %p15950_p0 }
 0x10c   : > { %p15952_p4 = pmov %p15950_p0 }
 0x10d   : > { %11931 = vsyncadd (%p15951_p1), [#allocation17], 4294967008 }
 0x10e   : > { %11933 = dma.done.wait (%p15952_p4), [#allocation20], 25600   ;;  %p15953_p6 = pmov %p15950_p0 }
 0x10f   : > { %p15954_p8 = pmov %p15950_p0 }
 0x110   : > { %11935 = vsyncadd (%p15953_p6), [#allocation20], 4294941696 }
 0x111   : > { %11937 = dma.done.wait (%p15954_p8), [#allocation23], 32   ;;  %p15955_p9 = pmov %p15950_p0 }
 0x112   : > { %v10728_v0 = vld [vmem:[#allocation8 + $0x4] ss:$8 sps:$4 sm:$0xff]   ;;  %v10730_v1 = vld [vmem:[#allocation8] ss:$8 sps:$4 sm:$0xff]   ;;  %v10731_v2 = vld [vmem:[#allocation8 + $0x14] ss:$8 sps:$4 sm:$0xff]  }
 0x113   : > { %11939 = vsyncadd (%p15955_p9), [#allocation23], 4294967264  ;;  %824 = vmatprep.subr.bf16.mxu0 %v10728_v0  ;;  %v10733_v3 = vld [vmem:[#allocation8 + $0x10] ss:$8 sps:$4 sm:$0xff]   ;;  %v10734_v4 = vld [vmem:[#allocation8 + $0x24] ss:$8 sps:$4 sm:$0xff]  }
 0x114   : > { %825 = vmatpush1.bf16.msra.mxu0 %v10730_v1  ;;  %s9833_s19 = sshll.u32 %s12025_s18, 4  ;;  %v10736_v5 = vld [vmem:[#allocation8 + $0x20] ss:$8 sps:$4 sm:$0xff]   ;;  %v10737_v6 = vld [vmem:[#allocation8 + $0x34] ss:$8 sps:$4 sm:$0xff]   ;;  %vm2735_vm0 = vcmask 654336  }
 0x115   : > { %826 = vmatprep.subr.bf16.mxu0 %v10731_v2  ;;  %p522_p10 = scmp.lt.s32.totalorder %s9833_s19, 31  ;;  %v10739_v7 = vld [vmem:[#allocation8 + $0x30] ss:$8 sps:$4 sm:$0xff]   ;;  %v10740_v8 = vld [vmem:[#allocation8 + $0x44] ss:$8 sps:$4 sm:$0xff]   ;;  %vm5298_vm1 = vcmask 785408  }
 0x116   : > { %v10742_v9 = vld [vmem:[#allocation8 + $0x40] ss:$8 sps:$4 sm:$0xff]   ;;  %v10743_v10 = vld [vmem:[#allocation8 + $0x54] ss:$8 sps:$4 sm:$0xff]   ;;  %v10745_v11 = vld [vmem:[#allocation8 + $0x50] ss:$8 sps:$4 sm:$0xff]  }
 0x117   : > { %s16708_s19 = smov (!%p522_p10, %s9833_s19), 31  ;;  %v10746_v12 = vld [vmem:[#allocation8 + $0x64] ss:$8 sps:$4 sm:$0xff]   ;;  %v10748_v14 = vld [vmem:[#allocation8 + $0x60] ss:$8 sps:$4 sm:$0xff]   ;;  %vm8752_vm2 = vcmask 523264  }
 0x118   : > { %827 = vmatpush1.bf16.msra.mxu0 %v10733_v3  ;;  %s10612_s24 = sshll.u32 %s16708_s19, 3  ;;  %v10749_v15 = vld [vmem:[#allocation8 + $0x74] ss:$8 sps:$4 sm:$0xff]   ;;  %v10751_v16 = vld [vmem:[#allocation8 + $0x70] ss:$8 sps:$4 sm:$0xff]   ;;  %s9836_s28 = sshll.u32 %s12025_s18, 3 }
 0x119   : > { %828 = vmatprep.subr.bf16.mxu0 %v10734_v4  ;;  %s12296_s29 = scalar_lea.vmem %s15643_s0, %s10612_s24  ;;  %v10752_v17 = vld [vmem:[#allocation8 + $0x84] ss:$8 sps:$4 sm:$0xff]   ;;  %v10754_v18 = vld [vmem:[#allocation8 + $0x80] ss:$8 sps:$4 sm:$0xff]   ;;  %v10755_v19 = vld [vmem:[#allocation8 + $0x94] ss:$8 sps:$4 sm:$0xff]  }
 0x11a   : > { %v10778_v13 = vld [vmem:[%s12296_s29 + $0x4] ss:$8 sps:$4 sm:$0xff]   ;;  %v10757_v21 = vld [vmem:[#allocation8 + $0x90] ss:$8 sps:$4 sm:$0xff]   ;;  %v10805_v22 = vld [vmem:[#allocation10] ss:$8 sps:$4 sm:$0xff]  }
 0x11b   : > { %856 = vmatprep.mubr.bf16.mxu0 %v10778_v13  ;;  %v10800_v20 = vld [vmem:[#allocation10 + $0x4] ss:$8 sps:$4 sm:$0xff]   ;;  %v10806_v23 = vld [vmem:[#allocation10 + $0x14] ss:$8 sps:$4 sm:$0xff]   ;;  %v10811_v25 = vld [vmem:[#allocation10 + $0x10] ss:$8 sps:$4 sm:$0xff]  }
 0x11c   : > { %829 = vmatpush1.bf16.msra.mxu0 %v10736_v5  ;;  %1209 = vmatprep.subr.bf16.mxu1 %v10800_v20  ;;  %v10758_v24 = vld [vmem:[#allocation8 + $0xa4] ss:$8 sps:$4 sm:$0xff]   ;;  %v10760_v27 = vld [vmem:[#allocation8 + $0xa0] ss:$8 sps:$4 sm:$0xff]   ;;  %v10761_v28 = vld [vmem:[#allocation8 + $0xb4] ss:$8 sps:$4 sm:$0xff]  }
 0x11d   : > { %830 = vmatprep.subr.bf16.mxu0 %v10737_v6  ;;  %1210 = vmatpush1.bf16.msra.mxu1 %v10805_v22  ;;  %v10812_v26 = vld [vmem:[#allocation10 + $0x24] ss:$8 sps:$4 sm:$0xff]   ;;  %v10817_v29 = vld [vmem:[#allocation10 + $0x20] ss:$8 sps:$4 sm:$0xff]   ;;  %v10818_v30 = vld [vmem:[#allocation10 + $0x34] ss:$8 sps:$4 sm:$0xff]  }
 0x11e   : > { %1211 = vmatprep.subr.bf16.mxu1 %v10806_v23  ;;  %v10763_v31 = vld [vmem:[#allocation8 + $0xb0] ss:$8 sps:$4 sm:$0xff]   ;;  %v10764_v32 = vld [vmem:[#allocation8 + $0xc4] ss:$8 sps:$4 sm:$0xff]   ;;  %v10766_v35 = vld [vmem:[#allocation8 + $0xc0] ss:$8 sps:$4 sm:$0xff]  }
 0x11f   : > { %v10823_v33 = vld [vmem:[#allocation10 + $0x30] ss:$8 sps:$4 sm:$0xff]   ;;  %v10824_v34 = vld [vmem:[#allocation10 + $0x44] ss:$8 sps:$4 sm:$0xff]   ;;  %v10767_v36 = vld [vmem:[#allocation8 + $0xd4] ss:$8 sps:$4 sm:$0xff]  }
 0x120   : > { %831 = vmatpush1.bf16.msra.mxu0 %v10739_v7  ;;  %v10829_v37 = vld [vmem:[#allocation10 + $0x40] ss:$8 sps:$4 sm:$0xff]   ;;  %v10830_v38 = vld [vmem:[#allocation10 + $0x54] ss:$8 sps:$4 sm:$0xff]   ;;  %v10769_v39 = vld [vmem:[#allocation8 + $0xd0] ss:$8 sps:$4 sm:$0xff]  }
 0x121   : > { %832 = vmatprep.subr.bf16.mxu0 %v10740_v8  ;;  %1212 = vmatpush1.bf16.msra.mxu1 %v10811_v25  ;;  %v10770_v40 = vld [vmem:[#allocation8 + $0xe4] ss:$8 sps:$4 sm:$0xff]   ;;  %v10835_v41 = vld [vmem:[#allocation10 + $0x50] ss:$8 sps:$4 sm:$0xff]   ;;  %v10772_v43 = vld [vmem:[#allocation8 + $0xe0] ss:$8 sps:$4 sm:$0xff]  }
 0x122   : > { %1213 = vmatprep.subr.bf16.mxu1 %v10812_v26  ;;  %v10836_v42 = vld [vmem:[#allocation10 + $0x64] ss:$8 sps:$4 sm:$0xff]   ;;  %v10773_v44 = vld [vmem:[#allocation8 + $0xf4] ss:$8 sps:$4 sm:$0xff]   ;;  %v10841_v45 = vld [vmem:[#allocation10 + $0x60] ss:$8 sps:$4 sm:$0xff]  }
 0x123   : > { %v10842_v46 = vld [vmem:[#allocation10 + $0x74] ss:$8 sps:$4 sm:$0xff]   ;;  %v10775_v47 = vld [vmem:[#allocation8 + $0xf0] ss:$8 sps:$4 sm:$0xff]   ;;  %v10804_v48 = vld [vmem:[#allocation10 + $0x104] ss:$8 sps:$4 sm:$0xff]  }
 0x124   : > { %833 = vmatpush1.bf16.msra.mxu0 %v10742_v9  ;;  %v10847_v49 = vld [vmem:[#allocation10 + $0x70] ss:$8 sps:$4 sm:$0xff]   ;;  %v10848_v50 = vld [vmem:[#allocation10 + $0x84] ss:$8 sps:$4 sm:$0xff]   ;;  %v10776_v51 = vld [vmem:[%s12296_s29] ss:$8 sps:$4 sm:$0xff]  }
 0x125   : > { %834 = vmatprep.subr.bf16.mxu0 %v10743_v10  ;;  %1214 = vmatpush1.bf16.msra.mxu1 %v10817_v29  ;;  %v10779_v52 = vld [vmem:[%s12296_s29 + $0x14] ss:$8 sps:$4 sm:$0xff]   ;;  %v10802_v53 = vld [vmem:[#allocation10 + $0x100] ss:$8 sps:$4 sm:$0xff]   ;;  %v10808_v57 = vld [vmem:[#allocation10 + $0x110] ss:$8 sps:$4 sm:$0xff]  }
 0x126   : > { %1215 = vmatprep.subr.bf16.mxu1 %v10818_v30  ;;  %v10810_v54 = vld [vmem:[#allocation10 + $0x114] ss:$8 sps:$4 sm:$0xff]   ;;  %v10853_v55 = vld [vmem:[#allocation10 + $0x80] ss:$8 sps:$4 sm:$0xff]   ;;  %v10781_v58 = vld [vmem:[%s12296_s29 + $0x10] ss:$8 sps:$4 sm:$0xff]  }
 0x127   : > { %v10854_v56 = vld [vmem:[#allocation10 + $0x94] ss:$8 sps:$4 sm:$0xff]   ;;  %v10816_v59 = vld [vmem:[#allocation10 + $0x124] ss:$8 sps:$4 sm:$0xff]   ;;  %v10859_v60 = vld [vmem:[#allocation10 + $0x90] ss:$8 sps:$4 sm:$0xff]  }
 0x128   : > { %835 = vmatpush1.bf16.msra.mxu0 %v10745_v11  ;;  %v10782_v61 = vld [vmem:[%s12296_s29 + $0x24] ss:$8 sps:$4 sm:$0xff]   ;;  %v10814_v62 = vld [vmem:[#allocation10 + $0x120] ss:$8 sps:$4 sm:$0xff]   ;;  %v10822_v0 = vld [vmem:[#allocation10 + $0x134] ss:$8 sps:$4 sm:$0xff]  }
 0x129   : > { %836 = vmatprep.subr.bf16.mxu0 %v10746_v12  ;;  %1216 = vmatpush1.bf16.msra.mxu1 %v10823_v33  ;;  %v10860_v63 = vld [vmem:[#allocation10 + $0xa4] ss:$8 sps:$4 sm:$0xff]   ;;  %v10865_v1 = vld [vmem:[#allocation10 + $0xa0] ss:$8 sps:$4 sm:$0xff]   ;;  %v10866_v2 = vld [vmem:[#allocation10 + $0xb4] ss:$8 sps:$4 sm:$0xff]  }
 0x12a   : > { %1217 = vmatprep.subr.bf16.mxu1 %v10824_v34  ;;  %v10820_v3 = vld [vmem:[#allocation10 + $0x130] ss:$8 sps:$4 sm:$0xff]   ;;  %v10828_v4 = vld [vmem:[#allocation10 + $0x144] ss:$8 sps:$4 sm:$0xff]   ;;  %v10784_v7 = vld [vmem:[%s12296_s29 + $0x20] ss:$8 sps:$4 sm:$0xff]  }
 0x12b   : > { %v10871_v5 = vld [vmem:[#allocation10 + $0xb0] ss:$8 sps:$4 sm:$0xff]   ;;  %v10872_v6 = vld [vmem:[#allocation10 + $0xc4] ss:$8 sps:$4 sm:$0xff]   ;;  %v10785_v8 = vld [vmem:[%s12296_s29 + $0x34] ss:$8 sps:$4 sm:$0xff]  }
 0x12c   : > { %837 = vmatpush1.bf16.msra.mxu0 %v10748_v14  ;;  %v10826_v9 = vld [vmem:[#allocation10 + $0x140] ss:$8 sps:$4 sm:$0xff]   ;;  %v10834_v10 = vld [vmem:[#allocation10 + $0x154] ss:$8 sps:$4 sm:$0xff]   ;;  %v10832_v13 = vld [vmem:[#allocation10 + $0x150] ss:$8 sps:$4 sm:$0xff]  }
 0x12d   : > { %838 = vmatprep.subr.bf16.mxu0 %v10749_v15  ;;  %1218 = vmatpush1.bf16.msra.mxu1 %v10829_v37  ;;  %v10877_v11 = vld [vmem:[#allocation10 + $0xc0] ss:$8 sps:$4 sm:$0xff]   ;;  %v10878_v12 = vld [vmem:[#allocation10 + $0xd4] ss:$8 sps:$4 sm:$0xff]   ;;  %v10840_v14 = vld [vmem:[#allocation10 + $0x164] ss:$8 sps:$4 sm:$0xff]  }
 0x12e   : > { %1219 = vmatprep.subr.bf16.mxu1 %v10830_v38  ;;  %v10883_v15 = vld [vmem:[#allocation10 + $0xd0] ss:$8 sps:$4 sm:$0xff]   ;;  %v10790_v22 = vld [vmem:[%s12296_s29 + $0x40] ss:$8 sps:$4 sm:$0xff]   ;;  %v10791_v23 = vld [vmem:[%s12296_s29 + $0x54] ss:$8 sps:$4 sm:$0xff]  }
 0x12f   : > { %v10844_v20 = vld [vmem:[#allocation10 + $0x170] ss:$8 sps:$4 sm:$0xff]   ;;  %v10858_v25 = vld [vmem:[#allocation10 + $0x194] ss:$8 sps:$4 sm:$0xff]   ;;  %v10794_v29 = vld [vmem:[%s12296_s29 + $0x64] ss:$8 sps:$4 sm:$0xff]  }
 0x130   : > { %839 = vmatpush1.bf16.msra.mxu0 %v10751_v16  ;;  %v10787_v16 = vld [vmem:[%s12296_s29 + $0x30] ss:$8 sps:$4 sm:$0xff]   ;;  %v10862_v30 = vld [vmem:[#allocation10 + $0x1a0] ss:$8 sps:$4 sm:$0xff]   ;;  %v10876_v33 = vld [vmem:[#allocation10 + $0x1c4] ss:$8 sps:$4 sm:$0xff]  }
 0x131   : > { %840 = vmatprep.subr.bf16.mxu0 %v10752_v17  ;;  %1220 = vmatpush1.bf16.msra.mxu1 %v10835_v41  ;;  %v10788_v17 = vld [vmem:[%s12296_s29 + $0x44] ss:$8 sps:$4 sm:$0xff]   ;;  %v10856_v26 = vld [vmem:[#allocation10 + $0x190] ss:$8 sps:$4 sm:$0xff]   ;;  %v10796_v34 = vld [vmem:[%s12296_s29 + $0x60] ss:$8 sps:$4 sm:$0xff]  }
 0x132   : > { %1221 = vmatprep.subr.bf16.mxu1 %v10836_v42  ;;  %v10882_v37 = vld [vmem:[#allocation10 + $0x1d4] ss:$8 sps:$4 sm:$0xff]   ;;  %v10880_v38 = vld [vmem:[#allocation10 + $0x1d0] ss:$8 sps:$4 sm:$0xff]   ;;  %v10888_v41 = vld [vmem:[#allocation10 + $0x1e4] ss:$8 sps:$4 sm:$0xff]  }
 0x133   : > { %v10886_v42 = vld [vmem:[#allocation10 + $0x1e0] ss:$8 sps:$4 sm:$0xff]   ;;  %p529_p2 = scmp.lt.s32.totalorder %s9836_s28, 15 }
 0x134   : > { %841 = vmatpush1.bf16.msra.mxu0 %v10754_v18  ;;  %v10838_v18 = vld [vmem:[#allocation10 + $0x160] ss:$8 sps:$4 sm:$0xff]  }
 0x135   : > { %842 = vmatprep.subr.bf16.mxu0 %v10755_v19  ;;  %1222 = vmatpush1.bf16.msra.mxu1 %v10841_v45  ;;  %v10846_v19 = vld [vmem:[#allocation10 + $0x174] ss:$8 sps:$4 sm:$0xff]   ;;  %s16710_s28 = smov (!%p529_p2, %s9836_s28), 15 }
 0x136   : > { %1223 = vmatprep.subr.bf16.mxu1 %v10842_v46  ;;  %v10894_v45 = vld [vmem:[#allocation10 + $0x1f4] ss:$8 sps:$4 sm:$0xff]   ;;  %v10892_v46 = vld [vmem:[#allocation10 + $0x1f0] ss:$8 sps:$4 sm:$0xff]   ;;  %s10613_s15 = sshll.u32 %s16710_s28, 7 }
 0x137   : > { %s15382_s16 = scalar_lea.vmem %s15654_s11, %s10613_s15 }
 0x138   : > { %843 = vmatpush1.bf16.msra.mxu0 %v10757_v21  ;;  %v10852_v21 = vld [vmem:[#allocation10 + $0x184] ss:$8 sps:$4 sm:$0xff]  }
 0x139   : > { %844 = vmatprep.subr.bf16.mxu0 %v10758_v24  ;;  %1224 = vmatpush1.bf16.msra.mxu1 %v10847_v49  ;;  %v10850_v24 = vld [vmem:[#allocation10 + $0x180] ss:$8 sps:$4 sm:$0xff]   ;;  %v10901_v49 = vld [vmem:[#allocation10 + $0x304] ss:$8 sps:$4 sm:$0xff]  }
 0x13a   : > { %1225 = vmatprep.subr.bf16.mxu1 %v10848_v50 }
 0x13c   : > { %845 = vmatpush1.bf16.msra.mxu0 %v10760_v27  ;;  %v10864_v27 = vld [vmem:[#allocation10 + $0x1a4] ss:$8 sps:$4 sm:$0xff]  }
 0x13d   : > { %846 = vmatprep.subr.bf16.mxu0 %v10761_v28  ;;  %1226 = vmatpush1.bf16.msra.mxu1 %v10853_v55  ;;  %v10793_v28 = vld [vmem:[%s12296_s29 + $0x50] ss:$8 sps:$4 sm:$0xff]  }
 0x13e   : > { %1227 = vmatprep.subr.bf16.mxu1 %v10854_v56 }
 0x140   : > { %847 = vmatpush1.bf16.msra.mxu0 %v10763_v31  ;;  %v10870_v31 = vld [vmem:[#allocation10 + $0x1b4] ss:$8 sps:$4 sm:$0xff]  }
 0x141   : > { %848 = vmatprep.subr.bf16.mxu0 %v10764_v32  ;;  %1228 = vmatpush1.bf16.msra.mxu1 %v10859_v60  ;;  %v10868_v32 = vld [vmem:[#allocation10 + $0x1b0] ss:$8 sps:$4 sm:$0xff]   ;;  %v10896_v60 = vld [vmem:[#allocation10 + $0x200] ss:$8 sps:$4 sm:$0xff]  }
 0x142   : > { %1229 = vmatprep.subr.bf16.mxu1 %v10860_v63  ;;  %v10907_v63 = vld [vmem:[#allocation10 + $0x314] ss:$8 sps:$4 sm:$0xff]  }
 0x144   : > { %849 = vmatpush1.bf16.msra.mxu0 %v10766_v35  ;;  %v10797_v35 = vld [vmem:[%s12296_s29 + $0x74] ss:$8 sps:$4 sm:$0xff]  }
 0x145   : > { %850 = vmatprep.subr.bf16.mxu0 %v10767_v36  ;;  %1230 = vmatpush1.bf16.msra.mxu1 %v10865_v1  ;;  %v10874_v36 = vld [vmem:[#allocation10 + $0x1c0] ss:$8 sps:$4 sm:$0xff]  }
 0x146   : > { %1231 = vmatprep.subr.bf16.mxu1 %v10866_v2  ;;  %v10902_v2 = vld [vmem:[#allocation10 + $0x210] ss:$8 sps:$4 sm:$0xff]  }
 0x148   : > { %851 = vmatpush1.bf16.msra.mxu0 %v10769_v39  ;;  %v10799_v39 = vld [vmem:[%s12296_s29 + $0x70] ss:$8 sps:$4 sm:$0xff]  }
 0x149   : > { %852 = vmatprep.subr.bf16.mxu0 %v10770_v40  ;;  %1232 = vmatpush1.bf16.msra.mxu1 %v10871_v5  ;;  %v10884_v40 = vld [vmem:[#allocation10 + $0xe4] ss:$8 sps:$4 sm:$0xff]  }
 0x14a   : > { %1233 = vmatprep.subr.bf16.mxu1 %v10872_v6  ;;  %v10910_v5 = vld [vmem:[#allocation10 + $0x224] ss:$8 sps:$4 sm:$0xff]  }
 0x14c   : > { %853 = vmatpush1.bf16.msra.mxu0 %v10772_v43  ;;  %v10889_v43 = vld [vmem:[#allocation10 + $0xe0] ss:$8 sps:$4 sm:$0xff]  }
 0x14d   : > { %854 = vmatprep.subr.bf16.mxu0 %v10773_v44  ;;  %1234 = vmatpush1.bf16.msra.mxu1 %v10877_v11  ;;  %v10890_v44 = vld [vmem:[#allocation10 + $0xf4] ss:$8 sps:$4 sm:$0xff]  }
 0x14e   : > { %1235 = vmatprep.subr.bf16.mxu1 %v10878_v12 }
 0x150   : > { %855 = vmatpush1.bf16.msra.mxu0 %v10775_v47  ;;  %v10895_v47 = vld [vmem:[#allocation10 + $0xf0] ss:$8 sps:$4 sm:$0xff]  }
 0x151   : > { %1547 = vmatprep.subr.bf16.mxu0 %v10804_v48  ;;  %1236 = vmatpush1.bf16.msra.mxu1 %v10883_v15  ;;  %v10898_v48 = vld [vmem:[#allocation10 + $0x204] ss:$8 sps:$4 sm:$0xff]   ;;  %v10911_v15 = vld [vmem:[#allocation10 + $0x320] ss:$8 sps:$4 sm:$0xff]  }
 0x152   : > { %1237 = vmatprep.subr.bf16.mxu1 %v10884_v40  ;;  %v10929_v40 = vld [vmem:[#allocation10 + $0x350] ss:$8 sps:$4 sm:$0xff]  }
 0x153   : > { %857 = vmatmul.mubr.bf16.vlgmr.msra.gmra.mrb[0].mxu0 %v10776_v51 }
 0x154   : > { %866 = vmatprep.mubr.bf16.mxu0 %v10779_v52  ;;  %1548 = vmatpush1.bf16.msra.mxu0 %v10802_v53 }
 0x155   : > { %1549 = vmatprep.subr.bf16.mxu0 %v10810_v54  ;;  %1238 = vmatpush1.bf16.msra.mxu1 %v10889_v43 }
 0x156   : > { %1239 = vmatprep.subr.bf16.mxu1 %v10890_v44 }
 0x158   : > { %1550 = vmatpush1.bf16.msra.mxu0 %v10808_v57 }
 0x159   : > { %1551 = vmatprep.subr.bf16.mxu0 %v10816_v59  ;;  %1240 = vmatpush1.bf16.msra.mxu1 %v10895_v47 }
 0x15a   : > { %1885 = vmatprep.subr.bf16.mxu1 %v10898_v48 }
 0x15b   : > { %867 = vmatmul.mubr.bf16.gmra.mrb[4].mxu0 %v10781_v58 }
 0x15c   : > { %876 = vmatprep.mubr.bf16.mxu0 %v10782_v61  ;;  %1552 = vmatpush1.bf16.msra.mxu0 %v10814_v62  ;;  %v10899_v61 = vld [vmem:[#allocation10 + $0x300] ss:$8 sps:$4 sm:$0xff]   ;;  %v10904_v62 = vld [vmem:[#allocation10 + $0x214] ss:$8 sps:$4 sm:$0xff]  }
 0x15d   : > { %1553 = vmatprep.subr.bf16.mxu0 %v10822_v0 }
 0x160   : > { %1554 = vmatpush1.bf16.msra.mxu0 %v10820_v3 }
 0x161   : > { %1555 = vmatprep.subr.bf16.mxu0 %v10828_v4  ;;  %v10905_v4 = vld [vmem:[#allocation10 + $0x310] ss:$8 sps:$4 sm:$0xff]  }
 0x163   : > { %877 = vmatmul.mubr.bf16.gmra.mrb[8].mxu0 %v10784_v7 }
 0x164   : > { %886 = vmatprep.mubr.bf16.mxu0 %v10785_v8  ;;  %1556 = vmatpush1.bf16.msra.mxu0 %v10826_v9  ;;  %v10913_v9 = vld [vmem:[#allocation10 + $0x324] ss:$8 sps:$4 sm:$0xff]  }
 0x165   : > { %1557 = vmatprep.subr.bf16.mxu0 %v10834_v10 }
 0x168   : > { %1558 = vmatpush1.bf16.msra.mxu0 %v10832_v13 }
 0x169   : > { %1559 = vmatprep.subr.bf16.mxu0 %v10840_v14  ;;  %v10908_v14 = vld [vmem:[#allocation10 + $0x220] ss:$8 sps:$4 sm:$0xff]  }
 0x16b   : > { %887 = vmatmul.mubr.bf16.gmra.mrb[12].mxu0 %v10787_v16  ;;  %v10916_v16 = vld [vmem:[#allocation10 + $0x234] ss:$8 sps:$4 sm:$0xff]  }
 0x16c   : > { %896 = vmatprep.mubr.bf16.mxu0 %v10788_v17  ;;  %1560 = vmatpush1.bf16.msra.mxu0 %v10838_v18  ;;  %v10919_v17 = vld [vmem:[#allocation10 + $0x334] ss:$8 sps:$4 sm:$0xff]  }
 0x16d   : > { %1561 = vmatprep.subr.bf16.mxu0 %v10846_v19 }
 0x170   : > { %1562 = vmatpush1.bf16.msra.mxu0 %v10844_v20  ;;  %v10914_v20 = vld [vmem:[#allocation10 + $0x230] ss:$8 sps:$4 sm:$0xff]  }
 0x171   : > { %1563 = vmatprep.subr.bf16.mxu0 %v10852_v21 }
 0x173   : > { %897 = vmatmul.mubr.bf16.gmra.mrb[16].mxu0 %v10790_v22  ;;  %v10917_v22 = vld [vmem:[#allocation10 + $0x330] ss:$8 sps:$4 sm:$0xff]  }
 0x174   : > { %906 = vmatprep.mubr.bf16.mxu0 %v10791_v23  ;;  %1564 = vmatpush1.bf16.msra.mxu0 %v10850_v24  ;;  %v10922_v23 = vld [vmem:[#allocation10 + $0x244] ss:$8 sps:$4 sm:$0xff]  }
 0x175   : > { %1565 = vmatprep.subr.bf16.mxu0 %v10858_v25 }
 0x178   : > { %1566 = vmatpush1.bf16.msra.mxu0 %v10856_v26 }
 0x179   : > { %1567 = vmatprep.subr.bf16.mxu0 %v10864_v27  ;;  %v10925_v27 = vld [vmem:[#allocation10 + $0x344] ss:$8 sps:$4 sm:$0xff]  }
 0x17b   : > { %907 = vmatmul.mubr.bf16.gmra.mrb[20].mxu0 %v10793_v28 }
 0x17c   : > { %916 = vmatprep.mubr.bf16.mxu0 %v10794_v29  ;;  %1568 = vmatpush1.bf16.msra.mxu0 %v10862_v30 }
 0x17d   : > { %1569 = vmatprep.subr.bf16.mxu0 %v10870_v31 }
 0x180   : > { %1570 = vmatpush1.bf16.msra.mxu0 %v10868_v32  ;;  %v10920_v32 = vld [vmem:[#allocation10 + $0x240] ss:$8 sps:$4 sm:$0xff]  }
 0x181   : > { %1571 = vmatprep.subr.bf16.mxu0 %v10876_v33  ;;  %v10923_v33 = vld [vmem:[#allocation10 + $0x340] ss:$8 sps:$4 sm:$0xff]  }
 0x183   : > { %917 = vmatmul.mubr.bf16.gmra.mrb[24].mxu0 %v10796_v34  ;;  %v10928_v34 = vld [vmem:[#allocation10 + $0x254] ss:$8 sps:$4 sm:$0xff]  }
 0x184   : > { %926 = vmatprep.mubr.bf16.mxu0 %v10797_v35  ;;  %1572 = vmatpush1.bf16.msra.mxu0 %v10874_v36  ;;  %v10931_v35 = vld [vmem:[#allocation10 + $0x354] ss:$8 sps:$4 sm:$0xff]  }
 0x185   : > { %1573 = vmatprep.subr.bf16.mxu0 %v10882_v37 }
 0x188   : > { %1574 = vmatpush1.bf16.msra.mxu0 %v10880_v38  ;;  %v10926_v38 = vld [vmem:[#allocation10 + $0x250] ss:$8 sps:$4 sm:$0xff]  }
 0x189   : > { %1575 = vmatprep.subr.bf16.mxu0 %v10888_v41  ;;  %v10934_v41 = vld [vmem:[#allocation10 + $0x264] ss:$8 sps:$4 sm:$0xff]  }
 0x18b   : > { %927 = vmatmul.mubr.bf16.gmra.mrb[28].mxu0 %v10799_v39 }
 0x18c   : > { %1576 = vmatpush1.bf16.msra.mxu0 %v10886_v42 }
 0x18d   : > { %1577 = vmatprep.subr.bf16.mxu0 %v10894_v45  ;;  %v10937_v45 = vld [vmem:[#allocation10 + $0x364] ss:$8 sps:$4 sm:$0xff]  }
 0x190   : > { %1578 = vmatpush1.bf16.msra.mxu0 %v10892_v46 }
 0x191   : > { %2223 = vmatprep.subr.bf16.mxu0 %v10901_v49 }
 0x226   : > { %v858_v50 = vpop.f32.mrb[0].mxu0 }
 0x227   : > { %v860_v51 = vpop.f32.mrb[1].mxu0  ;;  %v937_v53 = vmax.f32 %v858_v50, 0.0  ;;  %v10932_v50 = vld [vmem:[#allocation10 + $0x260] ss:$8 sps:$4 sm:$0xff]  }
 0x228   : > { %v862_v52 = vpop.f32.mrb[2].mxu0  ;;  %v938_v56 = vmax.f32 %v860_v51, 0.0  ;;  %v10935_v51 = vld [vmem:[#allocation10 + $0x360] ss:$8 sps:$4 sm:$0xff]  }
 0x229   : > { %v939_v54 = vmax.f32 %v862_v52, 0.0  ;;  %v864_v55 = vpop.f32.mrb[3].mxu0  ;;  %v10940_v52 = vld [vmem:[#allocation10 + $0x274] ss:$8 sps:$4 sm:$0xff]  }
 0x22a   : > { %v940_v57 = vmax.f32 %v864_v55, 0.0 }
 0x22b   : > { %v12314_v58 = vpack.c.bf16 %v939_v54, %v937_v53  ;;  %v10943_v53 = vld [vmem:[#allocation10 + $0x374] ss:$8 sps:$4 sm:$0xff]  }
 0x22c   : > { %v12316_v59 = vpack.c.bf16 %v940_v57, %v938_v56  ;;  %v10938_v56 = vld [vmem:[#allocation10 + $0x270] ss:$8 sps:$4 sm:$0xff]  }
 0x22e   : > { %v868_v0 = vpop.f32.mrb[4].mxu0  ;;  %1241 = vmatprep.mubr.bf16.mxu1 %v12316_v59  ;;  %1579 = vmatprep.mubr.bf16.mxu0 %v12316_v59 }
 0x22f   : > { %v870_v1 = vpop.f32.mrb[5].mxu0  ;;  %1242 = vmatmul.mubr.bf16.vlgmr.msra.gmra.mrb[0].mxu1 %v12314_v58  ;;  %1580 = vmatmul.mubr.bf16.vlgmr.msra.gmra.mrb[32].mxu0 %v12314_v58  ;;  %v941_v6 = vmax.f32 %v868_v0, 0.0 }
 0x230   : > { %v872_v3 = vpop.f32.mrb[6].mxu0  ;;  %1886 = vmatpush1.bf16.msra.mxu1 %v10896_v60  ;;  %2224 = vmatpush1.bf16.msra.mxu0 %v10899_v61  ;;  %v942_v10 = vmax.f32 %v870_v1, 0.0  ;;  %v10941_v60 = vld [vmem:[#allocation10 + $0x370] ss:$8 sps:$4 sm:$0xff]   ;;  %v10946_v61 = vld [vmem:[#allocation10 + $0x284] ss:$8 sps:$4 sm:$0xff]  }
 0x231   : > { %v943_v7 = vmax.f32 %v872_v3, 0.0  ;;  %v874_v8 = vpop.f32.mrb[7].mxu0  ;;  %1887 = vmatprep.subr.bf16.mxu1 %v10904_v62  ;;  %2225 = vmatprep.subr.bf16.mxu0 %v10907_v63  ;;  %v10949_v1 = vld [vmem:[#allocation10 + $0x384] ss:$8 sps:$4 sm:$0xff]  }
 0x232   : > { %v944_v11 = vmax.f32 %v874_v8, 0.0  ;;  %v10952_v8 = vld [vmem:[#allocation10 + $0x294] ss:$8 sps:$4 sm:$0xff]  }
 0x233   : > { %v12322_v12 = vpack.c.bf16 %v943_v7, %v941_v6  ;;  %v10944_v6 = vld [vmem:[#allocation10 + $0x280] ss:$8 sps:$4 sm:$0xff]  }
 0x234   : > { %v12324_v13 = vpack.c.bf16 %v944_v11, %v942_v10  ;;  %1888 = vmatpush1.bf16.msra.mxu1 %v10902_v2  ;;  %2226 = vmatpush1.bf16.msra.mxu0 %v10905_v4  ;;  %v10947_v7 = vld [vmem:[#allocation10 + $0x380] ss:$8 sps:$4 sm:$0xff]  }
 0x235   : > { %1889 = vmatprep.subr.bf16.mxu1 %v10910_v5  ;;  %2227 = vmatprep.subr.bf16.mxu0 %v10913_v9  ;;  %v10955_v9 = vld [vmem:[#allocation10 + $0x394] ss:$8 sps:$4 sm:$0xff]  }
 0x236   : > { %v878_v18 = vpop.f32.mrb[8].mxu0  ;;  %1251 = vmatprep.mubr.bf16.mxu1 %v12324_v13  ;;  %1589 = vmatprep.mubr.bf16.mxu0 %v12324_v13 }
 0x237   : > { %v880_v19 = vpop.f32.mrb[9].mxu0  ;;  %1252 = vmatmul.mubr.bf16.gmra.mrb[4].mxu1 %v12322_v12  ;;  %1590 = vmatmul.mubr.bf16.gmra.mrb[36].mxu0 %v12322_v12  ;;  %v945_v24 = vmax.f32 %v878_v18, 0.0 }
 0x238   : > { %v882_v21 = vpop.f32.mrb[10].mxu0  ;;  %1890 = vmatpush1.bf16.msra.mxu1 %v10908_v14  ;;  %2228 = vmatpush1.bf16.msra.mxu0 %v10911_v15  ;;  %v946_v28 = vmax.f32 %v880_v19, 0.0  ;;  %v10950_v14 = vld [vmem:[#allocation10 + $0x290] ss:$8 sps:$4 sm:$0xff]  }
 0x239   : > { %v947_v25 = vmax.f32 %v882_v21, 0.0  ;;  %v884_v26 = vpop.f32.mrb[11].mxu0  ;;  %1891 = vmatprep.subr.bf16.mxu1 %v10916_v16  ;;  %2229 = vmatprep.subr.bf16.mxu0 %v10919_v17  ;;  %v10953_v16 = vld [vmem:[#allocation10 + $0x390] ss:$8 sps:$4 sm:$0xff]   ;;  %v10958_v17 = vld [vmem:[#allocation10 + $0x2a4] ss:$8 sps:$4 sm:$0xff]  }
 0x23a   : > { %v948_v29 = vmax.f32 %v884_v26, 0.0  ;;  %v10961_v21 = vld [vmem:[#allocation10 + $0x3a4] ss:$8 sps:$4 sm:$0xff]   ;;  %v10956_v26 = vld [vmem:[#allocation10 + $0x2a0] ss:$8 sps:$4 sm:$0xff]  }
 0x23b   : > { %v12330_v30 = vpack.c.bf16 %v947_v25, %v945_v24 }
 0x23c   : > { %v12332_v31 = vpack.c.bf16 %v948_v29, %v946_v28  ;;  %1892 = vmatpush1.bf16.msra.mxu1 %v10914_v20  ;;  %2230 = vmatpush1.bf16.msra.mxu0 %v10917_v22  ;;  %v10964_v28 = vld [vmem:[#allocation10 + $0x2b4] ss:$8 sps:$4 sm:$0xff]  }
 0x23d   : > { %1893 = vmatprep.subr.bf16.mxu1 %v10922_v23  ;;  %2231 = vmatprep.subr.bf16.mxu0 %v10925_v27  ;;  %v10959_v27 = vld [vmem:[#allocation10 + $0x3a0] ss:$8 sps:$4 sm:$0xff]   ;;  %v10967_v29 = vld [vmem:[#allocation10 + $0x3b4] ss:$8 sps:$4 sm:$0xff]  }
 0x23e   : > { %v888_v36 = vpop.f32.mrb[12].mxu0  ;;  %1261 = vmatprep.mubr.bf16.mxu1 %v12332_v31  ;;  %1599 = vmatprep.mubr.bf16.mxu0 %v12332_v31 }
 0x23f   : > { %v890_v37 = vpop.f32.mrb[13].mxu0  ;;  %1262 = vmatmul.mubr.bf16.gmra.mrb[8].mxu1 %v12330_v30  ;;  %1600 = vmatmul.mubr.bf16.gmra.mrb[40].mxu0 %v12330_v30  ;;  %v949_v42 = vmax.f32 %v888_v36, 0.0  ;;  %v10965_v36 = vld [vmem:[#allocation10 + $0x3b0] ss:$8 sps:$4 sm:$0xff]  }
 0x240   : > { %v892_v39 = vpop.f32.mrb[14].mxu0  ;;  %1894 = vmatpush1.bf16.msra.mxu1 %v10920_v32  ;;  %2232 = vmatpush1.bf16.msra.mxu0 %v10923_v33  ;;  %v950_v46 = vmax.f32 %v890_v37, 0.0  ;;  %v10970_v37 = vld [vmem:[#allocation10 + $0x2c4] ss:$8 sps:$4 sm:$0xff]  }
 0x241   : > { %v951_v43 = vmax.f32 %v892_v39, 0.0  ;;  %v894_v44 = vpop.f32.mrb[15].mxu0  ;;  %1895 = vmatprep.subr.bf16.mxu1 %v10928_v34  ;;  %2233 = vmatprep.subr.bf16.mxu0 %v10931_v35  ;;  %v10962_v34 = vld [vmem:[#allocation10 + $0x2b0] ss:$8 sps:$4 sm:$0xff]  }
 0x242   : > { %v952_v47 = vmax.f32 %v894_v44, 0.0 }
 0x243   : > { %v12338_v48 = vpack.c.bf16 %v951_v43, %v949_v42 }
 0x244   : > { %v12340_v49 = vpack.c.bf16 %v952_v47, %v950_v46  ;;  %1896 = vmatpush1.bf16.msra.mxu1 %v10926_v38  ;;  %2234 = vmatpush1.bf16.msra.mxu0 %v10929_v40  ;;  %v10968_v46 = vld [vmem:[#allocation10 + $0x2c0] ss:$8 sps:$4 sm:$0xff]  }
 0x245   : > { %1897 = vmatprep.subr.bf16.mxu1 %v10934_v41  ;;  %2235 = vmatprep.subr.bf16.mxu0 %v10937_v45  ;;  %v10973_v41 = vld [vmem:[#allocation10 + $0x3c4] ss:$8 sps:$4 sm:$0xff]   ;;  %v10971_v47 = vld [vmem:[#allocation10 + $0x3c0] ss:$8 sps:$4 sm:$0xff]  }
 0x246   : > { %v898_v54 = vpop.f32.mrb[16].mxu0  ;;  %1271 = vmatprep.mubr.bf16.mxu1 %v12340_v49  ;;  %1609 = vmatprep.mubr.bf16.mxu0 %v12340_v49 }
 0x247   : > { %v900_v55 = vpop.f32.mrb[17].mxu0  ;;  %1272 = vmatmul.mubr.bf16.gmra.mrb[12].mxu1 %v12338_v48  ;;  %1610 = vmatmul.mubr.bf16.gmra.mrb[44].mxu0 %v12338_v48  ;;  %v953_v62 = vmax.f32 %v898_v54, 0.0  ;;  %v10974_v54 = vld [vmem:[#allocation10 + $0x2d0] ss:$8 sps:$4 sm:$0xff]  }
 0x248   : > { %v902_v57 = vpop.f32.mrb[18].mxu0  ;;  %1898 = vmatpush1.bf16.msra.mxu1 %v10932_v50  ;;  %2236 = vmatpush1.bf16.msra.mxu0 %v10935_v51  ;;  %v954_v2 = vmax.f32 %v900_v55, 0.0  ;;  %v10976_v50 = vld [vmem:[#allocation10 + $0x2d4] ss:$8 sps:$4 sm:$0xff]  }
 0x249   : > { %v955_v63 = vmax.f32 %v902_v57, 0.0  ;;  %v904_v0 = vpop.f32.mrb[19].mxu0  ;;  %1899 = vmatprep.subr.bf16.mxu1 %v10940_v52  ;;  %2237 = vmatprep.subr.bf16.mxu0 %v10943_v53  ;;  %v10979_v51 = vld [vmem:[#allocation10 + $0x3d4] ss:$8 sps:$4 sm:$0xff]   ;;  %v10982_v57 = vld [vmem:[#allocation10 + $0x2e4] ss:$8 sps:$4 sm:$0xff]  }
 0x24a   : > { %v956_v3 = vmax.f32 %v904_v0, 0.0 }
 0x24b   : > { %v12346_v4 = vpack.c.bf16 %v955_v63, %v953_v62  ;;  %v10985_v63 = vld [vmem:[#allocation10 + $0x3e4] ss:$8 sps:$4 sm:$0xff]  }
 0x24c   : > { %v12348_v5 = vpack.c.bf16 %v956_v3, %v954_v2  ;;  %1900 = vmatpush1.bf16.msra.mxu1 %v10938_v56  ;;  %2238 = vmatpush1.bf16.msra.mxu0 %v10941_v60  ;;  %v10977_v56 = vld [vmem:[#allocation10 + $0x3d0] ss:$8 sps:$4 sm:$0xff]  }
 0x24d   : > { %1901 = vmatprep.subr.bf16.mxu1 %v10946_v61  ;;  %2239 = vmatprep.subr.bf16.mxu0 %v10949_v1 }
 0x24e   : > { %v908_v10 = vpop.f32.mrb[20].mxu0  ;;  %1281 = vmatprep.mubr.bf16.mxu1 %v12348_v5  ;;  %1619 = vmatprep.mubr.bf16.mxu0 %v12348_v5 }
 0x24f   : > { %v910_v11 = vpop.f32.mrb[21].mxu0  ;;  %1282 = vmatmul.mubr.bf16.gmra.mrb[16].mxu1 %v12346_v4  ;;  %1620 = vmatmul.mubr.bf16.gmra.mrb[48].mxu0 %v12346_v4  ;;  %v957_v18 = vmax.f32 %v908_v10, 0.0  ;;  %v10986_v10 = vld [vmem:[#allocation10 + $0x2f0] ss:$8 sps:$4 sm:$0xff]  }
 0x250   : > { %v912_v15 = vpop.f32.mrb[22].mxu0  ;;  %1902 = vmatpush1.bf16.msra.mxu1 %v10944_v6  ;;  %2240 = vmatpush1.bf16.msra.mxu0 %v10947_v7  ;;  %v958_v22 = vmax.f32 %v910_v11, 0.0  ;;  %v10980_v6 = vld [vmem:[#allocation10 + $0x2e0] ss:$8 sps:$4 sm:$0xff]   ;;  %v10989_v11 = vld [vmem:[#allocation10 + $0x3f0] ss:$8 sps:$4 sm:$0xff]  }
 0x251   : > { %v959_v19 = vmax.f32 %v912_v15, 0.0  ;;  %v914_v20 = vpop.f32.mrb[23].mxu0  ;;  %1903 = vmatprep.subr.bf16.mxu1 %v10952_v8  ;;  %2241 = vmatprep.subr.bf16.mxu0 %v10955_v9  ;;  %v10983_v7 = vld [vmem:[#allocation10 + $0x3e0] ss:$8 sps:$4 sm:$0xff]   ;;  %v10988_v8 = vld [vmem:[#allocation10 + $0x2f4] ss:$8 sps:$4 sm:$0xff]  }
 0x252   : > { %v960_v23 = vmax.f32 %v914_v20, 0.0  ;;  %v10991_v9 = vld [vmem:[#allocation10 + $0x3f4] ss:$8 sps:$4 sm:$0xff]   ;;  %v10992_v15 = vld [vmem:[#allocation10 + $0x400] ss:$8 sps:$4 sm:$0xff]  }
 0x253   : > { %v12354_v24 = vpack.c.bf16 %v959_v19, %v957_v18  ;;  %v11000_v18 = vld [vmem:[#allocation10 + $0x424] ss:$8 sps:$4 sm:$0xff]   ;;  %v10998_v19 = vld [vmem:[#allocation10 + $0x420] ss:$8 sps:$4 sm:$0xff]   ;;  %v11003_v20 = vld [vmem:[#allocation10 + $0x434] ss:$8 sps:$4 sm:$0xff]  }
 0x254   : > { %v12356_v25 = vpack.c.bf16 %v960_v23, %v958_v22  ;;  %1904 = vmatpush1.bf16.msra.mxu1 %v10950_v14  ;;  %2242 = vmatpush1.bf16.msra.mxu0 %v10953_v16  ;;  %v10994_v14 = vld [vmem:[#allocation10 + $0x404] ss:$8 sps:$4 sm:$0xff]   ;;  %v10997_v16 = vld [vmem:[#allocation10 + $0x414] ss:$8 sps:$4 sm:$0xff]   ;;  %v11004_v23 = vld [vmem:[#allocation10 + $0x440] ss:$8 sps:$4 sm:$0xff]  }
 0x255   : > { %1905 = vmatprep.subr.bf16.mxu1 %v10958_v17  ;;  %2243 = vmatprep.subr.bf16.mxu0 %v10961_v21  ;;  %v10995_v17 = vld [vmem:[#allocation10 + $0x410] ss:$8 sps:$4 sm:$0xff]   ;;  %v11006_v22 = vld [vmem:[#allocation10 + $0x444] ss:$8 sps:$4 sm:$0xff]  }
 0x256   : > { %v918_v32 = vpop.f32.mrb[24].mxu0  ;;  %1291 = vmatprep.mubr.bf16.mxu1 %v12356_v25  ;;  %1629 = vmatprep.mubr.bf16.mxu0 %v12356_v25  ;;  %v11001_v21 = vld [vmem:[#allocation10 + $0x430] ss:$8 sps:$4 sm:$0xff]  }
 0x257   : > { %v920_v33 = vpop.f32.mrb[25].mxu0  ;;  %1292 = vmatmul.mubr.bf16.gmra.mrb[20].mxu1 %v12354_v24  ;;  %1630 = vmatmul.mubr.bf16.gmra.mrb[52].mxu0 %v12354_v24  ;;  %v961_v38 = vmax.f32 %v918_v32, 0.0  ;;  %v11015_v32 = vld [vmem:[#allocation10 + $0x474] ss:$8 sps:$4 sm:$0xff]  }
 0x258   : > { %v922_v35 = vpop.f32.mrb[26].mxu0  ;;  %1906 = vmatpush1.bf16.msra.mxu1 %v10956_v26  ;;  %2244 = vmatpush1.bf16.msra.mxu0 %v10959_v27  ;;  %v962_v42 = vmax.f32 %v920_v33, 0.0  ;;  %v11009_v26 = vld [vmem:[#allocation10 + $0x454] ss:$8 sps:$4 sm:$0xff]   ;;  %v11007_v27 = vld [vmem:[#allocation10 + $0x450] ss:$8 sps:$4 sm:$0xff]  }
 0x259   : > { %v963_v39 = vmax.f32 %v922_v35, 0.0  ;;  %v924_v40 = vpop.f32.mrb[27].mxu0  ;;  %1907 = vmatprep.subr.bf16.mxu1 %v10964_v28  ;;  %2245 = vmatprep.subr.bf16.mxu0 %v10967_v29  ;;  %v11012_v28 = vld [vmem:[#allocation10 + $0x464] ss:$8 sps:$4 sm:$0xff]   ;;  %v11010_v29 = vld [vmem:[#allocation10 + $0x460] ss:$8 sps:$4 sm:$0xff]  }
 0x25a   : > { %v964_v43 = vmax.f32 %v924_v40, 0.0  ;;  %v11013_v33 = vld [vmem:[#allocation10 + $0x470] ss:$8 sps:$4 sm:$0xff]   ;;  %v11016_v35 = vld [vmem:[#allocation10 + $0x480] ss:$8 sps:$4 sm:$0xff]  }
 0x25b   : > { %v12362_v44 = vpack.c.bf16 %v963_v39, %v961_v38  ;;  %v11024_v38 = vld [vmem:[#allocation10 + $0x4a4] ss:$8 sps:$4 sm:$0xff]   ;;  %v11022_v39 = vld [vmem:[#allocation10 + $0x4a0] ss:$8 sps:$4 sm:$0xff]   ;;  %v11027_v40 = vld [vmem:[#allocation10 + $0x4b4] ss:$8 sps:$4 sm:$0xff]  }
 0x25c   : > { %v12364_v45 = vpack.c.bf16 %v964_v43, %v962_v42  ;;  %1908 = vmatpush1.bf16.msra.mxu1 %v10962_v34  ;;  %2246 = vmatpush1.bf16.msra.mxu0 %v10965_v36  ;;  %v11018_v34 = vld [vmem:[#allocation10 + $0x484] ss:$8 sps:$4 sm:$0xff]   ;;  %v11021_v36 = vld [vmem:[#allocation10 + $0x494] ss:$8 sps:$4 sm:$0xff]   ;;  %v11028_v43 = vld [vmem:[#allocation10 + $0x4c0] ss:$8 sps:$4 sm:$0xff]  }
 0x25d   : > { %1909 = vmatprep.subr.bf16.mxu1 %v10970_v37  ;;  %2247 = vmatprep.subr.bf16.mxu0 %v10973_v41  ;;  %v11019_v37 = vld [vmem:[#allocation10 + $0x490] ss:$8 sps:$4 sm:$0xff]   ;;  %v11030_v42 = vld [vmem:[#allocation10 + $0x4c4] ss:$8 sps:$4 sm:$0xff]  }
 0x25e   : > { %v928_v52 = vpop.f32.mrb[28].mxu0  ;;  %1301 = vmatprep.mubr.bf16.mxu1 %v12364_v45  ;;  %1639 = vmatprep.mubr.bf16.mxu0 %v12364_v45  ;;  %v11025_v41 = vld [vmem:[#allocation10 + $0x4b0] ss:$8 sps:$4 sm:$0xff]  }
 0x25f   : > { %v930_v53 = vpop.f32.mrb[29].mxu0  ;;  %1302 = vmatmul.mubr.bf16.gmra.mrb[24].mxu1 %v12362_v44  ;;  %1640 = vmatmul.mubr.bf16.gmra.mrb[56].mxu0 %v12362_v44  ;;  %v965_v60 = vmax.f32 %v928_v52, 0.0  ;;  %v11039_v52 = vld [vmem:[#allocation10 + $0x4f4] ss:$8 sps:$4 sm:$0xff]  }
 0x260   : > { %v932_v55 = vpop.f32.mrb[30].mxu0  ;;  %1910 = vmatpush1.bf16.msra.mxu1 %v10968_v46  ;;  %2248 = vmatpush1.bf16.msra.mxu0 %v10971_v47  ;;  %v966_v0 = vmax.f32 %v930_v53, 0.0  ;;  %v11033_v46 = vld [vmem:[#allocation10 + $0x4d4] ss:$8 sps:$4 sm:$0xff]   ;;  %v11031_v47 = vld [vmem:[#allocation10 + $0x4d0] ss:$8 sps:$4 sm:$0xff]  }
 0x261   : > { %v967_v61 = vmax.f32 %v932_v55, 0.0  ;;  %v934_v62 = vpop.f32.mrb[31].mxu0  ;;  %1911 = vmatprep.subr.bf16.mxu1 %v10976_v50  ;;  %2249 = vmatprep.subr.bf16.mxu0 %v10979_v51  ;;  %v11036_v50 = vld [vmem:[#allocation10 + $0x4e4] ss:$8 sps:$4 sm:$0xff]   ;;  %v11034_v51 = vld [vmem:[#allocation10 + $0x4e0] ss:$8 sps:$4 sm:$0xff]  }
 0x262   : > { %v968_v1 = vmax.f32 %v934_v62, 0.0  ;;  %v11037_v53 = vld [vmem:[#allocation10 + $0x4f0] ss:$8 sps:$4 sm:$0xff]  }
 0x263   : > { %v12370_v2 = vpack.c.bf16 %v967_v61, %v965_v60  ;;  %v15663_v60 = vmov 0  }
 0x264   : > { %v12372_v3 = vpack.c.bf16 %v968_v1, %v966_v0  ;;  %1912 = vmatpush1.bf16.msra.mxu1 %v10974_v54  ;;  %2250 = vmatpush1.bf16.msra.mxu0 %v10977_v56 }
 0x265   : > { %1913 = vmatprep.subr.bf16.mxu1 %v10982_v57  ;;  %2251 = vmatprep.subr.bf16.mxu0 %v10985_v63 }
 0x266   : > { %1311 = vmatprep.mubr.bf16.mxu1 %v12372_v3  ;;  %1649 = vmatprep.mubr.bf16.mxu0 %v12372_v3 }
 0x267   : > { %1312 = vmatmul.mubr.bf16.gmra.mrb[28].mxu1 %v12370_v2  ;;  %1650 = vmatmul.mubr.bf16.gmra.mrb[60].mxu0 %v12370_v2 }
 0x268   : > { %1914 = vmatpush1.bf16.msra.mxu1 %v10980_v6  ;;  %1917 = vmatprep.mubr.bf16.mxu1 %v12316_v59 }
 0x269   : > { %2252 = vmatpush1.bf16.msra.mxu0 %v10983_v7  ;;  %2255 = vmatprep.mubr.bf16.mxu0 %v12316_v59 }
 0x26a   : > { %1915 = vmatprep.subr.bf16.mxu1 %v10988_v8  ;;  %2253 = vmatprep.subr.bf16.mxu0 %v10991_v9 }
 0x26c   : > { %1916 = vmatpush1.bf16.msra.mxu1 %v10986_v10 }
 0x26d   : > { %2254 = vmatpush1.bf16.msra.mxu0 %v10989_v11  ;;  %2561 = vmatprep.subr.bf16.mxu1 %v10994_v14 }
 0x26f   : > { %1918 = vmatmul.mubr.bf16.vlgmr.msra.gmra.mrb[32].mxu1 %v12314_v58 }
 0x270   : > { %2256 = vmatmul.mubr.bf16.vlgmr.msra.gmra.mrb[64].mxu0 %v12314_v58  ;;  %1927 = vmatprep.mubr.bf16.mxu1 %v12324_v13 }
 0x271   : > { %2265 = vmatprep.mubr.bf16.mxu0 %v12324_v13  ;;  %2562 = vmatpush1.bf16.msra.mxu1 %v10992_v15 }
 0x272   : > { %2563 = vmatprep.subr.bf16.mxu1 %v10997_v16 }
 0x275   : > { %2564 = vmatpush1.bf16.msra.mxu1 %v10995_v17 }
 0x276   : > { %2565 = vmatprep.subr.bf16.mxu1 %v11000_v18 }
 0x277   : > { %1928 = vmatmul.mubr.bf16.gmra.mrb[36].mxu1 %v12322_v12 }
 0x278   : > { %2266 = vmatmul.mubr.bf16.gmra.mrb[68].mxu0 %v12322_v12  ;;  %1937 = vmatprep.mubr.bf16.mxu1 %v12332_v31 }
 0x279   : > { %2275 = vmatprep.mubr.bf16.mxu0 %v12332_v31  ;;  %2566 = vmatpush1.bf16.msra.mxu1 %v10998_v19 }
 0x27a   : > { %2567 = vmatprep.subr.bf16.mxu1 %v11003_v20 }
 0x27d   : > { %2568 = vmatpush1.bf16.msra.mxu1 %v11001_v21 }
 0x27e   : > { %2569 = vmatprep.subr.bf16.mxu1 %v11006_v22 }
 0x27f   : > { %1938 = vmatmul.mubr.bf16.gmra.mrb[40].mxu1 %v12330_v30 }
 0x280   : > { %2276 = vmatmul.mubr.bf16.gmra.mrb[72].mxu0 %v12330_v30  ;;  %1947 = vmatprep.mubr.bf16.mxu1 %v12340_v49 }
 0x281   : > { %2285 = vmatprep.mubr.bf16.mxu0 %v12340_v49  ;;  %2570 = vmatpush1.bf16.msra.mxu1 %v11004_v23 }
 0x282   : > { %2571 = vmatprep.subr.bf16.mxu1 %v11009_v26 }
 0x285   : > { %2572 = vmatpush1.bf16.msra.mxu1 %v11007_v27 }
 0x286   : > { %2573 = vmatprep.subr.bf16.mxu1 %v11012_v28 }
 0x287   : > { %1948 = vmatmul.mubr.bf16.gmra.mrb[44].mxu1 %v12338_v48 }
 0x288   : > { %2286 = vmatmul.mubr.bf16.gmra.mrb[76].mxu0 %v12338_v48  ;;  %1957 = vmatprep.mubr.bf16.mxu1 %v12348_v5 }
 0x289   : > { %2295 = vmatprep.mubr.bf16.mxu0 %v12348_v5  ;;  %2574 = vmatpush1.bf16.msra.mxu1 %v11010_v29 }
 0x28a   : > { %2575 = vmatprep.subr.bf16.mxu1 %v11015_v32 }
 0x28d   : > { %2576 = vmatpush1.bf16.msra.mxu1 %v11013_v33 }
 0x28e   : > { %2577 = vmatprep.subr.bf16.mxu1 %v11018_v34 }
 0x28f   : > { %1958 = vmatmul.mubr.bf16.gmra.mrb[48].mxu1 %v12346_v4 }
 0x290   : > { %2296 = vmatmul.mubr.bf16.gmra.mrb[80].mxu0 %v12346_v4  ;;  %1967 = vmatprep.mubr.bf16.mxu1 %v12356_v25 }
 0x291   : > { %2305 = vmatprep.mubr.bf16.mxu0 %v12356_v25  ;;  %2578 = vmatpush1.bf16.msra.mxu1 %v11016_v35 }
 0x292   : > { %2579 = vmatprep.subr.bf16.mxu1 %v11021_v36 }
 0x295   : > { %2580 = vmatpush1.bf16.msra.mxu1 %v11019_v37 }
 0x296   : > { %2581 = vmatprep.subr.bf16.mxu1 %v11024_v38 }
 0x297   : > { %1968 = vmatmul.mubr.bf16.gmra.mrb[52].mxu1 %v12354_v24 }
 0x298   : > { %2306 = vmatmul.mubr.bf16.gmra.mrb[84].mxu0 %v12354_v24  ;;  %1977 = vmatprep.mubr.bf16.mxu1 %v12364_v45 }
 0x299   : > { %2315 = vmatprep.mubr.bf16.mxu0 %v12364_v45  ;;  %2582 = vmatpush1.bf16.msra.mxu1 %v11022_v39 }
 0x29a   : > { %2583 = vmatprep.subr.bf16.mxu1 %v11027_v40 }
 0x29d   : > { %2584 = vmatpush1.bf16.msra.mxu1 %v11025_v41 }
 0x29e   : > { %2585 = vmatprep.subr.bf16.mxu1 %v11030_v42 }
 0x29f   : > { %1978 = vmatmul.mubr.bf16.gmra.mrb[56].mxu1 %v12362_v44 }
 0x2a0   : > { %2316 = vmatmul.mubr.bf16.gmra.mrb[88].mxu0 %v12362_v44  ;;  %1987 = vmatprep.mubr.bf16.mxu1 %v12372_v3 }
 0x2a1   : > { %2325 = vmatprep.mubr.bf16.mxu0 %v12372_v3  ;;  %2586 = vmatpush1.bf16.msra.mxu1 %v11028_v43 }
 0x2a2   : > { %2587 = vmatprep.subr.bf16.mxu1 %v11033_v46 }
 0x2a5   : > { %2588 = vmatpush1.bf16.msra.mxu1 %v11031_v47 }
 0x2a6   : > { %2589 = vmatprep.subr.bf16.mxu1 %v11036_v50 }
 0x2a7   : > { %1988 = vmatmul.mubr.bf16.gmra.mrb[60].mxu1 %v12370_v2 }
 0x2a8   : > { %2326 = vmatmul.mubr.bf16.gmra.mrb[92].mxu0 %v12370_v2  ;;  %2593 = vmatprep.mubr.bf16.mxu1 %v12316_v59 }
 0x2a9   : > { %2590 = vmatpush1.bf16.msra.mxu1 %v11034_v51  ;;  %2771 = vmatprep.mubr.bf16.mxu0 %v15663_v60 }
 0x2aa   : > { %2591 = vmatprep.subr.bf16.mxu1 %v11039_v52 }
 0x2ad   : > { %2592 = vmatpush1.bf16.msra.mxu1 %v11037_v53 }
 0x2b0   : > { %2594 = vmatmul.mubr.bf16.vlgmr.msra.gmra.mrb[64].mxu1 %v12314_v58 }
 0x2b1   : > { %2603 = vmatprep.mubr.bf16.mxu1 %v12324_v13 }
 0x2b8   : > { %2604 = vmatmul.mubr.bf16.gmra.mrb[68].mxu1 %v12322_v12 }
 0x2b9   : > { %2613 = vmatprep.mubr.bf16.mxu1 %v12332_v31 }
 0x2c0   : > { %2614 = vmatmul.mubr.bf16.gmra.mrb[72].mxu1 %v12330_v30 }
 0x2c1   : > { %2623 = vmatprep.mubr.bf16.mxu1 %v12340_v49 }
 0x2c8   : > { %2624 = vmatmul.mubr.bf16.gmra.mrb[76].mxu1 %v12338_v48 }
 0x2c9   : > { %2633 = vmatprep.mubr.bf16.mxu1 %v12348_v5 }
 0x2d0   : > { %2634 = vmatmul.mubr.bf16.gmra.mrb[80].mxu1 %v12346_v4 }
 0x2d1   : > { %2643 = vmatprep.mubr.bf16.mxu1 %v12356_v25 }
 0x2d8   : > { %2644 = vmatmul.mubr.bf16.gmra.mrb[84].mxu1 %v12354_v24 }
 0x2d9   : > { %2653 = vmatprep.mubr.bf16.mxu1 %v12364_v45 }
 0x2e0   : > { %2654 = vmatmul.mubr.bf16.gmra.mrb[88].mxu1 %v12362_v44 }
 0x2e1   : > { %2663 = vmatprep.mubr.bf16.mxu1 %v12372_v3 }
 0x2e8   : > { %2664 = vmatmul.mubr.bf16.gmra.mrb[92].mxu1 %v12370_v2 }
 0x2e9   : > { %2832 = vmatprep.mubr.bf16.mxu1 %v15663_v60 }
 0x302   : > { %v1243_v58 = vpop.f32.mrb[0].mxu1  ;;  %v1581_v59 = vpop.f32.mrb[32].mxu0 }
 0x303   : > { %v1245_v12 = vpop.f32.mrb[1].mxu1  ;;  %v1583_v13 = vpop.f32.mrb[33].mxu0 }
 0x304   : > { %v1247_v30 = vpop.f32.mrb[2].mxu1  ;;  %v1585_v31 = vpop.f32.mrb[34].mxu0 }
 0x305   : > { %v1322_v48 = vpack.c.bf16 %v1247_v30, %v1243_v58  ;;  %v1660_v49 = vpack.c.bf16 %v1585_v31, %v1581_v59  ;;  %v1249_v4 = vpop.f32.mrb[3].mxu1  ;;  %v1587_v5 = vpop.f32.mrb[35].mxu0 }
 0x306   : > { %v1323_v25 = vpack.c.bf16 %v1249_v4, %v1245_v12  ;;  %v1661_v24 = vpack.c.bf16 %v1587_v5, %v1583_v13 }
 0x308   : > { %2739 = vmatprep.subr.bf16.mxu0 %v1323_v25 }
 0x309   : > { %2740 = vmatpush1.bf16.msra.mxu0 %v1322_v48 }
 0x30a   : > { %v1253_v45 = vpop.f32.mrb[4].mxu1  ;;  %v1591_v44 = vpop.f32.mrb[36].mxu0  ;;  %2741 = vmatprep.subr.bf16.mxu0 %v1661_v24 }
 0x30b   : > { %v1255_v54 = vpop.f32.mrb[5].mxu1  ;;  %v1593_v55 = vpop.f32.mrb[37].mxu0 }
 0x30c   : > { %v1257_v56 = vpop.f32.mrb[6].mxu1  ;;  %v1595_v57 = vpop.f32.mrb[38].mxu0 }
 0x30d   : > { %v1324_v61 = vpack.c.bf16 %v1257_v56, %v1253_v45  ;;  %v1662_v62 = vpack.c.bf16 %v1595_v57, %v1591_v44  ;;  %v1259_v63 = vpop.f32.mrb[7].mxu1  ;;  %v1597_v0 = vpop.f32.mrb[39].mxu0  ;;  %2742 = vmatpush1.bf16.msra.mxu0 %v1660_v49 }
 0x30e   : > { %v1325_v1 = vpack.c.bf16 %v1259_v63, %v1255_v54  ;;  %v1663_v2 = vpack.c.bf16 %v1597_v0, %v1593_v55 }
 0x310   : > { %2800 = vmatprep.subr.bf16.mxu1 %v1325_v1 }
 0x311   : > { %2801 = vmatpush1.bf16.msra.mxu1 %v1324_v61 }
 0x312   : > { %v12428_v3 = vpop.f32.mrb[8].mxu1  ;;  %v12430_v6 = vpop.f32.mrb[40].mxu0  ;;  %2802 = vmatprep.subr.bf16.mxu1 %v1663_v2 }
 0x313   : > { %v12432_v7 = vpop.f32.mrb[9].mxu1  ;;  %v12434_v8 = vpop.f32.mrb[41].mxu0 }
 0x314   : > { %v12436_v9 = vpop.f32.mrb[10].mxu1  ;;  %v12438_v10 = vpop.f32.mrb[42].mxu0 }
 0x315   : > { %v12444_v15 = vpop.f32.mrb[11].mxu1  ;;  %v12446_v16 = vpop.f32.mrb[43].mxu0  ;;  %2803 = vmatpush1.bf16.msra.mxu1 %v1662_v62 }
 0x31a   : > { %v12452_v19 = vpop.f32.mrb[12].mxu1  ;;  %v12454_v20 = vpop.f32.mrb[44].mxu0 }
 0x31b   : > { %v12456_v21 = vpop.f32.mrb[13].mxu1  ;;  %v12458_v22 = vpop.f32.mrb[45].mxu0 }
 0x31c   : > { %v12460_v23 = vpop.f32.mrb[14].mxu1  ;;  %v12462_v26 = vpop.f32.mrb[46].mxu0 }
 0x31d   : > { %v12468_v29 = vpop.f32.mrb[15].mxu1  ;;  %v12470_v32 = vpop.f32.mrb[47].mxu0 }
 0x322   : > { %v12476_v35 = vpop.f32.mrb[16].mxu1  ;;  %v12478_v36 = vpop.f32.mrb[48].mxu0 }
 0x323   : > { %v12480_v37 = vpop.f32.mrb[17].mxu1  ;;  %v12482_v38 = vpop.f32.mrb[49].mxu0 }
 0x324   : > { %v12484_v39 = vpop.f32.mrb[18].mxu1  ;;  %v12486_v40 = vpop.f32.mrb[50].mxu0 }
 0x325   : > { %v12492_v43 = vpop.f32.mrb[19].mxu1  ;;  %v12494_v46 = vpop.f32.mrb[51].mxu0 }
 0x32a   : > { %v12500_v51 = vpop.f32.mrb[20].mxu1  ;;  %v12502_v52 = vpop.f32.mrb[52].mxu0 }
 0x32b   : > { %15956 = vst [vmem:[#allocation30_spill] sm:$0xff] %v12502_v52  ;;  %v12504_v53 = vpop.f32.mrb[21].mxu1  ;;  %v12506_v58 = vpop.f32.mrb[53].mxu0 }
 0x32c   : > { %15957 = vst [vmem:[#allocation31_spill] sm:$0xff] %v12506_v58  ;;  %v12508_v59 = vpop.f32.mrb[22].mxu1  ;;  %v12510_v12 = vpop.f32.mrb[54].mxu0 }
 0x32d   : > { %15958 = vst [vmem:[#allocation32_spill] sm:$0xff] %v12510_v12  ;;  %v12516_v31 = vpop.f32.mrb[23].mxu1  ;;  %v12518_v48 = vpop.f32.mrb[55].mxu0 }
 0x32e   : > { %15959 = vst [vmem:[#allocation33_spill] sm:$0xff] %v12518_v48 }
 0x332   : > { %v12524_v5 = vpop.f32.mrb[24].mxu1  ;;  %v12526_v25 = vpop.f32.mrb[56].mxu0 }
 0x333   : > { %15960 = vst [vmem:[#allocation34_spill] sm:$0xff] %v12524_v5  ;;  %15961 = vst [vmem:[#allocation35_spill] sm:$0xff] %v12526_v25  ;;  %v12528_v24 = vpop.f32.mrb[25].mxu1  ;;  %v12530_v45 = vpop.f32.mrb[57].mxu0 }
 0x334   : > { %15962 = vst [vmem:[#allocation36_spill] sm:$0xff] %v12528_v24  ;;  %15963 = vst [vmem:[#allocation37_spill] sm:$0xff] %v12530_v45  ;;  %v12532_v44 = vpop.f32.mrb[26].mxu1  ;;  %v12534_v54 = vpop.f32.mrb[58].mxu0 }
 0x335   : > { %15964 = vst [vmem:[#allocation38_spill] sm:$0xff] %v12532_v44  ;;  %15965 = vst [vmem:[#allocation39_spill] sm:$0xff] %v12534_v54  ;;  %v12540_v57 = vpop.f32.mrb[27].mxu1  ;;  %v12542_v61 = vpop.f32.mrb[59].mxu0 }
 0x336   : > { %15966 = vst [vmem:[#allocation40_spill] sm:$0xff] %v12540_v57  ;;  %15967 = vst [vmem:[#allocation41_spill] sm:$0xff] %v12542_v61 }
 0x33a   : > { %v12548_v0 = vpop.f32.mrb[28].mxu1  ;;  %v12550_v1 = vpop.f32.mrb[60].mxu0 }
 0x33b   : > { %15968 = vst [vmem:[#allocation42_spill] sm:$0xff] %v12548_v0  ;;  %15969 = vst [vmem:[#allocation43_spill] sm:$0xff] %v12550_v1  ;;  %v12552_v2 = vpop.f32.mrb[29].mxu1  ;;  %v12554_v55 = vpop.f32.mrb[61].mxu0 }
 0x33c   : > { %15970 = vst [vmem:[#allocation44_spill] sm:$0xff] %v12552_v2  ;;  %15971 = vst [vmem:[#allocation45_spill] sm:$0xff] %v12554_v55  ;;  %v12556_v30 = vpop.f32.mrb[30].mxu1  ;;  %v12558_v56 = vpop.f32.mrb[62].mxu0 }
 0x33d   : > { %15972 = vst [vmem:[#allocation46_spill] sm:$0xff] %v12556_v30  ;;  %15973 = vst [vmem:[#allocation47_spill] sm:$0xff] %v12558_v56  ;;  %v12564_v13 = vpop.f32.mrb[31].mxu1  ;;  %v12566_v63 = vpop.f32.mrb[63].mxu0 }
 0x33e   : > { %15974 = vst [vmem:[#allocation48_spill] sm:$0xff] %v12564_v13  ;;  %15975 = vst [vmem:[#allocation49_spill] sm:$0xff] %v12566_v63 }
 0x342   : > { %v1919_v50 = vpop.f32.mrb[32].mxu1 }
 0x343   : > { %v2257_v41 = vpop.f32.mrb[64].mxu0  ;;  %v1921_v47 = vpop.f32.mrb[33].mxu1 }
 0x344   : > { %v2259_v28 = vpop.f32.mrb[65].mxu0  ;;  %v1923_v34 = vpop.f32.mrb[34].mxu1 }
 0x345   : > { %v1998_v27 = vpack.c.bf16 %v1923_v34, %v1919_v50  ;;  %v2261_v4 = vpop.f32.mrb[66].mxu0  ;;  %v1925_v33 = vpop.f32.mrb[35].mxu1 }
 0x346   : > { %v2336_v14 = vpack.c.bf16 %v2261_v4, %v2257_v41  ;;  %v1999_v62 = vpack.c.bf16 %v1925_v33, %v1921_v47  ;;  %v2263_v18 = vpop.f32.mrb[67].mxu0 }
 0x347   : > { %v2337_v60 = vpack.c.bf16 %v2263_v18, %v2259_v28 }
 0x348   : > { %2743 = vmatprep.subr.bf16.mxu0 %v1999_v62 }
 0x349   : > { %2744 = vmatpush1.bf16.msra.mxu0 %v1998_v27 }
 0x34a   : > { %v1929_v11 = vpop.f32.mrb[36].mxu1  ;;  %2745 = vmatprep.subr.bf16.mxu0 %v2337_v60 }
 0x34b   : > { %v2267_v49 = vpop.f32.mrb[68].mxu0  ;;  %v1931_v17 = vpop.f32.mrb[37].mxu1 }
 0x34c   : > { %v2269_v1 = vpop.f32.mrb[69].mxu0  ;;  %v1933_v42 = vpop.f32.mrb[38].mxu1 }
 0x34d   : > { %v2000_v56 = vpack.c.bf16 %v1933_v42, %v1929_v11  ;;  %v2271_v55 = vpop.f32.mrb[70].mxu0  ;;  %v1935_v63 = vpop.f32.mrb[39].mxu1  ;;  %2746 = vmatpush1.bf16.msra.mxu0 %v2336_v14 }
 0x34e   : > { %v2338_v0 = vpack.c.bf16 %v2271_v55, %v2267_v49  ;;  %v2001_v34 = vpack.c.bf16 %v1935_v63, %v1931_v17  ;;  %v2273_v50 = vpop.f32.mrb[71].mxu0 }
 0x34f   : > { %v2339_v30 = vpack.c.bf16 %v2273_v50, %v2269_v1 }
 0x350   : > { %2804 = vmatprep.subr.bf16.mxu1 %v2001_v34 }
 0x351   : > { %2805 = vmatpush1.bf16.msra.mxu1 %v2000_v56 }
 0x352   : > { %v12572_v33 = vpop.f32.mrb[40].mxu1  ;;  %2806 = vmatprep.subr.bf16.mxu1 %v2339_v30 }
 0x353   : > { %v12574_v18 = vpop.f32.mrb[72].mxu0  ;;  %v12576_v60 = vpop.f32.mrb[41].mxu1 }
 0x354   : > { %v12578_v27 = vpop.f32.mrb[73].mxu0  ;;  %v12580_v28 = vpop.f32.mrb[42].mxu1 }
 0x355   : > { %v12584_v14 = vpop.f32.mrb[74].mxu0  ;;  %v12586_v17 = vpop.f32.mrb[43].mxu1  ;;  %2807 = vmatpush1.bf16.msra.mxu1 %v2338_v0 }
 0x356   : > { %v12592_v47 = vpop.f32.mrb[75].mxu0 }
 0x35a   : > { %v12596_v49 = vpop.f32.mrb[44].mxu1 }
 0x35b   : > { %v12598_v4 = vpop.f32.mrb[76].mxu0  ;;  %v12600_v55 = vpop.f32.mrb[45].mxu1 }
 0x35c   : > { %v12602_v56 = vpop.f32.mrb[77].mxu0  ;;  %v12604_v62 = vpop.f32.mrb[46].mxu1 }
 0x35d   : > { %v12608_v0 = vpop.f32.mrb[78].mxu0  ;;  %v12610_v1 = vpop.f32.mrb[47].mxu1 }
 0x35e   : > { %v12616_v41 = vpop.f32.mrb[79].mxu0 }
 0x362   : > { %v12620_v11 = vpop.f32.mrb[48].mxu1 }
 0x363   : > { %v12622_v42 = vpop.f32.mrb[80].mxu0  ;;  %v12624_v63 = vpop.f32.mrb[49].mxu1 }
 0x364   : > { %15976 = vst [vmem:[#allocation50_spill] sm:$0xff] %v12622_v42  ;;  %v12626_v2 = vpop.f32.mrb[81].mxu0  ;;  %v12628_v13 = vpop.f32.mrb[50].mxu1 }
 0x365   : > { %15977 = vst [vmem:[#allocation51_spill] sm:$0xff] %v12626_v2  ;;  %v12632_v25 = vpop.f32.mrb[82].mxu0  ;;  %v12634_v50 = vpop.f32.mrb[51].mxu1 }
 0x366   : > { %15978 = vst [vmem:[#allocation52_spill] sm:$0xff] %v12632_v25  ;;  %v12640_v45 = vpop.f32.mrb[83].mxu0 }
 0x367   : > { %15979 = vst [vmem:[#allocation53_spill] sm:$0xff] %v12640_v45 }
 0x36a   : > { %v12644_v5 = vpop.f32.mrb[52].mxu1 }
 0x36b   : > { %15980 = vst [vmem:[#allocation54_spill] sm:$0xff] %v12644_v5  ;;  %v12646_v44 = vpop.f32.mrb[84].mxu0  ;;  %v12648_v34 = vpop.f32.mrb[53].mxu1 }
 0x36c   : > { %15981 = vst [vmem:[#allocation55_spill] sm:$0xff] %v12646_v44  ;;  %15982 = vst [vmem:[#allocation56_spill] sm:$0xff] %v12648_v34  ;;  %v12650_v24 = vpop.f32.mrb[85].mxu0  ;;  %v12652_v57 = vpop.f32.mrb[54].mxu1 }
 0x36d   : > { %15983 = vst [vmem:[#allocation57_spill] sm:$0xff] %v12650_v24  ;;  %15984 = vst [vmem:[#allocation58_spill] sm:$0xff] %v12652_v57  ;;  %v12656_v52 = vpop.f32.mrb[86].mxu0  ;;  %v12658_v54 = vpop.f32.mrb[55].mxu1 }
 0x36e   : > { %15985 = vst [vmem:[#allocation59_spill] sm:$0xff] %v12656_v52  ;;  %15986 = vst [vmem:[#allocation60_spill] sm:$0xff] %v12658_v54  ;;  %v12664_v42 = vpop.f32.mrb[87].mxu0 }
 0x36f   : > { %15987 = vst [vmem:[#allocation61_spill] sm:$0xff] %v12664_v42 }
 0x372   : > { %v12668_v58 = vpop.f32.mrb[56].mxu1 }
 0x373   : > { %15988 = vst [vmem:[#allocation62_spill] sm:$0xff] %v12668_v58  ;;  %v12670_v48 = vpop.f32.mrb[88].mxu0  ;;  %v12672_v30 = vpop.f32.mrb[57].mxu1 }
 0x374   : > { %15989 = vst [vmem:[#allocation63_spill] sm:$0xff] %v12670_v48  ;;  %15990 = vst [vmem:[#allocation64_spill] sm:$0xff] %v12672_v30  ;;  %v12674_v5 = vpop.f32.mrb[89].mxu0  ;;  %v12676_v57 = vpop.f32.mrb[58].mxu1 }
 0x375   : > { %15991 = vst [vmem:[#allocation65_spill] sm:$0xff] %v12674_v5  ;;  %15992 = vst [vmem:[#allocation66_spill] sm:$0xff] %v12676_v57  ;;  %v12680_v44 = vpop.f32.mrb[90].mxu0  ;;  %v12682_v12 = vpop.f32.mrb[59].mxu1 }
 0x376   : > { %15993 = vst [vmem:[#allocation67_spill] sm:$0xff] %v12680_v44  ;;  %15994 = vst [vmem:[#allocation68_spill] sm:$0xff] %v12682_v12  ;;  %v12688_v24 = vpop.f32.mrb[91].mxu0  ;;  %v16001_v44 = vpack.c.bf16 %v12444_v15, %v12432_v7  ;;  %v16005_v7 = vpack.c.bf16 %v12438_v10, %v12430_v6  ;;  %v16008_v6 = vpack.c.bf16 %v12580_v28, %v12572_v33 }
 0x377   : > { %15995 = vst [vmem:[#allocation69_spill] sm:$0xff] %v12688_v24  ;;  %v16009_v10 = vpack.c.bf16 %v12460_v23, %v12452_v19  ;;  %v16014_v23 = vpack.c.bf16 %v12610_v1, %v12600_v55  ;;  %v16018_v28 = vpack.c.bf16 %v12608_v0, %v12598_v4  ;;  %v16027_v4 = vld [vmem:[#allocation51_spill] sm:$0xff]  ;;  %v16033_v1 = vld [vmem:[#allocation50_spill] sm:$0xff] }
 0x37a   : > { %v12692_v34 = vpop.f32.mrb[60].mxu1 }
 0x37b   : > { %15996 = vst [vmem:[#allocation70_spill] sm:$0xff] %v12692_v34  ;;  %v12694_v54 = vpop.f32.mrb[92].mxu0  ;;  %v12696_v61 = vpop.f32.mrb[61].mxu1 }
 0x37c   : > { %15997 = vst [vmem:[#allocation71_spill] sm:$0xff] %v12694_v54  ;;  %v12698_v58 = vpop.f32.mrb[93].mxu0  ;;  %v12700_v57 = vpop.f32.mrb[62].mxu1 }
 0x37d   : > { %15998 = vst [vmem:[#allocation72_spill] sm:$0xff] %v12698_v58  ;;  %15999 = vst [vmem:[#allocation73_spill] sm:$0xff] %v12700_v57  ;;  %v12704_v48 = vpop.f32.mrb[94].mxu0  ;;  %v12706_v52 = vpop.f32.mrb[63].mxu1  ;;  %v12716_v57 = vld [vmem:[#allocation12] sm:$0xff]  }
 0x37e   : > { %16000 = vst [vmem:[#allocation74_spill] sm:$0xff] %v12704_v48  ;;  %v12712_v5 = vpop.f32.mrb[95].mxu0 }
 0x383   : > { %v2595_v30 = vpop.f32.mrb[64].mxu1 }
 0x384   : > { %v2597_v12 = vpop.f32.mrb[65].mxu1 }
 0x385   : > { %v2599_v2 = vpop.f32.mrb[66].mxu1 }
 0x386   : > { %v2674_v45 = vpack.c.bf16 %v2599_v2, %v2595_v30  ;;  %v2601_v25 = vpop.f32.mrb[67].mxu1  ;;  %v16004_v2 = vpack.c.bf16 %v12446_v16, %v12434_v8  ;;  %v16021_v30 = vpack.c.bf16 %v12486_v40, %v12478_v36  ;;  %v16025_v36 = vpack.c.bf16 %v12508_v59, %v12500_v51  ;;  %v16035_v51 = vld [vmem:[#allocation32_spill] sm:$0xff]  ;;  %v16036_v59 = vld [vmem:[#allocation30_spill] sm:$0xff] }
 0x387   : > { %v2675_v34 = vpack.c.bf16 %v2601_v25, %v2597_v12  ;;  %v16002_v12 = vpack.c.bf16 %v12436_v9, %v12428_v3  ;;  %v16003_v25 = vmov 0   ;;  %v16007_v3 = vpack.c.bf16 %v12468_v29, %v12456_v21 }
 0x388   : > { %v16010_v21 = vpack.c.bf16 %v12592_v47, %v12578_v27  ;;  %v16011_v29 = vpack.c.bf16 %v12470_v32, %v12458_v22  ;;  %v16015_v27 = vpack.c.bf16 %v12604_v62, %v12596_v49  ;;  %v16030_v62 = vld [vmem:[#allocation31_spill] sm:$0xff] }
 0x389   : > { %2747 = vmatprep.subr.bf16.mxu0 %v2675_v34 }
 0x38a   : > { %2748 = vmatpush1.bf16.msra.mxu0 %v2674_v45 }
 0x38b   : > { %v2605_v42 = vpop.f32.mrb[68].mxu1  ;;  %2861 = vmatprep.subr.bf16.mxu0 %v16001_v44  ;;  %v16012_v44 = vpack.c.bf16 %v12584_v14, %v12574_v18  ;;  %v16019_v14 = vpack.c.bf16 %v12484_v39, %v12476_v35  ;;  %v16022_v35 = vpack.c.bf16 %v12634_v50, %v12624_v63  ;;  %v16024_v39 = vpack.c.bf16 %v12628_v13, %v12620_v11  ;;  %v16032_v11 = vld [vmem:[#allocation52_spill] sm:$0xff] }
 0x38c   : > { %v2607_v54 = vpop.f32.mrb[69].mxu1  ;;  %v16034_v34 = vpack.c.bf16 %v16032_v11, %v16033_v1  ;;  %v16037_v50 = vpack.c.bf16 %v16035_v51, %v16036_v59  ;;  %v16078_v11 = vld [vmem:[#allocation45_spill] sm:$0xff]  ;;  %v16081_v51 = vld [vmem:[#allocation63_spill] sm:$0xff] }
 0x38d   : > { %v2609_v48 = vpop.f32.mrb[70].mxu1  ;;  %10048 = vmatmul.mubr.msk.bf16.vlgmr.msra.gmra.mrb[96].mxu0 %vm2735_vm0, %v12716_v57 }
 0x38e   : > { %v2676_v24 = vpack.c.bf16 %v2609_v48, %v2605_v42  ;;  %v2611_v58 = vpop.f32.mrb[71].mxu1  ;;  %2862 = vmatpush1.bf16.msra.mxu0 %v16002_v12  ;;  %2893 = vmatprep.mubr.bf16.mxu0 %v16003_v25  ;;  %v16006_v48 = vpack.c.bf16 %v12586_v17, %v12576_v60 }
 0x38f   : > { %v2677_v45 = vpack.c.bf16 %v2611_v58, %v2607_v54  ;;  %2863 = vmatprep.subr.bf16.mxu0 %v16004_v2  ;;  %v16013_v54 = vpack.c.bf16 %v12462_v26, %v12454_v20  ;;  %v16016_v20 = vpack.c.bf16 %v12616_v41, %v12602_v56  ;;  %v16017_v26 = vpack.c.bf16 %v12492_v43, %v12480_v37  ;;  %v16029_v56 = vld [vmem:[#allocation33_spill] sm:$0xff]  ;;  %v16039_v2 = vld [vmem:[#allocation56_spill] sm:$0xff] }
 0x390   : > { %v16020_v41 = vpack.c.bf16 %v12494_v46, %v12482_v38  ;;  %v16023_v38 = vpack.c.bf16 %v12516_v31, %v12504_v53  ;;  %v16026_v46 = vld [vmem:[#allocation53_spill] sm:$0xff]  ;;  %v16031_v53 = vpack.c.bf16 %v16029_v56, %v16030_v62  ;;  %v16072_v56 = vld [vmem:[#allocation42_spill] sm:$0xff] }
 0x391   : > { %2808 = vmatprep.subr.bf16.mxu1 %v2677_v45  ;;  %v16028_v55 = vpack.c.bf16 %v16026_v46, %v16027_v4  ;;  %v16038_v45 = vld [vmem:[#allocation60_spill] sm:$0xff]  ;;  %v16069_v46 = vld [vmem:[#allocation62_spill] sm:$0xff] }
 0x392   : > { %2809 = vmatpush1.bf16.msra.mxu1 %v2676_v24  ;;  %2864 = vmatpush1.bf16.msra.mxu0 %v16005_v7  ;;  %v16040_v7 = vpack.c.bf16 %v16038_v45, %v16039_v2  ;;  %v16086_v2 = vpack.c.bf16 %v12706_v52, %v12696_v61  ;;  %v11047_v61 = vld [vmem:[#allocation15 + $0x10] ss:$8 sps:$4 sm:$0xff]  }
 0x393   : > { %v2615_v15 = vpop.f32.mrb[72].mxu1  ;;  %2865 = vmatprep.subr.bf16.mxu0 %v16006_v48  ;;  %2922 = vmatprep.subr.bf16.mxu1 %v16007_v3  ;;  %v16042_v48 = vld [vmem:[#allocation54_spill] sm:$0xff] }
 0x394   : > { %v2617_v9 = vpop.f32.mrb[73].mxu1 }
 0x395   : > { %v2619_v58 = vpop.f32.mrb[74].mxu1  ;;  %10049 = vmatmul.mubr.msk.bf16.vlgmr.msra.gmra.mrb[96].mxu1 %vm2735_vm0, %v12716_v57 }
 0x396   : > { %v2678_v8 = vpack.c.bf16 %v2619_v58, %v2615_v15  ;;  %v2621_v16 = vpop.f32.mrb[75].mxu1  ;;  %2866 = vmatpush1.bf16.msra.mxu0 %v16008_v6  ;;  %2923 = vmatpush1.bf16.msra.mxu1 %v16009_v10  ;;  %v16041_v15 = vld [vmem:[#allocation58_spill] sm:$0xff]  ;;  %v16044_v58 = vld [vmem:[#allocation61_spill] sm:$0xff]  ;;  %v16047_v6 = vld [vmem:[#allocation40_spill] sm:$0xff] }
 0x397   : > { %v2679_v24 = vpack.c.bf16 %v2621_v16, %v2617_v9  ;;  %2867 = vmatprep.subr.bf16.mxu0 %v16010_v21  ;;  %2924 = vmatprep.subr.bf16.mxu1 %v16011_v29  ;;  %v16043_v3 = vpack.c.bf16 %v16041_v15, %v16042_v48  ;;  %v16048_v10 = vld [vmem:[#allocation36_spill] sm:$0xff]  ;;  %v16087_v15 = vld [vmem:[#allocation73_spill] sm:$0xff]  ;;  %v16088_v48 = vld [vmem:[#allocation70_spill] sm:$0xff] }
 0x398   : > { %2954 = vmatprep.mubr.bf16.mxu1 %v16003_v25 }
 0x39a   : > { %2868 = vmatpush1.bf16.msra.mxu0 %v16012_v44  ;;  %2925 = vmatpush1.bf16.msra.mxu1 %v16013_v54 }
 0x39b   : > { %v2625_v19 = vpop.f32.mrb[76].mxu1  ;;  %2869 = vmatprep.subr.bf16.mxu0 %v2679_v24  ;;  %2926 = vmatprep.subr.bf16.mxu1 %v16014_v23  ;;  %v16049_v24 = vpack.c.bf16 %v16047_v6, %v16048_v10  ;;  %v16051_v23 = vld [vmem:[#allocation55_spill] sm:$0xff]  ;;  %v16092_v6 = vld [vmem:[#allocation74_spill] sm:$0xff] }
 0x39c   : > { %v2627_v33 = vpop.f32.mrb[77].mxu1  ;;  %v16093_v10 = vld [vmem:[#allocation71_spill] sm:$0xff] }
 0x39d   : > { %v2629_v60 = vpop.f32.mrb[78].mxu1  ;;  %v16094_v52 = vpack.c.bf16 %v16092_v6, %v16093_v10  ;;  %v11136_v6 = vld [vmem:[#allocation15 + $0x1f4] ss:$8 sps:$4 sm:$0xff]   ;;  %v11134_v10 = vld [vmem:[#allocation15 + $0x1f0] ss:$8 sps:$4 sm:$0xff]  }
 0x39e   : > { %v2680_v22 = vpack.c.bf16 %v2629_v60, %v2625_v19  ;;  %v2631_v32 = vpop.f32.mrb[79].mxu1  ;;  %2870 = vmatpush1.bf16.msra.mxu0 %v2678_v8  ;;  %2927 = vmatpush1.bf16.msra.mxu1 %v16015_v27  ;;  %v16045_v8 = vld [vmem:[#allocation57_spill] sm:$0xff]  ;;  %v16050_v19 = vld [vmem:[#allocation59_spill] sm:$0xff]  ;;  %v16053_v60 = vld [vmem:[#allocation38_spill] sm:$0xff] }
 0x39f   : > { %v2681_v18 = vpack.c.bf16 %v2631_v32, %v2627_v33  ;;  %2928 = vmatprep.subr.bf16.mxu1 %v16016_v20  ;;  %2983 = vmatprep.subr.bf16.mxu0 %v16017_v26  ;;  %v16046_v16 = vpack.c.bf16 %v16044_v58, %v16045_v8  ;;  %v16052_v33 = vpack.c.bf16 %v16050_v19, %v16051_v23  ;;  %v16057_v20 = vld [vmem:[#allocation37_spill] sm:$0xff]  ;;  %v16090_v58 = vld [vmem:[#allocation72_spill] sm:$0xff] }
 0x3a0   : > { %v16091_v8 = vpack.c.bf16 %v12712_v5, %v16090_v58  ;;  %v11053_v5 = vld [vmem:[#allocation15 + $0x20] ss:$8 sps:$4 sm:$0xff]   ;;  %v11050_v19 = vld [vmem:[#allocation15 + $0x110] ss:$8 sps:$4 sm:$0xff]   ;;  %v11130_v58 = vld [vmem:[#allocation15 + $0x1e4] ss:$8 sps:$4 sm:$0xff]  }
 0x3a1   : > { %10050 = vmatmul.mubr.msk.bf16.vlgmr.msra.gmra.mrb[100].mxu0 %vm2735_vm0, %v12716_v57  ;;  %v11059_v23 = vld [vmem:[#allocation15 + $0x30] ss:$8 sps:$4 sm:$0xff]  }
 0x3a2   : > { %2929 = vmatpush1.bf16.msra.mxu1 %v16018_v28  ;;  %2984 = vmatpush1.bf16.msra.mxu0 %v16019_v14  ;;  %v16059_v28 = vld [vmem:[#allocation39_spill] sm:$0xff] }
 0x3a3   : > { %v2635_v17 = vpop.f32.mrb[80].mxu1  ;;  %2930 = vmatprep.subr.bf16.mxu1 %v2681_v18  ;;  %2985 = vmatprep.subr.bf16.mxu0 %v16020_v41  ;;  %v16056_v18 = vld [vmem:[#allocation41_spill] sm:$0xff]  ;;  %v16060_v14 = vld [vmem:[#allocation35_spill] sm:$0xff] }
 0x3a4   : > { %v2637_v42 = vpop.f32.mrb[81].mxu1  ;;  %3015 = vmatprep.mubr.bf16.mxu0 %v16003_v25  ;;  %v16058_v26 = vpack.c.bf16 %v16056_v18, %v16057_v20  ;;  %v11073_v18 = vld [vmem:[#allocation15 + $0x54] ss:$8 sps:$4 sm:$0xff]   ;;  %v11062_v20 = vld [vmem:[#allocation15 + $0x130] ss:$8 sps:$4 sm:$0xff]  }
 0x3a5   : > { %v2639_v37 = vpop.f32.mrb[82].mxu1 }
 0x3a6   : > { %v2682_v43 = vpack.c.bf16 %v2639_v37, %v2635_v17  ;;  %v2641_v47 = vpop.f32.mrb[83].mxu1  ;;  %2931 = vmatpush1.bf16.msra.mxu1 %v2680_v22  ;;  %2986 = vmatpush1.bf16.msra.mxu0 %v16021_v30  ;;  %v16054_v22 = vld [vmem:[#allocation34_spill] sm:$0xff]  ;;  %v16061_v17 = vpack.c.bf16 %v16059_v28, %v16060_v14  ;;  %v16063_v37 = vld [vmem:[#allocation64_spill] sm:$0xff] }
 0x3a7   : > { %v2683_v49 = vpack.c.bf16 %v2641_v47, %v2637_v42  ;;  %2987 = vmatprep.subr.bf16.mxu0 %v16022_v35  ;;  %3044 = vmatprep.subr.bf16.mxu1 %v16023_v38  ;;  %v16055_v32 = vpack.c.bf16 %v16053_v60, %v16054_v22  ;;  %v16062_v42 = vld [vmem:[#allocation68_spill] sm:$0xff] }
 0x3a8   : > { %v16065_v47 = vld [vmem:[#allocation48_spill] sm:$0xff] }
 0x3a9   : > { %10051 = vmatmul.mubr.msk.bf16.vlgmr.msra.gmra.mrb[100].mxu1 %vm2735_vm0, %v12716_v57  ;;  %v16066_v30 = vld [vmem:[#allocation44_spill] sm:$0xff] }
 0x3aa   : > { %2988 = vmatpush1.bf16.msra.mxu0 %v16024_v39  ;;  %3045 = vmatpush1.bf16.msra.mxu1 %v16025_v36  ;;  %v11067_v60 = vld [vmem:[#allocation15 + $0x44] ss:$8 sps:$4 sm:$0xff]   ;;  %v11056_v22 = vld [vmem:[#allocation15 + $0x120] ss:$8 sps:$4 sm:$0xff]  }
 0x3ab   : > { %v2645_v40 = vpop.f32.mrb[84].mxu1  ;;  %2989 = vmatprep.subr.bf16.mxu0 %v16028_v55  ;;  %3046 = vmatprep.subr.bf16.mxu1 %v16031_v53  ;;  %v16071_v55 = vld [vmem:[#allocation46_spill] sm:$0xff]  ;;  %v11079_v28 = vld [vmem:[#allocation15 + $0x64] ss:$8 sps:$4 sm:$0xff]   ;;  %v11068_v14 = vld [vmem:[#allocation15 + $0x140] ss:$8 sps:$4 sm:$0xff]  }
 0x3ac   : > { %v2647_v31 = vpop.f32.mrb[85].mxu1  ;;  %3076 = vmatprep.mubr.bf16.mxu1 %v16003_v25  ;;  %v16073_v62 = vpack.c.bf16 %v16071_v55, %v16072_v56  ;;  %v11092_v55 = vld [vmem:[#allocation15 + $0x180] ss:$8 sps:$4 sm:$0xff]  }
 0x3ad   : > { %v2649_v63 = vpop.f32.mrb[86].mxu1  ;;  %v11101_v56 = vld [vmem:[#allocation15 + $0xa0] ss:$8 sps:$4 sm:$0xff]  }
 0x3ae   : > { %v2684_v0 = vpack.c.bf16 %v2649_v63, %v2645_v40  ;;  %v2651_v13 = vpop.f32.mrb[87].mxu1  ;;  %2990 = vmatpush1.bf16.msra.mxu0 %v16034_v34  ;;  %3047 = vmatpush1.bf16.msra.mxu1 %v16037_v50  ;;  %v16068_v40 = vld [vmem:[#allocation66_spill] sm:$0xff]  ;;  %v16075_v63 = vld [vmem:[#allocation65_spill] sm:$0xff]  ;;  %v16080_v34 = vld [vmem:[#allocation67_spill] sm:$0xff] }
 0x3af   : > { %v2685_v12 = vpack.c.bf16 %v2651_v13, %v2647_v31  ;;  %2991 = vmatprep.subr.bf16.mxu0 %v2683_v49  ;;  %3048 = vmatprep.subr.bf16.mxu1 %v16040_v7  ;;  %v16067_v49 = vpack.c.bf16 %v16065_v47, %v16066_v30  ;;  %v16070_v4 = vpack.c.bf16 %v16068_v40, %v16069_v46  ;;  %v16074_v31 = vld [vmem:[#allocation69_spill] sm:$0xff]  ;;  %v16083_v50 = vld [vmem:[#allocation47_spill] sm:$0xff] }
 0x3b0   : > { %v16077_v13 = vld [vmem:[#allocation49_spill] sm:$0xff]  ;;  %v16082_v59 = vpack.c.bf16 %v16080_v34, %v16081_v51  ;;  %v11112_v34 = vld [vmem:[#allocation15 + $0x1b4] ss:$8 sps:$4 sm:$0xff]  }
 0x3b1   : > { %v16079_v1 = vpack.c.bf16 %v16077_v13, %v16078_v11  ;;  %v11043_v7 = vld [vmem:[#allocation15 + $0x4] ss:$8 sps:$4 sm:$0xff]   ;;  %v11095_v40 = vld [vmem:[#allocation15 + $0x90] ss:$8 sps:$4 sm:$0xff]   ;;  %v11104_v11 = vld [vmem:[#allocation15 + $0x1a0] ss:$8 sps:$4 sm:$0xff]  }
 0x3b2   : > { %2992 = vmatpush1.bf16.msra.mxu0 %v2682_v43  ;;  %3049 = vmatpush1.bf16.msra.mxu1 %v16043_v3  ;;  %v16064_v43 = vpack.c.bf16 %v16062_v42, %v16063_v37  ;;  %v16089_v3 = vpack.c.bf16 %v16087_v15, %v16088_v48  ;;  %v11085_v42 = vld [vmem:[#allocation15 + $0x74] ss:$8 sps:$4 sm:$0xff]   ;;  %v11074_v37 = vld [vmem:[#allocation15 + $0x150] ss:$8 sps:$4 sm:$0xff]   ;;  %v11082_v47 = vld [vmem:[#allocation15 + $0x164] ss:$8 sps:$4 sm:$0xff]  }
 0x3b3   : > { %v2655_v9 = vpop.f32.mrb[88].mxu1  ;;  %3050 = vmatprep.subr.bf16.mxu1 %v16046_v16  ;;  %3105 = vmatprep.subr.bf16.mxu0 %v16049_v24  ;;  %v11049_v16 = vld [vmem:[#allocation15 + $0x14] ss:$8 sps:$4 sm:$0xff]   ;;  %v11046_v24 = vld [vmem:[#allocation15 + $0x104] ss:$8 sps:$4 sm:$0xff]  }
 0x3b4   : > { %v2657_v21 = vpop.f32.mrb[89].mxu1  ;;  %v11091_v30 = vld [vmem:[#allocation15 + $0x84] ss:$8 sps:$4 sm:$0xff]   ;;  %v11121_v51 = vld [vmem:[#allocation15 + $0xd4] ss:$8 sps:$4 sm:$0xff]  }
 0x3b5   : > { %v2659_v29 = vpop.f32.mrb[90].mxu1  ;;  %10052 = vmatmul.mubr.msk.bf16.vlgmr.msra.gmra.mrb[104].mxu0 %vm2735_vm0, %v12716_v57  ;;  %v11094_v46 = vld [vmem:[#allocation15 + $0x184] ss:$8 sps:$4 sm:$0xff]   ;;  %v11124_v15 = vld [vmem:[#allocation15 + $0x1d4] ss:$8 sps:$4 sm:$0xff]  }
 0x3b6   : > { %v2686_v44 = vpack.c.bf16 %v2659_v29, %v2655_v9  ;;  %v2661_v54 = vpop.f32.mrb[91].mxu1  ;;  %3051 = vmatpush1.bf16.msra.mxu1 %v16052_v33  ;;  %3106 = vmatpush1.bf16.msra.mxu0 %v16055_v32  ;;  %v11041_v9 = vld [vmem:[#allocation15] ss:$8 sps:$4 sm:$0xff]   ;;  %v11058_v33 = vld [vmem:[#allocation15 + $0x124] ss:$8 sps:$4 sm:$0xff]  }
 0x3b7   : > { %v2687_v27 = vpack.c.bf16 %v2661_v54, %v2657_v21  ;;  %3052 = vmatprep.subr.bf16.mxu1 %v2685_v12  ;;  %3107 = vmatprep.subr.bf16.mxu0 %v16058_v26  ;;  %v16084_v12 = vld [vmem:[#allocation43_spill] sm:$0xff]  ;;  %v11055_v21 = vld [vmem:[#allocation15 + $0x24] ss:$8 sps:$4 sm:$0xff]  }
 0x3b8   : > { %3137 = vmatprep.mubr.bf16.mxu0 %v16003_v25  ;;  %v16085_v45 = vpack.c.bf16 %v16083_v50, %v16084_v12  ;;  %v11044_v29 = vld [vmem:[#allocation15 + $0x100] ss:$8 sps:$4 sm:$0xff]   ;;  %v11061_v54 = vld [vmem:[#allocation15 + $0x34] ss:$8 sps:$4 sm:$0xff]   ;;  %v11070_v26 = vld [vmem:[#allocation15 + $0x144] ss:$8 sps:$4 sm:$0xff]  }
 0x3b9   : > { %v11065_v32 = vld [vmem:[#allocation15 + $0x40] ss:$8 sps:$4 sm:$0xff]   ;;  %v11115_v13 = vld [vmem:[#allocation15 + $0xc4] ss:$8 sps:$4 sm:$0xff]   ;;  %v11119_v50 = vld [vmem:[#allocation15 + $0xd0] ss:$8 sps:$4 sm:$0xff]  }
 0x3ba   : > { %3053 = vmatpush1.bf16.msra.mxu1 %v2684_v0  ;;  %3108 = vmatpush1.bf16.msra.mxu0 %v16061_v17  ;;  %v16076_v0 = vpack.c.bf16 %v16074_v31, %v16075_v63  ;;  %v11077_v17 = vld [vmem:[#allocation15 + $0x60] ss:$8 sps:$4 sm:$0xff]   ;;  %v11098_v31 = vld [vmem:[#allocation15 + $0x190] ss:$8 sps:$4 sm:$0xff]   ;;  %v11118_v12 = vld [vmem:[#allocation15 + $0x1c4] ss:$8 sps:$4 sm:$0xff]  }
 0x3bb   : > { %v2665_v41 = vpop.f32.mrb[92].mxu1  ;;  %3109 = vmatprep.subr.bf16.mxu0 %v16064_v43  ;;  %3166 = vmatprep.subr.bf16.mxu1 %v16067_v49  ;;  %v11083_v43 = vld [vmem:[#allocation15 + $0x70] ss:$8 sps:$4 sm:$0xff]   ;;  %v11080_v49 = vld [vmem:[#allocation15 + $0x160] ss:$8 sps:$4 sm:$0xff]  }
 0x3bc   : > { %v2667_v35 = vpop.f32.mrb[93].mxu1  ;;  %v11107_v63 = vld [vmem:[#allocation15 + $0xb0] ss:$8 sps:$4 sm:$0xff]   ;;  %v11133_v48 = vld [vmem:[#allocation15 + $0xf4] ss:$8 sps:$4 sm:$0xff]  }
 0x3bd   : > { %v2669_v38 = vpop.f32.mrb[94].mxu1  ;;  %10053 = vmatmul.mubr.msk.bf16.vlgmr.msra.gmra.mrb[104].mxu1 %vm2735_vm0, %v12716_v57 }
 0x3be   : > { %v2688_v39 = vpack.c.bf16 %v2669_v38, %v2665_v41  ;;  %v2671_v36 = vpop.f32.mrb[95].mxu1  ;;  %3110 = vmatpush1.bf16.msra.mxu0 %v16070_v4  ;;  %3167 = vmatpush1.bf16.msra.mxu1 %v16073_v62  ;;  %v11076_v41 = vld [vmem:[#allocation15 + $0x154] ss:$8 sps:$4 sm:$0xff]   ;;  %v11103_v4 = vld [vmem:[#allocation15 + $0xa4] ss:$8 sps:$4 sm:$0xff]  }
 0x3bf   : > { %v2689_v53 = vpack.c.bf16 %v2671_v36, %v2667_v35  ;;  %3111 = vmatprep.subr.bf16.mxu0 %v16076_v0  ;;  %3168 = vmatprep.subr.bf16.mxu1 %v16079_v1  ;;  %v11089_v35 = vld [vmem:[#allocation15 + $0x80] ss:$8 sps:$4 sm:$0xff]   ;;  %v11088_v38 = vld [vmem:[#allocation15 + $0x174] ss:$8 sps:$4 sm:$0xff]   ;;  %v11086_v36 = vld [vmem:[#allocation15 + $0x170] ss:$8 sps:$4 sm:$0xff]  }
 0x3c0   : > { %3198 = vmatprep.mubr.bf16.mxu1 %v16003_v25  ;;  %v11100_v62 = vld [vmem:[#allocation15 + $0x194] ss:$8 sps:$4 sm:$0xff]   ;;  %v11106_v0 = vld [vmem:[#allocation15 + $0x1a4] ss:$8 sps:$4 sm:$0xff]   ;;  %v11113_v1 = vld [vmem:[#allocation15 + $0xc0] ss:$8 sps:$4 sm:$0xff]  }
 0x3c2   : > { %3112 = vmatpush1.bf16.msra.mxu0 %v16082_v59  ;;  %3169 = vmatpush1.bf16.msra.mxu1 %v16085_v45  ;;  %v11110_v59 = vld [vmem:[#allocation15 + $0x1b0] ss:$8 sps:$4 sm:$0xff]   ;;  %v11127_v45 = vld [vmem:[#allocation15 + $0xe4] ss:$8 sps:$4 sm:$0xff]  }
 0x3c3   : > { %3113 = vmatprep.subr.bf16.mxu0 %v2687_v27  ;;  %3170 = vmatprep.subr.bf16.mxu1 %v16086_v2  ;;  %v11064_v27 = vld [vmem:[#allocation15 + $0x134] ss:$8 sps:$4 sm:$0xff]   ;;  %v11116_v2 = vld [vmem:[#allocation15 + $0x1c0] ss:$8 sps:$4 sm:$0xff]  }
 0x3c6   : > { %3114 = vmatpush1.bf16.msra.mxu0 %v2686_v44  ;;  %3171 = vmatpush1.bf16.msra.mxu1 %v16089_v3  ;;  %v11052_v44 = vld [vmem:[#allocation15 + $0x114] ss:$8 sps:$4 sm:$0xff]   ;;  %v11122_v3 = vld [vmem:[#allocation15 + $0x1d0] ss:$8 sps:$4 sm:$0xff]  }
 0x3c7   : > { %3172 = vmatprep.subr.bf16.mxu1 %v16091_v8  ;;  %3425 = vmatprep.subr.bf16.mxu0 %v11043_v7  ;;  %v11125_v7 = vld [vmem:[#allocation15 + $0xe0] ss:$8 sps:$4 sm:$0xff]   ;;  %v11139_v8 = vld [vmem:[#allocation15 + $0x204] ss:$8 sps:$4 sm:$0xff]  }
 0x3c9   : > { %10054 = vmatmul.mubr.msk.bf16.vlgmr.msra.gmra.mrb[108].mxu0 %vm2735_vm0, %v12716_v57 }
 0x3ca   : > { %3173 = vmatpush1.bf16.msra.mxu1 %v16094_v52  ;;  %3426 = vmatpush1.bf16.msra.mxu0 %v11041_v9  ;;  %v11131_v9 = vld [vmem:[#allocation15 + $0xf0] ss:$8 sps:$4 sm:$0xff]   ;;  %v11142_v52 = vld [vmem:[#allocation15 + $0x304] ss:$8 sps:$4 sm:$0xff]  }
 0x3cb   : > { %3174 = vmatprep.subr.bf16.mxu1 %v2689_v53  ;;  %3427 = vmatprep.subr.bf16.mxu0 %v11049_v16  ;;  %v11109_v53 = vld [vmem:[#allocation15 + $0xb4] ss:$8 sps:$4 sm:$0xff]   ;;  %v11128_v16 = vld [vmem:[#allocation15 + $0x1e0] ss:$8 sps:$4 sm:$0xff]  }
 0x3ce   : > { %3175 = vmatpush1.bf16.msra.mxu1 %v2688_v39  ;;  %3428 = vmatpush1.bf16.msra.mxu0 %v11047_v61  ;;  %v11097_v39 = vld [vmem:[#allocation15 + $0x94] ss:$8 sps:$4 sm:$0xff]   ;;  %v2720_v61 = vlaneseq }
 0x3cf   : > { %3763 = vmatprep.subr.bf16.mxu1 %v11046_v24  ;;  %3429 = vmatprep.subr.bf16.mxu0 %v11055_v21 }
 0x3d0   : > { %v2721_v24 = vshrl.u32 %v2720_v61, 7  ;;  %v11169_v61 = vld [vmem:[#allocation15 + $0x254] ss:$8 sps:$4 sm:$0xff]  }
 0x3d1   : > { %10055 = vmatmul.mubr.msk.bf16.vlgmr.msra.gmra.mrb[108].mxu1 %vm2735_vm0, %v12716_v57  ;;  %v11071_v57 = vld [vmem:[#allocation15 + $0x50] ss:$8 sps:$4 sm:$0xff]  }
 0x3d2   : > { %3764 = vmatpush1.bf16.msra.mxu1 %v11044_v29  ;;  %3430 = vmatpush1.bf16.msra.mxu0 %v11053_v5  ;;  %v12884_v21 = vsub.s32 0, %v2721_v24  ;;  %v2708_v29 = vld [vmem:[#allocation13] sm:$0x3]  ;;  %v12886_v5 = vsub.s32 1, %v2721_v24 }
 0x3d3   : > { %3765 = vmatprep.subr.bf16.mxu1 %v11052_v44  ;;  %3431 = vmatprep.subr.bf16.mxu0 %v11061_v54  ;;  %v11172_v24 = vld [vmem:[#allocation15 + $0x354] ss:$8 sps:$4 sm:$0xff]  }
 0x3d4   : > { %16095 = vst [vmem:[#allocation53_spill] sm:$0xff] %v12884_v21  ;;  %16096 = vst [vmem:[#allocation51_spill] sm:$0xff] %v12886_v5  ;;  %v12889_v44 = vrot.slane %v2708_v29, %v12884_v21  ;;  %v12892_v54 = vrot.slane %v2708_v29, %v12886_v5 }
 0x3d6   : > { %3766 = vmatpush1.bf16.msra.mxu1 %v11050_v19  ;;  %3432 = vmatpush1.bf16.msra.mxu0 %v11059_v23 }
 0x3d7   : > { %3767 = vmatprep.subr.bf16.mxu1 %v11058_v33  ;;  %3433 = vmatprep.subr.bf16.mxu0 %v11067_v60 }
 0x3da   : > { %3768 = vmatpush1.bf16.msra.mxu1 %v11056_v22  ;;  %3434 = vmatpush1.bf16.msra.mxu0 %v11065_v32 }
 0x3db   : > { %3769 = vmatprep.subr.bf16.mxu1 %v11064_v27  ;;  %3435 = vmatprep.subr.bf16.mxu0 %v11073_v18 }
 0x3de   : > { %3770 = vmatpush1.bf16.msra.mxu1 %v11062_v20  ;;  %3436 = vmatpush1.bf16.msra.mxu0 %v11071_v57 }
 0x3df   : > { %3771 = vmatprep.subr.bf16.mxu1 %v11070_v26  ;;  %3437 = vmatprep.subr.bf16.mxu0 %v11079_v28 }
 0x3e2   : > { %3772 = vmatpush1.bf16.msra.mxu1 %v11068_v14  ;;  %3438 = vmatpush1.bf16.msra.mxu0 %v11077_v17 }
 0x3e3   : > { %3773 = vmatprep.subr.bf16.mxu1 %v11076_v41  ;;  %3439 = vmatprep.subr.bf16.mxu0 %v11085_v42  ;;  %v11137_v42 = vld [vmem:[#allocation15 + $0x200] ss:$8 sps:$4 sm:$0xff]  }
 0x3e6   : > { %3774 = vmatpush1.bf16.msra.mxu1 %v11074_v37  ;;  %3440 = vmatpush1.bf16.msra.mxu0 %v11083_v43  ;;  %v11140_v37 = vld [vmem:[#allocation15 + $0x300] ss:$8 sps:$4 sm:$0xff]  }
 0x3e7   : > { %3775 = vmatprep.subr.bf16.mxu1 %v11082_v47  ;;  %3441 = vmatprep.subr.bf16.mxu0 %v11091_v30  ;;  %v11145_v30 = vld [vmem:[#allocation15 + $0x214] ss:$8 sps:$4 sm:$0xff]  }
 0x3ea   : > { %3776 = vmatpush1.bf16.msra.mxu1 %v11080_v49  ;;  %3442 = vmatpush1.bf16.msra.mxu0 %v11089_v35  ;;  %v11148_v49 = vld [vmem:[#allocation15 + $0x314] ss:$8 sps:$4 sm:$0xff]  }
 0x3eb   : > { %3777 = vmatprep.subr.bf16.mxu1 %v11088_v38  ;;  %3443 = vmatprep.subr.bf16.mxu0 %v11097_v39 }
 0x3ee   : > { %3778 = vmatpush1.bf16.msra.mxu1 %v11086_v36  ;;  %3444 = vmatpush1.bf16.msra.mxu0 %v11095_v40 }
 0x3ef   : > { %3779 = vmatprep.subr.bf16.mxu1 %v11094_v46  ;;  %3445 = vmatprep.subr.bf16.mxu0 %v11103_v4  ;;  %v11143_v4 = vld [vmem:[#allocation15 + $0x210] ss:$8 sps:$4 sm:$0xff]  }
 0x3f2   : > { %3780 = vmatpush1.bf16.msra.mxu1 %v11092_v55  ;;  %3446 = vmatpush1.bf16.msra.mxu0 %v11101_v56  ;;  %v11146_v55 = vld [vmem:[#allocation15 + $0x310] ss:$8 sps:$4 sm:$0xff]  }
 0x3f3   : > { %3781 = vmatprep.subr.bf16.mxu1 %v11100_v62  ;;  %3447 = vmatprep.subr.bf16.mxu0 %v11109_v53  ;;  %v11151_v62 = vld [vmem:[#allocation15 + $0x224] ss:$8 sps:$4 sm:$0xff]  }
 0x3f4   : > { %v11154_v53 = vld [vmem:[#allocation15 + $0x324] ss:$8 sps:$4 sm:$0xff]  }
 0x3f6   : > { %3782 = vmatpush1.bf16.msra.mxu1 %v11098_v31  ;;  %3448 = vmatpush1.bf16.msra.mxu0 %v11107_v63 }
 0x3f7   : > { %3783 = vmatprep.subr.bf16.mxu1 %v11106_v0  ;;  %3449 = vmatprep.subr.bf16.mxu0 %v11115_v13 }
 0x3fa   : > { %3784 = vmatpush1.bf16.msra.mxu1 %v11104_v11  ;;  %3450 = vmatpush1.bf16.msra.mxu0 %v11113_v1  ;;  %v11149_v11 = vld [vmem:[#allocation15 + $0x220] ss:$8 sps:$4 sm:$0xff]  }
 0x3fb   : > { %3785 = vmatprep.subr.bf16.mxu1 %v11112_v34  ;;  %3451 = vmatprep.subr.bf16.mxu0 %v11121_v51  ;;  %v11152_v1 = vld [vmem:[#allocation15 + $0x320] ss:$8 sps:$4 sm:$0xff]   ;;  %v11157_v34 = vld [vmem:[#allocation15 + $0x234] ss:$8 sps:$4 sm:$0xff]  }
 0x3fc   : > { %v11160_v51 = vld [vmem:[#allocation15 + $0x334] ss:$8 sps:$4 sm:$0xff]  }
 0x3fe   : > { %3786 = vmatpush1.bf16.msra.mxu1 %v11110_v59  ;;  %3452 = vmatpush1.bf16.msra.mxu0 %v11119_v50  ;;  %v11155_v50 = vld [vmem:[#allocation15 + $0x230] ss:$8 sps:$4 sm:$0xff]  }
 0x3ff   : > { %3787 = vmatprep.subr.bf16.mxu1 %v11118_v12  ;;  %3453 = vmatprep.subr.bf16.mxu0 %v11127_v45  ;;  %v11158_v12 = vld [vmem:[#allocation15 + $0x330] ss:$8 sps:$4 sm:$0xff]  }
 0x402   : > { %3788 = vmatpush1.bf16.msra.mxu1 %v11116_v2  ;;  %3454 = vmatpush1.bf16.msra.mxu0 %v11125_v7  ;;  %v11163_v7 = vld [vmem:[#allocation15 + $0x244] ss:$8 sps:$4 sm:$0xff]  }
 0x403   : > { %3789 = vmatprep.subr.bf16.mxu1 %v11124_v15  ;;  %3455 = vmatprep.subr.bf16.mxu0 %v11133_v48  ;;  %v11166_v15 = vld [vmem:[#allocation15 + $0x344] ss:$8 sps:$4 sm:$0xff]  }
 0x406   : > { %3790 = vmatpush1.bf16.msra.mxu1 %v11122_v3  ;;  %3456 = vmatpush1.bf16.msra.mxu0 %v11131_v9 }
 0x407   : > { %3791 = vmatprep.subr.bf16.mxu1 %v11130_v58  ;;  %4101 = vmatprep.subr.bf16.mxu0 %v11139_v8 }
 0x40a   : > { %3792 = vmatpush1.bf16.msra.mxu1 %v11128_v16 }
 0x40b   : > { %3793 = vmatprep.subr.bf16.mxu1 %v11136_v6  ;;  %v11161_v6 = vld [vmem:[#allocation15 + $0x240] ss:$8 sps:$4 sm:$0xff]  }
 0x40e   : > { %3794 = vmatpush1.bf16.msra.mxu1 %v11134_v10  ;;  %v11164_v10 = vld [vmem:[#allocation15 + $0x340] ss:$8 sps:$4 sm:$0xff]  }
 0x40f   : > { %4439 = vmatprep.subr.bf16.mxu1 %v11142_v52 }
 0x460   : > { %v2773_v19 = vpop.f32.mrb[96].mxu0 }
 0x461   : > { %v2774_v23 = vadd.f32 %v2773_v19, %v12889_v44  ;;  %v2775_v33 = vpop.f32.mrb[97].mxu0 }
 0x462   : > { %v2776_v60 = vadd.f32 %v2775_v33, %v12892_v54  ;;  %v2777_v22 = vpop.f32.mrb[98].mxu0 }
 0x463   : > { %v2782_v32 = vmax.f32 %v2774_v23, 0.0  ;;  %v2778_v27 = vadd.f32 %v2777_v22, %v12889_v44  ;;  %v2779_v18 = vpop.f32.mrb[99].mxu0  ;;  %v11167_v22 = vld [vmem:[#allocation15 + $0x250] ss:$8 sps:$4 sm:$0xff]  }
 0x464   : > { %v2780_v20 = vadd.f32 %v2779_v18, %v12892_v54  ;;  %v2783_v26 = vmax.f32 %v2776_v60, 0.0 }
 0x465   : > { %v2784_v57 = vmax.f32 %v2778_v27, 0.0 }
 0x466   : > { %v2785_v28 = vmax.f32 %v2780_v20, 0.0  ;;  %v11175_v20 = vld [vmem:[#allocation15 + $0x264] ss:$8 sps:$4 sm:$0xff]  }
 0x467   : > { %v12898_v14 = vpack.c.bf16 %v2784_v57, %v2782_v32  ;;  %v11170_v32 = vld [vmem:[#allocation15 + $0x350] ss:$8 sps:$4 sm:$0xff]   ;;  %v11178_v57 = vld [vmem:[#allocation15 + $0x364] ss:$8 sps:$4 sm:$0xff]  }
 0x468   : > { %v12900_v17 = vpack.c.bf16 %v2785_v28, %v2783_v26  ;;  %v2834_v41 = vpop.f32.mrb[96].mxu1 }
 0x469   : > { %v2835_v43 = vadd.f32 %v2834_v41, %v12889_v44  ;;  %v2836_v47 = vpop.f32.mrb[97].mxu1 }
 0x46a   : > { %v2837_v35 = vadd.f32 %v2836_v47, %v12892_v54  ;;  %v2838_v38 = vpop.f32.mrb[98].mxu1  ;;  %3457 = vmatprep.mubr.bf16.mxu0 %v12900_v17  ;;  %3795 = vmatprep.mubr.bf16.mxu1 %v12900_v17  ;;  %v11173_v47 = vld [vmem:[#allocation15 + $0x260] ss:$8 sps:$4 sm:$0xff]  }
 0x46b   : > { %v2843_v39 = vmax.f32 %v2835_v43, 0.0  ;;  %v2839_v36 = vadd.f32 %v2838_v38, %v12889_v44  ;;  %v2840_v40 = vpop.f32.mrb[99].mxu1  ;;  %3458 = vmatmul.mubr.bf16.vlgmr.msra.gmra.mrb[112].mxu0 %v12898_v14  ;;  %3796 = vmatmul.mubr.bf16.vlgmr.msra.gmra.mrb[112].mxu1 %v12898_v14  ;;  %v11184_v38 = vld [vmem:[#allocation15 + $0x374] ss:$8 sps:$4 sm:$0xff]  }
 0x46c   : > { %v2841_v46 = vadd.f32 %v2840_v40, %v12892_v54  ;;  %4102 = vmatpush1.bf16.msra.mxu0 %v11137_v42  ;;  %4440 = vmatpush1.bf16.msra.mxu1 %v11140_v37  ;;  %v2844_v31 = vmax.f32 %v2837_v35, 0.0  ;;  %v11181_v35 = vld [vmem:[#allocation15 + $0x274] ss:$8 sps:$4 sm:$0xff]  }
 0x46d   : > { %v2845_v56 = vmax.f32 %v2839_v36, 0.0  ;;  %4103 = vmatprep.subr.bf16.mxu0 %v11145_v30  ;;  %4441 = vmatprep.subr.bf16.mxu1 %v11148_v49  ;;  %v11176_v30 = vld [vmem:[#allocation15 + $0x360] ss:$8 sps:$4 sm:$0xff]  }
 0x46e   : > { %v2846_v63 = vmax.f32 %v2841_v46, 0.0 }
 0x46f   : > { %v12910_v0 = vpack.c.bf16 %v2845_v56, %v2843_v39  ;;  %v11187_v56 = vld [vmem:[#allocation15 + $0x284] ss:$8 sps:$4 sm:$0xff]  }
 0x470   : > { %v12912_v13 = vpack.c.bf16 %v2846_v63, %v2844_v31  ;;  %4104 = vmatpush1.bf16.msra.mxu0 %v11143_v4  ;;  %4442 = vmatpush1.bf16.msra.mxu1 %v11146_v55  ;;  %v11179_v4 = vld [vmem:[#allocation15 + $0x270] ss:$8 sps:$4 sm:$0xff]   ;;  %v11185_v31 = vld [vmem:[#allocation15 + $0x280] ss:$8 sps:$4 sm:$0xff]  }
 0x471   : > { %4105 = vmatprep.subr.bf16.mxu0 %v11151_v62  ;;  %4443 = vmatprep.subr.bf16.mxu1 %v11154_v53  ;;  %v11182_v55 = vld [vmem:[#allocation15 + $0x370] ss:$8 sps:$4 sm:$0xff]   ;;  %v11190_v62 = vld [vmem:[#allocation15 + $0x384] ss:$8 sps:$4 sm:$0xff]   ;;  %v11188_v63 = vld [vmem:[#allocation15 + $0x380] ss:$8 sps:$4 sm:$0xff]  }
 0x472   : > { %3467 = vmatprep.mubr.bf16.mxu0 %v12912_v13  ;;  %3805 = vmatprep.mubr.bf16.mxu1 %v12912_v13 }
 0x473   : > { %3468 = vmatmul.mubr.bf16.gmra.mrb[116].mxu0 %v12910_v0  ;;  %3806 = vmatmul.mubr.bf16.gmra.mrb[116].mxu1 %v12910_v0 }
 0x474   : > { %v2895_v59 = vpop.f32.mrb[100].mxu0  ;;  %4106 = vmatpush1.bf16.msra.mxu0 %v11149_v11  ;;  %4444 = vmatpush1.bf16.msra.mxu1 %v11152_v1 }
 0x475   : > { %v2896_v45 = vadd.f32 %v2895_v59, %v12889_v44  ;;  %v2897_v2 = vpop.f32.mrb[101].mxu0  ;;  %4107 = vmatprep.subr.bf16.mxu0 %v11157_v34  ;;  %4445 = vmatprep.subr.bf16.mxu1 %v11160_v51  ;;  %v11193_v34 = vld [vmem:[#allocation15 + $0x294] ss:$8 sps:$4 sm:$0xff]  }
 0x476   : > { %v2898_v48 = vadd.f32 %v2897_v2, %v12892_v54  ;;  %v2899_v3 = vpop.f32.mrb[102].mxu0  ;;  %v11196_v51 = vld [vmem:[#allocation15 + $0x394] ss:$8 sps:$4 sm:$0xff]  }
 0x477   : > { %v2904_v9 = vmax.f32 %v2896_v45, 0.0  ;;  %v2900_v58 = vadd.f32 %v2899_v3, %v12889_v44  ;;  %v2901_v8 = vpop.f32.mrb[103].mxu0 }
 0x478   : > { %v2902_v16 = vadd.f32 %v2901_v8, %v12892_v54  ;;  %4108 = vmatpush1.bf16.msra.mxu0 %v11155_v50  ;;  %4446 = vmatpush1.bf16.msra.mxu1 %v11158_v12  ;;  %v2905_v29 = vmax.f32 %v2898_v48, 0.0  ;;  %v11194_v48 = vld [vmem:[#allocation15 + $0x390] ss:$8 sps:$4 sm:$0xff]  }
 0x479   : > { %v2906_v52 = vmax.f32 %v2900_v58, 0.0  ;;  %4109 = vmatprep.subr.bf16.mxu0 %v11163_v7  ;;  %4447 = vmatprep.subr.bf16.mxu1 %v11166_v15  ;;  %v11191_v15 = vld [vmem:[#allocation15 + $0x290] ss:$8 sps:$4 sm:$0xff]   ;;  %v11202_v58 = vld [vmem:[#allocation15 + $0x3a4] ss:$8 sps:$4 sm:$0xff]  }
 0x47a   : > { %v2907_v19 = vmax.f32 %v2902_v16, 0.0 }
 0x47b   : > { %v12922_v23 = vpack.c.bf16 %v2906_v52, %v2904_v9  ;;  %v11199_v9 = vld [vmem:[#allocation15 + $0x2a4] ss:$8 sps:$4 sm:$0xff]  }
 0x47c   : > { %v12924_v33 = vpack.c.bf16 %v2907_v19, %v2905_v29  ;;  %v2956_v60 = vpop.f32.mrb[100].mxu1  ;;  %4110 = vmatpush1.bf16.msra.mxu0 %v11161_v6  ;;  %4448 = vmatpush1.bf16.msra.mxu1 %v11164_v10 }
 0x47d   : > { %v2957_v27 = vadd.f32 %v2956_v60, %v12889_v44  ;;  %v2958_v18 = vpop.f32.mrb[101].mxu1  ;;  %4111 = vmatprep.subr.bf16.mxu0 %v11169_v61  ;;  %4449 = vmatprep.subr.bf16.mxu1 %v11172_v24  ;;  %v11197_v61 = vld [vmem:[#allocation15 + $0x2a0] ss:$8 sps:$4 sm:$0xff]   ;;  %v11205_v60 = vld [vmem:[#allocation15 + $0x2b4] ss:$8 sps:$4 sm:$0xff]  }
 0x47e   : > { %v2959_v26 = vadd.f32 %v2958_v18, %v12892_v54  ;;  %v2960_v28 = vpop.f32.mrb[102].mxu1  ;;  %3477 = vmatprep.mubr.bf16.mxu0 %v12924_v33  ;;  %3815 = vmatprep.mubr.bf16.mxu1 %v12924_v33  ;;  %v11200_v24 = vld [vmem:[#allocation15 + $0x3a0] ss:$8 sps:$4 sm:$0xff]  }
 0x47f   : > { %v2965_v41 = vmax.f32 %v2957_v27, 0.0  ;;  %v2961_v42 = vadd.f32 %v2960_v28, %v12889_v44  ;;  %v2962_v37 = vpop.f32.mrb[103].mxu1  ;;  %3478 = vmatmul.mubr.bf16.gmra.mrb[120].mxu0 %v12922_v23  ;;  %3816 = vmatmul.mubr.bf16.gmra.mrb[120].mxu1 %v12922_v23  ;;  %v11203_v28 = vld [vmem:[#allocation15 + $0x2b0] ss:$8 sps:$4 sm:$0xff]  }
 0x480   : > { %v2963_v43 = vadd.f32 %v2962_v37, %v12892_v54  ;;  %4112 = vmatpush1.bf16.msra.mxu0 %v11167_v22  ;;  %4450 = vmatpush1.bf16.msra.mxu1 %v11170_v32  ;;  %v2966_v39 = vmax.f32 %v2959_v26, 0.0  ;;  %v11208_v22 = vld [vmem:[#allocation15 + $0x3b4] ss:$8 sps:$4 sm:$0xff]   ;;  %v11211_v37 = vld [vmem:[#allocation15 + $0x2c4] ss:$8 sps:$4 sm:$0xff]  }
 0x481   : > { %v2967_v49 = vmax.f32 %v2961_v42, 0.0  ;;  %4113 = vmatprep.subr.bf16.mxu0 %v11175_v20  ;;  %4451 = vmatprep.subr.bf16.mxu1 %v11178_v57 }
 0x482   : > { %v2968_v36 = vmax.f32 %v2963_v43, 0.0  ;;  %v11214_v43 = vld [vmem:[#allocation15 + $0x3c4] ss:$8 sps:$4 sm:$0xff]  }
 0x483   : > { %v12934_v40 = vpack.c.bf16 %v2967_v49, %v2965_v41  ;;  %v11206_v41 = vld [vmem:[#allocation15 + $0x3b0] ss:$8 sps:$4 sm:$0xff]  }
 0x484   : > { %v12936_v46 = vpack.c.bf16 %v2968_v36, %v2966_v39  ;;  %4114 = vmatpush1.bf16.msra.mxu0 %v11173_v47  ;;  %4452 = vmatpush1.bf16.msra.mxu1 %v11176_v30  ;;  %v11212_v39 = vld [vmem:[#allocation15 + $0x3c0] ss:$8 sps:$4 sm:$0xff]   ;;  %v11217_v36 = vld [vmem:[#allocation15 + $0x2d4] ss:$8 sps:$4 sm:$0xff]  }
 0x485   : > { %4115 = vmatprep.subr.bf16.mxu0 %v11181_v35  ;;  %4453 = vmatprep.subr.bf16.mxu1 %v11184_v38  ;;  %v11209_v38 = vld [vmem:[#allocation15 + $0x2c0] ss:$8 sps:$4 sm:$0xff]  }
 0x486   : > { %3487 = vmatprep.mubr.bf16.mxu0 %v12936_v46  ;;  %3825 = vmatprep.mubr.bf16.mxu1 %v12936_v46 }
 0x487   : > { %3488 = vmatmul.mubr.bf16.gmra.mrb[124].mxu0 %v12934_v40  ;;  %3826 = vmatmul.mubr.bf16.gmra.mrb[124].mxu1 %v12934_v40 }
 0x488   : > { %v3017_v53 = vpop.f32.mrb[104].mxu0  ;;  %4116 = vmatpush1.bf16.msra.mxu0 %v11179_v4  ;;  %4454 = vmatpush1.bf16.msra.mxu1 %v11182_v55  ;;  %v11220_v4 = vld [vmem:[#allocation15 + $0x3d4] ss:$8 sps:$4 sm:$0xff]  }
 0x489   : > { %v3018_v11 = vadd.f32 %v3017_v53, %v12889_v44  ;;  %v3019_v1 = vpop.f32.mrb[105].mxu0  ;;  %4117 = vmatprep.subr.bf16.mxu0 %v11187_v56  ;;  %4455 = vmatprep.subr.bf16.mxu1 %v11190_v62  ;;  %v11215_v56 = vld [vmem:[#allocation15 + $0x2d0] ss:$8 sps:$4 sm:$0xff]  }
 0x48a   : > { %v3020_v59 = vadd.f32 %v3019_v1, %v12892_v54  ;;  %v3021_v50 = vpop.f32.mrb[106].mxu0  ;;  %v11218_v62 = vld [vmem:[#allocation15 + $0x3d0] ss:$8 sps:$4 sm:$0xff]  }
 0x48b   : > { %v3026_v12 = vmax.f32 %v3018_v11, 0.0  ;;  %v3022_v45 = vadd.f32 %v3021_v50, %v12889_v44  ;;  %v3023_v2 = vpop.f32.mrb[107].mxu0  ;;  %v11226_v11 = vld [vmem:[#allocation15 + $0x3e4] ss:$8 sps:$4 sm:$0xff]  }
 0x48c   : > { %v3024_v7 = vadd.f32 %v3023_v2, %v12892_v54  ;;  %4118 = vmatpush1.bf16.msra.mxu0 %v11185_v31  ;;  %4456 = vmatpush1.bf16.msra.mxu1 %v11188_v63  ;;  %v3027_v8 = vmax.f32 %v3020_v59, 0.0  ;;  %v11223_v63 = vld [vmem:[#allocation15 + $0x2e4] ss:$8 sps:$4 sm:$0xff]  }
 0x48d   : > { %v3028_v3 = vmax.f32 %v3022_v45, 0.0  ;;  %4119 = vmatprep.subr.bf16.mxu0 %v11193_v34  ;;  %4457 = vmatprep.subr.bf16.mxu1 %v11196_v51  ;;  %v11224_v45 = vld [vmem:[#allocation15 + $0x3e0] ss:$8 sps:$4 sm:$0xff]  }
 0x48e   : > { %v3029_v16 = vmax.f32 %v3024_v7, 0.0 }
 0x48f   : > { %v12946_v6 = vpack.c.bf16 %v3028_v3, %v3026_v12  ;;  %v11221_v12 = vld [vmem:[#allocation15 + $0x2e0] ss:$8 sps:$4 sm:$0xff]  }
 0x490   : > { %v12948_v10 = vpack.c.bf16 %v3029_v16, %v3027_v8  ;;  %v3078_v52 = vpop.f32.mrb[104].mxu1  ;;  %4120 = vmatpush1.bf16.msra.mxu0 %v11191_v15  ;;  %4458 = vmatpush1.bf16.msra.mxu1 %v11194_v48  ;;  %v11229_v15 = vld [vmem:[#allocation15 + $0x2f4] ss:$8 sps:$4 sm:$0xff]  }
 0x491   : > { %v3079_v29 = vadd.f32 %v3078_v52, %v12889_v44  ;;  %v3080_v19 = vpop.f32.mrb[105].mxu1  ;;  %4121 = vmatprep.subr.bf16.mxu0 %v11199_v9  ;;  %4459 = vmatprep.subr.bf16.mxu1 %v11202_v58  ;;  %v11232_v48 = vld [vmem:[#allocation15 + $0x3f4] ss:$8 sps:$4 sm:$0xff]   ;;  %v11227_v52 = vld [vmem:[#allocation15 + $0x2f0] ss:$8 sps:$4 sm:$0xff]  }
 0x492   : > { %v3081_v32 = vadd.f32 %v3080_v19, %v12892_v54  ;;  %v3082_v27 = vpop.f32.mrb[106].mxu1  ;;  %3497 = vmatprep.mubr.bf16.mxu0 %v12948_v10  ;;  %3835 = vmatprep.mubr.bf16.mxu1 %v12948_v10  ;;  %v11235_v19 = vld [vmem:[#allocation15 + $0x404] ss:$8 sps:$4 sm:$0xff]  }
 0x493   : > { %v3087_v18 = vmax.f32 %v3079_v29, 0.0  ;;  %v3083_v20 = vadd.f32 %v3082_v27, %v12889_v44  ;;  %v3084_v57 = vpop.f32.mrb[107].mxu1  ;;  %3498 = vmatmul.mubr.bf16.gmra.mrb[128].mxu0 %v12946_v6  ;;  %3836 = vmatmul.mubr.bf16.gmra.mrb[128].mxu1 %v12946_v6 }
 0x494   : > { %v3085_v26 = vadd.f32 %v3084_v57, %v12892_v54  ;;  %4122 = vmatpush1.bf16.msra.mxu0 %v11197_v61  ;;  %4460 = vmatpush1.bf16.msra.mxu1 %v11200_v24  ;;  %v3088_v47 = vmax.f32 %v3081_v32, 0.0  ;;  %v11230_v61 = vld [vmem:[#allocation15 + $0x3f0] ss:$8 sps:$4 sm:$0xff]  }
 0x495   : > { %v3089_v42 = vmax.f32 %v3083_v20, 0.0  ;;  %4123 = vmatprep.subr.bf16.mxu0 %v11205_v60  ;;  %4461 = vmatprep.subr.bf16.mxu1 %v11208_v22  ;;  %v11238_v60 = vld [vmem:[#allocation15 + $0x504] ss:$8 sps:$4 sm:$0xff]  }
 0x496   : > { %v3090_v30 = vmax.f32 %v3085_v26, 0.0 }
 0x497   : > { %v12958_v49 = vpack.c.bf16 %v3089_v42, %v3087_v18 }
 0x498   : > { %v12960_v35 = vpack.c.bf16 %v3090_v30, %v3088_v47  ;;  %4124 = vmatpush1.bf16.msra.mxu0 %v11203_v28  ;;  %4462 = vmatpush1.bf16.msra.mxu1 %v11206_v41  ;;  %v11244_v47 = vld [vmem:[#allocation15 + $0x514] ss:$8 sps:$4 sm:$0xff]   ;;  %v11239_v30 = vld [vmem:[#allocation15 + $0x410] ss:$8 sps:$4 sm:$0xff]  }
 0x499   : > { %4125 = vmatprep.subr.bf16.mxu0 %v11211_v37  ;;  %4463 = vmatprep.subr.bf16.mxu1 %v11214_v43  ;;  %v11241_v43 = vld [vmem:[#allocation15 + $0x414] ss:$8 sps:$4 sm:$0xff]  }
 0x49a   : > { %3507 = vmatprep.mubr.bf16.mxu0 %v12960_v35  ;;  %3845 = vmatprep.mubr.bf16.mxu1 %v12960_v35 }
 0x49b   : > { %3508 = vmatmul.mubr.bf16.gmra.mrb[132].mxu0 %v12958_v49  ;;  %3846 = vmatmul.mubr.bf16.gmra.mrb[132].mxu1 %v12958_v49 }
 0x49c   : > { %v3139_v55 = vpop.f32.mrb[108].mxu0  ;;  %4126 = vmatpush1.bf16.msra.mxu0 %v11209_v38  ;;  %4464 = vmatpush1.bf16.msra.mxu1 %v11212_v39  ;;  %v11242_v38 = vld [vmem:[#allocation15 + $0x510] ss:$8 sps:$4 sm:$0xff]   ;;  %v11247_v39 = vld [vmem:[#allocation15 + $0x424] ss:$8 sps:$4 sm:$0xff]  }
 0x49d   : > { %v3140_v53 = vadd.f32 %v3139_v55, %v12889_v44  ;;  %v3141_v31 = vpop.f32.mrb[109].mxu0  ;;  %4127 = vmatprep.subr.bf16.mxu0 %v11217_v36  ;;  %4465 = vmatprep.subr.bf16.mxu1 %v11220_v4  ;;  %v11250_v36 = vld [vmem:[#allocation15 + $0x524] ss:$8 sps:$4 sm:$0xff]   ;;  %v11245_v4 = vld [vmem:[#allocation15 + $0x420] ss:$8 sps:$4 sm:$0xff]  }
 0x49e   : > { %v3142_v1 = vadd.f32 %v3141_v31, %v12892_v54  ;;  %v3143_v34 = vpop.f32.mrb[110].mxu0  ;;  %v11248_v55 = vld [vmem:[#allocation15 + $0x520] ss:$8 sps:$4 sm:$0xff]   ;;  %v11254_v31 = vld [vmem:[#allocation15 + $0x530] ss:$8 sps:$4 sm:$0xff]  }
 0x49f   : > { %v3144_v51 = vadd.f32 %v3143_v34, %v12889_v44  ;;  %v3145_v59 = vpop.f32.mrb[111].mxu0  ;;  %v3148_v2 = vmax.f32 %v3140_v53, 0.0  ;;  %v11251_v53 = vld [vmem:[#allocation15 + $0x430] ss:$8 sps:$4 sm:$0xff]   ;;  %v11260_v34 = vld [vmem:[#allocation15 + $0x540] ss:$8 sps:$4 sm:$0xff]  }
 0x4a0   : > { %v3146_v50 = vadd.f32 %v3145_v59, %v12892_v54  ;;  %4128 = vmatpush1.bf16.msra.mxu0 %v11215_v56  ;;  %4466 = vmatpush1.bf16.msra.mxu1 %v11218_v62  ;;  %v3149_v3 = vmax.f32 %v3142_v1, 0.0  ;;  %v11253_v56 = vld [vmem:[#allocation15 + $0x434] ss:$8 sps:$4 sm:$0xff]   ;;  %v11257_v1 = vld [vmem:[#allocation15 + $0x440] ss:$8 sps:$4 sm:$0xff]  }
 0x4a1   : > { %v3150_v7 = vmax.f32 %v3144_v51, 0.0  ;;  %4129 = vmatprep.subr.bf16.mxu0 %v11223_v63  ;;  %4467 = vmatprep.subr.bf16.mxu1 %v11226_v11  ;;  %v11256_v62 = vld [vmem:[#allocation15 + $0x534] ss:$8 sps:$4 sm:$0xff]   ;;  %v11259_v63 = vld [vmem:[#allocation15 + $0x444] ss:$8 sps:$4 sm:$0xff]  }
 0x4a2   : > { %v3151_v9 = vmax.f32 %v3146_v50, 0.0  ;;  %v11262_v11 = vld [vmem:[#allocation15 + $0x544] ss:$8 sps:$4 sm:$0xff]   ;;  %v11265_v51 = vld [vmem:[#allocation15 + $0x454] ss:$8 sps:$4 sm:$0xff]  }
 0x4a3   : > { %v12970_v58 = vpack.c.bf16 %v3150_v7, %v3148_v2  ;;  %v11268_v59 = vld [vmem:[#allocation15 + $0x554] ss:$8 sps:$4 sm:$0xff]   ;;  %v11263_v50 = vld [vmem:[#allocation15 + $0x450] ss:$8 sps:$4 sm:$0xff]   ;;  %v11274_v2 = vld [vmem:[#allocation15 + $0x564] ss:$8 sps:$4 sm:$0xff]  }
 0x4a4   : > { %v12972_v8 = vpack.c.bf16 %v3151_v9, %v3149_v3  ;;  %v3200_v16 = vpop.f32.mrb[108].mxu1  ;;  %4130 = vmatpush1.bf16.msra.mxu0 %v11221_v12  ;;  %4468 = vmatpush1.bf16.msra.mxu1 %v11224_v45  ;;  %v11266_v12 = vld [vmem:[#allocation15 + $0x550] ss:$8 sps:$4 sm:$0xff]   ;;  %v11271_v45 = vld [vmem:[#allocation15 + $0x464] ss:$8 sps:$4 sm:$0xff]  }
 0x4a5   : > { %v3201_v24 = vadd.f32 %v3200_v16, %v12889_v44  ;;  %v3202_v29 = vpop.f32.mrb[109].mxu1  ;;  %4131 = vmatprep.subr.bf16.mxu0 %v11229_v15  ;;  %4469 = vmatprep.subr.bf16.mxu1 %v11232_v48  ;;  %v11269_v7 = vld [vmem:[#allocation15 + $0x460] ss:$8 sps:$4 sm:$0xff]   ;;  %v11277_v48 = vld [vmem:[#allocation15 + $0x474] ss:$8 sps:$4 sm:$0xff]  }
 0x4a6   : > { %v3203_v22 = vadd.f32 %v3202_v29, %v12892_v54  ;;  %v3204_v32 = vpop.f32.mrb[110].mxu1  ;;  %3517 = vmatprep.mubr.bf16.mxu0 %v12972_v8  ;;  %3855 = vmatprep.mubr.bf16.mxu1 %v12972_v8  ;;  %v11272_v15 = vld [vmem:[#allocation15 + $0x560] ss:$8 sps:$4 sm:$0xff]   ;;  %v11280_v3 = vld [vmem:[#allocation15 + $0x574] ss:$8 sps:$4 sm:$0xff]  }
 0x4a7   : > { %v3205_v27 = vadd.f32 %v3204_v32, %v12889_v44  ;;  %v3206_v18 = vpop.f32.mrb[111].mxu1  ;;  %3518 = vmatmul.mubr.bf16.gmra.mrb[136].mxu0 %v12970_v58  ;;  %3856 = vmatmul.mubr.bf16.gmra.mrb[136].mxu1 %v12970_v58  ;;  %v3209_v57 = vmax.f32 %v3201_v24, 0.0  ;;  %v11233_v44 = vld [vmem:[#allocation15 + $0x400] ss:$8 sps:$4 sm:$0xff]   ;;  %v11275_v9 = vld [vmem:[#allocation15 + $0x470] ss:$8 sps:$4 sm:$0xff]  }
 0x4a8   : > { %v3207_v20 = vadd.f32 %v3206_v18, %v12892_v54  ;;  %4132 = vmatpush1.bf16.msra.mxu0 %v11227_v52  ;;  %4470 = vmatpush1.bf16.msra.mxu1 %v11230_v61  ;;  %v3210_v28 = vmax.f32 %v3203_v22, 0.0  ;;  %v11236_v54 = vld [vmem:[#allocation15 + $0x500] ss:$8 sps:$4 sm:$0xff]   ;;  %v11278_v16 = vld [vmem:[#allocation15 + $0x570] ss:$8 sps:$4 sm:$0xff]  }
 0x4a9   : > { %v3211_v26 = vmax.f32 %v3205_v27, 0.0  ;;  %4777 = vmatprep.subr.bf16.mxu0 %v11235_v19  ;;  %5115 = vmatprep.subr.bf16.mxu1 %v11238_v60  ;;  %v11283_v52 = vld [vmem:[#allocation15 + $0x484] ss:$8 sps:$4 sm:$0xff]   ;;  %v11281_v24 = vld [vmem:[#allocation15 + $0x480] ss:$8 sps:$4 sm:$0xff]  }
 0x4aa   : > { %v3212_v41 = vmax.f32 %v3207_v20, 0.0  ;;  %v11286_v61 = vld [vmem:[#allocation15 + $0x584] ss:$8 sps:$4 sm:$0xff]   ;;  %v11284_v29 = vld [vmem:[#allocation15 + $0x580] ss:$8 sps:$4 sm:$0xff]  }
 0x4ab   : > { %v12982_v42 = vpack.c.bf16 %v3211_v26, %v3209_v57  ;;  %v11289_v19 = vld [vmem:[#allocation15 + $0x494] ss:$8 sps:$4 sm:$0xff]   ;;  %v11287_v22 = vld [vmem:[#allocation15 + $0x490] ss:$8 sps:$4 sm:$0xff]   ;;  %v11295_v27 = vld [vmem:[#allocation15 + $0x4a4] ss:$8 sps:$4 sm:$0xff]  }
 0x4ac   : > { %v12984_v37 = vpack.c.bf16 %v3212_v41, %v3210_v28  ;;  %v11292_v60 = vld [vmem:[#allocation15 + $0x594] ss:$8 sps:$4 sm:$0xff]   ;;  %v11290_v32 = vld [vmem:[#allocation15 + $0x590] ss:$8 sps:$4 sm:$0xff]   ;;  %v11298_v18 = vld [vmem:[#allocation15 + $0x5a4] ss:$8 sps:$4 sm:$0xff]  }
 0x4ad   : > { %v11293_v20 = vld [vmem:[#allocation15 + $0x4a0] ss:$8 sps:$4 sm:$0xff]   ;;  %v11301_v26 = vld [vmem:[#allocation15 + $0x4b4] ss:$8 sps:$4 sm:$0xff]   ;;  %v11299_v41 = vld [vmem:[#allocation15 + $0x4b0] ss:$8 sps:$4 sm:$0xff]  }
 0x4ae   : > { %3527 = vmatprep.mubr.bf16.mxu0 %v12984_v37  ;;  %3865 = vmatprep.mubr.bf16.mxu1 %v12984_v37  ;;  %v11296_v57 = vld [vmem:[#allocation15 + $0x5a0] ss:$8 sps:$4 sm:$0xff]   ;;  %v11304_v28 = vld [vmem:[#allocation15 + $0x5b4] ss:$8 sps:$4 sm:$0xff]  }
 0x4af   : > { %3528 = vmatmul.mubr.bf16.gmra.mrb[140].mxu0 %v12982_v42  ;;  %3866 = vmatmul.mubr.bf16.gmra.mrb[140].mxu1 %v12982_v42 }
 0x4b0   : > { %4133 = vmatprep.mubr.bf16.mxu0 %v12900_v17  ;;  %4471 = vmatprep.mubr.bf16.mxu1 %v12900_v17 }
 0x4b7   : > { %4134 = vmatmul.mubr.bf16.vlgmr.msra.gmra.mrb[144].mxu0 %v12898_v14  ;;  %4472 = vmatmul.mubr.bf16.vlgmr.msra.gmra.mrb[144].mxu1 %v12898_v14 }
 0x4b8   : > { %4143 = vmatprep.mubr.bf16.mxu0 %v12912_v13  ;;  %4481 = vmatprep.mubr.bf16.mxu1 %v12912_v13 }
 0x4b9   : > { %4778 = vmatpush1.bf16.msra.mxu0 %v11233_v44  ;;  %5116 = vmatpush1.bf16.msra.mxu1 %v11236_v54  ;;  %v11302_v44 = vld [vmem:[#allocation15 + $0x5b0] ss:$8 sps:$4 sm:$0xff]   ;;  %v11307_v54 = vld [vmem:[#allocation15 + $0x4c4] ss:$8 sps:$4 sm:$0xff]  }
 0x4ba   : > { %4779 = vmatprep.subr.bf16.mxu0 %v11241_v43  ;;  %5117 = vmatprep.subr.bf16.mxu1 %v11244_v47  ;;  %v11310_v43 = vld [vmem:[#allocation15 + $0x5c4] ss:$8 sps:$4 sm:$0xff]   ;;  %v11305_v47 = vld [vmem:[#allocation15 + $0x4c0] ss:$8 sps:$4 sm:$0xff]  }
 0x4bd   : > { %4780 = vmatpush1.bf16.msra.mxu0 %v11239_v30  ;;  %5118 = vmatpush1.bf16.msra.mxu1 %v11242_v38  ;;  %v11308_v30 = vld [vmem:[#allocation15 + $0x5c0] ss:$8 sps:$4 sm:$0xff]   ;;  %v11313_v38 = vld [vmem:[#allocation15 + $0x4d4] ss:$8 sps:$4 sm:$0xff]  }
 0x4be   : > { %4781 = vmatprep.subr.bf16.mxu0 %v11247_v39  ;;  %5119 = vmatprep.subr.bf16.mxu1 %v11250_v36  ;;  %v11316_v39 = vld [vmem:[#allocation15 + $0x5d4] ss:$8 sps:$4 sm:$0xff]   ;;  %v11311_v36 = vld [vmem:[#allocation15 + $0x4d0] ss:$8 sps:$4 sm:$0xff]  }
 0x4bf   : > { %4144 = vmatmul.mubr.bf16.gmra.mrb[148].mxu0 %v12910_v0  ;;  %4482 = vmatmul.mubr.bf16.gmra.mrb[148].mxu1 %v12910_v0 }
 0x4c0   : > { %4153 = vmatprep.mubr.bf16.mxu0 %v12924_v33  ;;  %4491 = vmatprep.mubr.bf16.mxu1 %v12924_v33 }
 0x4c1   : > { %4782 = vmatpush1.bf16.msra.mxu0 %v11245_v4  ;;  %5120 = vmatpush1.bf16.msra.mxu1 %v11248_v55  ;;  %v11314_v4 = vld [vmem:[#allocation15 + $0x5d0] ss:$8 sps:$4 sm:$0xff]   ;;  %v11319_v55 = vld [vmem:[#allocation15 + $0x4e4] ss:$8 sps:$4 sm:$0xff]  }
 0x4c2   : > { %4783 = vmatprep.subr.bf16.mxu0 %v11253_v56  ;;  %5121 = vmatprep.subr.bf16.mxu1 %v11256_v62  ;;  %v11322_v56 = vld [vmem:[#allocation15 + $0x5e4] ss:$8 sps:$4 sm:$0xff]   ;;  %v11317_v62 = vld [vmem:[#allocation15 + $0x4e0] ss:$8 sps:$4 sm:$0xff]  }
 0x4c5   : > { %4784 = vmatpush1.bf16.msra.mxu0 %v11251_v53  ;;  %5122 = vmatpush1.bf16.msra.mxu1 %v11254_v31  ;;  %v11320_v53 = vld [vmem:[#allocation15 + $0x5e0] ss:$8 sps:$4 sm:$0xff]   ;;  %v11325_v31 = vld [vmem:[#allocation15 + $0x4f4] ss:$8 sps:$4 sm:$0xff]  }
 0x4c6   : > { %4785 = vmatprep.subr.bf16.mxu0 %v11259_v63  ;;  %5123 = vmatprep.subr.bf16.mxu1 %v11262_v11  ;;  %v11328_v63 = vld [vmem:[#allocation15 + $0x5f4] ss:$8 sps:$4 sm:$0xff]   ;;  %v11323_v11 = vld [vmem:[#allocation15 + $0x4f0] ss:$8 sps:$4 sm:$0xff]  }
 0x4c7   : > { %4154 = vmatmul.mubr.bf16.gmra.mrb[152].mxu0 %v12922_v23  ;;  %4492 = vmatmul.mubr.bf16.gmra.mrb[152].mxu1 %v12922_v23 }
 0x4c8   : > { %4163 = vmatprep.mubr.bf16.mxu0 %v12936_v46  ;;  %4501 = vmatprep.mubr.bf16.mxu1 %v12936_v46 }
 0x4c9   : > { %4786 = vmatpush1.bf16.msra.mxu0 %v11257_v1  ;;  %5124 = vmatpush1.bf16.msra.mxu1 %v11260_v34  ;;  %v11326_v1 = vld [vmem:[#allocation15 + $0x5f0] ss:$8 sps:$4 sm:$0xff]  }
 0x4ca   : > { %4787 = vmatprep.subr.bf16.mxu0 %v11265_v51  ;;  %5125 = vmatprep.subr.bf16.mxu1 %v11268_v59 }
 0x4cd   : > { %4788 = vmatpush1.bf16.msra.mxu0 %v11263_v50  ;;  %5126 = vmatpush1.bf16.msra.mxu1 %v11266_v12 }
 0x4ce   : > { %4789 = vmatprep.subr.bf16.mxu0 %v11271_v45  ;;  %5127 = vmatprep.subr.bf16.mxu1 %v11274_v2 }
 0x4cf   : > { %4164 = vmatmul.mubr.bf16.gmra.mrb[156].mxu0 %v12934_v40  ;;  %4502 = vmatmul.mubr.bf16.gmra.mrb[156].mxu1 %v12934_v40 }
 0x4d0   : > { %4173 = vmatprep.mubr.bf16.mxu0 %v12948_v10  ;;  %4511 = vmatprep.mubr.bf16.mxu1 %v12948_v10 }
 0x4d1   : > { %4790 = vmatpush1.bf16.msra.mxu0 %v11269_v7  ;;  %5128 = vmatpush1.bf16.msra.mxu1 %v11272_v15 }
 0x4d2   : > { %4791 = vmatprep.subr.bf16.mxu0 %v11277_v48  ;;  %5129 = vmatprep.subr.bf16.mxu1 %v11280_v3 }
 0x4d5   : > { %4792 = vmatpush1.bf16.msra.mxu0 %v11275_v9  ;;  %5130 = vmatpush1.bf16.msra.mxu1 %v11278_v16 }
 0x4d6   : > { %4793 = vmatprep.subr.bf16.mxu0 %v11283_v52  ;;  %5131 = vmatprep.subr.bf16.mxu1 %v11286_v61 }
 0x4d7   : > { %4174 = vmatmul.mubr.bf16.gmra.mrb[160].mxu0 %v12946_v6  ;;  %4512 = vmatmul.mubr.bf16.gmra.mrb[160].mxu1 %v12946_v6 }
 0x4d8   : > { %4183 = vmatprep.mubr.bf16.mxu0 %v12960_v35  ;;  %4521 = vmatprep.mubr.bf16.mxu1 %v12960_v35 }
 0x4d9   : > { %4794 = vmatpush1.bf16.msra.mxu0 %v11281_v24  ;;  %5132 = vmatpush1.bf16.msra.mxu1 %v11284_v29 }
 0x4da   : > { %4795 = vmatprep.subr.bf16.mxu0 %v11289_v19  ;;  %5133 = vmatprep.subr.bf16.mxu1 %v11292_v60 }
 0x4dd   : > { %4796 = vmatpush1.bf16.msra.mxu0 %v11287_v22  ;;  %5134 = vmatpush1.bf16.msra.mxu1 %v11290_v32 }
 0x4de   : > { %4797 = vmatprep.subr.bf16.mxu0 %v11295_v27  ;;  %5135 = vmatprep.subr.bf16.mxu1 %v11298_v18 }
 0x4df   : > { %4184 = vmatmul.mubr.bf16.gmra.mrb[164].mxu0 %v12958_v49  ;;  %4522 = vmatmul.mubr.bf16.gmra.mrb[164].mxu1 %v12958_v49 }
 0x4e0   : > { %4193 = vmatprep.mubr.bf16.mxu0 %v12972_v8  ;;  %4531 = vmatprep.mubr.bf16.mxu1 %v12972_v8 }
 0x4e1   : > { %4798 = vmatpush1.bf16.msra.mxu0 %v11293_v20  ;;  %5136 = vmatpush1.bf16.msra.mxu1 %v11296_v57 }
 0x4e2   : > { %4799 = vmatprep.subr.bf16.mxu0 %v11301_v26  ;;  %5137 = vmatprep.subr.bf16.mxu1 %v11304_v28 }
 0x4e5   : > { %4800 = vmatpush1.bf16.msra.mxu0 %v11299_v41  ;;  %5138 = vmatpush1.bf16.msra.mxu1 %v11302_v44 }
 0x4e6   : > { %4801 = vmatprep.subr.bf16.mxu0 %v11307_v54  ;;  %5139 = vmatprep.subr.bf16.mxu1 %v11310_v43 }
 0x4e7   : > { %4194 = vmatmul.mubr.bf16.gmra.mrb[168].mxu0 %v12970_v58  ;;  %4532 = vmatmul.mubr.bf16.gmra.mrb[168].mxu1 %v12970_v58 }
 0x4e8   : > { %4203 = vmatprep.mubr.bf16.mxu0 %v12984_v37  ;;  %4541 = vmatprep.mubr.bf16.mxu1 %v12984_v37 }
 0x4e9   : > { %4802 = vmatpush1.bf16.msra.mxu0 %v11305_v47  ;;  %5140 = vmatpush1.bf16.msra.mxu1 %v11308_v30 }
 0x4ea   : > { %4803 = vmatprep.subr.bf16.mxu0 %v11313_v38  ;;  %5141 = vmatprep.subr.bf16.mxu1 %v11316_v39 }
 0x4ed   : > { %4804 = vmatpush1.bf16.msra.mxu0 %v11311_v36  ;;  %5142 = vmatpush1.bf16.msra.mxu1 %v11314_v4 }
 0x4ee   : > { %4805 = vmatprep.subr.bf16.mxu0 %v11319_v55  ;;  %5143 = vmatprep.subr.bf16.mxu1 %v11322_v56 }
 0x4ef   : > { %4204 = vmatmul.mubr.bf16.gmra.mrb[172].mxu0 %v12982_v42  ;;  %4542 = vmatmul.mubr.bf16.gmra.mrb[172].mxu1 %v12982_v42 }
 0x4f0   : > { %4809 = vmatprep.mubr.bf16.mxu0 %v12900_v17  ;;  %5147 = vmatprep.mubr.bf16.mxu1 %v12900_v17 }
 0x4f1   : > { %4806 = vmatpush1.bf16.msra.mxu0 %v11317_v62  ;;  %5144 = vmatpush1.bf16.msra.mxu1 %v11320_v53 }
 0x4f2   : > { %4807 = vmatprep.subr.bf16.mxu0 %v11325_v31  ;;  %5145 = vmatprep.subr.bf16.mxu1 %v11328_v63 }
 0x4f5   : > { %4808 = vmatpush1.bf16.msra.mxu0 %v11323_v11  ;;  %5146 = vmatpush1.bf16.msra.mxu1 %v11326_v1 }
 0x4f8   : > { %4810 = vmatmul.mubr.bf16.vlgmr.msra.gmra.mrb[176].mxu0 %v12898_v14  ;;  %5148 = vmatmul.mubr.bf16.vlgmr.msra.gmra.mrb[176].mxu1 %v12898_v14 }
 0x4f9   : > { %4819 = vmatprep.mubr.bf16.mxu0 %v12912_v13  ;;  %5157 = vmatprep.mubr.bf16.mxu1 %v12912_v13 }
 0x500   : > { %4820 = vmatmul.mubr.bf16.gmra.mrb[180].mxu0 %v12910_v0  ;;  %5158 = vmatmul.mubr.bf16.gmra.mrb[180].mxu1 %v12910_v0 }
 0x501   : > { %4829 = vmatprep.mubr.bf16.mxu0 %v12924_v33  ;;  %5167 = vmatprep.mubr.bf16.mxu1 %v12924_v33 }
 0x508   : > { %4830 = vmatmul.mubr.bf16.gmra.mrb[184].mxu0 %v12922_v23  ;;  %5168 = vmatmul.mubr.bf16.gmra.mrb[184].mxu1 %v12922_v23 }
 0x509   : > { %4839 = vmatprep.mubr.bf16.mxu0 %v12936_v46  ;;  %5177 = vmatprep.mubr.bf16.mxu1 %v12936_v46 }
 0x510   : > { %4840 = vmatmul.mubr.bf16.gmra.mrb[188].mxu0 %v12934_v40  ;;  %5178 = vmatmul.mubr.bf16.gmra.mrb[188].mxu1 %v12934_v40 }
 0x511   : > { %4849 = vmatprep.mubr.bf16.mxu0 %v12948_v10  ;;  %5187 = vmatprep.mubr.bf16.mxu1 %v12948_v10 }
 0x518   : > { %4850 = vmatmul.mubr.bf16.gmra.mrb[192].mxu0 %v12946_v6  ;;  %5188 = vmatmul.mubr.bf16.gmra.mrb[192].mxu1 %v12946_v6 }
 0x519   : > { %4859 = vmatprep.mubr.bf16.mxu0 %v12960_v35  ;;  %5197 = vmatprep.mubr.bf16.mxu1 %v12960_v35 }
 0x520   : > { %4860 = vmatmul.mubr.bf16.gmra.mrb[196].mxu0 %v12958_v49  ;;  %5198 = vmatmul.mubr.bf16.gmra.mrb[196].mxu1 %v12958_v49 }
 0x521   : > { %4869 = vmatprep.mubr.bf16.mxu0 %v12972_v8  ;;  %5207 = vmatprep.mubr.bf16.mxu1 %v12972_v8 }
 0x528   : > { %4870 = vmatmul.mubr.bf16.gmra.mrb[200].mxu0 %v12970_v58  ;;  %5208 = vmatmul.mubr.bf16.gmra.mrb[200].mxu1 %v12970_v58 }
 0x529   : > { %4879 = vmatprep.mubr.bf16.mxu0 %v12984_v37  ;;  %5217 = vmatprep.mubr.bf16.mxu1 %v12984_v37 }
 0x530   : > { %4880 = vmatmul.mubr.bf16.gmra.mrb[204].mxu0 %v12982_v42  ;;  %5218 = vmatmul.mubr.bf16.gmra.mrb[204].mxu1 %v12982_v42 }
 0x531   : > { %5337 = vmatprep.mubr.bf16.mxu0 %v16003_v25  ;;  %5418 = vmatprep.mubr.bf16.mxu1 %v16003_v25 }
 0x53e   : > { %v3459_v14 = vpop.f32.mrb[112].mxu0  ;;  %v3797_v17 = vpop.f32.mrb[112].mxu1 }
 0x53f   : > { %v3461_v0 = vpop.f32.mrb[113].mxu0  ;;  %v3799_v13 = vpop.f32.mrb[113].mxu1 }
 0x540   : > { %v3463_v23 = vpop.f32.mrb[114].mxu0  ;;  %v3801_v33 = vpop.f32.mrb[114].mxu1 }
 0x541   : > { %v3538_v40 = vpack.c.bf16 %v3463_v23, %v3459_v14  ;;  %v3876_v46 = vpack.c.bf16 %v3801_v33, %v3797_v17  ;;  %v3465_v6 = vpop.f32.mrb[115].mxu0  ;;  %v3803_v10 = vpop.f32.mrb[115].mxu1 }
 0x542   : > { %v3539_v49 = vpack.c.bf16 %v3465_v6, %v3461_v0  ;;  %v3877_v35 = vpack.c.bf16 %v3803_v10, %v3799_v13 }
 0x544   : > { %5305 = vmatprep.subr.bf16.mxu0 %v3539_v49 }
 0x545   : > { %5306 = vmatpush1.bf16.msra.mxu0 %v3538_v40 }
 0x546   : > { %v3469_v58 = vpop.f32.mrb[116].mxu0  ;;  %v3807_v8 = vpop.f32.mrb[116].mxu1  ;;  %5307 = vmatprep.subr.bf16.mxu0 %v3877_v35 }
 0x547   : > { %v3471_v42 = vpop.f32.mrb[117].mxu0  ;;  %v3809_v37 = vpop.f32.mrb[117].mxu1 }
 0x548   : > { %v3473_v34 = vpop.f32.mrb[118].mxu0  ;;  %v3811_v51 = vpop.f32.mrb[118].mxu1 }
 0x549   : > { %v3540_v59 = vpack.c.bf16 %v3473_v34, %v3469_v58  ;;  %v3878_v50 = vpack.c.bf16 %v3811_v51, %v3807_v8  ;;  %v3475_v12 = vpop.f32.mrb[119].mxu0  ;;  %v3813_v45 = vpop.f32.mrb[119].mxu1  ;;  %5308 = vmatpush1.bf16.msra.mxu0 %v3876_v46 }
 0x54a   : > { %v3541_v2 = vpack.c.bf16 %v3475_v12, %v3471_v42  ;;  %v3879_v7 = vpack.c.bf16 %v3813_v45, %v3809_v37 }
 0x54c   : > { %5386 = vmatprep.subr.bf16.mxu1 %v3541_v2 }
 0x54d   : > { %5387 = vmatpush1.bf16.msra.mxu1 %v3540_v59 }
 0x54e   : > { %5388 = vmatprep.subr.bf16.mxu1 %v3879_v7 }
 0x551   : > { %5389 = vmatpush1.bf16.msra.mxu1 %v3878_v50 }
 0x552   : > { %v13056_v15 = vpop.f32.mrb[120].mxu0  ;;  %v13058_v48 = vpop.f32.mrb[120].mxu1 }
 0x553   : > { %v13060_v3 = vpop.f32.mrb[121].mxu0  ;;  %v13062_v9 = vpop.f32.mrb[121].mxu1 }
 0x554   : > { %v13064_v16 = vpop.f32.mrb[122].mxu0  ;;  %v13066_v52 = vpop.f32.mrb[122].mxu1 }
 0x555   : > { %v13072_v29 = vpop.f32.mrb[123].mxu0  ;;  %v13074_v19 = vpop.f32.mrb[123].mxu1 }
 0x55a   : > { %v13080_v32 = vpop.f32.mrb[124].mxu0  ;;  %v13082_v27 = vpop.f32.mrb[124].mxu1 }
 0x55b   : > { %v13084_v18 = vpop.f32.mrb[125].mxu0  ;;  %v13086_v20 = vpop.f32.mrb[125].mxu1 }
 0x55c   : > { %v13088_v57 = vpop.f32.mrb[126].mxu0  ;;  %v13090_v26 = vpop.f32.mrb[126].mxu1 }
 0x55d   : > { %v13096_v44 = vpop.f32.mrb[127].mxu0  ;;  %v13098_v54 = vpop.f32.mrb[127].mxu1 }
 0x566   : > { %v13104_v30 = vpop.f32.mrb[128].mxu0  ;;  %v13106_v38 = vpop.f32.mrb[128].mxu1 }
 0x567   : > { %v13108_v39 = vpop.f32.mrb[129].mxu0  ;;  %v13110_v36 = vpop.f32.mrb[129].mxu1 }
 0x568   : > { %v13112_v4 = vpop.f32.mrb[130].mxu0  ;;  %v13114_v55 = vpop.f32.mrb[130].mxu1 }
 0x569   : > { %v13120_v53 = vpop.f32.mrb[131].mxu0  ;;  %v13122_v31 = vpop.f32.mrb[131].mxu1 }
 0x56e   : > { %v13128_v1 = vpop.f32.mrb[132].mxu0  ;;  %v13130_v14 = vpop.f32.mrb[132].mxu1 }
 0x56f   : > { %16097 = vst [vmem:[#allocation33_spill] sm:$0xff] %v13128_v1  ;;  %16098 = vst [vmem:[#allocation31_spill] sm:$0xff] %v13130_v14  ;;  %v13132_v17 = vpop.f32.mrb[133].mxu0  ;;  %v13134_v0 = vpop.f32.mrb[133].mxu1 }
 0x570   : > { %16099 = vst [vmem:[#allocation52_spill] sm:$0xff] %v13132_v17  ;;  %16100 = vst [vmem:[#allocation50_spill] sm:$0xff] %v13134_v0  ;;  %v13136_v13 = vpop.f32.mrb[134].mxu0  ;;  %v13138_v23 = vpop.f32.mrb[134].mxu1 }
 0x571   : > { %16101 = vst [vmem:[#allocation32_spill] sm:$0xff] %v13136_v13  ;;  %16102 = vst [vmem:[#allocation30_spill] sm:$0xff] %v13138_v23  ;;  %v13144_v46 = vpop.f32.mrb[135].mxu0  ;;  %v13146_v6 = vpop.f32.mrb[135].mxu1 }
 0x572   : > { %16103 = vst [vmem:[#allocation60_spill] sm:$0xff] %v13144_v46  ;;  %16104 = vst [vmem:[#allocation56_spill] sm:$0xff] %v13146_v6 }
 0x57a   : > { %v13152_v35 = vpop.f32.mrb[136].mxu0  ;;  %v13154_v58 = vpop.f32.mrb[136].mxu1 }
 0x57b   : > { %16105 = vst [vmem:[#allocation58_spill] sm:$0xff] %v13152_v35  ;;  %16106 = vst [vmem:[#allocation54_spill] sm:$0xff] %v13154_v58  ;;  %v13156_v8 = vpop.f32.mrb[137].mxu0  ;;  %v13158_v42 = vpop.f32.mrb[137].mxu1 }
 0x57c   : > { %16107 = vst [vmem:[#allocation61_spill] sm:$0xff] %v13156_v8  ;;  %16108 = vst [vmem:[#allocation57_spill] sm:$0xff] %v13158_v42  ;;  %v13160_v37 = vpop.f32.mrb[138].mxu0  ;;  %v13162_v34 = vpop.f32.mrb[138].mxu1 }
 0x57d   : > { %16109 = vst [vmem:[#allocation40_spill] sm:$0xff] %v13160_v37  ;;  %16110 = vst [vmem:[#allocation36_spill] sm:$0xff] %v13162_v34  ;;  %v13168_v50 = vpop.f32.mrb[139].mxu0  ;;  %v13170_v12 = vpop.f32.mrb[139].mxu1 }
 0x57e   : > { %16111 = vst [vmem:[#allocation59_spill] sm:$0xff] %v13168_v50  ;;  %16112 = vst [vmem:[#allocation55_spill] sm:$0xff] %v13170_v12 }
 0x582   : > { %v13176_v7 = vpop.f32.mrb[140].mxu0  ;;  %v13178_v40 = vpop.f32.mrb[140].mxu1 }
 0x583   : > { %16113 = vst [vmem:[#allocation38_spill] sm:$0xff] %v13176_v7  ;;  %16114 = vst [vmem:[#allocation34_spill] sm:$0xff] %v13178_v40  ;;  %v13180_v49 = vpop.f32.mrb[141].mxu0  ;;  %v13182_v51 = vpop.f32.mrb[141].mxu1 }
 0x584   : > { %16115 = vst [vmem:[#allocation41_spill] sm:$0xff] %v13180_v49  ;;  %16116 = vst [vmem:[#allocation37_spill] sm:$0xff] %v13182_v51  ;;  %v13184_v33 = vpop.f32.mrb[142].mxu0  ;;  %v13186_v59 = vpop.f32.mrb[142].mxu1 }
 0x585   : > { %16117 = vst [vmem:[#allocation39_spill] sm:$0xff] %v13184_v33  ;;  %16118 = vst [vmem:[#allocation35_spill] sm:$0xff] %v13186_v59  ;;  %v13192_v62 = vpop.f32.mrb[143].mxu0  ;;  %v13194_v2 = vpop.f32.mrb[143].mxu1 }
 0x586   : > { %16119 = vst [vmem:[#allocation68_spill] sm:$0xff] %v13192_v62  ;;  %16120 = vst [vmem:[#allocation64_spill] sm:$0xff] %v13194_v2 }
 0x58a   : > { %v4135_v63 = vpop.f32.mrb[144].mxu0  ;;  %v4473_v41 = vpop.f32.mrb[144].mxu1 }
 0x58b   : > { %v4137_v47 = vpop.f32.mrb[145].mxu0  ;;  %v4475_v28 = vpop.f32.mrb[145].mxu1 }
 0x58c   : > { %v4139_v43 = vpop.f32.mrb[146].mxu0  ;;  %v4477_v24 = vpop.f32.mrb[146].mxu1 }
 0x58d   : > { %v4214_v10 = vpack.c.bf16 %v4139_v43, %v4135_v63  ;;  %v4552_v22 = vpack.c.bf16 %v4477_v24, %v4473_v41  ;;  %v4141_v61 = vpop.f32.mrb[147].mxu0  ;;  %v4479_v45 = vpop.f32.mrb[147].mxu1 }
 0x58e   : > { %v4215_v60 = vpack.c.bf16 %v4141_v61, %v4137_v47  ;;  %v4553_v5 = vpack.c.bf16 %v4479_v45, %v4475_v28 }
 0x590   : > { %5309 = vmatprep.subr.bf16.mxu0 %v4215_v60 }
 0x591   : > { %5310 = vmatpush1.bf16.msra.mxu0 %v4214_v10 }
 0x592   : > { %v4145_v21 = vpop.f32.mrb[148].mxu0  ;;  %v4483_v40 = vpop.f32.mrb[148].mxu1  ;;  %5311 = vmatprep.subr.bf16.mxu0 %v4553_v5 }
 0x593   : > { %v4147_v11 = vpop.f32.mrb[149].mxu0  ;;  %v4485_v59 = vpop.f32.mrb[149].mxu1 }
 0x594   : > { %v4149_v56 = vpop.f32.mrb[150].mxu0  ;;  %v4487_v51 = vpop.f32.mrb[150].mxu1 }
 0x595   : > { %v4216_v2 = vpack.c.bf16 %v4149_v56, %v4145_v21  ;;  %v4554_v7 = vpack.c.bf16 %v4487_v51, %v4483_v40  ;;  %v4151_v33 = vpop.f32.mrb[151].mxu0  ;;  %v4489_v49 = vpop.f32.mrb[151].mxu1  ;;  %5312 = vmatpush1.bf16.msra.mxu0 %v4552_v22 }
 0x596   : > { %v4217_v43 = vpack.c.bf16 %v4151_v33, %v4147_v11  ;;  %v4555_v24 = vpack.c.bf16 %v4489_v49, %v4485_v59 }
 0x598   : > { %5390 = vmatprep.subr.bf16.mxu1 %v4217_v43 }
 0x599   : > { %5391 = vmatpush1.bf16.msra.mxu1 %v4216_v2 }
 0x59a   : > { %v13200_v61 = vpop.f32.mrb[152].mxu0  ;;  %v13202_v60 = vpop.f32.mrb[152].mxu1  ;;  %5392 = vmatprep.subr.bf16.mxu1 %v4555_v24 }
 0x59b   : > { %v13204_v28 = vpop.f32.mrb[153].mxu0  ;;  %v13206_v5 = vpop.f32.mrb[153].mxu1 }
 0x59c   : > { %v13208_v41 = vpop.f32.mrb[154].mxu0  ;;  %v13210_v21 = vpop.f32.mrb[154].mxu1 }
 0x59d   : > { %v13216_v56 = vpop.f32.mrb[155].mxu0  ;;  %v13218_v63 = vpop.f32.mrb[155].mxu1  ;;  %5393 = vmatpush1.bf16.msra.mxu1 %v4554_v7 }
 0x5a2   : > { %v13224_v40 = vpop.f32.mrb[156].mxu0  ;;  %v13226_v10 = vpop.f32.mrb[156].mxu1 }
 0x5a3   : > { %v13228_v49 = vpop.f32.mrb[157].mxu0  ;;  %v13230_v51 = vpop.f32.mrb[157].mxu1 }
 0x5a4   : > { %v13232_v59 = vpop.f32.mrb[158].mxu0  ;;  %v13234_v45 = vpop.f32.mrb[158].mxu1 }
 0x5a5   : > { %v13240_v43 = vpop.f32.mrb[159].mxu0  ;;  %v13242_v24 = vpop.f32.mrb[159].mxu1 }
 0x5aa   : > { %v13248_v22 = vpop.f32.mrb[160].mxu0  ;;  %v13250_v11 = vpop.f32.mrb[160].mxu1 }
 0x5ab   : > { %16121 = vst [vmem:[#allocation48_spill] sm:$0xff] %v13248_v22  ;;  %16122 = vst [vmem:[#allocation44_spill] sm:$0xff] %v13250_v11  ;;  %v13252_v62 = vpop.f32.mrb[161].mxu0  ;;  %v13254_v2 = vpop.f32.mrb[161].mxu1 }
 0x5ac   : > { %16123 = vst [vmem:[#allocation66_spill] sm:$0xff] %v13252_v62  ;;  %16124 = vst [vmem:[#allocation62_spill] sm:$0xff] %v13254_v2  ;;  %v13256_v58 = vpop.f32.mrb[162].mxu0  ;;  %v13258_v7 = vpop.f32.mrb[162].mxu1 }
 0x5ad   : > { %16125 = vst [vmem:[#allocation46_spill] sm:$0xff] %v13256_v58  ;;  %16126 = vst [vmem:[#allocation42_spill] sm:$0xff] %v13258_v7  ;;  %v13264_v42 = vpop.f32.mrb[163].mxu0  ;;  %v13266_v33 = vpop.f32.mrb[163].mxu1 }
 0x5ae   : > { %16127 = vst [vmem:[#allocation69_spill] sm:$0xff] %v13266_v33 }
 0x5b2   : > { %v13272_v37 = vpop.f32.mrb[164].mxu0  ;;  %v13274_v8 = vpop.f32.mrb[164].mxu1 }
 0x5b3   : > { %16128 = vst [vmem:[#allocation65_spill] sm:$0xff] %v13272_v37  ;;  %16129 = vst [vmem:[#allocation49_spill] sm:$0xff] %v13274_v8  ;;  %v13276_v50 = vpop.f32.mrb[165].mxu0  ;;  %v13278_v34 = vpop.f32.mrb[165].mxu1 }
 0x5b4   : > { %16130 = vst [vmem:[#allocation45_spill] sm:$0xff] %v13276_v50  ;;  %16131 = vst [vmem:[#allocation67_spill] sm:$0xff] %v13278_v34  ;;  %v13280_v14 = vpop.f32.mrb[166].mxu0  ;;  %v13282_v47 = vpop.f32.mrb[166].mxu1 }
 0x5b5   : > { %16132 = vst [vmem:[#allocation63_spill] sm:$0xff] %v13280_v14  ;;  %16133 = vst [vmem:[#allocation47_spill] sm:$0xff] %v13282_v47  ;;  %v13288_v11 = vpop.f32.mrb[167].mxu0  ;;  %v13290_v35 = vpop.f32.mrb[167].mxu1 }
 0x5b6   : > { %16134 = vst [vmem:[#allocation43_spill] sm:$0xff] %v13288_v11  ;;  %16135 = vst [vmem:[#allocation73_spill] sm:$0xff] %v13290_v35 }
 0x5ba   : > { %v13296_v6 = vpop.f32.mrb[168].mxu0  ;;  %v13298_v2 = vpop.f32.mrb[168].mxu1 }
 0x5bb   : > { %16136 = vst [vmem:[#allocation70_spill] sm:$0xff] %v13296_v6  ;;  %16137 = vst [vmem:[#allocation72_spill] sm:$0xff] %v13298_v2  ;;  %v13300_v33 = vpop.f32.mrb[169].mxu0  ;;  %v13302_v23 = vpop.f32.mrb[169].mxu1 }
 0x5bc   : > { %16138 = vst [vmem:[#allocation74_spill] sm:$0xff] %v13300_v33  ;;  %16139 = vst [vmem:[#allocation71_spill] sm:$0xff] %v13302_v23  ;;  %v13304_v37 = vpop.f32.mrb[170].mxu0  ;;  %v13306_v12 = vpop.f32.mrb[170].mxu1 }
 0x5bd   : > { %16140 = vst [vmem:[#allocation75_spill] sm:$0xff] %v13304_v37  ;;  %16141 = vst [vmem:[#allocation76_spill] sm:$0xff] %v13306_v12  ;;  %v13312_v47 = vpop.f32.mrb[171].mxu0  ;;  %v13314_v0 = vpop.f32.mrb[171].mxu1 }
 0x5be   : > { %16142 = vst [vmem:[#allocation77_spill] sm:$0xff] %v13312_v47  ;;  %16143 = vst [vmem:[#allocation78_spill] sm:$0xff] %v13314_v0 }
 0x5c2   : > { %v13320_v14 = vpop.f32.mrb[172].mxu0  ;;  %v13322_v50 = vpop.f32.mrb[172].mxu1 }
 0x5c3   : > { %16144 = vst [vmem:[#allocation79_spill] sm:$0xff] %v13320_v14  ;;  %16145 = vst [vmem:[#allocation80_spill] sm:$0xff] %v13322_v50  ;;  %v13324_v11 = vpop.f32.mrb[173].mxu0  ;;  %v13326_v8 = vpop.f32.mrb[173].mxu1 }
 0x5c4   : > { %16146 = vst [vmem:[#allocation81_spill] sm:$0xff] %v13324_v11  ;;  %16147 = vst [vmem:[#allocation82_spill] sm:$0xff] %v13326_v8  ;;  %v13328_v6 = vpop.f32.mrb[174].mxu0  ;;  %v13330_v7 = vpop.f32.mrb[174].mxu1 }
 0x5c5   : > { %16148 = vst [vmem:[#allocation83_spill] sm:$0xff] %v13328_v6  ;;  %16149 = vst [vmem:[#allocation84_spill] sm:$0xff] %v13330_v7  ;;  %v13336_v12 = vpop.f32.mrb[175].mxu0  ;;  %v13338_v35 = vpop.f32.mrb[175].mxu1 }
 0x5c6   : > { %16150 = vst [vmem:[#allocation85_spill] sm:$0xff] %v13336_v12  ;;  %16151 = vst [vmem:[#allocation86_spill] sm:$0xff] %v13338_v35  ;;  %v13344_v35 = vld [vmem:[#allocation16] sm:$0xff]  }
 0x5cb   : > { %v4811_v37 = vpop.f32.mrb[176].mxu0  ;;  %v5149_v33 = vpop.f32.mrb[176].mxu1 }
 0x5cc   : > { %v4813_v47 = vpop.f32.mrb[177].mxu0  ;;  %v5151_v1 = vpop.f32.mrb[177].mxu1 }
 0x5cd   : > { %v4815_v13 = vpop.f32.mrb[178].mxu0  ;;  %v5153_v22 = vpop.f32.mrb[178].mxu1 }
 0x5ce   : > { %v4890_v2 = vpack.c.bf16 %v4815_v13, %v4811_v37  ;;  %v5228_v14 = vpack.c.bf16 %v5153_v22, %v5149_v33  ;;  %v4817_v6 = vpop.f32.mrb[179].mxu0  ;;  %v5155_v34 = vpop.f32.mrb[179].mxu1 }
 0x5cf   : > { %v4891_v50 = vpack.c.bf16 %v4817_v6, %v4813_v47  ;;  %v5229_v7 = vpack.c.bf16 %v5155_v34, %v5151_v1  ;;  %v16152_v1 = vpack.c.bf16 %v13072_v29, %v13060_v3  ;;  %v16153_v34 = vpack.c.bf16 %v13064_v16, %v13056_v15 }
 0x5d0   : > { %v16155_v16 = vpack.c.bf16 %v13066_v52, %v13058_v48  ;;  %v16157_v47 = vpack.c.bf16 %v13096_v44, %v13084_v18  ;;  %v16158_v48 = vpack.c.bf16 %v13208_v41, %v13200_v61  ;;  %v16159_v52 = vpack.c.bf16 %v13088_v57, %v13080_v32 }
 0x5d1   : > { %5313 = vmatprep.subr.bf16.mxu0 %v4891_v50  ;;  %v16160_v18 = vpack.c.bf16 %v13218_v63, %v13206_v5  ;;  %v16161_v44 = vpack.c.bf16 %v13098_v54, %v13086_v20  ;;  %v16162_v5 = vpack.c.bf16 %v13210_v21, %v13202_v60  ;;  %v16163_v20 = vpack.c.bf16 %v13090_v26, %v13082_v27 }
 0x5d2   : > { %5314 = vmatpush1.bf16.msra.mxu0 %v4890_v2  ;;  %v16166_v27 = vpack.c.bf16 %v13242_v24, %v13230_v51  ;;  %v16167_v51 = vpack.c.bf16 %v13234_v45, %v13226_v10  ;;  %v16170_v45 = vpack.c.bf16 %v13122_v31, %v13110_v36  ;;  %v16171_v36 = vpack.c.bf16 %v13114_v55, %v13106_v38  ;;  %v16178_v38 = vld [vmem:[#allocation48_spill] sm:$0xff] }
 0x5d3   : > { %v4821_v58 = vpop.f32.mrb[180].mxu0  ;;  %v5159_v17 = vpop.f32.mrb[180].mxu1  ;;  %5315 = vmatprep.subr.bf16.mxu0 %v5229_v7  ;;  %v16164_v7 = vpack.c.bf16 %v13240_v43, %v13228_v49 }
 0x5d4   : > { %v4823_v23 = vpop.f32.mrb[181].mxu0  ;;  %v5161_v11 = vpop.f32.mrb[181].mxu1 }
 0x5d5   : > { %v4825_v0 = vpop.f32.mrb[182].mxu0  ;;  %v5163_v8 = vpop.f32.mrb[182].mxu1 }
 0x5d6   : > { %v4892_v12 = vpack.c.bf16 %v4825_v0, %v4821_v58  ;;  %v5230_v46 = vpack.c.bf16 %v5163_v8, %v5159_v17  ;;  %v4827_v62 = vpop.f32.mrb[183].mxu0  ;;  %v5165_v13 = vpop.f32.mrb[183].mxu1  ;;  %5316 = vmatpush1.bf16.msra.mxu0 %v5228_v14  ;;  %v13358_v58 = vld [vmem:[#allocation16 + $0x8] sm:$0xff]  }
 0x5d7   : > { %v4893_v37 = vpack.c.bf16 %v4827_v62, %v4823_v23  ;;  %v5231_v6 = vpack.c.bf16 %v5165_v13, %v5161_v11  ;;  %5467 = vmatprep.subr.bf16.mxu0 %v16152_v1  ;;  %v16154_v62 = vpack.c.bf16 %v13074_v19, %v13062_v9  ;;  %v16156_v19 = vpack.c.bf16 %v13216_v56, %v13204_v28 }
 0x5d8   : > { %v16165_v13 = vpack.c.bf16 %v13232_v59, %v13224_v40 }
 0x5d9   : > { %10250 = vmatmul.mubr.msk.bf16.vlgmr.msra.gmra.mrb[208].mxu0 %vm5298_vm1, %v13344_v35  ;;  %5394 = vmatprep.subr.bf16.mxu1 %v4893_v37 }
 0x5da   : > { %5395 = vmatpush1.bf16.msra.mxu1 %v4892_v12  ;;  %5468 = vmatpush1.bf16.msra.mxu0 %v16153_v34 }
 0x5db   : > { %v4831_v17 = vpop.f32.mrb[184].mxu0  ;;  %v5169_v0 = vpop.f32.mrb[184].mxu1  ;;  %5396 = vmatprep.subr.bf16.mxu1 %v5231_v6  ;;  %5469 = vmatprep.subr.bf16.mxu0 %v16154_v62 }
 0x5dc   : > { %v4833_v14 = vpop.f32.mrb[185].mxu0  ;;  %v5171_v23 = vpop.f32.mrb[185].mxu1  ;;  %5347 = vmatprep.mubr.bf16.mxu0 %v16003_v25 }
 0x5dd   : > { %v4835_v3 = vpop.f32.mrb[186].mxu0  ;;  %v5173_v29 = vpop.f32.mrb[186].mxu1 }
 0x5de   : > { %v4894_v8 = vpack.c.bf16 %v4835_v3, %v4831_v17  ;;  %v5232_v50 = vpack.c.bf16 %v5173_v29, %v5169_v0  ;;  %v4837_v12 = vpop.f32.mrb[187].mxu0  ;;  %v5175_v15 = vpop.f32.mrb[187].mxu1  ;;  %5397 = vmatpush1.bf16.msra.mxu1 %v5230_v46  ;;  %5470 = vmatpush1.bf16.msra.mxu0 %v16155_v16  ;;  %v16168_v17 = vpack.c.bf16 %v13120_v53, %v13108_v39  ;;  %v16175_v16 = vld [vmem:[#allocation52_spill] sm:$0xff] }
 0x5df   : > { %v4895_v22 = vpack.c.bf16 %v4837_v12, %v4833_v14  ;;  %v5233_v9 = vpack.c.bf16 %v5175_v15, %v5171_v23  ;;  %5471 = vmatprep.subr.bf16.mxu0 %v16156_v19  ;;  %5548 = vmatprep.subr.bf16.mxu1 %v16157_v47  ;;  %v16169_v0 = vpack.c.bf16 %v13112_v4, %v13104_v30  ;;  %v16174_v15 = vld [vmem:[#allocation60_spill] sm:$0xff]  ;;  %v16181_v47 = vld [vmem:[#allocation33_spill] sm:$0xff] }
 0x5e0   : > { %v16180_v19 = vld [vmem:[#allocation32_spill] sm:$0xff] }
 0x5e1   : > { %10251 = vmatmul.mubr.msk.bf16.gmra.mrb[212].mxu0 %vm5298_vm1, %v13358_v58  ;;  %10252 = vmatmul.mubr.msk.bf16.vlgmr.msra.gmra.mrb[208].mxu1 %vm5298_vm1, %v13344_v35 }
 0x5e2   : > { %5472 = vmatpush1.bf16.msra.mxu0 %v16158_v48  ;;  %5549 = vmatpush1.bf16.msra.mxu1 %v16159_v52  ;;  %v16182_v48 = vpack.c.bf16 %v16180_v19, %v16181_v47  ;;  %v16210_v19 = vld [vmem:[#allocation40_spill] sm:$0xff]  ;;  %v16211_v47 = vld [vmem:[#allocation58_spill] sm:$0xff] }
 0x5e3   : > { %v4841_v46 = vpop.f32.mrb[188].mxu0  ;;  %v5179_v28 = vpop.f32.mrb[188].mxu1  ;;  %5473 = vmatprep.subr.bf16.mxu0 %v16160_v18  ;;  %5550 = vmatprep.subr.bf16.mxu1 %v16161_v44  ;;  %v16186_v44 = vld [vmem:[#allocation56_spill] sm:$0xff] }
 0x5e4   : > { %v4843_v56 = vpop.f32.mrb[189].mxu0  ;;  %v5181_v11 = vpop.f32.mrb[189].mxu1  ;;  %5428 = vmatprep.mubr.bf16.mxu1 %v16003_v25  ;;  %5499 = vmatprep.mubr.bf16.mxu0 %v16003_v25 }
 0x5e5   : > { %v4845_v61 = vpop.f32.mrb[190].mxu0  ;;  %v5183_v41 = vpop.f32.mrb[190].mxu1 }
 0x5e6   : > { %v4896_v32 = vpack.c.bf16 %v4845_v61, %v4841_v46  ;;  %v5234_v57 = vpack.c.bf16 %v5183_v41, %v5179_v28  ;;  %v4847_v33 = vpop.f32.mrb[191].mxu0  ;;  %v5185_v2 = vpop.f32.mrb[191].mxu1  ;;  %5474 = vmatpush1.bf16.msra.mxu0 %v16162_v5  ;;  %5551 = vmatpush1.bf16.msra.mxu1 %v16163_v20  ;;  %v16183_v46 = vld [vmem:[#allocation69_spill] sm:$0xff]  ;;  %v16184_v28 = vld [vmem:[#allocation62_spill] sm:$0xff] }
 0x5e7   : > { %v4897_v54 = vpack.c.bf16 %v4847_v33, %v4843_v56  ;;  %v5235_v63 = vpack.c.bf16 %v5185_v2, %v5181_v11  ;;  %5475 = vmatprep.subr.bf16.mxu0 %v4895_v22  ;;  %5552 = vmatprep.subr.bf16.mxu1 %v16164_v7  ;;  %v16176_v22 = vpack.c.bf16 %v16174_v15, %v16175_v16  ;;  %v16187_v56 = vld [vmem:[#allocation50_spill] sm:$0xff] }
 0x5e8   : > { %v16185_v18 = vpack.c.bf16 %v16183_v46, %v16184_v28  ;;  %v16188_v11 = vpack.c.bf16 %v16186_v44, %v16187_v56  ;;  %v16219_v46 = vld [vmem:[#allocation77_spill] sm:$0xff]  ;;  %v16220_v28 = vld [vmem:[#allocation74_spill] sm:$0xff] }
 0x5e9   : > { %10253 = vmatmul.mubr.msk.bf16.gmra.mrb[212].mxu1 %vm5298_vm1, %v13358_v58  ;;  %v16223_v44 = vld [vmem:[#allocation41_spill] sm:$0xff] }
 0x5ea   : > { %5476 = vmatpush1.bf16.msra.mxu0 %v4894_v8  ;;  %5553 = vmatpush1.bf16.msra.mxu1 %v16165_v13  ;;  %v16192_v13 = vld [vmem:[#allocation30_spill] sm:$0xff] }
 0x5eb   : > { %v13401_v60 = vpop.f32.mrb[192].mxu0  ;;  %v13403_v21 = vpop.f32.mrb[192].mxu1  ;;  %5477 = vmatprep.subr.bf16.mxu0 %v5233_v9  ;;  %5554 = vmatprep.subr.bf16.mxu1 %v16166_v27  ;;  %v16177_v9 = vld [vmem:[#allocation46_spill] sm:$0xff] }
 0x5ec   : > { %v4853_v26 = vpop.f32.mrb[193].mxu0  ;;  %v13408_v49 = vpop.f32.mrb[193].mxu1  ;;  %5580 = vmatprep.mubr.bf16.mxu1 %v16003_v25  ;;  %v16179_v55 = vpack.c.bf16 %v16177_v9, %v16178_v38  ;;  %v16207_v9 = vld [vmem:[#allocation59_spill] sm:$0xff]  ;;  %v16208_v38 = vld [vmem:[#allocation61_spill] sm:$0xff] }
 0x5ed   : > { %v4855_v43 = vpop.f32.mrb[194].mxu0  ;;  %v13411_v37 = vpop.f32.mrb[194].mxu1 }
 0x5ee   : > { %v4898_v40 = vpack.c.bf16 %v4855_v43, %v13401_v60  ;;  %v5236_v59 = vpack.c.bf16 %v13411_v37, %v13403_v21  ;;  %v4857_v6 = vpop.f32.mrb[195].mxu0  ;;  %v5195_v1 = vpop.f32.mrb[195].mxu1  ;;  %5478 = vmatpush1.bf16.msra.mxu0 %v5232_v50  ;;  %5555 = vmatpush1.bf16.msra.mxu1 %v16167_v51  ;;  %v16172_v50 = vld [vmem:[#allocation66_spill] sm:$0xff]  ;;  %v16193_v60 = vld [vmem:[#allocation31_spill] sm:$0xff]  ;;  %v16214_v37 = vld [vmem:[#allocation57_spill] sm:$0xff] }
 0x5ef   : > { %v4899_v24 = vpack.c.bf16 %v4857_v6, %v4853_v26  ;;  %v5237_v34 = vpack.c.bf16 %v5195_v1, %v13408_v49  ;;  %5556 = vmatprep.subr.bf16.mxu1 %v4897_v54  ;;  %5629 = vmatprep.subr.bf16.mxu0 %v16168_v17  ;;  %v16173_v12 = vpack.c.bf16 %v13264_v42, %v16172_v50  ;;  %v16189_v54 = vld [vmem:[#allocation42_spill] sm:$0xff]  ;;  %v16195_v43 = vld [vmem:[#allocation43_spill] sm:$0xff]  ;;  %v16196_v6 = vld [vmem:[#allocation45_spill] sm:$0xff] }
 0x5f0   : > { %v16194_v27 = vpack.c.bf16 %v16192_v13, %v16193_v60  ;;  %v16197_v1 = vpack.c.bf16 %v16195_v43, %v16196_v6  ;;  %v16198_v51 = vld [vmem:[#allocation63_spill] sm:$0xff]  ;;  %v16199_v17 = vld [vmem:[#allocation65_spill] sm:$0xff]  ;;  %v16237_v13 = vld [vmem:[#allocation76_spill] sm:$0xff] }
 0x5f1   : > { %10254 = vmatmul.mubr.msk.bf16.vlgmr.msra.gmra.mrb[216].mxu0 %vm5298_vm1, %v13344_v35  ;;  %v16213_v21 = vld [vmem:[#allocation55_spill] sm:$0xff]  ;;  %v16238_v60 = vld [vmem:[#allocation72_spill] sm:$0xff]  ;;  %v16241_v6 = vld [vmem:[#allocation34_spill] sm:$0xff] }
 0x5f2   : > { %5557 = vmatpush1.bf16.msra.mxu1 %v4896_v32  ;;  %5630 = vmatpush1.bf16.msra.mxu0 %v16169_v0  ;;  %v16200_v0 = vpack.c.bf16 %v16198_v51, %v16199_v17  ;;  %v16240_v43 = vld [vmem:[#allocation35_spill] sm:$0xff]  ;;  %v16243_v51 = vld [vmem:[#allocation85_spill] sm:$0xff] }
 0x5f3   : > { %v13428_v62 = vpop.f32.mrb[196].mxu0  ;;  %v13430_v10 = vpop.f32.mrb[196].mxu1  ;;  %5558 = vmatprep.subr.bf16.mxu1 %v5235_v63  ;;  %5631 = vmatprep.subr.bf16.mxu0 %v16170_v45  ;;  %v16190_v63 = vld [vmem:[#allocation44_spill] sm:$0xff]  ;;  %v16201_v45 = vld [vmem:[#allocation73_spill] sm:$0xff] }
 0x5f4   : > { %v4863_v14 = vpop.f32.mrb[197].mxu0  ;;  %v13435_v39 = vpop.f32.mrb[197].mxu1  ;;  %5509 = vmatprep.mubr.bf16.mxu0 %v16003_v25  ;;  %v16191_v7 = vpack.c.bf16 %v16189_v54, %v16190_v63  ;;  %v16234_v54 = vld [vmem:[#allocation64_spill] sm:$0xff]  ;;  %v16235_v63 = vld [vmem:[#allocation37_spill] sm:$0xff] }
 0x5f5   : > { %v4865_v53 = vpop.f32.mrb[198].mxu0  ;;  %v13438_v23 = vpop.f32.mrb[198].mxu1  ;;  %v16244_v17 = vld [vmem:[#allocation81_spill] sm:$0xff] }
 0x5f6   : > { %v4900_v30 = vpack.c.bf16 %v4865_v53, %v13428_v62  ;;  %v5238_v4 = vpack.c.bf16 %v13438_v23, %v13430_v10  ;;  %v4867_v3 = vpop.f32.mrb[199].mxu0  ;;  %v5205_v29 = vpop.f32.mrb[199].mxu1  ;;  %5559 = vmatpush1.bf16.msra.mxu1 %v5234_v57  ;;  %5632 = vmatpush1.bf16.msra.mxu0 %v16171_v36 }
 0x5f7   : > { %v4901_v31 = vpack.c.bf16 %v4867_v3, %v4863_v14  ;;  %v5239_v8 = vpack.c.bf16 %v5205_v29, %v13435_v39  ;;  %5633 = vmatprep.subr.bf16.mxu0 %v16173_v12  ;;  %5710 = vmatprep.subr.bf16.mxu1 %v16176_v22  ;;  %v16202_v14 = vld [vmem:[#allocation67_spill] sm:$0xff] }
 0x5f8   : > { %v16203_v39 = vpack.c.bf16 %v16201_v45, %v16202_v14  ;;  %v16204_v12 = vld [vmem:[#allocation47_spill] sm:$0xff]  ;;  %v16249_v14 = vld [vmem:[#allocation86_spill] sm:$0xff] }
 0x5f9   : > { %10256 = vmatmul.mubr.msk.bf16.vlgmr.msra.gmra.mrb[216].mxu1 %vm5298_vm1, %v13344_v35  ;;  %10255 = vmatmul.mubr.msk.bf16.gmra.mrb[220].mxu0 %vm5298_vm1, %v13358_v58 }
 0x5fa   : > { %5634 = vmatpush1.bf16.msra.mxu0 %v16179_v55  ;;  %5711 = vmatpush1.bf16.msra.mxu1 %v16182_v48  ;;  %v16209_v55 = vpack.c.bf16 %v16207_v9, %v16208_v38  ;;  %v16212_v48 = vpack.c.bf16 %v16210_v19, %v16211_v47  ;;  %v11357_v9 = vld [vmem:[#allocation19 + $0x44] ss:$8 sps:$4 sm:$0xff]   ;;  %v11346_v38 = vld [vmem:[#allocation19 + $0x120] ss:$8 sps:$4 sm:$0xff]   ;;  %v11363_v47 = vld [vmem:[#allocation19 + $0x54] ss:$8 sps:$4 sm:$0xff]  }
 0x5fb   : > { %v13463_v42 = vpop.f32.mrb[200].mxu0  ;;  %v13465_v52 = vpop.f32.mrb[200].mxu1  ;;  %5635 = vmatprep.subr.bf16.mxu0 %v16185_v18  ;;  %5712 = vmatprep.subr.bf16.mxu1 %v16188_v11  ;;  %v16221_v18 = vpack.c.bf16 %v16219_v46, %v16220_v28  ;;  %v11355_v19 = vld [vmem:[#allocation19 + $0x40] ss:$8 sps:$4 sm:$0xff]   ;;  %v11373_v46 = vld [vmem:[#allocation19 + $0x70] ss:$8 sps:$4 sm:$0xff]  }
 0x5fc   : > { %v4873_v61 = vpop.f32.mrb[201].mxu0  ;;  %v5211_v41 = vpop.f32.mrb[201].mxu1  ;;  %5590 = vmatprep.mubr.bf16.mxu1 %v16003_v25  ;;  %5661 = vmatprep.mubr.bf16.mxu0 %v16003_v25  ;;  %v11381_v28 = vld [vmem:[#allocation19 + $0x84] ss:$8 sps:$4 sm:$0xff]  }
 0x5fd   : > { %v4875_v32 = vpop.f32.mrb[202].mxu0  ;;  %v5213_v57 = vpop.f32.mrb[202].mxu1 }
 0x5fe   : > { %v4902_v33 = vpack.c.bf16 %v4875_v32, %v13463_v42  ;;  %v5240_v2 = vpack.c.bf16 %v5213_v57, %v13465_v52  ;;  %v4877_v5 = vpop.f32.mrb[203].mxu0  ;;  %v5215_v20 = vpop.f32.mrb[203].mxu1  ;;  %5636 = vmatpush1.bf16.msra.mxu0 %v16191_v7  ;;  %5713 = vmatpush1.bf16.msra.mxu1 %v16194_v27  ;;  %v16217_v42 = vld [vmem:[#allocation54_spill] sm:$0xff]  ;;  %v16236_v7 = vpack.c.bf16 %v16234_v54, %v16235_v63  ;;  %v11397_v63 = vld [vmem:[#allocation19 + $0xb0] ss:$8 sps:$4 sm:$0xff]  }
 0x5ff   : > { %v4903_v26 = vpack.c.bf16 %v4877_v5, %v4873_v61  ;;  %v5241_v49 = vpack.c.bf16 %v5215_v20, %v5211_v41  ;;  %5637 = vmatprep.subr.bf16.mxu0 %v4899_v24  ;;  %5714 = vmatprep.subr.bf16.mxu1 %v16197_v1  ;;  %v16228_v61 = vld [vmem:[#allocation39_spill] sm:$0xff]  ;;  %v16229_v41 = vld [vmem:[#allocation38_spill] sm:$0xff]  ;;  %v16239_v27 = vpack.c.bf16 %v16237_v13, %v16238_v60  ;;  %v11402_v60 = vld [vmem:[#allocation19 + $0x1b4] ss:$8 sps:$4 sm:$0xff]  }
 0x600   : > { %v16230_v32 = vpack.c.bf16 %v16228_v61, %v16229_v41  ;;  %v16231_v57 = vld [vmem:[#allocation78_spill] sm:$0xff]  ;;  %v16232_v5 = vld [vmem:[#allocation71_spill] sm:$0xff]  ;;  %v16242_v1 = vpack.c.bf16 %v16240_v43, %v16241_v6  ;;  %v11411_v43 = vld [vmem:[#allocation19 + $0xd4] ss:$8 sps:$4 sm:$0xff]  }
 0x601   : > { %10257 = vmatmul.mubr.msk.bf16.gmra.mrb[220].mxu1 %vm5298_vm1, %v13358_v58  ;;  %v16233_v20 = vpack.c.bf16 %v16231_v57, %v16232_v5  ;;  %v11393_v61 = vld [vmem:[#allocation19 + $0xa4] ss:$8 sps:$4 sm:$0xff]   ;;  %v11382_v41 = vld [vmem:[#allocation19 + $0x180] ss:$8 sps:$4 sm:$0xff]   ;;  %v11399_v5 = vld [vmem:[#allocation19 + $0xb4] ss:$8 sps:$4 sm:$0xff]  }
 0x602   : > { %5638 = vmatpush1.bf16.msra.mxu0 %v4898_v40  ;;  %5715 = vmatpush1.bf16.msra.mxu1 %v16200_v0  ;;  %v16245_v0 = vpack.c.bf16 %v16243_v51, %v16244_v17  ;;  %v11391_v57 = vld [vmem:[#allocation19 + $0xa0] ss:$8 sps:$4 sm:$0xff]   ;;  %v11396_v54 = vld [vmem:[#allocation19 + $0x1a4] ss:$8 sps:$4 sm:$0xff]   ;;  %v11400_v6 = vld [vmem:[#allocation19 + $0x1b0] ss:$8 sps:$4 sm:$0xff]  }
 0x603   : > { %v4881_v62 = vpop.f32.mrb[204].mxu0  ;;  %v5219_v10 = vpop.f32.mrb[204].mxu1  ;;  %5639 = vmatprep.subr.bf16.mxu0 %v5237_v34  ;;  %5716 = vmatprep.subr.bf16.mxu1 %v16203_v39  ;;  %v16205_v34 = vld [vmem:[#allocation49_spill] sm:$0xff]  ;;  %v16250_v39 = vld [vmem:[#allocation82_spill] sm:$0xff] }
 0x604   : > { %v4883_v24 = vpop.f32.mrb[205].mxu0  ;;  %v5221_v53 = vpop.f32.mrb[205].mxu1  ;;  %5742 = vmatprep.mubr.bf16.mxu1 %v16003_v25  ;;  %v16206_v15 = vpack.c.bf16 %v16204_v12, %v16205_v34  ;;  %v11334_v12 = vld [vmem:[#allocation19 + $0x100] ss:$8 sps:$4 sm:$0xff]   ;;  %v11342_v34 = vld [vmem:[#allocation19 + $0x114] ss:$8 sps:$4 sm:$0xff]  }
 0x605   : > { %v4885_v23 = vpop.f32.mrb[206].mxu0  ;;  %v5223_v3 = vpop.f32.mrb[206].mxu1  ;;  %v11394_v13 = vld [vmem:[#allocation19 + $0x1a0] ss:$8 sps:$4 sm:$0xff]   ;;  %v11409_v51 = vld [vmem:[#allocation19 + $0xd0] ss:$8 sps:$4 sm:$0xff]  }
 0x606   : > { %v4904_v29 = vpack.c.bf16 %v4885_v23, %v4881_v62  ;;  %v5242_v36 = vpack.c.bf16 %v5223_v3, %v5219_v10  ;;  %v4887_v40 = vpop.f32.mrb[207].mxu0  ;;  %v5225_v50 = vpop.f32.mrb[207].mxu1  ;;  %5640 = vmatpush1.bf16.msra.mxu0 %v5236_v59  ;;  %5717 = vmatpush1.bf16.msra.mxu1 %v16206_v15  ;;  %v16215_v59 = vpack.c.bf16 %v16213_v21, %v16214_v37  ;;  %v16246_v62 = vld [vmem:[#allocation83_spill] sm:$0xff]  ;;  %v16253_v23 = vld [vmem:[#allocation80_spill] sm:$0xff] }
 0x607   : > { %v4905_v16 = vpack.c.bf16 %v4887_v40, %v4883_v24  ;;  %v5243_v22 = vpack.c.bf16 %v5225_v50, %v5221_v53  ;;  %5718 = vmatprep.subr.bf16.mxu1 %v4901_v31  ;;  %5791 = vmatprep.subr.bf16.mxu0 %v16209_v55  ;;  %v16216_v31 = vld [vmem:[#allocation36_spill] sm:$0xff]  ;;  %v16247_v10 = vld [vmem:[#allocation79_spill] sm:$0xff]  ;;  %v16251_v24 = vpack.c.bf16 %v16249_v14, %v16250_v39 }
 0x608   : > { %v16218_v52 = vpack.c.bf16 %v16216_v31, %v16217_v42  ;;  %v16248_v45 = vpack.c.bf16 %v16246_v62, %v16247_v10  ;;  %v11333_v53 = vld [vmem:[#allocation19 + $0x4] ss:$8 sps:$4 sm:$0xff]   ;;  %v11331_v40 = vld [vmem:[#allocation19] ss:$8 sps:$4 sm:$0xff]   ;;  %v11337_v50 = vld [vmem:[#allocation19 + $0x10] ss:$8 sps:$4 sm:$0xff]  }
 0x609   : > { %10258 = vmatmul.mubr.msk.bf16.vlgmr.msra.gmra.mrb[224].mxu0 %vm5298_vm1, %v13344_v35  ;;  %v11343_v15 = vld [vmem:[#allocation19 + $0x20] ss:$8 sps:$4 sm:$0xff]   ;;  %v11354_v55 = vld [vmem:[#allocation19 + $0x134] ss:$8 sps:$4 sm:$0xff]   ;;  %v11369_v21 = vld [vmem:[#allocation19 + $0x64] ss:$8 sps:$4 sm:$0xff]  }
 0x60a   : > { %5719 = vmatpush1.bf16.msra.mxu1 %v4900_v30  ;;  %5792 = vmatpush1.bf16.msra.mxu0 %v16212_v48  ;;  %v16222_v30 = vld [vmem:[#allocation68_spill] sm:$0xff]  ;;  %v11358_v37 = vld [vmem:[#allocation19 + $0x140] ss:$8 sps:$4 sm:$0xff]   ;;  %v11417_v17 = vld [vmem:[#allocation19 + $0xe4] ss:$8 sps:$4 sm:$0xff]  }
 0x60b   : > { %5720 = vmatprep.subr.bf16.mxu1 %v5239_v8  ;;  %5793 = vmatprep.subr.bf16.mxu0 %v16215_v59  ;;  %v16224_v56 = vpack.c.bf16 %v16222_v30, %v16223_v44  ;;  %v16225_v8 = vld [vmem:[#allocation75_spill] sm:$0xff]  ;;  %v11366_v59 = vld [vmem:[#allocation19 + $0x154] ss:$8 sps:$4 sm:$0xff]  }
 0x60c   : > { %5671 = vmatprep.mubr.bf16.mxu0 %v16003_v25  ;;  %v11361_v48 = vld [vmem:[#allocation19 + $0x50] ss:$8 sps:$4 sm:$0xff]   ;;  %v11367_v31 = vld [vmem:[#allocation19 + $0x60] ss:$8 sps:$4 sm:$0xff]   ;;  %v11375_v42 = vld [vmem:[#allocation19 + $0x74] ss:$8 sps:$4 sm:$0xff]  }
 0x60d   : > { %v11378_v30 = vld [vmem:[#allocation19 + $0x174] ss:$8 sps:$4 sm:$0xff]   ;;  %v11379_v44 = vld [vmem:[#allocation19 + $0x80] ss:$8 sps:$4 sm:$0xff]   ;;  %v11412_v14 = vld [vmem:[#allocation19 + $0x1d0] ss:$8 sps:$4 sm:$0xff]  }
 0x60e   : > { %5721 = vmatpush1.bf16.msra.mxu1 %v5238_v4  ;;  %5794 = vmatpush1.bf16.msra.mxu0 %v16218_v52  ;;  %v16226_v4 = vld [vmem:[#allocation70_spill] sm:$0xff]  ;;  %v11364_v52 = vld [vmem:[#allocation19 + $0x150] ss:$8 sps:$4 sm:$0xff]   ;;  %v11414_v62 = vld [vmem:[#allocation19 + $0x1d4] ss:$8 sps:$4 sm:$0xff]  }
 0x60f   : > { %5795 = vmatprep.subr.bf16.mxu0 %v16221_v18  ;;  %5872 = vmatprep.subr.bf16.mxu1 %v16224_v56  ;;  %v16227_v11 = vpack.c.bf16 %v16225_v8, %v16226_v4  ;;  %v11370_v18 = vld [vmem:[#allocation19 + $0x160] ss:$8 sps:$4 sm:$0xff]   ;;  %v11387_v56 = vld [vmem:[#allocation19 + $0x94] ss:$8 sps:$4 sm:$0xff]   ;;  %v11376_v8 = vld [vmem:[#allocation19 + $0x170] ss:$8 sps:$4 sm:$0xff]  }
 0x610   : > { %v11384_v4 = vld [vmem:[#allocation19 + $0x184] ss:$8 sps:$4 sm:$0xff]   ;;  %v11415_v10 = vld [vmem:[#allocation19 + $0xe0] ss:$8 sps:$4 sm:$0xff]  }
 0x611   : > { %10260 = vmatmul.mubr.msk.bf16.vlgmr.msra.gmra.mrb[224].mxu1 %vm5298_vm1, %v13344_v35  ;;  %10259 = vmatmul.mubr.msk.bf16.gmra.mrb[228].mxu0 %vm5298_vm1, %v13358_v58  ;;  %v11420_v39 = vld [vmem:[#allocation19 + $0x1e4] ss:$8 sps:$4 sm:$0xff]  }
 0x612   : > { %5796 = vmatpush1.bf16.msra.mxu0 %v16227_v11  ;;  %5873 = vmatpush1.bf16.msra.mxu1 %v16230_v32  ;;  %v11385_v11 = vld [vmem:[#allocation19 + $0x90] ss:$8 sps:$4 sm:$0xff]   ;;  %v11390_v32 = vld [vmem:[#allocation19 + $0x194] ss:$8 sps:$4 sm:$0xff]  }
 0x613   : > { %5797 = vmatprep.subr.bf16.mxu0 %v16233_v20  ;;  %5874 = vmatprep.subr.bf16.mxu1 %v16236_v7  ;;  %v11388_v20 = vld [vmem:[#allocation19 + $0x190] ss:$8 sps:$4 sm:$0xff]   ;;  %v11405_v7 = vld [vmem:[#allocation19 + $0xc4] ss:$8 sps:$4 sm:$0xff]  }
 0x614   : > { %5752 = vmatprep.mubr.bf16.mxu1 %v16003_v25  ;;  %5823 = vmatprep.mubr.bf16.mxu0 %v16003_v25 }
 0x616   : > { %5798 = vmatpush1.bf16.msra.mxu0 %v16239_v27  ;;  %5875 = vmatpush1.bf16.msra.mxu1 %v16242_v1  ;;  %v11403_v27 = vld [vmem:[#allocation19 + $0xc0] ss:$8 sps:$4 sm:$0xff]   ;;  %v11408_v1 = vld [vmem:[#allocation19 + $0x1c4] ss:$8 sps:$4 sm:$0xff]  }
 0x617   : > { %5799 = vmatprep.subr.bf16.mxu0 %v4903_v26  ;;  %5876 = vmatprep.subr.bf16.mxu1 %v16245_v0  ;;  %v16252_v26 = vld [vmem:[#allocation84_spill] sm:$0xff]  ;;  %v11406_v0 = vld [vmem:[#allocation19 + $0x1c0] ss:$8 sps:$4 sm:$0xff]  }
 0x618   : > { %v16254_v3 = vpack.c.bf16 %v16252_v26, %v16253_v23  ;;  %v11418_v26 = vld [vmem:[#allocation19 + $0x1e0] ss:$8 sps:$4 sm:$0xff]   ;;  %v11426_v23 = vld [vmem:[#allocation19 + $0x1f4] ss:$8 sps:$4 sm:$0xff]  }
 0x619   : > { %10261 = vmatmul.mubr.msk.bf16.gmra.mrb[228].mxu1 %vm5298_vm1, %v13358_v58 }
 0x61a   : > { %5800 = vmatpush1.bf16.msra.mxu0 %v4902_v33  ;;  %5877 = vmatpush1.bf16.msra.mxu1 %v16248_v45  ;;  %v11339_v33 = vld [vmem:[#allocation19 + $0x14] ss:$8 sps:$4 sm:$0xff]  }
 0x61b   : > { %5801 = vmatprep.subr.bf16.mxu0 %v5241_v49  ;;  %5878 = vmatprep.subr.bf16.mxu1 %v16251_v24  ;;  %v11336_v49 = vld [vmem:[#allocation19 + $0x104] ss:$8 sps:$4 sm:$0xff]   ;;  %v11423_v45 = vld [vmem:[#allocation19 + $0xf4] ss:$8 sps:$4 sm:$0xff]   ;;  %v11421_v24 = vld [vmem:[#allocation19 + $0xf0] ss:$8 sps:$4 sm:$0xff]  }
 0x61c   : > { %5904 = vmatprep.mubr.bf16.mxu1 %v16003_v25 }
 0x61e   : > { %5802 = vmatpush1.bf16.msra.mxu0 %v5240_v2  ;;  %5879 = vmatpush1.bf16.msra.mxu1 %v16254_v3  ;;  %v11345_v2 = vld [vmem:[#allocation19 + $0x24] ss:$8 sps:$4 sm:$0xff]   ;;  %v11424_v3 = vld [vmem:[#allocation19 + $0x1f0] ss:$8 sps:$4 sm:$0xff]  }
 0x61f   : > { %5880 = vmatprep.subr.bf16.mxu1 %v4905_v16  ;;  %6165 = vmatprep.subr.bf16.mxu0 %v11333_v53  ;;  %v11351_v16 = vld [vmem:[#allocation19 + $0x34] ss:$8 sps:$4 sm:$0xff]   ;;  %v11429_v53 = vld [vmem:[#allocation19 + $0x204] ss:$8 sps:$4 sm:$0xff]  }
 0x621   : > { %10262 = vmatmul.mubr.msk.bf16.vlgmr.msra.gmra.mrb[232].mxu0 %vm5298_vm1, %v13344_v35 }
 0x622   : > { %5881 = vmatpush1.bf16.msra.mxu1 %v4904_v29  ;;  %5833 = vmatprep.mubr.bf16.mxu0 %v16003_v25  ;;  %v11340_v29 = vld [vmem:[#allocation19 + $0x110] ss:$8 sps:$4 sm:$0xff]  }
 0x623   : > { %5882 = vmatprep.subr.bf16.mxu1 %v5243_v22  ;;  %6166 = vmatpush1.bf16.msra.mxu0 %v11331_v40  ;;  %v11348_v22 = vld [vmem:[#allocation19 + $0x124] ss:$8 sps:$4 sm:$0xff]  }
 0x624   : > { %6167 = vmatprep.subr.bf16.mxu0 %v11339_v33  ;;  %v11435_v40 = vld [vmem:[#allocation19 + $0x304] ss:$8 sps:$4 sm:$0xff]   ;;  %v5264_v33 = vld [vmem:[#allocation18] sm:$0x3] }
 0x626   : > { %5883 = vmatpush1.bf16.msra.mxu1 %v5242_v36  ;;  %v11349_v36 = vld [vmem:[#allocation19 + $0x30] ss:$8 sps:$4 sm:$0xff]  }
 0x627   : > { %6615 = vmatprep.subr.bf16.mxu1 %v11336_v49  ;;  %6168 = vmatpush1.bf16.msra.mxu0 %v11337_v50  ;;  %v16255_v49 = vld [vmem:[#allocation53_spill] sm:$0xff] }
 0x628   : > { %6169 = vmatprep.subr.bf16.mxu0 %v11345_v2  ;;  %v13572_v50 = vrot.slane %v5264_v33, %v16255_v49  ;;  %v16256_v2 = vld [vmem:[#allocation51_spill] sm:$0xff] }
 0x629   : > { %10263 = vmatmul.mubr.msk.bf16.gmra.mrb[236].mxu0 %vm5298_vm1, %v13358_v58  ;;  %10264 = vmatmul.mubr.msk.bf16.vlgmr.msra.gmra.mrb[232].mxu1 %vm5298_vm1, %v13344_v35  ;;  %v11360_v35 = vld [vmem:[#allocation19 + $0x144] ss:$8 sps:$4 sm:$0xff]  }
 0x62a   : > { %5914 = vmatprep.mubr.bf16.mxu1 %v16003_v25  ;;  %6616 = vmatpush1.bf16.msra.mxu1 %v11334_v12  ;;  %v11352_v25 = vld [vmem:[#allocation19 + $0x130] ss:$8 sps:$4 sm:$0xff]   ;;  %v13575_v12 = vrot.slane %v5264_v33, %v16256_v2 }
 0x62b   : > { %6617 = vmatprep.subr.bf16.mxu1 %v11342_v34  ;;  %6170 = vmatpush1.bf16.msra.mxu0 %v11343_v15 }
 0x62c   : > { %6171 = vmatprep.subr.bf16.mxu0 %v11351_v16 }
 0x62e   : > { %6618 = vmatpush1.bf16.msra.mxu1 %v11340_v29 }
 0x62f   : > { %6619 = vmatprep.subr.bf16.mxu1 %v11348_v22  ;;  %6172 = vmatpush1.bf16.msra.mxu0 %v11349_v36 }
 0x630   : > { %6173 = vmatprep.subr.bf16.mxu0 %v11357_v9 }
 0x631   : > { %10265 = vmatmul.mubr.msk.bf16.gmra.mrb[236].mxu1 %vm5298_vm1, %v13358_v58  ;;  %v11372_v58 = vld [vmem:[#allocation19 + $0x164] ss:$8 sps:$4 sm:$0xff]  }
 0x632   : > { %6620 = vmatpush1.bf16.msra.mxu1 %v11346_v38 }
 0x633   : > { %6621 = vmatprep.subr.bf16.mxu1 %v11354_v55  ;;  %6174 = vmatpush1.bf16.msra.mxu0 %v11355_v19 }
 0x634   : > { %6175 = vmatprep.subr.bf16.mxu0 %v11363_v47 }
 0x636   : > { %6622 = vmatpush1.bf16.msra.mxu1 %v11352_v25 }
 0x637   : > { %6623 = vmatprep.subr.bf16.mxu1 %v11360_v35  ;;  %6176 = vmatpush1.bf16.msra.mxu0 %v11361_v48 }
 0x638   : > { %6177 = vmatprep.subr.bf16.mxu0 %v11369_v21 }
 0x63a   : > { %6624 = vmatpush1.bf16.msra.mxu1 %v11358_v37 }
 0x63b   : > { %6625 = vmatprep.subr.bf16.mxu1 %v11366_v59  ;;  %6178 = vmatpush1.bf16.msra.mxu0 %v11367_v31  ;;  %v11427_v59 = vld [vmem:[#allocation19 + $0x200] ss:$8 sps:$4 sm:$0xff]  }
 0x63c   : > { %6179 = vmatprep.subr.bf16.mxu0 %v11375_v42  ;;  %v11433_v31 = vld [vmem:[#allocation19 + $0x300] ss:$8 sps:$4 sm:$0xff]  }
 0x63e   : > { %6626 = vmatpush1.bf16.msra.mxu1 %v11364_v52 }
 0x63f   : > { %6627 = vmatprep.subr.bf16.mxu1 %v11372_v58  ;;  %6180 = vmatpush1.bf16.msra.mxu0 %v11373_v46 }
 0x640   : > { %6181 = vmatprep.subr.bf16.mxu0 %v11381_v28  ;;  %v11432_v28 = vld [vmem:[#allocation19 + $0x214] ss:$8 sps:$4 sm:$0xff]  }
 0x642   : > { %6628 = vmatpush1.bf16.msra.mxu1 %v11370_v18  ;;  %v11441_v18 = vld [vmem:[#allocation19 + $0x314] ss:$8 sps:$4 sm:$0xff]  }
 0x643   : > { %6629 = vmatprep.subr.bf16.mxu1 %v11378_v30  ;;  %6182 = vmatpush1.bf16.msra.mxu0 %v11379_v44 }
 0x644   : > { %6183 = vmatprep.subr.bf16.mxu0 %v11387_v56 }
 0x646   : > { %6630 = vmatpush1.bf16.msra.mxu1 %v11376_v8 }
 0x647   : > { %6631 = vmatprep.subr.bf16.mxu1 %v11384_v4  ;;  %6184 = vmatpush1.bf16.msra.mxu0 %v11385_v11 }
 0x648   : > { %6185 = vmatprep.subr.bf16.mxu0 %v11393_v61 }
 0x64a   : > { %6632 = vmatpush1.bf16.msra.mxu1 %v11382_v41 }
 0x64b   : > { %6633 = vmatprep.subr.bf16.mxu1 %v11390_v32  ;;  %6186 = vmatpush1.bf16.msra.mxu0 %v11391_v57  ;;  %v11430_v57 = vld [vmem:[#allocation19 + $0x210] ss:$8 sps:$4 sm:$0xff]  }
 0x64c   : > { %6187 = vmatprep.subr.bf16.mxu0 %v11399_v5 }
 0x64e   : > { %6634 = vmatpush1.bf16.msra.mxu1 %v11388_v20 }
 0x64f   : > { %6635 = vmatprep.subr.bf16.mxu1 %v11396_v54  ;;  %6188 = vmatpush1.bf16.msra.mxu0 %v11397_v63  ;;  %v11438_v63 = vld [vmem:[#allocation19 + $0x224] ss:$8 sps:$4 sm:$0xff]  }
 0x650   : > { %6189 = vmatprep.subr.bf16.mxu0 %v11405_v7  ;;  %v11439_v7 = vld [vmem:[#allocation19 + $0x310] ss:$8 sps:$4 sm:$0xff]  }
 0x652   : > { %6636 = vmatpush1.bf16.msra.mxu1 %v11394_v13 }
 0x653   : > { %6637 = vmatprep.subr.bf16.mxu1 %v11402_v60  ;;  %6190 = vmatpush1.bf16.msra.mxu0 %v11403_v27 }
 0x654   : > { %6191 = vmatprep.subr.bf16.mxu0 %v11411_v43  ;;  %v11447_v43 = vld [vmem:[#allocation19 + $0x324] ss:$8 sps:$4 sm:$0xff]  }
 0x656   : > { %6638 = vmatpush1.bf16.msra.mxu1 %v11400_v6 }
 0x657   : > { %6639 = vmatprep.subr.bf16.mxu1 %v11408_v1  ;;  %6192 = vmatpush1.bf16.msra.mxu0 %v11409_v51 }
 0x658   : > { %6193 = vmatprep.subr.bf16.mxu0 %v11417_v17 }
 0x65a   : > { %6640 = vmatpush1.bf16.msra.mxu1 %v11406_v0 }
 0x65b   : > { %6641 = vmatprep.subr.bf16.mxu1 %v11414_v62  ;;  %6194 = vmatpush1.bf16.msra.mxu0 %v11415_v10 }
 0x65c   : > { %6195 = vmatprep.subr.bf16.mxu0 %v11423_v45 }
 0x65e   : > { %6642 = vmatpush1.bf16.msra.mxu1 %v11412_v14 }
 0x65f   : > { %6643 = vmatprep.subr.bf16.mxu1 %v11420_v39  ;;  %6196 = vmatpush1.bf16.msra.mxu0 %v11421_v24  ;;  %v11436_v24 = vld [vmem:[#allocation19 + $0x220] ss:$8 sps:$4 sm:$0xff]  }
 0x660   : > { %7065 = vmatprep.subr.bf16.mxu0 %v11429_v53  ;;  %v11445_v53 = vld [vmem:[#allocation19 + $0x320] ss:$8 sps:$4 sm:$0xff]  }
 0x662   : > { %6644 = vmatpush1.bf16.msra.mxu1 %v11418_v26 }
 0x663   : > { %6645 = vmatprep.subr.bf16.mxu1 %v11426_v23 }
 0x666   : > { %6646 = vmatpush1.bf16.msra.mxu1 %v11424_v3  ;;  %v11444_v3 = vld [vmem:[#allocation19 + $0x234] ss:$8 sps:$4 sm:$0xff]  }
 0x667   : > { %7515 = vmatprep.subr.bf16.mxu1 %v11435_v40  ;;  %v11453_v40 = vld [vmem:[#allocation19 + $0x334] ss:$8 sps:$4 sm:$0xff]  }
 0x6ac   : > { %v5339_v34 = vpop.f32.mrb[208].mxu0 }
 0x6ad   : > { %v5340_v15 = vadd.f32 %v5339_v34, %v13572_v50  ;;  %v5341_v16 = vpop.f32.mrb[209].mxu0 }
 0x6ae   : > { %v5342_v29 = vadd.f32 %v5341_v16, %v13575_v12  ;;  %v5343_v22 = vpop.f32.mrb[210].mxu0 }
 0x6af   : > { %v5344_v36 = vadd.f32 %v5343_v22, %v13572_v50  ;;  %v5345_v9 = vpop.f32.mrb[211].mxu0  ;;  %v5358_v55 = vmax.f32 %v5340_v15, 0.0 }
 0x6b0   : > { %v5346_v38 = vadd.f32 %v5345_v9, %v13575_v12  ;;  %v5359_v47 = vmax.f32 %v5342_v29, 0.0  ;;  %v11451_v9 = vld [vmem:[#allocation19 + $0x330] ss:$8 sps:$4 sm:$0xff]  }
 0x6b1   : > { %v5360_v19 = vmax.f32 %v5344_v36, 0.0  ;;  %v11442_v36 = vld [vmem:[#allocation19 + $0x230] ss:$8 sps:$4 sm:$0xff]  }
 0x6b2   : > { %v5361_v25 = vmax.f32 %v5346_v38, 0.0 }
 0x6b3   : > { %v13581_v35 = vpack.c.bf16 %v5360_v19, %v5358_v55  ;;  %v11450_v55 = vld [vmem:[#allocation19 + $0x244] ss:$8 sps:$4 sm:$0xff]  }
 0x6b4   : > { %v13583_v48 = vpack.c.bf16 %v5361_v25, %v5359_v47  ;;  %v5349_v21 = vpop.f32.mrb[212].mxu0  ;;  %v5420_v37 = vpop.f32.mrb[208].mxu1  ;;  %v11459_v19 = vld [vmem:[#allocation19 + $0x344] ss:$8 sps:$4 sm:$0xff]  }
 0x6b5   : > { %v5350_v42 = vadd.f32 %v5349_v21, %v13572_v50  ;;  %v5351_v52 = vpop.f32.mrb[213].mxu0  ;;  %v5421_v58 = vadd.f32 %v5420_v37, %v13572_v50  ;;  %v5422_v46 = vpop.f32.mrb[209].mxu1 }
 0x6b6   : > { %v5352_v30 = vadd.f32 %v5351_v52, %v13575_v12  ;;  %v5353_v44 = vpop.f32.mrb[214].mxu0  ;;  %6197 = vmatprep.mubr.bf16.mxu0 %v13583_v48  ;;  %6647 = vmatprep.mubr.bf16.mxu1 %v13583_v48  ;;  %v5423_v56 = vadd.f32 %v5422_v46, %v13575_v12  ;;  %v5424_v8 = vpop.f32.mrb[210].mxu1  ;;  %v11456_v46 = vld [vmem:[#allocation19 + $0x254] ss:$8 sps:$4 sm:$0xff]  }
 0x6b7   : > { %v5354_v4 = vadd.f32 %v5353_v44, %v13572_v50  ;;  %v5355_v11 = vpop.f32.mrb[215].mxu0  ;;  %6198 = vmatmul.mubr.bf16.vlgmr.msra.gmra.mrb[240].mxu0 %v13581_v35  ;;  %6648 = vmatmul.mubr.bf16.vlgmr.msra.gmra.mrb[240].mxu1 %v13581_v35  ;;  %v5439_v61 = vmax.f32 %v5421_v58, 0.0  ;;  %v5425_v41 = vadd.f32 %v5424_v8, %v13572_v50  ;;  %v5426_v32 = vpop.f32.mrb[211].mxu1  ;;  %v5362_v13 = vmax.f32 %v5350_v42, 0.0  ;;  %v11457_v42 = vld [vmem:[#allocation19 + $0x340] ss:$8 sps:$4 sm:$0xff]  }
 0x6b8   : > { %v5356_v5 = vadd.f32 %v5355_v11, %v13575_v12  ;;  %v5440_v20 = vmax.f32 %v5423_v56, 0.0  ;;  %v5427_v54 = vadd.f32 %v5426_v32, %v13575_v12  ;;  %7066 = vmatpush1.bf16.msra.mxu0 %v11427_v59  ;;  %7516 = vmatpush1.bf16.msra.mxu1 %v11433_v31  ;;  %v5363_v6 = vmax.f32 %v5352_v30, 0.0  ;;  %v11448_v31 = vld [vmem:[#allocation19 + $0x240] ss:$8 sps:$4 sm:$0xff]   ;;  %v11454_v11 = vld [vmem:[#allocation19 + $0x250] ss:$8 sps:$4 sm:$0xff]  }
 0x6b9   : > { %v5364_v60 = vmax.f32 %v5354_v4, 0.0  ;;  %v5441_v27 = vmax.f32 %v5425_v41, 0.0  ;;  %7067 = vmatprep.subr.bf16.mxu0 %v11432_v28  ;;  %7517 = vmatprep.subr.bf16.mxu1 %v11441_v18  ;;  %v11465_v28 = vld [vmem:[#allocation19 + $0x354] ss:$8 sps:$4 sm:$0xff]   ;;  %v11462_v32 = vld [vmem:[#allocation19 + $0x264] ss:$8 sps:$4 sm:$0xff]  }
 0x6ba   : > { %v5365_v1 = vmax.f32 %v5356_v5, 0.0  ;;  %v5442_v51 = vmax.f32 %v5427_v54, 0.0 }
 0x6bb   : > { %v13597_v17 = vpack.c.bf16 %v5364_v60, %v5362_v13  ;;  %v13599_v0 = vpack.c.bf16 %v5441_v27, %v5439_v61  ;;  %v11463_v61 = vld [vmem:[#allocation19 + $0x350] ss:$8 sps:$4 sm:$0xff]  }
 0x6bc   : > { %v13601_v62 = vpack.c.bf16 %v5365_v1, %v5363_v6  ;;  %v13603_v10 = vpack.c.bf16 %v5442_v51, %v5440_v20  ;;  %v5430_v45 = vpop.f32.mrb[212].mxu1  ;;  %7068 = vmatpush1.bf16.msra.mxu0 %v11430_v57  ;;  %7518 = vmatpush1.bf16.msra.mxu1 %v11439_v7  ;;  %v11471_v57 = vld [vmem:[#allocation19 + $0x364] ss:$8 sps:$4 sm:$0xff]   ;;  %v11469_v6 = vld [vmem:[#allocation19 + $0x360] ss:$8 sps:$4 sm:$0xff]  }
 0x6bd   : > { %v5431_v14 = vadd.f32 %v5430_v45, %v13572_v50  ;;  %v5432_v39 = vpop.f32.mrb[213].mxu1  ;;  %7069 = vmatprep.subr.bf16.mxu0 %v11438_v63  ;;  %7519 = vmatprep.subr.bf16.mxu1 %v11447_v43  ;;  %v11460_v43 = vld [vmem:[#allocation19 + $0x260] ss:$8 sps:$4 sm:$0xff]  }
 0x6be   : > { %6207 = vmatprep.mubr.bf16.mxu0 %v13601_v62  ;;  %6657 = vmatprep.mubr.bf16.mxu1 %v13601_v62  ;;  %v5433_v26 = vadd.f32 %v5432_v39, %v13575_v12  ;;  %v5434_v23 = vpop.f32.mrb[214].mxu1  ;;  %v11468_v39 = vld [vmem:[#allocation19 + $0x274] ss:$8 sps:$4 sm:$0xff]  }
 0x6bf   : > { %6208 = vmatmul.mubr.bf16.gmra.mrb[244].mxu0 %v13597_v17  ;;  %6658 = vmatmul.mubr.bf16.gmra.mrb[244].mxu1 %v13597_v17  ;;  %v5443_v33 = vmax.f32 %v5431_v14, 0.0  ;;  %v5435_v34 = vadd.f32 %v5434_v23, %v13572_v50  ;;  %v5436_v15 = vpop.f32.mrb[215].mxu1 }
 0x6c0   : > { %v5444_v16 = vmax.f32 %v5433_v26, 0.0  ;;  %6217 = vmatprep.mubr.bf16.mxu0 %v13603_v10  ;;  %6667 = vmatprep.mubr.bf16.mxu1 %v13603_v10  ;;  %v5437_v29 = vadd.f32 %v5436_v15, %v13575_v12 }
 0x6c1   : > { %v5445_v22 = vmax.f32 %v5435_v34, 0.0  ;;  %7070 = vmatpush1.bf16.msra.mxu0 %v11436_v24  ;;  %7520 = vmatpush1.bf16.msra.mxu1 %v11445_v53  ;;  %v11477_v24 = vld [vmem:[#allocation19 + $0x374] ss:$8 sps:$4 sm:$0xff]  }
 0x6c2   : > { %v5446_v38 = vmax.f32 %v5437_v29, 0.0  ;;  %7071 = vmatprep.subr.bf16.mxu0 %v11444_v3  ;;  %7521 = vmatprep.subr.bf16.mxu1 %v11453_v40 }
 0x6c3   : > { %v13615_v47 = vpack.c.bf16 %v5445_v22, %v5443_v33 }
 0x6c4   : > { %v13617_v25 = vpack.c.bf16 %v5446_v38, %v5444_v16  ;;  %v5501_v21 = vpop.f32.mrb[216].mxu0  ;;  %v11475_v38 = vld [vmem:[#allocation19 + $0x370] ss:$8 sps:$4 sm:$0xff]  }
 0x6c5   : > { %v5502_v37 = vadd.f32 %v5501_v21, %v13572_v50  ;;  %v5503_v59 = vpop.f32.mrb[217].mxu0  ;;  %7072 = vmatpush1.bf16.msra.mxu0 %v11442_v36  ;;  %7522 = vmatpush1.bf16.msra.mxu1 %v11451_v9  ;;  %v11466_v9 = vld [vmem:[#allocation19 + $0x270] ss:$8 sps:$4 sm:$0xff]   ;;  %v11474_v21 = vld [vmem:[#allocation19 + $0x284] ss:$8 sps:$4 sm:$0xff]  }
 0x6c6   : > { %v5504_v52 = vadd.f32 %v5503_v59, %v13575_v12  ;;  %v5505_v58 = vpop.f32.mrb[218].mxu0  ;;  %7073 = vmatprep.subr.bf16.mxu0 %v11450_v55  ;;  %7523 = vmatprep.subr.bf16.mxu1 %v11459_v19 }
 0x6c7   : > { %6218 = vmatmul.mubr.bf16.gmra.mrb[248].mxu0 %v13599_v0  ;;  %6668 = vmatmul.mubr.bf16.gmra.mrb[248].mxu1 %v13599_v0  ;;  %v5520_v18 = vmax.f32 %v5502_v37, 0.0  ;;  %v5506_v30 = vadd.f32 %v5505_v58, %v13572_v50  ;;  %v5507_v44 = vpop.f32.mrb[219].mxu0  ;;  %v11483_v37 = vld [vmem:[#allocation19 + $0x384] ss:$8 sps:$4 sm:$0xff]  }
 0x6c8   : > { %v5521_v56 = vmax.f32 %v5504_v52, 0.0  ;;  %6227 = vmatprep.mubr.bf16.mxu0 %v13617_v25  ;;  %6677 = vmatprep.mubr.bf16.mxu1 %v13617_v25  ;;  %v5508_v8 = vadd.f32 %v5507_v44, %v13575_v12 }
 0x6c9   : > { %v5522_v4 = vmax.f32 %v5506_v30, 0.0  ;;  %7074 = vmatpush1.bf16.msra.mxu0 %v11448_v31  ;;  %7524 = vmatpush1.bf16.msra.mxu1 %v11457_v42  ;;  %v11481_v30 = vld [vmem:[#allocation19 + $0x380] ss:$8 sps:$4 sm:$0xff]  }
 0x6ca   : > { %v5523_v41 = vmax.f32 %v5508_v8, 0.0  ;;  %7075 = vmatprep.subr.bf16.mxu0 %v11456_v46  ;;  %7525 = vmatprep.subr.bf16.mxu1 %v11465_v28  ;;  %v11480_v8 = vld [vmem:[#allocation19 + $0x294] ss:$8 sps:$4 sm:$0xff]  }
 0x6cb   : > { %v13627_v5 = vpack.c.bf16 %v5522_v4, %v5520_v18  ;;  %v11472_v18 = vld [vmem:[#allocation19 + $0x280] ss:$8 sps:$4 sm:$0xff]   ;;  %v11486_v4 = vld [vmem:[#allocation19 + $0x394] ss:$8 sps:$4 sm:$0xff]  }
 0x6cc   : > { %v13629_v20 = vpack.c.bf16 %v5523_v41, %v5521_v56  ;;  %v5511_v54 = vpop.f32.mrb[220].mxu0  ;;  %v5582_v63 = vpop.f32.mrb[216].mxu1 }
 0x6cd   : > { %v5512_v7 = vadd.f32 %v5511_v54, %v13572_v50  ;;  %v5513_v13 = vpop.f32.mrb[221].mxu0  ;;  %v5583_v60 = vadd.f32 %v5582_v63, %v13572_v50  ;;  %v5584_v27 = vpop.f32.mrb[217].mxu1  ;;  %7076 = vmatpush1.bf16.msra.mxu0 %v11454_v11  ;;  %7526 = vmatpush1.bf16.msra.mxu1 %v11463_v61  ;;  %v11478_v63 = vld [vmem:[#allocation19 + $0x290] ss:$8 sps:$4 sm:$0xff]  }
 0x6ce   : > { %v5514_v1 = vadd.f32 %v5513_v13, %v13575_v12  ;;  %v5515_v51 = vpop.f32.mrb[222].mxu0  ;;  %v5585_v45 = vadd.f32 %v5584_v27, %v13575_v12  ;;  %v5586_v14 = vpop.f32.mrb[218].mxu1  ;;  %7077 = vmatprep.subr.bf16.mxu0 %v11462_v32  ;;  %7527 = vmatprep.subr.bf16.mxu1 %v11471_v57  ;;  %v11492_v27 = vld [vmem:[#allocation19 + $0x3a4] ss:$8 sps:$4 sm:$0xff]  }
 0x6cf   : > { %6228 = vmatmul.mubr.bf16.gmra.mrb[252].mxu0 %v13615_v47  ;;  %6678 = vmatmul.mubr.bf16.gmra.mrb[252].mxu1 %v13615_v47  ;;  %v5524_v53 = vmax.f32 %v5512_v7, 0.0  ;;  %v5516_v26 = vadd.f32 %v5515_v51, %v13572_v50  ;;  %v5517_v23 = vpop.f32.mrb[223].mxu0  ;;  %v5601_v3 = vmax.f32 %v5583_v60, 0.0  ;;  %v5587_v40 = vadd.f32 %v5586_v14, %v13572_v50  ;;  %v5588_v33 = vpop.f32.mrb[219].mxu1  ;;  %v11484_v7 = vld [vmem:[#allocation19 + $0x390] ss:$8 sps:$4 sm:$0xff]  }
 0x6d0   : > { %v5525_v34 = vmax.f32 %v5514_v1, 0.0  ;;  %6237 = vmatprep.mubr.bf16.mxu0 %v13629_v20  ;;  %6687 = vmatprep.mubr.bf16.mxu1 %v13629_v20  ;;  %v5518_v15 = vadd.f32 %v5517_v23, %v13575_v12  ;;  %v5602_v16 = vmax.f32 %v5585_v45, 0.0  ;;  %v5589_v29 = vadd.f32 %v5588_v33, %v13575_v12  ;;  %v11489_v60 = vld [vmem:[#allocation19 + $0x2a4] ss:$8 sps:$4 sm:$0xff]   ;;  %v11487_v14 = vld [vmem:[#allocation19 + $0x2a0] ss:$8 sps:$4 sm:$0xff]  }
 0x6d1   : > { %v5526_v22 = vmax.f32 %v5516_v26, 0.0  ;;  %v5603_v36 = vmax.f32 %v5587_v40, 0.0  ;;  %7078 = vmatpush1.bf16.msra.mxu0 %v11460_v43  ;;  %7528 = vmatpush1.bf16.msra.mxu1 %v11469_v6  ;;  %v11495_v26 = vld [vmem:[#allocation19 + $0x2b4] ss:$8 sps:$4 sm:$0xff]  }
 0x6d2   : > { %v5527_v55 = vmax.f32 %v5518_v15, 0.0  ;;  %v5604_v19 = vmax.f32 %v5589_v29, 0.0  ;;  %7079 = vmatprep.subr.bf16.mxu0 %v11468_v39  ;;  %7529 = vmatprep.subr.bf16.mxu1 %v11477_v24  ;;  %v11490_v39 = vld [vmem:[#allocation19 + $0x3a0] ss:$8 sps:$4 sm:$0xff]   ;;  %v11498_v23 = vld [vmem:[#allocation19 + $0x3b4] ss:$8 sps:$4 sm:$0xff]  }
 0x6d3   : > { %v13643_v59 = vpack.c.bf16 %v5526_v22, %v5524_v53  ;;  %v13645_v31 = vpack.c.bf16 %v5603_v36, %v5601_v3  ;;  %v11493_v29 = vld [vmem:[#allocation19 + $0x2b0] ss:$8 sps:$4 sm:$0xff]  }
 0x6d4   : > { %v13647_v42 = vpack.c.bf16 %v5527_v55, %v5525_v34  ;;  %v13649_v52 = vpack.c.bf16 %v5604_v19, %v5602_v16  ;;  %v5592_v58 = vpop.f32.mrb[220].mxu1  ;;  %v11496_v22 = vld [vmem:[#allocation19 + $0x3b0] ss:$8 sps:$4 sm:$0xff]  }
 0x6d5   : > { %v5593_v46 = vadd.f32 %v5592_v58, %v13572_v50  ;;  %v5594_v28 = vpop.f32.mrb[221].mxu1  ;;  %7080 = vmatpush1.bf16.msra.mxu0 %v11466_v9  ;;  %7530 = vmatpush1.bf16.msra.mxu1 %v11475_v38  ;;  %v11501_v9 = vld [vmem:[#allocation19 + $0x2c4] ss:$8 sps:$4 sm:$0xff]  }
 0x6d6   : > { %v5595_v44 = vadd.f32 %v5594_v28, %v13575_v12  ;;  %v5596_v56 = vpop.f32.mrb[222].mxu1  ;;  %7081 = vmatprep.subr.bf16.mxu0 %v11474_v21  ;;  %7531 = vmatprep.subr.bf16.mxu1 %v11483_v37  ;;  %v11504_v38 = vld [vmem:[#allocation19 + $0x3c4] ss:$8 sps:$4 sm:$0xff]  }
 0x6d7   : > { %6238 = vmatmul.mubr.bf16.gmra.mrb[0].mxu0 %v13627_v5  ;;  %6688 = vmatmul.mubr.bf16.gmra.mrb[0].mxu1 %v13627_v5  ;;  %v5605_v11 = vmax.f32 %v5593_v46, 0.0  ;;  %v5597_v61 = vadd.f32 %v5596_v56, %v13572_v50  ;;  %v5598_v41 = vpop.f32.mrb[223].mxu1 }
 0x6d8   : > { %6247 = vmatprep.mubr.bf16.mxu0 %v13647_v42  ;;  %6697 = vmatprep.mubr.bf16.mxu1 %v13647_v42  ;;  %v5606_v32 = vmax.f32 %v5595_v44, 0.0  ;;  %v5599_v57 = vadd.f32 %v5598_v41, %v13575_v12  ;;  %v11502_v44 = vld [vmem:[#allocation19 + $0x3c0] ss:$8 sps:$4 sm:$0xff]   ;;  %v11510_v41 = vld [vmem:[#allocation19 + $0x3d4] ss:$8 sps:$4 sm:$0xff]  }
 0x6d9   : > { %v5607_v54 = vmax.f32 %v5597_v61, 0.0  ;;  %7082 = vmatpush1.bf16.msra.mxu0 %v11472_v18  ;;  %7532 = vmatpush1.bf16.msra.mxu1 %v11481_v30  ;;  %v11499_v30 = vld [vmem:[#allocation19 + $0x2c0] ss:$8 sps:$4 sm:$0xff]   ;;  %v11507_v61 = vld [vmem:[#allocation19 + $0x2d4] ss:$8 sps:$4 sm:$0xff]  }
 0x6da   : > { %v5608_v13 = vmax.f32 %v5599_v57, 0.0  ;;  %7083 = vmatprep.subr.bf16.mxu0 %v11480_v8  ;;  %7533 = vmatprep.subr.bf16.mxu1 %v11486_v4 }
 0x6db   : > { %v13659_v43 = vpack.c.bf16 %v5607_v54, %v5605_v11 }
 0x6dc   : > { %v13661_v6 = vpack.c.bf16 %v5608_v13, %v5606_v32  ;;  %v5663_v1 = vpop.f32.mrb[224].mxu0 }
 0x6dd   : > { %v5664_v51 = vadd.f32 %v5663_v1, %v13572_v50  ;;  %v5665_v45 = vpop.f32.mrb[225].mxu0  ;;  %7084 = vmatpush1.bf16.msra.mxu0 %v11478_v63  ;;  %7534 = vmatpush1.bf16.msra.mxu1 %v11484_v7 }
 0x6de   : > { %v5666_v24 = vadd.f32 %v5665_v45, %v13575_v12  ;;  %v5667_v53 = vpop.f32.mrb[226].mxu0  ;;  %7085 = vmatprep.subr.bf16.mxu0 %v11489_v60  ;;  %7535 = vmatprep.subr.bf16.mxu1 %v11492_v27 }
 0x6df   : > { %6248 = vmatmul.mubr.bf16.gmra.mrb[4].mxu0 %v13643_v59  ;;  %6698 = vmatmul.mubr.bf16.gmra.mrb[4].mxu1 %v13643_v59  ;;  %v5682_v3 = vmax.f32 %v5664_v51, 0.0  ;;  %v5668_v40 = vadd.f32 %v5667_v53, %v13572_v50  ;;  %v5669_v33 = vpop.f32.mrb[227].mxu0 }
 0x6e0   : > { %6257 = vmatprep.mubr.bf16.mxu0 %v13649_v52  ;;  %6707 = vmatprep.mubr.bf16.mxu1 %v13649_v52  ;;  %v5683_v34 = vmax.f32 %v5666_v24, 0.0  ;;  %v5670_v15 = vadd.f32 %v5669_v33, %v13575_v12  ;;  %v11508_v24 = vld [vmem:[#allocation19 + $0x3d0] ss:$8 sps:$4 sm:$0xff]  }
 0x6e1   : > { %v5684_v16 = vmax.f32 %v5668_v40, 0.0  ;;  %7086 = vmatpush1.bf16.msra.mxu0 %v11487_v14  ;;  %7536 = vmatpush1.bf16.msra.mxu1 %v11490_v39  ;;  %v11505_v39 = vld [vmem:[#allocation19 + $0x2d0] ss:$8 sps:$4 sm:$0xff]  }
 0x6e2   : > { %v5685_v36 = vmax.f32 %v5670_v15, 0.0  ;;  %7087 = vmatprep.subr.bf16.mxu0 %v11495_v26  ;;  %7537 = vmatprep.subr.bf16.mxu1 %v11498_v23  ;;  %v11513_v23 = vld [vmem:[#allocation19 + $0x2e4] ss:$8 sps:$4 sm:$0xff]  }
 0x6e3   : > { %v13671_v55 = vpack.c.bf16 %v5684_v16, %v5682_v3  ;;  %v11516_v3 = vld [vmem:[#allocation19 + $0x3e4] ss:$8 sps:$4 sm:$0xff]  }
 0x6e4   : > { %v13673_v19 = vpack.c.bf16 %v5685_v36, %v5683_v34  ;;  %v5673_v21 = vpop.f32.mrb[228].mxu0  ;;  %v5744_v37 = vpop.f32.mrb[224].mxu1  ;;  %v11511_v36 = vld [vmem:[#allocation19 + $0x2e0] ss:$8 sps:$4 sm:$0xff]  }
 0x6e5   : > { %v5674_v58 = vadd.f32 %v5673_v21, %v13572_v50  ;;  %v5675_v46 = vpop.f32.mrb[229].mxu0  ;;  %v5745_v28 = vadd.f32 %v5744_v37, %v13572_v50  ;;  %v5746_v18 = vpop.f32.mrb[225].mxu1  ;;  %7088 = vmatpush1.bf16.msra.mxu0 %v11493_v29  ;;  %7538 = vmatpush1.bf16.msra.mxu1 %v11496_v22  ;;  %v11519_v37 = vld [vmem:[#allocation19 + $0x2f4] ss:$8 sps:$4 sm:$0xff]  }
 0x6e6   : > { %v5676_v56 = vadd.f32 %v5675_v46, %v13575_v12  ;;  %v5677_v8 = vpop.f32.mrb[230].mxu0  ;;  %v5747_v4 = vadd.f32 %v5746_v18, %v13575_v12  ;;  %v5748_v11 = vpop.f32.mrb[226].mxu1  ;;  %7089 = vmatprep.subr.bf16.mxu0 %v11501_v9  ;;  %7539 = vmatprep.subr.bf16.mxu1 %v11504_v38  ;;  %v11514_v9 = vld [vmem:[#allocation19 + $0x3e0] ss:$8 sps:$4 sm:$0xff]  }
 0x6e7   : > { %6258 = vmatmul.mubr.bf16.gmra.mrb[8].mxu0 %v13645_v31  ;;  %6708 = vmatmul.mubr.bf16.gmra.mrb[8].mxu1 %v13645_v31  ;;  %v5686_v32 = vmax.f32 %v5674_v58, 0.0  ;;  %v5678_v57 = vadd.f32 %v5677_v8, %v13572_v50  ;;  %v5679_v54 = vpop.f32.mrb[231].mxu0  ;;  %v5763_v63 = vmax.f32 %v5745_v28, 0.0  ;;  %v5749_v7 = vadd.f32 %v5748_v11, %v13572_v50  ;;  %v5750_v13 = vpop.f32.mrb[227].mxu1  ;;  %v11522_v58 = vld [vmem:[#allocation19 + $0x3f4] ss:$8 sps:$4 sm:$0xff]  }
 0x6e8   : > { %6267 = vmatprep.mubr.bf16.mxu0 %v13661_v6  ;;  %6717 = vmatprep.mubr.bf16.mxu1 %v13661_v6  ;;  %v5687_v60 = vmax.f32 %v5676_v56, 0.0  ;;  %v5680_v27 = vadd.f32 %v5679_v54, %v13575_v12  ;;  %v5764_v1 = vmax.f32 %v5747_v4, 0.0  ;;  %v5751_v51 = vadd.f32 %v5750_v13, %v13575_v12  ;;  %v11517_v8 = vld [vmem:[#allocation19 + $0x2f0] ss:$8 sps:$4 sm:$0xff]  }
 0x6e9   : > { %v5688_v45 = vmax.f32 %v5678_v57, 0.0  ;;  %v5765_v14 = vmax.f32 %v5749_v7, 0.0  ;;  %7090 = vmatpush1.bf16.msra.mxu0 %v11499_v30  ;;  %7540 = vmatpush1.bf16.msra.mxu1 %v11502_v44  ;;  %v11520_v4 = vld [vmem:[#allocation19 + $0x3f0] ss:$8 sps:$4 sm:$0xff]  }
 0x6ea   : > { %v5689_v53 = vmax.f32 %v5680_v27, 0.0  ;;  %v5766_v26 = vmax.f32 %v5751_v51, 0.0  ;;  %7091 = vmatprep.subr.bf16.mxu0 %v11507_v61  ;;  %7541 = vmatprep.subr.bf16.mxu1 %v11510_v41  ;;  %v11525_v61 = vld [vmem:[#allocation19 + $0x404] ss:$8 sps:$4 sm:$0xff]  }
 0x6eb   : > { %v13687_v40 = vpack.c.bf16 %v5688_v45, %v5686_v32  ;;  %v13689_v33 = vpack.c.bf16 %v5765_v14, %v5763_v63  ;;  %v11531_v41 = vld [vmem:[#allocation19 + $0x504] ss:$8 sps:$4 sm:$0xff]  }
 0x6ec   : > { %v13691_v34 = vpack.c.bf16 %v5689_v53, %v5687_v60  ;;  %v13693_v15 = vpack.c.bf16 %v5766_v26, %v5764_v1  ;;  %v5754_v16 = vpop.f32.mrb[228].mxu1 }
 0x6ed   : > { %v5755_v29 = vadd.f32 %v5754_v16, %v13572_v50  ;;  %v5756_v22 = vpop.f32.mrb[229].mxu1  ;;  %7092 = vmatpush1.bf16.msra.mxu0 %v11505_v39  ;;  %7542 = vmatpush1.bf16.msra.mxu1 %v11508_v24 }
 0x6ee   : > { %v5757_v38 = vadd.f32 %v5756_v22, %v13575_v12  ;;  %v5758_v21 = vpop.f32.mrb[230].mxu1  ;;  %7093 = vmatprep.subr.bf16.mxu0 %v11513_v23  ;;  %7543 = vmatprep.subr.bf16.mxu1 %v11516_v3 }
 0x6ef   : > { %6268 = vmatmul.mubr.bf16.gmra.mrb[12].mxu0 %v13659_v43  ;;  %6718 = vmatmul.mubr.bf16.gmra.mrb[12].mxu1 %v13659_v43  ;;  %v5767_v46 = vmax.f32 %v5755_v29, 0.0  ;;  %v5759_v28 = vadd.f32 %v5758_v21, %v13572_v50  ;;  %v5760_v18 = vpop.f32.mrb[231].mxu1 }
 0x6f0   : > { %6277 = vmatprep.mubr.bf16.mxu0 %v13673_v19  ;;  %6727 = vmatprep.mubr.bf16.mxu1 %v13673_v19  ;;  %v5768_v30 = vmax.f32 %v5757_v38, 0.0  ;;  %v5761_v44 = vadd.f32 %v5760_v18, %v13575_v12 }
 0x6f1   : > { %v5769_v56 = vmax.f32 %v5759_v28, 0.0  ;;  %7094 = vmatpush1.bf16.msra.mxu0 %v11511_v36  ;;  %7544 = vmatpush1.bf16.msra.mxu1 %v11514_v9 }
 0x6f2   : > { %v5770_v11 = vmax.f32 %v5761_v44, 0.0  ;;  %7095 = vmatprep.subr.bf16.mxu0 %v11519_v37  ;;  %7545 = vmatprep.subr.bf16.mxu1 %v11522_v58 }
 0x6f3   : > { %v13703_v32 = vpack.c.bf16 %v5769_v56, %v5767_v46 }
 0x6f4   : > { %v13705_v57 = vpack.c.bf16 %v5770_v11, %v5768_v30  ;;  %v5825_v54 = vpop.f32.mrb[232].mxu0 }
 0x6f5   : > { %v5826_v63 = vadd.f32 %v5825_v54, %v13572_v50  ;;  %v5827_v7 = vpop.f32.mrb[233].mxu0  ;;  %7096 = vmatpush1.bf16.msra.mxu0 %v11517_v8  ;;  %7546 = vmatpush1.bf16.msra.mxu1 %v11520_v4 }
 0x6f6   : > { %v5828_v13 = vadd.f32 %v5827_v7, %v13575_v12  ;;  %v5829_v60 = vpop.f32.mrb[234].mxu0  ;;  %7965 = vmatprep.subr.bf16.mxu0 %v11525_v61  ;;  %8415 = vmatprep.subr.bf16.mxu1 %v11531_v41 }
 0x6f7   : > { %6278 = vmatmul.mubr.bf16.gmra.mrb[16].mxu0 %v13671_v55  ;;  %6728 = vmatmul.mubr.bf16.gmra.mrb[16].mxu1 %v13671_v55  ;;  %v5844_v27 = vmax.f32 %v5826_v63, 0.0  ;;  %v5830_v1 = vadd.f32 %v5829_v60, %v13572_v50  ;;  %v5831_v51 = vpop.f32.mrb[235].mxu0 }
 0x6f8   : > { %6287 = vmatprep.mubr.bf16.mxu0 %v13691_v34  ;;  %6737 = vmatprep.mubr.bf16.mxu1 %v13691_v34  ;;  %v5845_v45 = vmax.f32 %v5828_v13, 0.0  ;;  %v5832_v14 = vadd.f32 %v5831_v51, %v13575_v12 }
 0x6f9   : > { %v5846_v39 = vmax.f32 %v5830_v1, 0.0 }
 0x6fa   : > { %v5847_v24 = vmax.f32 %v5832_v14, 0.0 }
 0x6fb   : > { %v13715_v53 = vpack.c.bf16 %v5846_v39, %v5844_v27 }
 0x6fc   : > { %v13717_v26 = vpack.c.bf16 %v5847_v24, %v5845_v45  ;;  %v5835_v23 = vpop.f32.mrb[236].mxu0  ;;  %v5906_v3 = vpop.f32.mrb[232].mxu1 }
 0x6fd   : > { %v5836_v16 = vadd.f32 %v5835_v23, %v13572_v50  ;;  %v5837_v29 = vpop.f32.mrb[237].mxu0  ;;  %v5907_v22 = vadd.f32 %v5906_v3, %v13572_v50  ;;  %v5908_v36 = vpop.f32.mrb[233].mxu1 }
 0x6fe   : > { %v5838_v9 = vadd.f32 %v5837_v29, %v13575_v12  ;;  %v5839_v38 = vpop.f32.mrb[238].mxu0  ;;  %v5909_v21 = vadd.f32 %v5908_v36, %v13575_v12  ;;  %v5910_v37 = vpop.f32.mrb[234].mxu1 }
 0x6ff   : > { %6288 = vmatmul.mubr.bf16.gmra.mrb[20].mxu0 %v13687_v40  ;;  %6738 = vmatmul.mubr.bf16.gmra.mrb[20].mxu1 %v13687_v40  ;;  %v5848_v58 = vmax.f32 %v5836_v16, 0.0  ;;  %v5840_v46 = vadd.f32 %v5839_v38, %v13572_v50  ;;  %v5841_v28 = vpop.f32.mrb[239].mxu0  ;;  %v5925_v18 = vmax.f32 %v5907_v22, 0.0  ;;  %v5911_v30 = vadd.f32 %v5910_v37, %v13572_v50  ;;  %v5912_v44 = vpop.f32.mrb[235].mxu1  ;;  %v11537_v37 = vld [vmem:[#allocation19 + $0x514] ss:$8 sps:$4 sm:$0xff]  }
 0x700   : > { %6297 = vmatprep.mubr.bf16.mxu0 %v13693_v15  ;;  %6747 = vmatprep.mubr.bf16.mxu1 %v13693_v15  ;;  %v5849_v56 = vmax.f32 %v5838_v9, 0.0  ;;  %v5842_v8 = vadd.f32 %v5841_v28, %v13575_v12  ;;  %v5926_v4 = vmax.f32 %v5909_v21, 0.0  ;;  %v5913_v11 = vadd.f32 %v5912_v44, %v13575_v12  ;;  %v11528_v21 = vld [vmem:[#allocation19 + $0x414] ss:$8 sps:$4 sm:$0xff]   ;;  %v11534_v28 = vld [vmem:[#allocation19 + $0x424] ss:$8 sps:$4 sm:$0xff]  }
 0x701   : > { %v5850_v61 = vmax.f32 %v5840_v46, 0.0  ;;  %v5927_v41 = vmax.f32 %v5911_v30, 0.0  ;;  %v11535_v46 = vld [vmem:[#allocation19 + $0x510] ss:$8 sps:$4 sm:$0xff]   ;;  %v11532_v30 = vld [vmem:[#allocation19 + $0x420] ss:$8 sps:$4 sm:$0xff]  }
 0x702   : > { %v5851_v54 = vmax.f32 %v5842_v8, 0.0  ;;  %v5928_v63 = vmax.f32 %v5913_v11, 0.0  ;;  %v11544_v44 = vld [vmem:[#allocation19 + $0x520] ss:$8 sps:$4 sm:$0xff]   ;;  %v11555_v8 = vld [vmem:[#allocation19 + $0x534] ss:$8 sps:$4 sm:$0xff]  }
 0x703   : > { %v13731_v7 = vpack.c.bf16 %v5850_v61, %v5848_v58  ;;  %v13733_v13 = vpack.c.bf16 %v5927_v41, %v5925_v18  ;;  %v11526_v58 = vld [vmem:[#allocation19 + $0x410] ss:$8 sps:$4 sm:$0xff]   ;;  %v11546_v18 = vld [vmem:[#allocation19 + $0x524] ss:$8 sps:$4 sm:$0xff]  }
 0x704   : > { %v13735_v60 = vpack.c.bf16 %v5851_v54, %v5849_v56  ;;  %v13737_v27 = vpack.c.bf16 %v5928_v63, %v5926_v4  ;;  %v5916_v1 = vpop.f32.mrb[236].mxu1  ;;  %v11540_v56 = vld [vmem:[#allocation19 + $0x434] ss:$8 sps:$4 sm:$0xff]   ;;  %v11538_v4 = vld [vmem:[#allocation19 + $0x430] ss:$8 sps:$4 sm:$0xff]  }
 0x705   : > { %16257 = vst [vmem:[#allocation66_spill] sm:$0xff] %v13731_v7  ;;  %16258 = vst [vmem:[#allocation60_spill] sm:$0xff] %v13733_v13  ;;  %v5917_v51 = vadd.f32 %v5916_v1, %v13572_v50  ;;  %v5918_v45 = vpop.f32.mrb[237].mxu1  ;;  %v11553_v11 = vld [vmem:[#allocation19 + $0x530] ss:$8 sps:$4 sm:$0xff]  }
 0x706   : > { %16259 = vst [vmem:[#allocation52_spill] sm:$0xff] %v13735_v60  ;;  %16260 = vst [vmem:[#allocation46_spill] sm:$0xff] %v13737_v27  ;;  %v5919_v14 = vadd.f32 %v5918_v45, %v13575_v12  ;;  %v5920_v39 = vpop.f32.mrb[238].mxu1  ;;  %v11543_v61 = vld [vmem:[#allocation19 + $0x444] ss:$8 sps:$4 sm:$0xff]  }
 0x707   : > { %6298 = vmatmul.mubr.bf16.gmra.mrb[24].mxu0 %v13689_v33  ;;  %6748 = vmatmul.mubr.bf16.gmra.mrb[24].mxu1 %v13689_v33  ;;  %v5929_v24 = vmax.f32 %v5917_v51, 0.0  ;;  %v5921_v23 = vadd.f32 %v5920_v39, %v13572_v50  ;;  %v5922_v3 = vpop.f32.mrb[239].mxu1  ;;  %v11523_v50 = vld [vmem:[#allocation19 + $0x400] ss:$8 sps:$4 sm:$0xff]   ;;  %v11564_v41 = vld [vmem:[#allocation19 + $0x544] ss:$8 sps:$4 sm:$0xff]  }
 0x708   : > { %6307 = vmatprep.mubr.bf16.mxu0 %v13705_v57  ;;  %6757 = vmatprep.mubr.bf16.mxu1 %v13705_v57  ;;  %v5930_v16 = vmax.f32 %v5919_v14, 0.0  ;;  %v5923_v29 = vadd.f32 %v5922_v3, %v13575_v12  ;;  %v11529_v12 = vld [vmem:[#allocation19 + $0x500] ss:$8 sps:$4 sm:$0xff]   ;;  %v11549_v1 = vld [vmem:[#allocation19 + $0x454] ss:$8 sps:$4 sm:$0xff]  }
 0x709   : > { %v5931_v22 = vmax.f32 %v5921_v23, 0.0  ;;  %v11541_v54 = vld [vmem:[#allocation19 + $0x440] ss:$8 sps:$4 sm:$0xff]   ;;  %v11570_v51 = vld [vmem:[#allocation19 + $0x554] ss:$8 sps:$4 sm:$0xff]  }
 0x70a   : > { %v5932_v36 = vmax.f32 %v5923_v29, 0.0  ;;  %v11562_v63 = vld [vmem:[#allocation19 + $0x540] ss:$8 sps:$4 sm:$0xff]   ;;  %v11547_v45 = vld [vmem:[#allocation19 + $0x450] ss:$8 sps:$4 sm:$0xff]  }
 0x70b   : > { %v13747_v9 = vpack.c.bf16 %v5931_v22, %v5929_v24  ;;  %v11568_v14 = vld [vmem:[#allocation19 + $0x550] ss:$8 sps:$4 sm:$0xff]   ;;  %v11552_v39 = vld [vmem:[#allocation19 + $0x464] ss:$8 sps:$4 sm:$0xff]   ;;  %v11550_v23 = vld [vmem:[#allocation19 + $0x460] ss:$8 sps:$4 sm:$0xff]  }
 0x70c   : > { %v13749_v38 = vpack.c.bf16 %v5932_v36, %v5930_v16  ;;  %v11576_v24 = vld [vmem:[#allocation19 + $0x564] ss:$8 sps:$4 sm:$0xff]   ;;  %v11574_v3 = vld [vmem:[#allocation19 + $0x560] ss:$8 sps:$4 sm:$0xff]   ;;  %v11558_v16 = vld [vmem:[#allocation19 + $0x474] ss:$8 sps:$4 sm:$0xff]  }
 0x70d   : > { %v11582_v29 = vld [vmem:[#allocation19 + $0x574] ss:$8 sps:$4 sm:$0xff]   ;;  %v11556_v22 = vld [vmem:[#allocation19 + $0x470] ss:$8 sps:$4 sm:$0xff]  }
 0x70e   : > { %16261 = vst [vmem:[#allocation48_spill] sm:$0xff] %v13749_v38  ;;  %v11580_v36 = vld [vmem:[#allocation19 + $0x570] ss:$8 sps:$4 sm:$0xff]  }
 0x70f   : > { %6308 = vmatmul.mubr.bf16.gmra.mrb[28].mxu0 %v13703_v32  ;;  %6758 = vmatmul.mubr.bf16.gmra.mrb[28].mxu1 %v13703_v32 }
 0x710   : > { %6317 = vmatprep.mubr.bf16.mxu0 %v13717_v26  ;;  %6767 = vmatprep.mubr.bf16.mxu1 %v13717_v26 }
 0x717   : > { %6318 = vmatmul.mubr.bf16.gmra.mrb[32].mxu0 %v13715_v53  ;;  %6768 = vmatmul.mubr.bf16.gmra.mrb[32].mxu1 %v13715_v53 }
 0x718   : > { %6327 = vmatprep.mubr.bf16.mxu0 %v13735_v60  ;;  %6777 = vmatprep.mubr.bf16.mxu1 %v13735_v60 }
 0x71f   : > { %6328 = vmatmul.mubr.bf16.gmra.mrb[36].mxu0 %v13731_v7  ;;  %6778 = vmatmul.mubr.bf16.gmra.mrb[36].mxu1 %v13731_v7 }
 0x720   : > { %6337 = vmatprep.mubr.bf16.mxu0 %v13737_v27  ;;  %6787 = vmatprep.mubr.bf16.mxu1 %v13737_v27 }
 0x727   : > { %6338 = vmatmul.mubr.bf16.gmra.mrb[40].mxu0 %v13733_v13  ;;  %6788 = vmatmul.mubr.bf16.gmra.mrb[40].mxu1 %v13733_v13 }
 0x728   : > { %6347 = vmatprep.mubr.bf16.mxu0 %v13749_v38  ;;  %6797 = vmatprep.mubr.bf16.mxu1 %v13749_v38 }
 0x72f   : > { %6348 = vmatmul.mubr.bf16.gmra.mrb[44].mxu0 %v13747_v9  ;;  %6798 = vmatmul.mubr.bf16.gmra.mrb[44].mxu1 %v13747_v9 }
 0x730   : > { %7097 = vmatprep.mubr.bf16.mxu0 %v13583_v48  ;;  %7547 = vmatprep.mubr.bf16.mxu1 %v13583_v48 }
 0x737   : > { %7098 = vmatmul.mubr.bf16.vlgmr.msra.gmra.mrb[48].mxu0 %v13581_v35  ;;  %7548 = vmatmul.mubr.bf16.vlgmr.msra.gmra.mrb[48].mxu1 %v13581_v35 }
 0x738   : > { %7107 = vmatprep.mubr.bf16.mxu0 %v13601_v62  ;;  %7557 = vmatprep.mubr.bf16.mxu1 %v13601_v62 }
 0x739   : > { %7966 = vmatpush1.bf16.msra.mxu0 %v11523_v50  ;;  %8416 = vmatpush1.bf16.msra.mxu1 %v11529_v12  ;;  %v11561_v50 = vld [vmem:[#allocation19 + $0x484] ss:$8 sps:$4 sm:$0xff]  }
 0x73a   : > { %7967 = vmatprep.subr.bf16.mxu0 %v11528_v21  ;;  %8417 = vmatprep.subr.bf16.mxu1 %v11537_v37  ;;  %v11588_v12 = vld [vmem:[#allocation19 + $0x584] ss:$8 sps:$4 sm:$0xff]   ;;  %v11559_v21 = vld [vmem:[#allocation19 + $0x480] ss:$8 sps:$4 sm:$0xff]  }
 0x73b   : > { %v11586_v37 = vld [vmem:[#allocation19 + $0x580] ss:$8 sps:$4 sm:$0xff]  }
 0x73d   : > { %7968 = vmatpush1.bf16.msra.mxu0 %v11526_v58  ;;  %8418 = vmatpush1.bf16.msra.mxu1 %v11535_v46  ;;  %v11567_v58 = vld [vmem:[#allocation19 + $0x494] ss:$8 sps:$4 sm:$0xff]  }
 0x73e   : > { %7969 = vmatprep.subr.bf16.mxu0 %v11534_v28  ;;  %8419 = vmatprep.subr.bf16.mxu1 %v11546_v18  ;;  %v11594_v46 = vld [vmem:[#allocation19 + $0x594] ss:$8 sps:$4 sm:$0xff]   ;;  %v11565_v28 = vld [vmem:[#allocation19 + $0x490] ss:$8 sps:$4 sm:$0xff]  }
 0x73f   : > { %7108 = vmatmul.mubr.bf16.gmra.mrb[52].mxu0 %v13597_v17  ;;  %7558 = vmatmul.mubr.bf16.gmra.mrb[52].mxu1 %v13597_v17  ;;  %v11592_v18 = vld [vmem:[#allocation19 + $0x590] ss:$8 sps:$4 sm:$0xff]  }
 0x740   : > { %7117 = vmatprep.mubr.bf16.mxu0 %v13603_v10  ;;  %7567 = vmatprep.mubr.bf16.mxu1 %v13603_v10 }
 0x741   : > { %7970 = vmatpush1.bf16.msra.mxu0 %v11532_v30  ;;  %8420 = vmatpush1.bf16.msra.mxu1 %v11544_v44  ;;  %v11573_v30 = vld [vmem:[#allocation19 + $0x4a4] ss:$8 sps:$4 sm:$0xff]  }
 0x742   : > { %7971 = vmatprep.subr.bf16.mxu0 %v11540_v56  ;;  %8421 = vmatprep.subr.bf16.mxu1 %v11555_v8  ;;  %v11600_v44 = vld [vmem:[#allocation19 + $0x5a4] ss:$8 sps:$4 sm:$0xff]   ;;  %v11571_v56 = vld [vmem:[#allocation19 + $0x4a0] ss:$8 sps:$4 sm:$0xff]  }
 0x743   : > { %v11598_v8 = vld [vmem:[#allocation19 + $0x5a0] ss:$8 sps:$4 sm:$0xff]  }
 0x745   : > { %7972 = vmatpush1.bf16.msra.mxu0 %v11538_v4  ;;  %8422 = vmatpush1.bf16.msra.mxu1 %v11553_v11  ;;  %v11579_v4 = vld [vmem:[#allocation19 + $0x4b4] ss:$8 sps:$4 sm:$0xff]  }
 0x746   : > { %7973 = vmatprep.subr.bf16.mxu0 %v11543_v61  ;;  %8423 = vmatprep.subr.bf16.mxu1 %v11564_v41  ;;  %v11606_v11 = vld [vmem:[#allocation19 + $0x5b4] ss:$8 sps:$4 sm:$0xff]   ;;  %v11577_v61 = vld [vmem:[#allocation19 + $0x4b0] ss:$8 sps:$4 sm:$0xff]  }
 0x747   : > { %7118 = vmatmul.mubr.bf16.gmra.mrb[56].mxu0 %v13599_v0  ;;  %7568 = vmatmul.mubr.bf16.gmra.mrb[56].mxu1 %v13599_v0  ;;  %v11604_v41 = vld [vmem:[#allocation19 + $0x5b0] ss:$8 sps:$4 sm:$0xff]  }
 0x748   : > { %7127 = vmatprep.mubr.bf16.mxu0 %v13617_v25  ;;  %7577 = vmatprep.mubr.bf16.mxu1 %v13617_v25 }
 0x749   : > { %7974 = vmatpush1.bf16.msra.mxu0 %v11541_v54  ;;  %8424 = vmatpush1.bf16.msra.mxu1 %v11562_v63  ;;  %v11585_v54 = vld [vmem:[#allocation19 + $0x4c4] ss:$8 sps:$4 sm:$0xff]  }
 0x74a   : > { %7975 = vmatprep.subr.bf16.mxu0 %v11549_v1  ;;  %8425 = vmatprep.subr.bf16.mxu1 %v11570_v51  ;;  %v11609_v63 = vld [vmem:[#allocation19 + $0x5c4] ss:$8 sps:$4 sm:$0xff]   ;;  %v11583_v1 = vld [vmem:[#allocation19 + $0x4c0] ss:$8 sps:$4 sm:$0xff]  }
 0x74b   : > { %v11607_v51 = vld [vmem:[#allocation19 + $0x5c0] ss:$8 sps:$4 sm:$0xff]  }
 0x74d   : > { %7976 = vmatpush1.bf16.msra.mxu0 %v11547_v45  ;;  %8426 = vmatpush1.bf16.msra.mxu1 %v11568_v14  ;;  %v11591_v45 = vld [vmem:[#allocation19 + $0x4d4] ss:$8 sps:$4 sm:$0xff]  }
 0x74e   : > { %7977 = vmatprep.subr.bf16.mxu0 %v11552_v39  ;;  %8427 = vmatprep.subr.bf16.mxu1 %v11576_v24  ;;  %v11612_v14 = vld [vmem:[#allocation19 + $0x5d4] ss:$8 sps:$4 sm:$0xff]   ;;  %v11589_v39 = vld [vmem:[#allocation19 + $0x4d0] ss:$8 sps:$4 sm:$0xff]  }
 0x74f   : > { %7128 = vmatmul.mubr.bf16.gmra.mrb[60].mxu0 %v13615_v47  ;;  %7578 = vmatmul.mubr.bf16.gmra.mrb[60].mxu1 %v13615_v47  ;;  %v11610_v24 = vld [vmem:[#allocation19 + $0x5d0] ss:$8 sps:$4 sm:$0xff]  }
 0x750   : > { %7137 = vmatprep.mubr.bf16.mxu0 %v13629_v20  ;;  %7587 = vmatprep.mubr.bf16.mxu1 %v13629_v20 }
 0x751   : > { %7978 = vmatpush1.bf16.msra.mxu0 %v11550_v23  ;;  %8428 = vmatpush1.bf16.msra.mxu1 %v11574_v3  ;;  %v11597_v23 = vld [vmem:[#allocation19 + $0x4e4] ss:$8 sps:$4 sm:$0xff]  }
 0x752   : > { %7979 = vmatprep.subr.bf16.mxu0 %v11558_v16  ;;  %8429 = vmatprep.subr.bf16.mxu1 %v11582_v29  ;;  %v11615_v3 = vld [vmem:[#allocation19 + $0x5e4] ss:$8 sps:$4 sm:$0xff]   ;;  %v11595_v16 = vld [vmem:[#allocation19 + $0x4e0] ss:$8 sps:$4 sm:$0xff]  }
 0x753   : > { %v11613_v29 = vld [vmem:[#allocation19 + $0x5e0] ss:$8 sps:$4 sm:$0xff]  }
 0x755   : > { %7980 = vmatpush1.bf16.msra.mxu0 %v11556_v22  ;;  %8430 = vmatpush1.bf16.msra.mxu1 %v11580_v36  ;;  %v11603_v22 = vld [vmem:[#allocation19 + $0x4f4] ss:$8 sps:$4 sm:$0xff]  }
 0x756   : > { %7981 = vmatprep.subr.bf16.mxu0 %v11561_v50  ;;  %8431 = vmatprep.subr.bf16.mxu1 %v11588_v12  ;;  %v11618_v36 = vld [vmem:[#allocation19 + $0x5f4] ss:$8 sps:$4 sm:$0xff]   ;;  %v11601_v50 = vld [vmem:[#allocation19 + $0x4f0] ss:$8 sps:$4 sm:$0xff]  }
 0x757   : > { %7138 = vmatmul.mubr.bf16.gmra.mrb[64].mxu0 %v13627_v5  ;;  %7588 = vmatmul.mubr.bf16.gmra.mrb[64].mxu1 %v13627_v5  ;;  %v11616_v12 = vld [vmem:[#allocation19 + $0x5f0] ss:$8 sps:$4 sm:$0xff]  }
 0x758   : > { %7147 = vmatprep.mubr.bf16.mxu0 %v13647_v42  ;;  %7597 = vmatprep.mubr.bf16.mxu1 %v13647_v42 }
 0x759   : > { %7982 = vmatpush1.bf16.msra.mxu0 %v11559_v21  ;;  %8432 = vmatpush1.bf16.msra.mxu1 %v11586_v37 }
 0x75a   : > { %7983 = vmatprep.subr.bf16.mxu0 %v11567_v58  ;;  %8433 = vmatprep.subr.bf16.mxu1 %v11594_v46 }
 0x75d   : > { %7984 = vmatpush1.bf16.msra.mxu0 %v11565_v28  ;;  %8434 = vmatpush1.bf16.msra.mxu1 %v11592_v18 }
 0x75e   : > { %7985 = vmatprep.subr.bf16.mxu0 %v11573_v30  ;;  %8435 = vmatprep.subr.bf16.mxu1 %v11600_v44 }
 0x75f   : > { %7148 = vmatmul.mubr.bf16.gmra.mrb[68].mxu0 %v13643_v59  ;;  %7598 = vmatmul.mubr.bf16.gmra.mrb[68].mxu1 %v13643_v59 }
 0x760   : > { %7157 = vmatprep.mubr.bf16.mxu0 %v13649_v52  ;;  %7607 = vmatprep.mubr.bf16.mxu1 %v13649_v52 }
 0x761   : > { %7986 = vmatpush1.bf16.msra.mxu0 %v11571_v56  ;;  %8436 = vmatpush1.bf16.msra.mxu1 %v11598_v8 }
 0x762   : > { %7987 = vmatprep.subr.bf16.mxu0 %v11579_v4  ;;  %8437 = vmatprep.subr.bf16.mxu1 %v11606_v11 }
 0x765   : > { %7988 = vmatpush1.bf16.msra.mxu0 %v11577_v61  ;;  %8438 = vmatpush1.bf16.msra.mxu1 %v11604_v41 }
 0x766   : > { %7989 = vmatprep.subr.bf16.mxu0 %v11585_v54  ;;  %8439 = vmatprep.subr.bf16.mxu1 %v11609_v63 }
 0x767   : > { %7158 = vmatmul.mubr.bf16.gmra.mrb[72].mxu0 %v13645_v31  ;;  %7608 = vmatmul.mubr.bf16.gmra.mrb[72].mxu1 %v13645_v31 }
 0x768   : > { %7167 = vmatprep.mubr.bf16.mxu0 %v13661_v6  ;;  %7617 = vmatprep.mubr.bf16.mxu1 %v13661_v6 }
 0x769   : > { %7990 = vmatpush1.bf16.msra.mxu0 %v11583_v1  ;;  %8440 = vmatpush1.bf16.msra.mxu1 %v11607_v51 }
 0x76a   : > { %7991 = vmatprep.subr.bf16.mxu0 %v11591_v45  ;;  %8441 = vmatprep.subr.bf16.mxu1 %v11612_v14 }
 0x76d   : > { %7992 = vmatpush1.bf16.msra.mxu0 %v11589_v39  ;;  %8442 = vmatpush1.bf16.msra.mxu1 %v11610_v24 }
 0x76e   : > { %7993 = vmatprep.subr.bf16.mxu0 %v11597_v23  ;;  %8443 = vmatprep.subr.bf16.mxu1 %v11615_v3 }
 0x76f   : > { %7168 = vmatmul.mubr.bf16.gmra.mrb[76].mxu0 %v13659_v43  ;;  %7618 = vmatmul.mubr.bf16.gmra.mrb[76].mxu1 %v13659_v43 }
 0x770   : > { %7177 = vmatprep.mubr.bf16.mxu0 %v13673_v19  ;;  %7627 = vmatprep.mubr.bf16.mxu1 %v13673_v19 }
 0x771   : > { %7994 = vmatpush1.bf16.msra.mxu0 %v11595_v16  ;;  %8444 = vmatpush1.bf16.msra.mxu1 %v11613_v29 }
 0x772   : > { %7995 = vmatprep.subr.bf16.mxu0 %v11603_v22  ;;  %8445 = vmatprep.subr.bf16.mxu1 %v11618_v36 }
 0x775   : > { %7996 = vmatpush1.bf16.msra.mxu0 %v11601_v50  ;;  %8446 = vmatpush1.bf16.msra.mxu1 %v11616_v12 }
 0x777   : > { %7178 = vmatmul.mubr.bf16.gmra.mrb[80].mxu0 %v13671_v55  ;;  %7628 = vmatmul.mubr.bf16.gmra.mrb[80].mxu1 %v13671_v55 }
 0x778   : > { %7187 = vmatprep.mubr.bf16.mxu0 %v13691_v34  ;;  %7637 = vmatprep.mubr.bf16.mxu1 %v13691_v34 }
 0x77f   : > { %7188 = vmatmul.mubr.bf16.gmra.mrb[84].mxu0 %v13687_v40  ;;  %7638 = vmatmul.mubr.bf16.gmra.mrb[84].mxu1 %v13687_v40 }
 0x780   : > { %7197 = vmatprep.mubr.bf16.mxu0 %v13693_v15  ;;  %7647 = vmatprep.mubr.bf16.mxu1 %v13693_v15 }
 0x787   : > { %7198 = vmatmul.mubr.bf16.gmra.mrb[88].mxu0 %v13689_v33  ;;  %7648 = vmatmul.mubr.bf16.gmra.mrb[88].mxu1 %v13689_v33 }
 0x788   : > { %7207 = vmatprep.mubr.bf16.mxu0 %v13705_v57  ;;  %7657 = vmatprep.mubr.bf16.mxu1 %v13705_v57 }
 0x78a   : > { %v13815_v21 = vpop.f32.mrb[240].mxu0  ;;  %v13817_v37 = vpop.f32.mrb[240].mxu1 }
 0x78b   : > { %v6201_v58 = vpop.f32.mrb[241].mxu0  ;;  %v13819_v46 = vpop.f32.mrb[241].mxu1 }
 0x78c   : > { %v13821_v28 = vpop.f32.mrb[242].mxu0  ;;  %v13823_v18 = vpop.f32.mrb[242].mxu1 }
 0x78d   : > { %v6205_v56 = vpop.f32.mrb[243].mxu0  ;;  %v13829_v8 = vpop.f32.mrb[243].mxu1 }
 0x78e   : > { %v6359_v4 = vpack.c.bf16 %v6205_v56, %v6201_v58 }
 0x78f   : > { %7208 = vmatmul.mubr.bf16.gmra.mrb[92].mxu0 %v13703_v32  ;;  %7658 = vmatmul.mubr.bf16.gmra.mrb[92].mxu1 %v13703_v32 }
 0x790   : > { %7217 = vmatprep.mubr.bf16.mxu0 %v13717_v26  ;;  %7667 = vmatprep.mubr.bf16.mxu1 %v13717_v26 }
 0x791   : > { %8765 = vmatprep.subr.bf16.mxu0 %v6359_v4 }
 0x792   : > { %v13837_v61 = vpop.f32.mrb[244].mxu0  ;;  %v13839_v41 = vpop.f32.mrb[244].mxu1 }
 0x793   : > { %v13841_v54 = vpop.f32.mrb[245].mxu0  ;;  %v13843_v63 = vpop.f32.mrb[245].mxu1 }
 0x794   : > { %v13845_v1 = vpop.f32.mrb[246].mxu0  ;;  %v13847_v51 = vpop.f32.mrb[246].mxu1 }
 0x795   : > { %v13853_v39 = vpop.f32.mrb[247].mxu0  ;;  %v13855_v24 = vpop.f32.mrb[247].mxu1 }
 0x797   : > { %7218 = vmatmul.mubr.bf16.gmra.mrb[96].mxu0 %v13715_v53  ;;  %7668 = vmatmul.mubr.bf16.gmra.mrb[96].mxu1 %v13715_v53 }
 0x798   : > { %7227 = vmatprep.mubr.bf16.mxu0 %v13735_v60  ;;  %7677 = vmatprep.mubr.bf16.mxu1 %v13735_v60  ;;  %v16270_v60 = vpack.c.bf16 %v13821_v28, %v13815_v21 }
 0x79a   : > { %v13865_v16 = vpop.f32.mrb[248].mxu0  ;;  %v13867_v29 = vpop.f32.mrb[248].mxu1 }
 0x79b   : > { %v6221_v22 = vpop.f32.mrb[249].mxu0  ;;  %v13869_v36 = vpop.f32.mrb[249].mxu1 }
 0x79c   : > { %v6223_v50 = vpop.f32.mrb[250].mxu0  ;;  %v13871_v12 = vpop.f32.mrb[250].mxu1 }
 0x79d   : > { %v6362_v58 = vpack.c.bf16 %v6223_v50, %v13865_v16  ;;  %v6225_v4 = vpop.f32.mrb[251].mxu0  ;;  %v13876_v14 = vpop.f32.mrb[251].mxu1 }
 0x79e   : > { %v6363_v3 = vpack.c.bf16 %v6225_v4, %v6221_v22 }
 0x79f   : > { %7228 = vmatmul.mubr.bf16.gmra.mrb[100].mxu0 %v13731_v7  ;;  %7678 = vmatmul.mubr.bf16.gmra.mrb[100].mxu1 %v13731_v7 }
 0x7a0   : > { %7237 = vmatprep.mubr.bf16.mxu0 %v13737_v27  ;;  %7687 = vmatprep.mubr.bf16.mxu1 %v13737_v27 }
 0x7a1   : > { %8878 = vmatprep.subr.bf16.mxu1 %v6363_v3 }
 0x7a2   : > { %v6229_v16 = vpop.f32.mrb[252].mxu0  ;;  %v13884_v50 = vpop.f32.mrb[252].mxu1 }
 0x7a3   : > { %v6231_v56 = vpop.f32.mrb[253].mxu0  ;;  %v13886_v11 = vpop.f32.mrb[253].mxu1 }
 0x7a4   : > { %v6233_v45 = vpop.f32.mrb[254].mxu0  ;;  %v13888_v22 = vpop.f32.mrb[254].mxu1 }
 0x7a5   : > { %v6364_v4 = vpack.c.bf16 %v6233_v45, %v6229_v16  ;;  %v6235_v23 = vpop.f32.mrb[255].mxu0  ;;  %v13892_v30 = vpop.f32.mrb[255].mxu1 }
 0x7a6   : > { %v6365_v2 = vpack.c.bf16 %v6235_v23, %v6231_v56 }
 0x7a7   : > { %7238 = vmatmul.mubr.bf16.gmra.mrb[104].mxu0 %v13733_v13  ;;  %7688 = vmatmul.mubr.bf16.gmra.mrb[104].mxu1 %v13733_v13 }
 0x7a8   : > { %7247 = vmatprep.mubr.bf16.mxu0 %v13749_v38  ;;  %7697 = vmatprep.mubr.bf16.mxu1 %v13749_v38 }
 0x7aa   : > { %v13900_v49 = vpop.f32.mrb[0].mxu0  ;;  %v13902_v45 = vpop.f32.mrb[0].mxu1 }
 0x7ab   : > { %16262 = vst [vmem:[#allocation32_spill] sm:$0xff] %v13900_v49  ;;  %16263 = vst [vmem:[#allocation33_spill] sm:$0xff] %v13902_v45  ;;  %v13904_v16 = vpop.f32.mrb[1].mxu0  ;;  %v13906_v44 = vpop.f32.mrb[1].mxu1 }
 0x7ac   : > { %16264 = vst [vmem:[#allocation69_spill] sm:$0xff] %v13904_v16  ;;  %16265 = vst [vmem:[#allocation62_spill] sm:$0xff] %v13906_v44  ;;  %v13908_v23 = vpop.f32.mrb[2].mxu0  ;;  %v13910_v56 = vpop.f32.mrb[2].mxu1  ;;  %v16271_v44 = vpack.c.bf16 %v13853_v39, %v13841_v54  ;;  %v16274_v54 = vpack.c.bf16 %v13876_v14, %v13869_v36  ;;  %v16277_v14 = vpack.c.bf16 %v13855_v24, %v13843_v63 }
 0x7ad   : > { %16266 = vst [vmem:[#allocation56_spill] sm:$0xff] %v13908_v23  ;;  %16267 = vst [vmem:[#allocation50_spill] sm:$0xff] %v13910_v56  ;;  %v13916_v27 = vpop.f32.mrb[3].mxu0  ;;  %v13918_v38 = vpop.f32.mrb[3].mxu1  ;;  %v16278_v36 = vpack.c.bf16 %v13892_v30, %v13886_v11 }
 0x7ae   : > { %16268 = vst [vmem:[#allocation42_spill] sm:$0xff] %v13918_v38 }
 0x7af   : > { %7248 = vmatmul.mubr.bf16.gmra.mrb[108].mxu0 %v13747_v9  ;;  %7698 = vmatmul.mubr.bf16.gmra.mrb[108].mxu1 %v13747_v9 }
 0x7b0   : > { %7997 = vmatprep.mubr.bf16.mxu0 %v13583_v48  ;;  %8447 = vmatprep.mubr.bf16.mxu1 %v13583_v48 }
 0x7b2   : > { %v13928_v3 = vpop.f32.mrb[4].mxu0  ;;  %v13930_v13 = vpop.f32.mrb[4].mxu1 }
 0x7b3   : > { %16269 = vst [vmem:[#allocation44_spill] sm:$0xff] %v13930_v13  ;;  %v13932_v45 = vpop.f32.mrb[5].mxu0  ;;  %v13934_v56 = vpop.f32.mrb[5].mxu1 }
 0x7b4   : > { %v13936_v7 = vpop.f32.mrb[6].mxu0  ;;  %v13938_v49 = vpop.f32.mrb[6].mxu1 }
 0x7b5   : > { %v13944_v38 = vpop.f32.mrb[7].mxu0  ;;  %v13946_v48 = vpop.f32.mrb[7].mxu1 }
 0x7b7   : > { %7998 = vmatmul.mubr.bf16.vlgmr.msra.gmra.mrb[112].mxu0 %v13581_v35  ;;  %8448 = vmatmul.mubr.bf16.vlgmr.msra.gmra.mrb[112].mxu1 %v13581_v35 }
 0x7b8   : > { %8766 = vmatpush1.bf16.msra.mxu0 %v16270_v60  ;;  %8879 = vmatpush1.bf16.msra.mxu1 %v6362_v58  ;;  %v16272_v60 = vpack.c.bf16 %v13845_v1, %v13837_v61 }
 0x7b9   : > { %8007 = vmatprep.mubr.bf16.mxu0 %v13601_v62  ;;  %8457 = vmatprep.mubr.bf16.mxu1 %v13601_v62 }
 0x7ba   : > { %8767 = vmatprep.subr.bf16.mxu0 %v16271_v44  ;;  %8880 = vmatprep.subr.bf16.mxu1 %v6365_v2  ;;  %v13962_v23 = vpop.f32.mrb[8].mxu0  ;;  %v13964_v16 = vpop.f32.mrb[8].mxu1  ;;  %v16273_v44 = vpack.c.bf16 %v13829_v8, %v13819_v46  ;;  %v16275_v46 = vpack.c.bf16 %v13823_v18, %v13817_v37  ;;  %v16276_v8 = vpack.c.bf16 %v13871_v12, %v13867_v29 }
 0x7bb   : > { %v13966_v13 = vpop.f32.mrb[9].mxu0  ;;  %v13968_v35 = vpop.f32.mrb[9].mxu1  ;;  %v16280_v12 = vpack.c.bf16 %v13847_v51, %v13839_v41 }
 0x7bc   : > { %8768 = vmatpush1.bf16.msra.mxu0 %v16272_v60  ;;  %8881 = vmatpush1.bf16.msra.mxu1 %v6364_v4  ;;  %v13973_v21 = vpop.f32.mrb[10].mxu0  ;;  %v13975_v62 = vpop.f32.mrb[10].mxu1 }
 0x7bd   : > { %8769 = vmatprep.subr.bf16.mxu0 %v16273_v44  ;;  %8882 = vmatprep.subr.bf16.mxu1 %v16274_v54  ;;  %v13987_v61 = vpop.f32.mrb[11].mxu0  ;;  %v13989_v1 = vpop.f32.mrb[11].mxu1 }
 0x7bf   : > { %8008 = vmatmul.mubr.bf16.gmra.mrb[116].mxu0 %v13597_v17  ;;  %8458 = vmatmul.mubr.bf16.gmra.mrb[116].mxu1 %v13597_v17 }
 0x7c0   : > { %8770 = vmatpush1.bf16.msra.mxu0 %v16275_v46  ;;  %8883 = vmatpush1.bf16.msra.mxu1 %v16276_v8 }
 0x7c1   : > { %8017 = vmatprep.mubr.bf16.mxu0 %v13603_v10  ;;  %8467 = vmatprep.mubr.bf16.mxu1 %v13603_v10  ;;  %v16281_v10 = vpack.c.bf16 %v13888_v22, %v13884_v50 }
 0x7c2   : > { %8771 = vmatprep.subr.bf16.mxu0 %v16277_v14  ;;  %8884 = vmatprep.subr.bf16.mxu1 %v16278_v36  ;;  %v14011_v17 = vpop.f32.mrb[12].mxu0  ;;  %v14013_v37 = vpop.f32.mrb[12].mxu1 }
 0x7c3   : > { %16279 = vst [vmem:[#allocation30_spill] sm:$0xff] %v14013_v37  ;;  %v14015_v18 = vpop.f32.mrb[13].mxu0  ;;  %v14017_v29 = vpop.f32.mrb[13].mxu1 }
 0x7c4   : > { %8772 = vmatpush1.bf16.msra.mxu0 %v16280_v12  ;;  %8885 = vmatpush1.bf16.msra.mxu1 %v16281_v10  ;;  %v14025_v63 = vpop.f32.mrb[14].mxu0  ;;  %v14027_v30 = vpop.f32.mrb[14].mxu1 }
 0x7c5   : > { %v14033_v4 = vpop.f32.mrb[15].mxu0  ;;  %v14035_v60 = vpop.f32.mrb[15].mxu1 }
 0x7c7   : > { %8018 = vmatmul.mubr.bf16.gmra.mrb[120].mxu0 %v13599_v0  ;;  %8468 = vmatmul.mubr.bf16.gmra.mrb[120].mxu1 %v13599_v0 }
 0x7c8   : > { %8027 = vmatprep.mubr.bf16.mxu0 %v13617_v25  ;;  %8477 = vmatprep.mubr.bf16.mxu1 %v13617_v25 }
 0x7ca   : > { %v14045_v50 = vpop.f32.mrb[16].mxu0  ;;  %v14047_v22 = vpop.f32.mrb[16].mxu1 }
 0x7cb   : > { %16282 = vst [vmem:[#allocation31_spill] sm:$0xff] %v14045_v50  ;;  %16283 = vst [vmem:[#allocation43_spill] sm:$0xff] %v14047_v22  ;;  %v14049_v44 = vpop.f32.mrb[17].mxu0  ;;  %v14051_v54 = vpop.f32.mrb[17].mxu1 }
 0x7cc   : > { %16284 = vst [vmem:[#allocation45_spill] sm:$0xff] %v14049_v44  ;;  %16285 = vst [vmem:[#allocation63_spill] sm:$0xff] %v14051_v54  ;;  %v14053_v46 = vpop.f32.mrb[18].mxu0  ;;  %v14055_v8 = vpop.f32.mrb[18].mxu1 }
 0x7cd   : > { %16286 = vst [vmem:[#allocation65_spill] sm:$0xff] %v14053_v46  ;;  %16287 = vst [vmem:[#allocation73_spill] sm:$0xff] %v14055_v8  ;;  %v14061_v36 = vpop.f32.mrb[19].mxu0  ;;  %v14063_v25 = vpop.f32.mrb[19].mxu1 }
 0x7ce   : > { %16288 = vst [vmem:[#allocation67_spill] sm:$0xff] %v14061_v36  ;;  %16289 = vst [vmem:[#allocation47_spill] sm:$0xff] %v14063_v25 }
 0x7cf   : > { %8028 = vmatmul.mubr.bf16.gmra.mrb[124].mxu0 %v13615_v47  ;;  %8478 = vmatmul.mubr.bf16.gmra.mrb[124].mxu1 %v13615_v47 }
 0x7d0   : > { %8037 = vmatprep.mubr.bf16.mxu0 %v13629_v20  ;;  %8487 = vmatprep.mubr.bf16.mxu1 %v13629_v20 }
 0x7d2   : > { %v14073_v14 = vpop.f32.mrb[20].mxu0  ;;  %v14075_v0 = vpop.f32.mrb[20].mxu1 }
 0x7d3   : > { %16290 = vst [vmem:[#allocation49_spill] sm:$0xff] %v14073_v14  ;;  %16291 = vst [vmem:[#allocation59_spill] sm:$0xff] %v14075_v0  ;;  %v14077_v24 = vpop.f32.mrb[21].mxu0  ;;  %v14079_v51 = vpop.f32.mrb[21].mxu1 }
 0x7d4   : > { %16292 = vst [vmem:[#allocation61_spill] sm:$0xff] %v14077_v24  ;;  %16293 = vst [vmem:[#allocation40_spill] sm:$0xff] %v14079_v51  ;;  %v14081_v12 = vpop.f32.mrb[22].mxu0  ;;  %v14083_v28 = vpop.f32.mrb[22].mxu1 }
 0x7d5   : > { %16294 = vst [vmem:[#allocation58_spill] sm:$0xff] %v14081_v12  ;;  %16295 = vst [vmem:[#allocation55_spill] sm:$0xff] %v14083_v28  ;;  %v14089_v58 = vpop.f32.mrb[23].mxu0  ;;  %v14091_v20 = vpop.f32.mrb[23].mxu1 }
 0x7d6   : > { %16296 = vst [vmem:[#allocation57_spill] sm:$0xff] %v14089_v58  ;;  %16297 = vst [vmem:[#allocation36_spill] sm:$0xff] %v14091_v20 }
 0x7d7   : > { %8038 = vmatmul.mubr.bf16.gmra.mrb[128].mxu0 %v13627_v5  ;;  %8488 = vmatmul.mubr.bf16.gmra.mrb[128].mxu1 %v13627_v5 }
 0x7d8   : > { %8047 = vmatprep.mubr.bf16.mxu0 %v13647_v42  ;;  %8497 = vmatprep.mubr.bf16.mxu1 %v13647_v42 }
 0x7da   : > { %v14101_v10 = vpop.f32.mrb[24].mxu0  ;;  %v14103_v47 = vpop.f32.mrb[24].mxu1 }
 0x7db   : > { %16298 = vst [vmem:[#allocation54_spill] sm:$0xff] %v14101_v10  ;;  %16299 = vst [vmem:[#allocation77_spill] sm:$0xff] %v14103_v47  ;;  %v14105_v2 = vpop.f32.mrb[25].mxu0  ;;  %v14107_v39 = vpop.f32.mrb[25].mxu1 }
 0x7dc   : > { %16300 = vst [vmem:[#allocation74_spill] sm:$0xff] %v14105_v2  ;;  %16301 = vst [vmem:[#allocation68_spill] sm:$0xff] %v14107_v39  ;;  %v14109_v11 = vpop.f32.mrb[26].mxu0  ;;  %v14111_v0 = vpop.f32.mrb[26].mxu1 }
 0x7dd   : > { %16302 = vst [vmem:[#allocation41_spill] sm:$0xff] %v14109_v11  ;;  %16303 = vst [vmem:[#allocation75_spill] sm:$0xff] %v14111_v0  ;;  %v14117_v28 = vpop.f32.mrb[27].mxu0  ;;  %v14119_v42 = vpop.f32.mrb[27].mxu1 }
 0x7de   : > { %16304 = vst [vmem:[#allocation70_spill] sm:$0xff] %v14117_v28  ;;  %16305 = vst [vmem:[#allocation39_spill] sm:$0xff] %v14119_v42 }
 0x7df   : > { %8048 = vmatmul.mubr.bf16.gmra.mrb[132].mxu0 %v13643_v59  ;;  %8498 = vmatmul.mubr.bf16.gmra.mrb[132].mxu1 %v13643_v59 }
 0x7e0   : > { %8057 = vmatprep.mubr.bf16.mxu0 %v13649_v52  ;;  %8507 = vmatprep.mubr.bf16.mxu1 %v13649_v52 }
 0x7e2   : > { %v14129_v41 = vpop.f32.mrb[28].mxu0  ;;  %v14131_v5 = vpop.f32.mrb[28].mxu1 }
 0x7e3   : > { %16306 = vst [vmem:[#allocation38_spill] sm:$0xff] %v14129_v41  ;;  %16307 = vst [vmem:[#allocation78_spill] sm:$0xff] %v14131_v5  ;;  %v14133_v47 = vpop.f32.mrb[29].mxu0  ;;  %v14135_v0 = vpop.f32.mrb[29].mxu1 }
 0x7e4   : > { %16308 = vst [vmem:[#allocation71_spill] sm:$0xff] %v14133_v47  ;;  %16309 = vst [vmem:[#allocation64_spill] sm:$0xff] %v14135_v0  ;;  %v14137_v51 = vpop.f32.mrb[30].mxu0  ;;  %v14139_v10 = vpop.f32.mrb[30].mxu1 }
 0x7e5   : > { %16310 = vst [vmem:[#allocation37_spill] sm:$0xff] %v14137_v51  ;;  %16311 = vst [vmem:[#allocation76_spill] sm:$0xff] %v14139_v10  ;;  %v14145_v39 = vpop.f32.mrb[31].mxu0  ;;  %v14147_v52 = vpop.f32.mrb[31].mxu1 }
 0x7e6   : > { %16312 = vst [vmem:[#allocation72_spill] sm:$0xff] %v14145_v39  ;;  %16313 = vst [vmem:[#allocation35_spill] sm:$0xff] %v14147_v52 }
 0x7e7   : > { %8058 = vmatmul.mubr.bf16.gmra.mrb[136].mxu0 %v13645_v31  ;;  %8508 = vmatmul.mubr.bf16.gmra.mrb[136].mxu1 %v13645_v31 }
 0x7e8   : > { %8067 = vmatprep.mubr.bf16.mxu0 %v13661_v6  ;;  %8517 = vmatprep.mubr.bf16.mxu1 %v13661_v6 }
 0x7ea   : > { %v14157_v20 = vpop.f32.mrb[32].mxu0  ;;  %v14159_v59 = vpop.f32.mrb[32].mxu1 }
 0x7eb   : > { %16314 = vst [vmem:[#allocation34_spill] sm:$0xff] %v14157_v20  ;;  %16315 = vst [vmem:[#allocation85_spill] sm:$0xff] %v14159_v59  ;;  %v14161_v5 = vpop.f32.mrb[33].mxu0  ;;  %v14163_v10 = vpop.f32.mrb[33].mxu1 }
 0x7ec   : > { %16316 = vst [vmem:[#allocation81_spill] sm:$0xff] %v14161_v5  ;;  %16317 = vst [vmem:[#allocation83_spill] sm:$0xff] %v14163_v10  ;;  %v14165_v42 = vpop.f32.mrb[34].mxu0  ;;  %v14167_v41 = vpop.f32.mrb[34].mxu1 }
 0x7ed   : > { %16318 = vst [vmem:[#allocation79_spill] sm:$0xff] %v14165_v42  ;;  %16319 = vst [vmem:[#allocation86_spill] sm:$0xff] %v14167_v41  ;;  %v14173_v0 = vpop.f32.mrb[35].mxu0  ;;  %v14175_v6 = vpop.f32.mrb[35].mxu1 }
 0x7ee   : > { %16320 = vst [vmem:[#allocation82_spill] sm:$0xff] %v14173_v0  ;;  %16321 = vst [vmem:[#allocation84_spill] sm:$0xff] %v14175_v6 }
 0x7ef   : > { %8068 = vmatmul.mubr.bf16.gmra.mrb[140].mxu0 %v13659_v43  ;;  %8518 = vmatmul.mubr.bf16.gmra.mrb[140].mxu1 %v13659_v43 }
 0x7f0   : > { %8077 = vmatprep.mubr.bf16.mxu0 %v13673_v19  ;;  %8527 = vmatprep.mubr.bf16.mxu1 %v13673_v19 }
 0x7f2   : > { %v14185_v11 = vpop.f32.mrb[36].mxu0  ;;  %v14187_v31 = vpop.f32.mrb[36].mxu1 }
 0x7f3   : > { %16322 = vst [vmem:[#allocation80_spill] sm:$0xff] %v14185_v11  ;;  %16323 = vst [vmem:[#allocation87_spill] sm:$0xff] %v14187_v31  ;;  %v14189_v59 = vpop.f32.mrb[37].mxu0  ;;  %v14191_v41 = vpop.f32.mrb[37].mxu1 }
 0x7f4   : > { %16324 = vst [vmem:[#allocation88_spill] sm:$0xff] %v14189_v59  ;;  %16325 = vst [vmem:[#allocation89_spill] sm:$0xff] %v14191_v41  ;;  %v14193_v52 = vpop.f32.mrb[38].mxu0  ;;  %v14195_v20 = vpop.f32.mrb[38].mxu1 }
 0x7f5   : > { %16326 = vst [vmem:[#allocation90_spill] sm:$0xff] %v14193_v52  ;;  %16327 = vst [vmem:[#allocation91_spill] sm:$0xff] %v14195_v20  ;;  %v14201_v10 = vpop.f32.mrb[39].mxu0  ;;  %v14203_v19 = vpop.f32.mrb[39].mxu1 }
 0x7f6   : > { %16328 = vst [vmem:[#allocation92_spill] sm:$0xff] %v14201_v10  ;;  %16329 = vst [vmem:[#allocation93_spill] sm:$0xff] %v14203_v19 }
 0x7f7   : > { %8078 = vmatmul.mubr.bf16.gmra.mrb[144].mxu0 %v13671_v55  ;;  %8528 = vmatmul.mubr.bf16.gmra.mrb[144].mxu1 %v13671_v55 }
 0x7f8   : > { %8087 = vmatprep.mubr.bf16.mxu0 %v13691_v34  ;;  %8537 = vmatprep.mubr.bf16.mxu1 %v13691_v34 }
 0x7fa   : > { %v14213_v51 = vpop.f32.mrb[40].mxu0  ;;  %v14215_v43 = vpop.f32.mrb[40].mxu1 }
 0x7fb   : > { %16330 = vst [vmem:[#allocation94_spill] sm:$0xff] %v14213_v51  ;;  %16331 = vst [vmem:[#allocation95_spill] sm:$0xff] %v14215_v43  ;;  %v14217_v31 = vpop.f32.mrb[41].mxu0  ;;  %v14219_v20 = vpop.f32.mrb[41].mxu1 }
 0x7fc   : > { %16332 = vst [vmem:[#allocation96_spill] sm:$0xff] %v14217_v31  ;;  %16333 = vst [vmem:[#allocation97_spill] sm:$0xff] %v14219_v20  ;;  %v14221_v6 = vpop.f32.mrb[42].mxu0  ;;  %v14223_v11 = vpop.f32.mrb[42].mxu1 }
 0x7fd   : > { %16334 = vst [vmem:[#allocation98_spill] sm:$0xff] %v14221_v6  ;;  %16335 = vst [vmem:[#allocation99_spill] sm:$0xff] %v14223_v11  ;;  %v14229_v41 = vpop.f32.mrb[43].mxu0  ;;  %v14231_v34 = vpop.f32.mrb[43].mxu1 }
 0x7fe   : > { %16336 = vst [vmem:[#allocation100_spill] sm:$0xff] %v14229_v41  ;;  %16337 = vst [vmem:[#allocation101_spill] sm:$0xff] %v14231_v34 }
 0x7ff   : > { %8088 = vmatmul.mubr.bf16.gmra.mrb[148].mxu0 %v13687_v40  ;;  %8538 = vmatmul.mubr.bf16.gmra.mrb[148].mxu1 %v13687_v40 }
 0x800   : > { %8097 = vmatprep.mubr.bf16.mxu0 %v13693_v15  ;;  %8547 = vmatprep.mubr.bf16.mxu1 %v13693_v15 }
 0x802   : > { %v14241_v42 = vpop.f32.mrb[44].mxu0  ;;  %v14243_v55 = vpop.f32.mrb[44].mxu1 }
 0x803   : > { %16338 = vst [vmem:[#allocation102_spill] sm:$0xff] %v14241_v42  ;;  %16339 = vst [vmem:[#allocation103_spill] sm:$0xff] %v14243_v55  ;;  %v14245_v43 = vpop.f32.mrb[45].mxu0  ;;  %v14247_v11 = vpop.f32.mrb[45].mxu1 }
 0x804   : > { %16340 = vst [vmem:[#allocation104_spill] sm:$0xff] %v14245_v43  ;;  %16341 = vst [vmem:[#allocation105_spill] sm:$0xff] %v14247_v11  ;;  %v14249_v19 = vpop.f32.mrb[46].mxu0  ;;  %v14251_v51 = vpop.f32.mrb[46].mxu1 }
 0x805   : > { %16342 = vst [vmem:[#allocation106_spill] sm:$0xff] %v14249_v19  ;;  %16343 = vst [vmem:[#allocation107_spill] sm:$0xff] %v14251_v51  ;;  %v14257_v20 = vpop.f32.mrb[47].mxu0  ;;  %v14259_v15 = vpop.f32.mrb[47].mxu1 }
 0x806   : > { %16344 = vst [vmem:[#allocation108_spill] sm:$0xff] %v14257_v20  ;;  %16345 = vst [vmem:[#allocation109_spill] sm:$0xff] %v14259_v15 }
 0x807   : > { %8098 = vmatmul.mubr.bf16.gmra.mrb[152].mxu0 %v13689_v33  ;;  %8548 = vmatmul.mubr.bf16.gmra.mrb[152].mxu1 %v13689_v33 }
 0x808   : > { %8107 = vmatprep.mubr.bf16.mxu0 %v13705_v57  ;;  %8557 = vmatprep.mubr.bf16.mxu1 %v13705_v57 }
 0x80a   : > { %v7099_v52 = vpop.f32.mrb[48].mxu0  ;;  %v7549_v40 = vpop.f32.mrb[48].mxu1 }
 0x80b   : > { %v7101_v55 = vpop.f32.mrb[49].mxu0  ;;  %v7551_v51 = vpop.f32.mrb[49].mxu1 }
 0x80c   : > { %v7103_v42 = vpop.f32.mrb[50].mxu0  ;;  %v7553_v19 = vpop.f32.mrb[50].mxu1 }
 0x80d   : > { %v7258_v31 = vpack.c.bf16 %v7103_v42, %v7099_v52  ;;  %v7708_v41 = vpack.c.bf16 %v7553_v19, %v7549_v40  ;;  %v7105_v34 = vpop.f32.mrb[51].mxu0  ;;  %v7555_v43 = vpop.f32.mrb[51].mxu1 }
 0x80e   : > { %v7259_v20 = vpack.c.bf16 %v7105_v34, %v7101_v55  ;;  %v7709_v6 = vpack.c.bf16 %v7555_v43, %v7551_v51 }
 0x80f   : > { %8108 = vmatmul.mubr.bf16.gmra.mrb[156].mxu0 %v13703_v32  ;;  %8558 = vmatmul.mubr.bf16.gmra.mrb[156].mxu1 %v13703_v32  ;;  %v16346_v32 = vld [vmem:[#allocation52_spill] sm:$0xff] }
 0x810   : > { %8117 = vmatprep.mubr.bf16.mxu0 %v13717_v26  ;;  %8567 = vmatprep.mubr.bf16.mxu1 %v13717_v26 }
 0x811   : > { %8773 = vmatprep.subr.bf16.mxu0 %v7259_v20 }
 0x812   : > { %8774 = vmatpush1.bf16.msra.mxu0 %v7258_v31  ;;  %v7109_v33 = vpop.f32.mrb[52].mxu0  ;;  %v7559_v57 = vpop.f32.mrb[52].mxu1 }
 0x813   : > { %v7111_v11 = vpop.f32.mrb[53].mxu0  ;;  %v7561_v15 = vpop.f32.mrb[53].mxu1 }
 0x814   : > { %v7113_v42 = vpop.f32.mrb[54].mxu0  ;;  %v7563_v52 = vpop.f32.mrb[54].mxu1 }
 0x815   : > { %v7260_v19 = vpack.c.bf16 %v7113_v42, %v7109_v33  ;;  %v7710_v40 = vpack.c.bf16 %v7563_v52, %v7559_v57  ;;  %v7115_v55 = vpop.f32.mrb[55].mxu0  ;;  %v7565_v51 = vpop.f32.mrb[55].mxu1 }
 0x816   : > { %v7261_v43 = vpack.c.bf16 %v7115_v55, %v7111_v11  ;;  %v7711_v34 = vpack.c.bf16 %v7565_v51, %v7561_v15 }
 0x817   : > { %8118 = vmatmul.mubr.bf16.gmra.mrb[160].mxu0 %v13715_v53  ;;  %8568 = vmatmul.mubr.bf16.gmra.mrb[160].mxu1 %v13715_v53  ;;  %v16347_v53 = vld [vmem:[#allocation66_spill] sm:$0xff] }
 0x818   : > { %8127 = vmatprep.mubr.bf16.mxu0 %v16346_v32  ;;  %8577 = vmatprep.mubr.bf16.mxu1 %v16346_v32 }
 0x819   : > { %8775 = vmatprep.subr.bf16.mxu0 %v7261_v43 }
 0x81a   : > { %8776 = vmatpush1.bf16.msra.mxu0 %v7260_v19  ;;  %v7119_v26 = vpop.f32.mrb[56].mxu0  ;;  %v7569_v20 = vpop.f32.mrb[56].mxu1  ;;  %v16348_v19 = vld [vmem:[#allocation46_spill] sm:$0xff] }
 0x81b   : > { %8777 = vmatprep.subr.bf16.mxu0 %v7709_v6  ;;  %v7121_v31 = vpop.f32.mrb[57].mxu0  ;;  %v7571_v33 = vpop.f32.mrb[57].mxu1 }
 0x81c   : > { %v7123_v57 = vpop.f32.mrb[58].mxu0  ;;  %v7573_v42 = vpop.f32.mrb[58].mxu1 }
 0x81d   : > { %v7262_v52 = vpack.c.bf16 %v7123_v57, %v7119_v26  ;;  %v7712_v11 = vpack.c.bf16 %v7573_v42, %v7569_v20  ;;  %v7125_v15 = vpop.f32.mrb[59].mxu0  ;;  %v7575_v55 = vpop.f32.mrb[59].mxu1 }
 0x81e   : > { %v7263_v51 = vpack.c.bf16 %v7125_v15, %v7121_v31  ;;  %v7713_v59 = vpack.c.bf16 %v7575_v55, %v7571_v33  ;;  %8778 = vmatpush1.bf16.msra.mxu0 %v7708_v41  ;;  %v16349_v55 = vld [vmem:[#allocation60_spill] sm:$0xff] }
 0x81f   : > { %8779 = vmatprep.subr.bf16.mxu0 %v7711_v34  ;;  %8128 = vmatmul.mubr.bf16.gmra.mrb[164].mxu0 %v16347_v53 }
 0x820   : > { %8578 = vmatmul.mubr.bf16.gmra.mrb[164].mxu1 %v16347_v53  ;;  %8137 = vmatprep.mubr.bf16.mxu0 %v16348_v19  ;;  %v16350_v53 = vld [vmem:[#allocation48_spill] sm:$0xff] }
 0x821   : > { %8587 = vmatprep.mubr.bf16.mxu1 %v16348_v19  ;;  %8886 = vmatprep.subr.bf16.mxu1 %v7263_v51 }
 0x822   : > { %8780 = vmatpush1.bf16.msra.mxu0 %v7710_v40  ;;  %8887 = vmatpush1.bf16.msra.mxu1 %v7262_v52  ;;  %v7129_v6 = vpop.f32.mrb[60].mxu0  ;;  %v7579_v43 = vpop.f32.mrb[60].mxu1 }
 0x823   : > { %v7131_v32 = vpop.f32.mrb[61].mxu0  ;;  %v7581_v26 = vpop.f32.mrb[61].mxu1 }
 0x824   : > { %v7133_v20 = vpop.f32.mrb[62].mxu0  ;;  %v7583_v31 = vpop.f32.mrb[62].mxu1 }
 0x825   : > { %v7264_v33 = vpack.c.bf16 %v7133_v20, %v7129_v6  ;;  %v7714_v41 = vpack.c.bf16 %v7583_v31, %v7579_v43  ;;  %v7135_v34 = vpop.f32.mrb[63].mxu0  ;;  %v7585_v57 = vpop.f32.mrb[63].mxu1 }
 0x826   : > { %v7265_v42 = vpack.c.bf16 %v7135_v34, %v7131_v32  ;;  %v7715_v15 = vpack.c.bf16 %v7585_v57, %v7581_v26  ;;  %v14297_v32 = vld [vmem:[#allocation21 + $0x4] ss:$8 sps:$4 sm:$0xff]  }
 0x827   : > { %8138 = vmatmul.mubr.bf16.gmra.mrb[168].mxu0 %v16349_v55 }
 0x828   : > { %8588 = vmatmul.mubr.bf16.gmra.mrb[168].mxu1 %v16349_v55  ;;  %8147 = vmatprep.mubr.bf16.mxu0 %v16350_v53 }
 0x829   : > { %8597 = vmatprep.mubr.bf16.mxu1 %v16350_v53  ;;  %8888 = vmatprep.subr.bf16.mxu1 %v7265_v42 }
 0x82a   : > { %8889 = vmatpush1.bf16.msra.mxu1 %v7264_v33  ;;  %v14285_v40 = vpop.f32.mrb[64].mxu0  ;;  %v14287_v52 = vpop.f32.mrb[64].mxu1 }
 0x82b   : > { %8890 = vmatprep.subr.bf16.mxu1 %v7713_v59  ;;  %v14289_v51 = vpop.f32.mrb[65].mxu0  ;;  %v14291_v19 = vpop.f32.mrb[65].mxu1 }
 0x82c   : > { %v14293_v6 = vpop.f32.mrb[66].mxu0  ;;  %v14295_v43 = vpop.f32.mrb[66].mxu1 }
 0x82d   : > { %v14303_v31 = vpop.f32.mrb[67].mxu0  ;;  %v14305_v33 = vpop.f32.mrb[67].mxu1 }
 0x82e   : > { %8891 = vmatpush1.bf16.msra.mxu1 %v7712_v11 }
 0x82f   : > { %8892 = vmatprep.subr.bf16.mxu1 %v7715_v15  ;;  %8148 = vmatmul.mubr.bf16.gmra.mrb[172].mxu0 %v13747_v9 }
 0x830   : > { %8598 = vmatmul.mubr.bf16.gmra.mrb[172].mxu1 %v13747_v9  ;;  %10466 = vmatprep.mubr.msk.bf16.mxu0 %vm8752_vm2, %v14297_v32 }
 0x831   : > { %10470 = vmatprep.mubr.msk.bf16.mxu1 %vm8752_vm2, %v14297_v32 }
 0x832   : > { %8893 = vmatpush1.bf16.msra.mxu1 %v7714_v41  ;;  %v14317_v57 = vpop.f32.mrb[68].mxu0  ;;  %v14319_v42 = vpop.f32.mrb[68].mxu1 }
 0x833   : > { %v14321_v55 = vpop.f32.mrb[69].mxu0  ;;  %v14323_v53 = vpop.f32.mrb[69].mxu1 }
 0x834   : > { %v14325_v11 = vpop.f32.mrb[70].mxu0  ;;  %v14327_v15 = vpop.f32.mrb[70].mxu1 }
 0x835   : > { %v14333_v34 = vpop.f32.mrb[71].mxu0  ;;  %v14335_v41 = vpop.f32.mrb[71].mxu1 }
 0x83a   : > { %v14341_v10 = vpop.f32.mrb[72].mxu0  ;;  %v14343_v5 = vpop.f32.mrb[72].mxu1 }
 0x83b   : > { %16351 = vst [vmem:[#allocation52_spill] sm:$0xff] %v14341_v10  ;;  %16352 = vst [vmem:[#allocation66_spill] sm:$0xff] %v14343_v5  ;;  %v14345_v0 = vpop.f32.mrb[73].mxu0  ;;  %v14347_v9 = vpop.f32.mrb[73].mxu1 }
 0x83c   : > { %16353 = vst [vmem:[#allocation46_spill] sm:$0xff] %v14345_v0  ;;  %16354 = vst [vmem:[#allocation60_spill] sm:$0xff] %v14347_v9  ;;  %v14349_v47 = vpop.f32.mrb[74].mxu0  ;;  %v14351_v20 = vpop.f32.mrb[74].mxu1 }
 0x83d   : > { %16355 = vst [vmem:[#allocation48_spill] sm:$0xff] %v14349_v47  ;;  %16356 = vst [vmem:[#allocation110_spill] sm:$0xff] %v14351_v20  ;;  %v14357_v2 = vpop.f32.mrb[75].mxu0  ;;  %v14359_v59 = vpop.f32.mrb[75].mxu1 }
 0x83e   : > { %16357 = vst [vmem:[#allocation111_spill] sm:$0xff] %v14357_v2  ;;  %16358 = vst [vmem:[#allocation112_spill] sm:$0xff] %v14359_v59 }
 0x842   : > { %v14365_v8 = vpop.f32.mrb[76].mxu0  ;;  %v14367_v54 = vpop.f32.mrb[76].mxu1 }
 0x843   : > { %16359 = vst [vmem:[#allocation113_spill] sm:$0xff] %v14365_v8  ;;  %16360 = vst [vmem:[#allocation114_spill] sm:$0xff] %v14367_v54  ;;  %v14369_v25 = vpop.f32.mrb[77].mxu0  ;;  %v14371_v39 = vpop.f32.mrb[77].mxu1 }
 0x844   : > { %16361 = vst [vmem:[#allocation115_spill] sm:$0xff] %v14369_v25  ;;  %16362 = vst [vmem:[#allocation116_spill] sm:$0xff] %v14371_v39  ;;  %v14373_v14 = vpop.f32.mrb[78].mxu0  ;;  %v14375_v26 = vpop.f32.mrb[78].mxu1 }
 0x845   : > { %16363 = vst [vmem:[#allocation117_spill] sm:$0xff] %v14373_v14  ;;  %16364 = vst [vmem:[#allocation118_spill] sm:$0xff] %v14375_v26  ;;  %v14381_v24 = vpop.f32.mrb[79].mxu0  ;;  %v14383_v22 = vpop.f32.mrb[79].mxu1 }
 0x846   : > { %16365 = vst [vmem:[#allocation119_spill] sm:$0xff] %v14381_v24  ;;  %16366 = vst [vmem:[#allocation120_spill] sm:$0xff] %v14383_v22 }
 0x84a   : > { %v14389_v46 = vpop.f32.mrb[80].mxu0  ;;  %v14391_v44 = vpop.f32.mrb[80].mxu1 }
 0x84b   : > { %16367 = vst [vmem:[#allocation121_spill] sm:$0xff] %v14389_v46  ;;  %16368 = vst [vmem:[#allocation122_spill] sm:$0xff] %v14391_v44  ;;  %v14393_v36 = vpop.f32.mrb[81].mxu0  ;;  %v14395_v12 = vpop.f32.mrb[81].mxu1 }
 0x84c   : > { %16369 = vst [vmem:[#allocation123_spill] sm:$0xff] %v14393_v36  ;;  %16370 = vst [vmem:[#allocation124_spill] sm:$0xff] %v14395_v12  ;;  %v14397_v5 = vpop.f32.mrb[82].mxu0  ;;  %v14399_v28 = vpop.f32.mrb[82].mxu1 }
 0x84d   : > { %16371 = vst [vmem:[#allocation125_spill] sm:$0xff] %v14397_v5  ;;  %16372 = vst [vmem:[#allocation126_spill] sm:$0xff] %v14399_v28  ;;  %v14405_v26 = vpop.f32.mrb[83].mxu0  ;;  %v14407_v50 = vpop.f32.mrb[83].mxu1 }
 0x84e   : > { %16373 = vst [vmem:[#allocation127_spill] sm:$0xff] %v14405_v26  ;;  %16374 = vst [vmem:[#allocation128_spill] sm:$0xff] %v14407_v50 }
 0x852   : > { %v14413_v20 = vpop.f32.mrb[84].mxu0  ;;  %v14415_v9 = vpop.f32.mrb[84].mxu1 }
 0x853   : > { %16375 = vst [vmem:[#allocation129_spill] sm:$0xff] %v14413_v20  ;;  %16376 = vst [vmem:[#allocation130_spill] sm:$0xff] %v14415_v9  ;;  %v14417_v59 = vpop.f32.mrb[85].mxu0  ;;  %v14419_v54 = vpop.f32.mrb[85].mxu1 }
 0x854   : > { %16377 = vst [vmem:[#allocation131_spill] sm:$0xff] %v14417_v59  ;;  %16378 = vst [vmem:[#allocation132_spill] sm:$0xff] %v14419_v54  ;;  %v14421_v46 = vpop.f32.mrb[86].mxu0  ;;  %v14423_v58 = vpop.f32.mrb[86].mxu1 }
 0x855   : > { %16379 = vst [vmem:[#allocation133_spill] sm:$0xff] %v14421_v46  ;;  %16380 = vst [vmem:[#allocation134_spill] sm:$0xff] %v14423_v58  ;;  %v14429_v28 = vpop.f32.mrb[87].mxu0  ;;  %v14431_v22 = vpop.f32.mrb[87].mxu1 }
 0x856   : > { %16381 = vst [vmem:[#allocation135_spill] sm:$0xff] %v14429_v28  ;;  %16382 = vst [vmem:[#allocation136_spill] sm:$0xff] %v14431_v22 }
 0x85a   : > { %v14437_v5 = vpop.f32.mrb[88].mxu0  ;;  %v14439_v36 = vpop.f32.mrb[88].mxu1 }
 0x85b   : > { %16383 = vst [vmem:[#allocation137_spill] sm:$0xff] %v14437_v5  ;;  %16384 = vst [vmem:[#allocation138_spill] sm:$0xff] %v14439_v36  ;;  %v14441_v26 = vpop.f32.mrb[89].mxu0  ;;  %v14443_v44 = vpop.f32.mrb[89].mxu1 }
 0x85c   : > { %16385 = vst [vmem:[#allocation139_spill] sm:$0xff] %v14441_v26  ;;  %16386 = vst [vmem:[#allocation140_spill] sm:$0xff] %v14443_v44  ;;  %v14445_v20 = vpop.f32.mrb[90].mxu0  ;;  %v14447_v39 = vpop.f32.mrb[90].mxu1 }
 0x85d   : > { %16387 = vst [vmem:[#allocation141_spill] sm:$0xff] %v14445_v20  ;;  %16388 = vst [vmem:[#allocation142_spill] sm:$0xff] %v14447_v39  ;;  %v14453_v58 = vpop.f32.mrb[91].mxu0  ;;  %v14455_v50 = vpop.f32.mrb[91].mxu1 }
 0x85e   : > { %16389 = vst [vmem:[#allocation143_spill] sm:$0xff] %v14453_v58  ;;  %16390 = vst [vmem:[#allocation144_spill] sm:$0xff] %v14455_v50 }
 0x862   : > { %v14461_v46 = vpop.f32.mrb[92].mxu0  ;;  %v14463_v59 = vpop.f32.mrb[92].mxu1 }
 0x863   : > { %16391 = vst [vmem:[#allocation145_spill] sm:$0xff] %v14461_v46  ;;  %16392 = vst [vmem:[#allocation146_spill] sm:$0xff] %v14463_v59  ;;  %v14465_v28 = vpop.f32.mrb[93].mxu0  ;;  %v14467_v9 = vpop.f32.mrb[93].mxu1 }
 0x864   : > { %16393 = vst [vmem:[#allocation147_spill] sm:$0xff] %v14465_v28  ;;  %16394 = vst [vmem:[#allocation148_spill] sm:$0xff] %v14467_v9  ;;  %v14469_v5 = vpop.f32.mrb[94].mxu0  ;;  %v14471_v12 = vpop.f32.mrb[94].mxu1 }
 0x865   : > { %16395 = vst [vmem:[#allocation149_spill] sm:$0xff] %v14469_v5  ;;  %16396 = vst [vmem:[#allocation150_spill] sm:$0xff] %v14471_v12  ;;  %v14477_v39 = vpop.f32.mrb[95].mxu0  ;;  %v14479_v22 = vpop.f32.mrb[95].mxu1 }
 0x866   : > { %16397 = vst [vmem:[#allocation151_spill] sm:$0xff] %v14477_v39  ;;  %16398 = vst [vmem:[#allocation152_spill] sm:$0xff] %v14479_v22 }
 0x86a   : > { %v14485_v20 = vpop.f32.mrb[96].mxu0  ;;  %v14487_v26 = vpop.f32.mrb[96].mxu1 }
 0x86b   : > { %16399 = vst [vmem:[#allocation153_spill] sm:$0xff] %v14485_v20  ;;  %16400 = vst [vmem:[#allocation154_spill] sm:$0xff] %v14487_v26  ;;  %v14489_v58 = vpop.f32.mrb[97].mxu0  ;;  %v14491_v36 = vpop.f32.mrb[97].mxu1 }
 0x86c   : > { %16401 = vst [vmem:[#allocation155_spill] sm:$0xff] %v14489_v58  ;;  %16402 = vst [vmem:[#allocation156_spill] sm:$0xff] %v14491_v36  ;;  %v14493_v46 = vpop.f32.mrb[98].mxu0  ;;  %v14495_v54 = vpop.f32.mrb[98].mxu1 }
 0x86d   : > { %16403 = vst [vmem:[#allocation157_spill] sm:$0xff] %v14493_v46  ;;  %16404 = vst [vmem:[#allocation158_spill] sm:$0xff] %v14495_v54  ;;  %v14501_v12 = vpop.f32.mrb[99].mxu0  ;;  %v14503_v50 = vpop.f32.mrb[99].mxu1 }
 0x86e   : > { %16405 = vst [vmem:[#allocation159_spill] sm:$0xff] %v14501_v12  ;;  %16406 = vst [vmem:[#allocation160_spill] sm:$0xff] %v14503_v50 }
 0x872   : > { %v14509_v5 = vpop.f32.mrb[100].mxu0  ;;  %v14511_v28 = vpop.f32.mrb[100].mxu1 }
 0x873   : > { %16407 = vst [vmem:[#allocation161_spill] sm:$0xff] %v14509_v5  ;;  %16408 = vst [vmem:[#allocation162_spill] sm:$0xff] %v14511_v28  ;;  %v14513_v39 = vpop.f32.mrb[101].mxu0  ;;  %v14515_v59 = vpop.f32.mrb[101].mxu1 }
 0x874   : > { %16409 = vst [vmem:[#allocation163_spill] sm:$0xff] %v14513_v39  ;;  %16410 = vst [vmem:[#allocation164_spill] sm:$0xff] %v14515_v59  ;;  %v14517_v20 = vpop.f32.mrb[102].mxu0  ;;  %v14519_v44 = vpop.f32.mrb[102].mxu1 }
 0x875   : > { %16411 = vst [vmem:[#allocation165_spill] sm:$0xff] %v14517_v20  ;;  %16412 = vst [vmem:[#allocation166_spill] sm:$0xff] %v14519_v44  ;;  %v14525_v54 = vpop.f32.mrb[103].mxu0  ;;  %v14527_v22 = vpop.f32.mrb[103].mxu1 }
 0x876   : > { %16413 = vst [vmem:[#allocation167_spill] sm:$0xff] %v14525_v54  ;;  %16414 = vst [vmem:[#allocation168_spill] sm:$0xff] %v14527_v22 }
 0x87a   : > { %v14533_v46 = vpop.f32.mrb[104].mxu0  ;;  %v14535_v58 = vpop.f32.mrb[104].mxu1 }
 0x87b   : > { %16415 = vst [vmem:[#allocation169_spill] sm:$0xff] %v14533_v46  ;;  %16416 = vst [vmem:[#allocation170_spill] sm:$0xff] %v14535_v58  ;;  %v14537_v12 = vpop.f32.mrb[105].mxu0  ;;  %v14539_v26 = vpop.f32.mrb[105].mxu1 }
 0x87c   : > { %16417 = vst [vmem:[#allocation171_spill] sm:$0xff] %v14537_v12  ;;  %16418 = vst [vmem:[#allocation172_spill] sm:$0xff] %v14539_v26  ;;  %v14541_v5 = vpop.f32.mrb[106].mxu0  ;;  %v14543_v9 = vpop.f32.mrb[106].mxu1 }
 0x87d   : > { %16419 = vst [vmem:[#allocation173_spill] sm:$0xff] %v14541_v5  ;;  %16420 = vst [vmem:[#allocation174_spill] sm:$0xff] %v14543_v9  ;;  %v14549_v44 = vpop.f32.mrb[107].mxu0  ;;  %v14551_v50 = vpop.f32.mrb[107].mxu1 }
 0x87e   : > { %16421 = vst [vmem:[#allocation175_spill] sm:$0xff] %v14549_v44  ;;  %16422 = vst [vmem:[#allocation176_spill] sm:$0xff] %v14551_v50 }
 0x882   : > { %v14557_v20 = vpop.f32.mrb[108].mxu0  ;;  %v14559_v39 = vpop.f32.mrb[108].mxu1 }
 0x883   : > { %16423 = vst [vmem:[#allocation177_spill] sm:$0xff] %v14557_v20  ;;  %16424 = vst [vmem:[#allocation178_spill] sm:$0xff] %v14559_v39  ;;  %v14561_v54 = vpop.f32.mrb[109].mxu0  ;;  %v14563_v28 = vpop.f32.mrb[109].mxu1 }
 0x884   : > { %16425 = vst [vmem:[#allocation179_spill] sm:$0xff] %v14561_v54  ;;  %16426 = vst [vmem:[#allocation180_spill] sm:$0xff] %v14563_v28  ;;  %v14565_v46 = vpop.f32.mrb[110].mxu0  ;;  %v14567_v36 = vpop.f32.mrb[110].mxu1 }
 0x885   : > { %16427 = vst [vmem:[#allocation181_spill] sm:$0xff] %v14565_v46  ;;  %16428 = vst [vmem:[#allocation182_spill] sm:$0xff] %v14567_v36  ;;  %v14573_v9 = vpop.f32.mrb[111].mxu0  ;;  %v14575_v22 = vpop.f32.mrb[111].mxu1 }
 0x886   : > { %16429 = vst [vmem:[#allocation183_spill] sm:$0xff] %v14573_v9  ;;  %16430 = vst [vmem:[#allocation184_spill] sm:$0xff] %v14575_v22 }
 0x88a   : > { %v7999_v5 = vpop.f32.mrb[112].mxu0  ;;  %v8449_v12 = vpop.f32.mrb[112].mxu1 }
 0x88b   : > { %v8001_v44 = vpop.f32.mrb[113].mxu0  ;;  %v8451_v8 = vpop.f32.mrb[113].mxu1 }
 0x88c   : > { %v8003_v14 = vpop.f32.mrb[114].mxu0  ;;  %v8453_v25 = vpop.f32.mrb[114].mxu1 }
 0x88d   : > { %v8158_v58 = vpack.c.bf16 %v8003_v14, %v7999_v5  ;;  %v8608_v20 = vpack.c.bf16 %v8453_v25, %v8449_v12  ;;  %v8005_v46 = vpop.f32.mrb[115].mxu0  ;;  %v8455_v59 = vpop.f32.mrb[115].mxu1 }
 0x88e   : > { %v8159_v39 = vpack.c.bf16 %v8005_v46, %v8001_v44  ;;  %v8609_v36 = vpack.c.bf16 %v8455_v59, %v8451_v8 }
 0x890   : > { %8781 = vmatprep.subr.bf16.mxu0 %v8159_v39 }
 0x891   : > { %8782 = vmatpush1.bf16.msra.mxu0 %v8158_v58 }
 0x892   : > { %v8009_v24 = vpop.f32.mrb[116].mxu0  ;;  %v8459_v10 = vpop.f32.mrb[116].mxu1 }
 0x893   : > { %v8011_v26 = vpop.f32.mrb[117].mxu0  ;;  %v8461_v54 = vpop.f32.mrb[117].mxu1 }
 0x894   : > { %v8013_v9 = vpop.f32.mrb[118].mxu0  ;;  %v8463_v50 = vpop.f32.mrb[118].mxu1 }
 0x895   : > { %v8160_v28 = vpack.c.bf16 %v8013_v9, %v8009_v24  ;;  %v8610_v22 = vpack.c.bf16 %v8463_v50, %v8459_v10  ;;  %v8015_v47 = vpop.f32.mrb[119].mxu0  ;;  %v8465_v0 = vpop.f32.mrb[119].mxu1  ;;  %v14581_v10 = vld [vmem:[#allocation21] ss:$8 sps:$4 sm:$0xff]  }
 0x896   : > { %v8161_v2 = vpack.c.bf16 %v8015_v47, %v8011_v26  ;;  %v8611_v37 = vpack.c.bf16 %v8465_v0, %v8461_v54  ;;  %v16431_v0 = vld [vmem:[#allocation69_spill] sm:$0xff] }
 0x898   : > { %8783 = vmatprep.subr.bf16.mxu0 %v8161_v2  ;;  %v14583_v2 = vld [vmem:[#allocation21 + $0x14] ss:$8 sps:$4 sm:$0xff]  }
 0x899   : > { %8784 = vmatpush1.bf16.msra.mxu0 %v8160_v28 }
 0x89a   : > { %v8019_v14 = vpop.f32.mrb[120].mxu0  ;;  %v8469_v25 = vpop.f32.mrb[120].mxu1  ;;  %8785 = vmatprep.subr.bf16.mxu0 %v8609_v36  ;;  %v16432_v36 = vpack.c.bf16 %v13916_v27, %v16431_v0  ;;  %v16439_v0 = vld [vmem:[#allocation62_spill] sm:$0xff] }
 0x89b   : > { %v8021_v44 = vpop.f32.mrb[121].mxu0  ;;  %v8471_v39 = vpop.f32.mrb[121].mxu1 }
 0x89c   : > { %v8023_v58 = vpop.f32.mrb[122].mxu0  ;;  %v8473_v46 = vpop.f32.mrb[122].mxu1 }
 0x89d   : > { %v8162_v8 = vpack.c.bf16 %v8023_v58, %v8019_v14  ;;  %v8612_v12 = vpack.c.bf16 %v8473_v46, %v8469_v25  ;;  %v8025_v5 = vpop.f32.mrb[123].mxu0  ;;  %v8475_v59 = vpop.f32.mrb[123].mxu1  ;;  %8786 = vmatpush1.bf16.msra.mxu0 %v8608_v20 }
 0x89e   : > { %v8163_v24 = vpack.c.bf16 %v8025_v5, %v8021_v44  ;;  %v8613_v50 = vpack.c.bf16 %v8475_v59, %v8471_v39  ;;  %8787 = vmatprep.subr.bf16.mxu0 %v8611_v37  ;;  %v16434_v39 = vld [vmem:[#allocation32_spill] sm:$0xff]  ;;  %v16437_v59 = vpack.c.bf16 %v13936_v7, %v13928_v3 }
 0x89f   : > { %v14597_v5 = vld [vmem:[#allocation21 + $0x10] ss:$8 sps:$4 sm:$0xff]  }
 0x8a0   : > { %8894 = vmatprep.subr.bf16.mxu1 %v8163_v24 }
 0x8a1   : > { %8788 = vmatpush1.bf16.msra.mxu0 %v8610_v22  ;;  %8895 = vmatpush1.bf16.msra.mxu1 %v8162_v8  ;;  %v16433_v22 = vld [vmem:[#allocation56_spill] sm:$0xff]  ;;  %v16436_v8 = vpack.c.bf16 %v13944_v38, %v13932_v45  ;;  %v14613_v45 = vld [vmem:[#allocation21 + $0x24] ss:$8 sps:$4 sm:$0xff]  }
 0x8a2   : > { %v8029_v28 = vpop.f32.mrb[124].mxu0  ;;  %v8479_v54 = vpop.f32.mrb[124].mxu1  ;;  %8992 = vmatprep.subr.bf16.mxu0 %v16432_v36  ;;  %v16435_v58 = vpack.c.bf16 %v16433_v22, %v16434_v39 }
 0x8a3   : > { %v8031_v47 = vpop.f32.mrb[125].mxu0  ;;  %v8481_v26 = vpop.f32.mrb[125].mxu1 }
 0x8a4   : > { %v8033_v9 = vpop.f32.mrb[126].mxu0  ;;  %v8483_v20 = vpop.f32.mrb[126].mxu1  ;;  %8798 = vmatmul.mubr.bf16.vlgmr.msra.gmra.mrb[176].mxu0 %v14581_v10 }
 0x8a5   : > { %v8164_v37 = vpack.c.bf16 %v8033_v9, %v8029_v28  ;;  %v8614_v14 = vpack.c.bf16 %v8483_v20, %v8479_v54  ;;  %v8035_v25 = vpop.f32.mrb[127].mxu0  ;;  %v8485_v44 = vpop.f32.mrb[127].mxu1  ;;  %8993 = vmatpush1.bf16.msra.mxu0 %v16435_v58  ;;  %10467 = vmatprep.mubr.msk.bf16.mxu0 %vm8752_vm2, %v14583_v2  ;;  %v16438_v54 = vld [vmem:[#allocation42_spill] sm:$0xff]  ;;  %v16444_v58 = vpack.c.bf16 %v13946_v48, %v13934_v56 }
 0x8a6   : > { %v8165_v46 = vpack.c.bf16 %v8035_v25, %v8031_v47  ;;  %v8615_v27 = vpack.c.bf16 %v8485_v44, %v8481_v26  ;;  %8994 = vmatprep.subr.bf16.mxu0 %v16436_v8  ;;  %v16440_v36 = vpack.c.bf16 %v16438_v54, %v16439_v0  ;;  %v16442_v25 = vld [vmem:[#allocation33_spill] sm:$0xff]  ;;  %v16448_v56 = vpack.c.bf16 %v13987_v61, %v13966_v13 }
 0x8a8   : > { %8896 = vmatprep.subr.bf16.mxu1 %v8165_v46  ;;  %v14640_v46 = vld [vmem:[#allocation21 + $0x20] ss:$8 sps:$4 sm:$0xff]  }
 0x8a9   : > { %8897 = vmatpush1.bf16.msra.mxu1 %v8164_v37  ;;  %8995 = vmatpush1.bf16.msra.mxu0 %v16437_v59  ;;  %v16441_v37 = vld [vmem:[#allocation50_spill] sm:$0xff] }
 0x8aa   : > { %v14602_v24 = vpop.f32.mrb[128].mxu0  ;;  %v14604_v28 = vpop.f32.mrb[128].mxu1  ;;  %8898 = vmatprep.subr.bf16.mxu1 %v8613_v50  ;;  %8996 = vmatprep.subr.bf16.mxu0 %v16440_v36  ;;  %v16443_v44 = vpack.c.bf16 %v16441_v37, %v16442_v25 }
 0x8ab   : > { %v14609_v47 = vpop.f32.mrb[129].mxu0  ;;  %v14611_v38 = vpop.f32.mrb[129].mxu1 }
 0x8ac   : > { %v14615_v26 = vpop.f32.mrb[130].mxu0  ;;  %v14617_v9 = vpop.f32.mrb[130].mxu1  ;;  %8808 = vmatmul.mubr.bf16.gmra.mrb[180].mxu0 %v14597_v5 }
 0x8ad   : > { %v8166_v7 = vpack.c.bf16 %v14615_v26, %v14602_v24  ;;  %v8616_v3 = vpack.c.bf16 %v14617_v9, %v14604_v28  ;;  %v14624_v50 = vpop.f32.mrb[131].mxu0  ;;  %v14626_v20 = vpop.f32.mrb[131].mxu1  ;;  %8899 = vmatpush1.bf16.msra.mxu1 %v8612_v12  ;;  %8997 = vmatpush1.bf16.msra.mxu0 %v16443_v44  ;;  %v16445_v12 = vld [vmem:[#allocation44_spill] sm:$0xff]  ;;  %v16451_v44 = vpack.c.bf16 %v14333_v34, %v14321_v55  ;;  %v16474_v24 = vld [vmem:[#allocation113_spill] sm:$0xff]  ;;  %v16485_v28 = vld [vmem:[#allocation118_spill] sm:$0xff] }
 0x8ae   : > { %v8167_v22 = vpack.c.bf16 %v14624_v50, %v14609_v47  ;;  %v8617_v39 = vpack.c.bf16 %v14626_v20, %v14611_v38  ;;  %8900 = vmatprep.subr.bf16.mxu1 %v8615_v27  ;;  %8998 = vmatprep.subr.bf16.mxu0 %v16444_v58  ;;  %v16446_v8 = vpack.c.bf16 %v13938_v49, %v16445_v12  ;;  %v16486_v9 = vld [vmem:[#allocation114_spill] sm:$0xff] }
 0x8af   : > { %10468 = vmatprep.mubr.msk.bf16.mxu0 %vm8752_vm2, %v14613_v45  ;;  %v16447_v27 = vpack.c.bf16 %v14303_v31, %v14289_v51  ;;  %v16449_v47 = vpack.c.bf16 %v14293_v6, %v14285_v40  ;;  %v16450_v50 = vpack.c.bf16 %v13973_v21, %v13962_v23  ;;  %v16452_v58 = vpack.c.bf16 %v14033_v4, %v14015_v18  ;;  %v14692_v23 = vld [vmem:[#allocation21 + $0x30] ss:$8 sps:$4 sm:$0xff]  }
 0x8b0   : > { %v16453_v21 = vpack.c.bf16 %v14325_v11, %v14317_v57  ;;  %v16454_v40 = vpack.c.bf16 %v14025_v63, %v14011_v17  ;;  %v16455_v4 = vpack.c.bf16 %v14305_v33, %v14291_v19  ;;  %v16456_v34 = vpack.c.bf16 %v13989_v1, %v13968_v35 }
 0x8b1   : > { %8901 = vmatpush1.bf16.msra.mxu1 %v8614_v14  ;;  %8999 = vmatpush1.bf16.msra.mxu0 %v16446_v8  ;;  %v14659_v14 = vld [vmem:[#allocation21 + $0x34] ss:$8 sps:$4 sm:$0xff]   ;;  %v16457_v33 = vpack.c.bf16 %v14295_v43, %v14287_v52  ;;  %v16458_v12 = vpack.c.bf16 %v13975_v62, %v13964_v16  ;;  %v16461_v16 = vpack.c.bf16 %v14327_v15, %v14319_v42  ;;  %v16462_v62 = vld [vmem:[#allocation30_spill] sm:$0xff] }
 0x8b2   : > { %v14645_v59 = vpop.f32.mrb[132].mxu0  ;;  %v14647_v54 = vpop.f32.mrb[132].mxu1  ;;  %9000 = vmatprep.subr.bf16.mxu0 %v16447_v27  ;;  %9106 = vmatprep.subr.bf16.mxu1 %v16448_v56  ;;  %v16459_v27 = vpack.c.bf16 %v14335_v41, %v14323_v53  ;;  %v16460_v56 = vpack.c.bf16 %v14035_v60, %v14017_v29  ;;  %v16463_v52 = vpack.c.bf16 %v14027_v30, %v16462_v62  ;;  %v16464_v29 = vld [vmem:[#allocation111_spill] sm:$0xff]  ;;  %v16465_v60 = vld [vmem:[#allocation46_spill] sm:$0xff] }
 0x8b3   : > { %v14655_v48 = vpop.f32.mrb[133].mxu0  ;;  %v14657_v0 = vpop.f32.mrb[133].mxu1  ;;  %v16466_v41 = vpack.c.bf16 %v16464_v29, %v16465_v60  ;;  %v16480_v29 = vld [vmem:[#allocation66_spill] sm:$0xff] }
 0x8b4   : > { %v14661_v49 = vpop.f32.mrb[134].mxu0  ;;  %v14663_v36 = vpop.f32.mrb[134].mxu1  ;;  %8911 = vmatmul.mubr.bf16.vlgmr.msra.gmra.mrb[176].mxu1 %v14581_v10  ;;  %8818 = vmatmul.mubr.bf16.gmra.mrb[184].mxu0 %v14640_v46 }
 0x8b5   : > { %v8168_v51 = vpack.c.bf16 %v14661_v49, %v14645_v59  ;;  %v8618_v13 = vpack.c.bf16 %v14663_v36, %v14647_v54  ;;  %v8055_v61 = vpop.f32.mrb[135].mxu0  ;;  %v14671_v31 = vpop.f32.mrb[135].mxu1  ;;  %9001 = vmatpush1.bf16.msra.mxu0 %v16449_v47  ;;  %9107 = vmatpush1.bf16.msra.mxu1 %v16450_v50  ;;  %v16552_v36 = vld [vmem:[#allocation64_spill] sm:$0xff] }
 0x8b6   : > { %v8169_v37 = vpack.c.bf16 %v8055_v61, %v14655_v48  ;;  %v8619_v25 = vpack.c.bf16 %v14671_v31, %v14657_v0  ;;  %9002 = vmatprep.subr.bf16.mxu0 %v16451_v44  ;;  %9108 = vmatprep.subr.bf16.mxu1 %v16452_v58  ;;  %v16468_v44 = vld [vmem:[#allocation52_spill] sm:$0xff]  ;;  %v16488_v0 = vld [vmem:[#allocation67_spill] sm:$0xff]  ;;  %v16489_v31 = vld [vmem:[#allocation45_spill] sm:$0xff] }
 0x8b7   : > { %10469 = vmatprep.mubr.msk.bf16.mxu0 %vm8752_vm2, %v14659_v14  ;;  %10471 = vmatprep.mubr.msk.bf16.mxu1 %vm8752_vm2, %v14583_v2 }
 0x8b9   : > { %9003 = vmatpush1.bf16.msra.mxu0 %v16453_v21  ;;  %9109 = vmatpush1.bf16.msra.mxu1 %v16454_v40 }
 0x8ba   : > { %v14700_v6 = vpop.f32.mrb[136].mxu0  ;;  %v14702_v18 = vpop.f32.mrb[136].mxu1  ;;  %9004 = vmatprep.subr.bf16.mxu0 %v16455_v4  ;;  %9110 = vmatprep.subr.bf16.mxu1 %v16456_v34  ;;  %v16470_v4 = vld [vmem:[#allocation119_spill] sm:$0xff] }
 0x8bb   : > { %v14710_v55 = vpop.f32.mrb[137].mxu0  ;;  %v14712_v57 = vpop.f32.mrb[137].mxu1  ;;  %v16471_v34 = vld [vmem:[#allocation115_spill] sm:$0xff] }
 0x8bc   : > { %v14714_v11 = vpop.f32.mrb[138].mxu0  ;;  %v14716_v17 = vpop.f32.mrb[138].mxu1  ;;  %8828 = vmatmul.mubr.bf16.gmra.mrb[188].mxu0 %v14692_v23  ;;  %8921 = vmatmul.mubr.bf16.gmra.mrb[180].mxu1 %v14597_v5 }
 0x8bd   : > { %v8170_v63 = vpack.c.bf16 %v14714_v11, %v14700_v6  ;;  %v8620_v19 = vpack.c.bf16 %v14716_v17, %v14702_v18  ;;  %v8065_v35 = vpop.f32.mrb[139].mxu0  ;;  %v14724_v1 = vpop.f32.mrb[139].mxu1  ;;  %9005 = vmatpush1.bf16.msra.mxu0 %v16457_v33  ;;  %9111 = vmatpush1.bf16.msra.mxu1 %v16458_v12  ;;  %v16477_v12 = vld [vmem:[#allocation60_spill] sm:$0xff]  ;;  %v16497_v6 = vld [vmem:[#allocation58_spill] sm:$0xff]  ;;  %v16498_v11 = vld [vmem:[#allocation49_spill] sm:$0xff] }
 0x8be   : > { %v8171_v8 = vpack.c.bf16 %v8065_v35, %v14710_v55  ;;  %v8621_v59 = vpack.c.bf16 %v14724_v1, %v14712_v57  ;;  %9006 = vmatprep.subr.bf16.mxu0 %v16459_v27  ;;  %9112 = vmatprep.subr.bf16.mxu1 %v16460_v56  ;;  %v16472_v55 = vpack.c.bf16 %v16470_v4, %v16471_v34  ;;  %v16473_v35 = vld [vmem:[#allocation117_spill] sm:$0xff]  ;;  %v16509_v18 = vld [vmem:[#allocation55_spill] sm:$0xff]  ;;  %v16527_v57 = vld [vmem:[#allocation72_spill] sm:$0xff] }
 0x8bf   : > { %10472 = vmatprep.mubr.msk.bf16.mxu1 %vm8752_vm2, %v14613_v45  ;;  %10490 = vmatprep.mubr.msk.bf16.mxu0 %vm8752_vm2, %v14297_v32  ;;  %v16475_v26 = vpack.c.bf16 %v16473_v35, %v16474_v24  ;;  %v16491_v24 = vld [vmem:[#allocation65_spill] sm:$0xff]  ;;  %v16510_v17 = vld [vmem:[#allocation59_spill] sm:$0xff] }
 0x8c1   : > { %9007 = vmatpush1.bf16.msra.mxu0 %v16461_v16  ;;  %9113 = vmatpush1.bf16.msra.mxu1 %v16463_v52 }
 0x8c2   : > { %v14751_v43 = vpop.f32.mrb[140].mxu0  ;;  %v14753_v53 = vpop.f32.mrb[140].mxu1  ;;  %9008 = vmatprep.subr.bf16.mxu0 %v8167_v22  ;;  %9114 = vmatprep.subr.bf16.mxu1 %v16466_v41  ;;  %v16467_v22 = vld [vmem:[#allocation48_spill] sm:$0xff] }
 0x8c3   : > { %v8071_v48 = vpop.f32.mrb[141].mxu0  ;;  %v14758_v49 = vpop.f32.mrb[141].mxu1  ;;  %v16469_v58 = vpack.c.bf16 %v16467_v22, %v16468_v44 }
 0x8c4   : > { %v8073_v61 = vpop.f32.mrb[142].mxu0  ;;  %v14760_v47 = vpop.f32.mrb[142].mxu1  ;;  %8931 = vmatmul.mubr.bf16.gmra.mrb[184].mxu1 %v14640_v46 }
 0x8c5   : > { %v8172_v30 = vpack.c.bf16 %v8073_v61, %v14751_v43  ;;  %v8622_v42 = vpack.c.bf16 %v14760_v47, %v14753_v53  ;;  %v8075_v15 = vpop.f32.mrb[143].mxu0  ;;  %v14766_v50 = vpop.f32.mrb[143].mxu1  ;;  %9009 = vmatpush1.bf16.msra.mxu0 %v8166_v7  ;;  %9115 = vmatpush1.bf16.msra.mxu1 %v16469_v58  ;;  %v16479_v43 = vld [vmem:[#allocation110_spill] sm:$0xff]  ;;  %v16482_v61 = vld [vmem:[#allocation120_spill] sm:$0xff] }
 0x8c6   : > { %v8173_v21 = vpack.c.bf16 %v8075_v15, %v8071_v48  ;;  %v8623_v40 = vpack.c.bf16 %v14766_v50, %v14758_v49  ;;  %9010 = vmatprep.subr.bf16.mxu0 %v8169_v37  ;;  %9116 = vmatprep.subr.bf16.mxu1 %v16472_v55  ;;  %v16476_v37 = vld [vmem:[#allocation112_spill] sm:$0xff]  ;;  %v16481_v60 = vpack.c.bf16 %v16479_v43, %v16480_v29  ;;  %v16494_v43 = vld [vmem:[#allocation57_spill] sm:$0xff]  ;;  %v16512_v49 = vld [vmem:[#allocation127_spill] sm:$0xff] }
 0x8c7   : > { %10473 = vmatprep.mubr.msk.bf16.mxu1 %vm8752_vm2, %v14659_v14  ;;  %v16478_v27 = vpack.c.bf16 %v16476_v37, %v16477_v12  ;;  %v16483_v15 = vld [vmem:[#allocation116_spill] sm:$0xff]  ;;  %v16495_v29 = vld [vmem:[#allocation61_spill] sm:$0xff]  ;;  %v16513_v50 = vld [vmem:[#allocation123_spill] sm:$0xff] }
 0x8c8   : > { %v16484_v22 = vpack.c.bf16 %v16482_v61, %v16483_v15  ;;  %v16551_v48 = vld [vmem:[#allocation35_spill] sm:$0xff] }
 0x8c9   : > { %9011 = vmatpush1.bf16.msra.mxu0 %v8168_v51  ;;  %9117 = vmatpush1.bf16.msra.mxu1 %v16475_v26  ;;  %v16492_v26 = vld [vmem:[#allocation31_spill] sm:$0xff]  ;;  %v16553_v12 = vpack.c.bf16 %v16551_v48, %v16552_v36 }
 0x8ca   : > { %v14784_v7 = vpop.f32.mrb[144].mxu0  ;;  %v14786_v33 = vpop.f32.mrb[144].mxu1  ;;  %9012 = vmatprep.subr.bf16.mxu0 %v8617_v39  ;;  %9118 = vmatprep.subr.bf16.mxu1 %v16478_v27  ;;  %v16493_v37 = vpack.c.bf16 %v16491_v24, %v16492_v26  ;;  %v16504_v24 = vld [vmem:[#allocation43_spill] sm:$0xff]  ;;  %v16548_v27 = vld [vmem:[#allocation136_spill] sm:$0xff] }
 0x8cb   : > { %v14794_v56 = vpop.f32.mrb[145].mxu0  ;;  %v14796_v16 = vpop.f32.mrb[145].mxu1  ;;  %v16561_v48 = vld [vmem:[#allocation139_spill] sm:$0xff] }
 0x8cc   : > { %v14798_v51 = vpop.f32.mrb[146].mxu0  ;;  %v14800_v62 = vpop.f32.mrb[146].mxu1  ;;  %8941 = vmatmul.mubr.bf16.gmra.mrb[188].mxu1 %v14692_v23 }
 0x8cd   : > { %v8174_v52 = vpack.c.bf16 %v14798_v51, %v14784_v7  ;;  %v14807_v20 = vpop.f32.mrb[147].mxu0  ;;  %v14809_v39 = vpop.f32.mrb[147].mxu1  ;;  %9013 = vmatpush1.bf16.msra.mxu0 %v8616_v3  ;;  %9119 = vmatpush1.bf16.msra.mxu1 %v16481_v60  ;;  %v16487_v3 = vpack.c.bf16 %v16485_v28, %v16486_v9  ;;  %v16496_v60 = vpack.c.bf16 %v16494_v43, %v16495_v29  ;;  %v16506_v29 = vld [vmem:[#allocation36_spill] sm:$0xff]  ;;  %v16528_v43 = vld [vmem:[#allocation71_spill] sm:$0xff] }
 0x8ce   : > { %v8175_v41 = vpack.c.bf16 %v14807_v20, %v14794_v56  ;;  %9014 = vmatprep.subr.bf16.mxu0 %v8619_v25  ;;  %9120 = vmatprep.subr.bf16.mxu1 %v16484_v22  ;;  %v16490_v25 = vpack.c.bf16 %v16488_v0, %v16489_v31  ;;  %v16501_v22 = vld [vmem:[#allocation63_spill] sm:$0xff]  ;;  %v16563_v20 = vld [vmem:[#allocation141_spill] sm:$0xff]  ;;  %v16583_v51 = vld [vmem:[#allocation152_spill] sm:$0xff] }
 0x8cf   : > { %10510 = vmatprep.mubr.msk.bf16.mxu1 %vm8752_vm2, %v14297_v32 }
 0x8d1   : > { %9015 = vmatpush1.bf16.msra.mxu0 %v8618_v13  ;;  %9121 = vmatpush1.bf16.msra.mxu1 %v16487_v3 }
 0x8d2   : > { %v14835_v44 = vpop.f32.mrb[148].mxu0  ;;  %v14837_v58 = vpop.f32.mrb[148].mxu1  ;;  %9122 = vmatprep.subr.bf16.mxu1 %v8171_v8  ;;  %9220 = vmatprep.subr.bf16.mxu0 %v16490_v25  ;;  %v16503_v25 = vld [vmem:[#allocation73_spill] sm:$0xff] }
 0x8d3   : > { %v14842_v4 = vpop.f32.mrb[149].mxu0  ;;  %v14844_v34 = vpop.f32.mrb[149].mxu1  ;;  %v16505_v26 = vpack.c.bf16 %v16503_v25, %v16504_v24  ;;  %v16529_v24 = vpack.c.bf16 %v16527_v57, %v16528_v43  ;;  %v16536_v57 = vld [vmem:[#allocation128_spill] sm:$0xff] }
 0x8d4   : > { %v14846_v55 = vpop.f32.mrb[150].mxu0  ;;  %v14848_v54 = vpop.f32.mrb[150].mxu1  ;;  %9025 = vmatmul.mubr.bf16.vlgmr.msra.gmra.mrb[192].mxu0 %v14581_v10  ;;  %v16537_v43 = vld [vmem:[#allocation124_spill] sm:$0xff] }
 0x8d5   : > { %v14855_v8 = vpop.f32.mrb[151].mxu0  ;;  %v14857_v35 = vpop.f32.mrb[151].mxu1  ;;  %9123 = vmatpush1.bf16.msra.mxu1 %v8170_v63  ;;  %9221 = vmatpush1.bf16.msra.mxu0 %v16493_v37  ;;  %v16499_v63 = vpack.c.bf16 %v16497_v6, %v16498_v11 }
 0x8d6   : > { %9124 = vmatprep.subr.bf16.mxu1 %v8173_v21  ;;  %9222 = vmatprep.subr.bf16.mxu0 %v16496_v60  ;;  %v16500_v21 = vld [vmem:[#allocation47_spill] sm:$0xff]  ;;  %v16507_v60 = vld [vmem:[#allocation40_spill] sm:$0xff] }
 0x8d7   : > { %10491 = vmatprep.mubr.msk.bf16.mxu0 %vm8752_vm2, %v14583_v2  ;;  %v16502_v28 = vpack.c.bf16 %v16500_v21, %v16501_v22  ;;  %v16508_v6 = vpack.c.bf16 %v16506_v29, %v16507_v60  ;;  %v16515_v21 = vld [vmem:[#allocation70_spill] sm:$0xff] }
 0x8d8   : > { %v16516_v22 = vld [vmem:[#allocation74_spill] sm:$0xff] }
 0x8d9   : > { %9125 = vmatpush1.bf16.msra.mxu1 %v8172_v30  ;;  %9223 = vmatpush1.bf16.msra.mxu0 %v16499_v63 }
 0x8da   : > { %v14877_v61 = vpop.f32.mrb[152].mxu0  ;;  %v14879_v15 = vpop.f32.mrb[152].mxu1  ;;  %9126 = vmatprep.subr.bf16.mxu1 %v8621_v59  ;;  %9224 = vmatprep.subr.bf16.mxu0 %v16502_v28  ;;  %v16517_v28 = vpack.c.bf16 %v16515_v21, %v16516_v22  ;;  %v16524_v22 = vld [vmem:[#allocation135_spill] sm:$0xff]  ;;  %v16540_v21 = vld [vmem:[#allocation68_spill] sm:$0xff] }
 0x8db   : > { %v14887_v9 = vpop.f32.mrb[153].mxu0  ;;  %v14889_v3 = vpop.f32.mrb[153].mxu1 }
 0x8dc   : > { %v14891_v30 = vpop.f32.mrb[154].mxu0  ;;  %v14893_v0 = vpop.f32.mrb[154].mxu1  ;;  %9035 = vmatmul.mubr.bf16.gmra.mrb[196].mxu0 %v14597_v5 }
 0x8dd   : > { %v14900_v1 = vpop.f32.mrb[155].mxu0  ;;  %v14902_v59 = vpop.f32.mrb[155].mxu1  ;;  %9127 = vmatpush1.bf16.msra.mxu1 %v8620_v19  ;;  %9225 = vmatpush1.bf16.msra.mxu0 %v16505_v26  ;;  %v16511_v19 = vpack.c.bf16 %v16509_v18, %v16510_v17  ;;  %v16519_v18 = vld [vmem:[#allocation121_spill] sm:$0xff] }
 0x8de   : > { %9128 = vmatprep.subr.bf16.mxu1 %v8623_v40  ;;  %9226 = vmatprep.subr.bf16.mxu0 %v16508_v6  ;;  %v16514_v40 = vpack.c.bf16 %v16512_v49, %v16513_v50  ;;  %v16518_v6 = vld [vmem:[#allocation125_spill] sm:$0xff]  ;;  %v16522_v49 = vld [vmem:[#allocation54_spill] sm:$0xff] }
 0x8df   : > { %10492 = vmatprep.mubr.msk.bf16.mxu0 %vm8752_vm2, %v14613_v45  ;;  %v16520_v17 = vpack.c.bf16 %v16518_v6, %v16519_v18  ;;  %v16530_v6 = vld [vmem:[#allocation133_spill] sm:$0xff] }
 0x8e0   : > { %v16531_v18 = vld [vmem:[#allocation129_spill] sm:$0xff] }
 0x8e1   : > { %9129 = vmatpush1.bf16.msra.mxu1 %v8622_v42  ;;  %9227 = vmatpush1.bf16.msra.mxu0 %v16511_v19  ;;  %v16521_v19 = vld [vmem:[#allocation41_spill] sm:$0xff] }
 0x8e2   : > { %v14928_v11 = vpop.f32.mrb[156].mxu0  ;;  %v14930_v63 = vpop.f32.mrb[156].mxu1  ;;  %9228 = vmatprep.subr.bf16.mxu0 %v16514_v40  ;;  %9334 = vmatprep.subr.bf16.mxu1 %v16517_v28  ;;  %v16523_v50 = vpack.c.bf16 %v16521_v19, %v16522_v49  ;;  %v16525_v28 = vld [vmem:[#allocation131_spill] sm:$0xff]  ;;  %v16533_v19 = vld [vmem:[#allocation37_spill] sm:$0xff]  ;;  %v16534_v49 = vld [vmem:[#allocation38_spill] sm:$0xff] }
 0x8e3   : > { %v14938_v25 = vpop.f32.mrb[157].mxu0  ;;  %v14940_v53 = vpop.f32.mrb[157].mxu1  ;;  %v16526_v26 = vpack.c.bf16 %v16524_v22, %v16525_v28  ;;  %v16539_v28 = vld [vmem:[#allocation39_spill] sm:$0xff] }
 0x8e4   : > { %v14942_v47 = vpop.f32.mrb[158].mxu0  ;;  %v14944_v42 = vpop.f32.mrb[158].mxu1  ;;  %9139 = vmatmul.mubr.bf16.vlgmr.msra.gmra.mrb[192].mxu1 %v14581_v10  ;;  %9045 = vmatmul.mubr.bf16.gmra.mrb[200].mxu0 %v14640_v46  ;;  %v16541_v40 = vpack.c.bf16 %v16539_v28, %v16540_v21  ;;  %v16546_v28 = vld [vmem:[#allocation77_spill] sm:$0xff] }
 0x8e5   : > { %v14952_v29 = vpop.f32.mrb[159].mxu0  ;;  %v14954_v60 = vpop.f32.mrb[159].mxu1  ;;  %9229 = vmatpush1.bf16.msra.mxu0 %v16520_v17  ;;  %9335 = vmatpush1.bf16.msra.mxu1 %v16523_v50  ;;  %v16532_v17 = vpack.c.bf16 %v16530_v6, %v16531_v18  ;;  %v16535_v50 = vpack.c.bf16 %v16533_v19, %v16534_v49  ;;  %v16549_v49 = vld [vmem:[#allocation132_spill] sm:$0xff]  ;;  %v16567_v19 = vld [vmem:[#allocation151_spill] sm:$0xff] }
 0x8e6   : > { %9230 = vmatprep.subr.bf16.mxu0 %v16526_v26  ;;  %9336 = vmatprep.subr.bf16.mxu1 %v16529_v24  ;;  %v16538_v24 = vpack.c.bf16 %v16536_v57, %v16537_v43  ;;  %v16543_v57 = vld [vmem:[#allocation122_spill] sm:$0xff]  ;;  %v16550_v38 = vpack.c.bf16 %v16548_v27, %v16549_v49 }
 0x8e7   : > { %10493 = vmatprep.mubr.msk.bf16.mxu0 %vm8752_vm2, %v14659_v14  ;;  %10511 = vmatprep.mubr.msk.bf16.mxu1 %vm8752_vm2, %v14583_v2 }
 0x8e9   : > { %9231 = vmatpush1.bf16.msra.mxu0 %v16532_v17  ;;  %9337 = vmatpush1.bf16.msra.mxu1 %v16535_v50  ;;  %v16542_v50 = vld [vmem:[#allocation126_spill] sm:$0xff] }
 0x8ea   : > { %v14982_v22 = vpop.f32.mrb[160].mxu0  ;;  %v14984_v26 = vpop.f32.mrb[160].mxu1  ;;  %9232 = vmatprep.subr.bf16.mxu0 %v16538_v24  ;;  %9338 = vmatprep.subr.bf16.mxu1 %v16541_v40  ;;  %v16544_v43 = vpack.c.bf16 %v16542_v50, %v16543_v57  ;;  %v16545_v24 = vld [vmem:[#allocation75_spill] sm:$0xff]  ;;  %v16555_v50 = vld [vmem:[#allocation130_spill] sm:$0xff] }
 0x8eb   : > { %v14992_v31 = vpop.f32.mrb[161].mxu0  ;;  %v14994_v6 = vpop.f32.mrb[161].mxu1  ;;  %v16547_v37 = vpack.c.bf16 %v16545_v24, %v16546_v28  ;;  %v16558_v24 = vld [vmem:[#allocation78_spill] sm:$0xff] }
 0x8ec   : > { %v14996_v18 = vpop.f32.mrb[162].mxu0  ;;  %v14998_v17 = vpop.f32.mrb[162].mxu1  ;;  %9055 = vmatmul.mubr.bf16.gmra.mrb[204].mxu0 %v14692_v23  ;;  %9149 = vmatmul.mubr.bf16.gmra.mrb[196].mxu1 %v14597_v5 }
 0x8ed   : > { %v15006_v21 = vpop.f32.mrb[163].mxu0  ;;  %v15008_v40 = vpop.f32.mrb[163].mxu1  ;;  %9233 = vmatpush1.bf16.msra.mxu0 %v16544_v43  ;;  %9339 = vmatpush1.bf16.msra.mxu1 %v16547_v37  ;;  %v16554_v37 = vld [vmem:[#allocation134_spill] sm:$0xff]  ;;  %v16557_v43 = vld [vmem:[#allocation76_spill] sm:$0xff] }
 0x8ee   : > { %v8183_v13 = vpack.c.bf16 %v15006_v21, %v14992_v31  ;;  %9234 = vmatprep.subr.bf16.mxu0 %v16550_v38  ;;  %9340 = vmatprep.subr.bf16.mxu1 %v16553_v12  ;;  %v16556_v57 = vpack.c.bf16 %v16554_v37, %v16555_v50  ;;  %v16559_v28 = vpack.c.bf16 %v16557_v43, %v16558_v24  ;;  %v16560_v38 = vld [vmem:[#allocation143_spill] sm:$0xff] }
 0x8ef   : > { %10512 = vmatprep.mubr.msk.bf16.mxu1 %vm8752_vm2, %v14613_v45  ;;  %10530 = vmatprep.mubr.msk.bf16.mxu0 %vm8752_vm2, %v14297_v32  ;;  %v16562_v36 = vpack.c.bf16 %v16560_v38, %v16561_v48  ;;  %v16584_v38 = vld [vmem:[#allocation148_spill] sm:$0xff]  ;;  %v16678_v31 = vld [vmem:[#allocation183_spill] sm:$0xff] }
 0x8f1   : > { %9235 = vmatpush1.bf16.msra.mxu0 %v16556_v57  ;;  %9341 = vmatpush1.bf16.msra.mxu1 %v16559_v28  ;;  %v16568_v57 = vld [vmem:[#allocation147_spill] sm:$0xff] }
 0x8f2   : > { %v15036_v27 = vpop.f32.mrb[164].mxu0  ;;  %9236 = vmatprep.subr.bf16.mxu0 %v8175_v41  ;;  %9342 = vmatprep.subr.bf16.mxu1 %v16562_v36  ;;  %v16564_v41 = vld [vmem:[#allocation137_spill] sm:$0xff]  ;;  %v16566_v36 = vpack.c.bf16 %v14855_v8, %v14842_v4  ;;  %v16569_v7 = vpack.c.bf16 %v16567_v19, %v16568_v57  ;;  %v16574_v8 = vpack.c.bf16 %v14809_v39, %v14796_v16  ;;  %v16575_v19 = vld [vmem:[#allocation144_spill] sm:$0xff] }
 0x8f3   : > { %v15044_v12 = vpop.f32.mrb[164].mxu1  ;;  %v15046_v49 = vpop.f32.mrb[165].mxu0  ;;  %v16565_v24 = vpack.c.bf16 %v16563_v20, %v16564_v41  ;;  %v16571_v20 = vld [vmem:[#allocation149_spill] sm:$0xff]  ;;  %v16576_v57 = vld [vmem:[#allocation140_spill] sm:$0xff]  ;;  %v16578_v39 = vpack.c.bf16 %v14800_v62, %v14786_v33  ;;  %v16585_v33 = vpack.c.bf16 %v16583_v51, %v16584_v38  ;;  %v16591_v38 = vld [vmem:[#allocation82_spill] sm:$0xff] }
 0x8f4   : > { %v15048_v37 = vpop.f32.mrb[165].mxu1  ;;  %v15050_v50 = vpop.f32.mrb[166].mxu0  ;;  %9159 = vmatmul.mubr.bf16.gmra.mrb[200].mxu1 %v14640_v46  ;;  %v16572_v41 = vld [vmem:[#allocation145_spill] sm:$0xff]  ;;  %v16599_v62 = vld [vmem:[#allocation92_spill] sm:$0xff] }
 0x8f5   : > { %v15055_v43 = vpop.f32.mrb[166].mxu1  ;;  %v15057_v56 = vpop.f32.mrb[167].mxu0  ;;  %9237 = vmatpush1.bf16.msra.mxu0 %v8174_v52  ;;  %9343 = vmatpush1.bf16.msra.mxu1 %v16565_v24  ;;  %v16570_v52 = vpack.c.bf16 %v14846_v55, %v14835_v44  ;;  %v16573_v24 = vpack.c.bf16 %v16571_v20, %v16572_v41  ;;  %v16579_v41 = vld [vmem:[#allocation142_spill] sm:$0xff]  ;;  %v16592_v51 = vld [vmem:[#allocation81_spill] sm:$0xff] }
 0x8f6   : > { %v15069_v48 = vpop.f32.mrb[167].mxu1  ;;  %9238 = vmatprep.subr.bf16.mxu0 %v16566_v36  ;;  %9344 = vmatprep.subr.bf16.mxu1 %v16569_v7  ;;  %v16577_v36 = vpack.c.bf16 %v16575_v19, %v16576_v57  ;;  %v16598_v19 = vpack.c.bf16 %v14952_v29, %v14938_v25  ;;  %v16606_v25 = vpack.c.bf16 %v14902_v59, %v14889_v3  ;;  %v16607_v29 = vld [vmem:[#allocation84_spill] sm:$0xff]  ;;  %v16615_v3 = vld [vmem:[#allocation93_spill] sm:$0xff] }
 0x8f7   : > { %10513 = vmatprep.mubr.msk.bf16.mxu1 %vm8752_vm2, %v14659_v14  ;;  %v16616_v59 = vld [vmem:[#allocation89_spill] sm:$0xff] }
 0x8f9   : > { %9239 = vmatpush1.bf16.msra.mxu0 %v16570_v52  ;;  %9345 = vmatpush1.bf16.msra.mxu1 %v16573_v24  ;;  %v16580_v24 = vld [vmem:[#allocation138_spill] sm:$0xff]  ;;  %v16582_v52 = vpack.c.bf16 %v14857_v35, %v14844_v34  ;;  %v16590_v35 = vpack.c.bf16 %v14900_v1, %v14887_v9  ;;  %v16594_v1 = vpack.c.bf16 %v14891_v30, %v14877_v61 }
 0x8fa   : > { %v15087_v4 = vpop.f32.mrb[168].mxu0  ;;  %9240 = vmatprep.subr.bf16.mxu0 %v16574_v8  ;;  %9346 = vmatprep.subr.bf16.mxu1 %v16577_v36  ;;  %v16581_v8 = vpack.c.bf16 %v16579_v41, %v16580_v24  ;;  %v16587_v41 = vld [vmem:[#allocation150_spill] sm:$0xff] }
 0x8fb   : > { %v15095_v7 = vpop.f32.mrb[168].mxu1  ;;  %v15097_v28 = vpop.f32.mrb[169].mxu0  ;;  %v16588_v24 = vld [vmem:[#allocation146_spill] sm:$0xff] }
 0x8fc   : > { %v15099_v44 = vpop.f32.mrb[169].mxu1  ;;  %v15101_v55 = vpop.f32.mrb[170].mxu0  ;;  %9169 = vmatmul.mubr.bf16.gmra.mrb[204].mxu1 %v14692_v23 }
 0x8fd   : > { %v15106_v20 = vpop.f32.mrb[170].mxu1  ;;  %v15108_v16 = vpop.f32.mrb[171].mxu0  ;;  %9241 = vmatpush1.bf16.msra.mxu0 %v16578_v39  ;;  %9347 = vmatpush1.bf16.msra.mxu1 %v16581_v8  ;;  %v16586_v39 = vpack.c.bf16 %v14848_v54, %v14837_v58  ;;  %v16589_v8 = vpack.c.bf16 %v16587_v41, %v16588_v24  ;;  %v16595_v24 = vld [vmem:[#allocation79_spill] sm:$0xff] }
 0x8fe   : > { %v8187_v57 = vpack.c.bf16 %v15108_v16, %v15097_v28  ;;  %v15120_v36 = vpop.f32.mrb[171].mxu1  ;;  %9242 = vmatprep.subr.bf16.mxu0 %v16582_v52  ;;  %9348 = vmatprep.subr.bf16.mxu1 %v16585_v33  ;;  %v16593_v52 = vpack.c.bf16 %v16591_v38, %v16592_v51  ;;  %v16704_v28 = vpack.c.bf16 %v15106_v20, %v15095_v7 }
 0x8ff   : > { %10550 = vmatprep.mubr.msk.bf16.mxu1 %vm8752_vm2, %v14297_v32 }
 0x901   : > { %9243 = vmatpush1.bf16.msra.mxu0 %v16586_v39  ;;  %9349 = vmatpush1.bf16.msra.mxu1 %v16589_v8  ;;  %v16596_v8 = vld [vmem:[#allocation34_spill] sm:$0xff]  ;;  %v16600_v39 = vld [vmem:[#allocation88_spill] sm:$0xff] }
 0x902   : > { %v15138_v34 = vpop.f32.mrb[172].mxu0  ;;  %9350 = vmatprep.subr.bf16.mxu1 %v16590_v35  ;;  %9448 = vmatprep.subr.bf16.mxu0 %v16593_v52  ;;  %v16597_v35 = vpack.c.bf16 %v16595_v24, %v16596_v8  ;;  %v16601_v61 = vpack.c.bf16 %v16599_v62, %v16600_v39  ;;  %v16603_v24 = vld [vmem:[#allocation90_spill] sm:$0xff]  ;;  %v16604_v8 = vld [vmem:[#allocation80_spill] sm:$0xff]  ;;  %v16610_v39 = vpack.c.bf16 %v14893_v0, %v14879_v15  ;;  %v16619_v15 = vld [vmem:[#allocation91_spill] sm:$0xff] }
 0x903   : > { %v15146_v33 = vpop.f32.mrb[172].mxu1  ;;  %v15148_v32 = vpop.f32.mrb[173].mxu0  ;;  %v16620_v0 = vld [vmem:[#allocation87_spill] sm:$0xff] }
 0x904   : > { %v15150_v58 = vpop.f32.mrb[173].mxu1  ;;  %v15152_v54 = vpop.f32.mrb[174].mxu0  ;;  %9253 = vmatmul.mubr.bf16.vlgmr.msra.gmra.mrb[208].mxu0 %v14581_v10 }
 0x905   : > { %v15157_v41 = vpop.f32.mrb[174].mxu1  ;;  %v15159_v9 = vpop.f32.mrb[175].mxu0  ;;  %9351 = vmatpush1.bf16.msra.mxu1 %v16594_v1  ;;  %9449 = vmatpush1.bf16.msra.mxu0 %v16597_v35  ;;  %v16602_v1 = vpack.c.bf16 %v14942_v47, %v14928_v11  ;;  %v16605_v35 = vpack.c.bf16 %v16603_v24, %v16604_v8  ;;  %v16611_v11 = vld [vmem:[#allocation86_spill] sm:$0xff]  ;;  %v16612_v47 = vld [vmem:[#allocation85_spill] sm:$0xff]  ;;  %v16617_v24 = vpack.c.bf16 %v16615_v3, %v16616_v59  ;;  %v16635_v3 = vld [vmem:[#allocation163_spill] sm:$0xff] }
 0x906   : > { %v8638_v38 = vpack.c.bf16 %v15157_v41, %v15146_v33  ;;  %v8189_v51 = vpack.c.bf16 %v15159_v9, %v15148_v32  ;;  %v15171_v52 = vpop.f32.mrb[175].mxu1  ;;  %9352 = vmatprep.subr.bf16.mxu1 %v16598_v19  ;;  %9450 = vmatprep.subr.bf16.mxu0 %v16601_v61  ;;  %v16608_v19 = vld [vmem:[#allocation83_spill] sm:$0xff]  ;;  %v16613_v61 = vpack.c.bf16 %v16611_v11, %v16612_v47  ;;  %v16629_v11 = vld [vmem:[#allocation153_spill] sm:$0xff]  ;;  %v16632_v47 = vld [vmem:[#allocation94_spill] sm:$0xff] }
 0x907   : > { %v8639_v30 = vpack.c.bf16 %v15171_v52, %v15150_v58  ;;  %10531 = vmatprep.mubr.msk.bf16.mxu0 %vm8752_vm2, %v14583_v2  ;;  %v16609_v62 = vpack.c.bf16 %v16607_v29, %v16608_v19  ;;  %v16618_v8 = vpack.c.bf16 %v14944_v42, %v14930_v63  ;;  %v16623_v29 = vld [vmem:[#allocation155_spill] sm:$0xff]  ;;  %v16631_v42 = vld [vmem:[#allocation98_spill] sm:$0xff] }
 0x909   : > { %9353 = vmatpush1.bf16.msra.mxu1 %v16602_v1  ;;  %9451 = vmatpush1.bf16.msra.mxu0 %v16605_v35  ;;  %v16614_v1 = vpack.c.bf16 %v14954_v60, %v14940_v53  ;;  %v16621_v35 = vpack.c.bf16 %v16619_v15, %v16620_v0  ;;  %v16625_v53 = vld [vmem:[#allocation100_spill] sm:$0xff]  ;;  %v16640_v0 = vld [vmem:[#allocation165_spill] sm:$0xff] }
 0x90a   : > { %9354 = vmatprep.subr.bf16.mxu1 %v16606_v25  ;;  %9452 = vmatprep.subr.bf16.mxu0 %v16609_v62  ;;  %v16622_v25 = vld [vmem:[#allocation159_spill] sm:$0xff]  ;;  %v16626_v60 = vld [vmem:[#allocation96_spill] sm:$0xff] }
 0x90b   : > { %v16624_v19 = vpack.c.bf16 %v16622_v25, %v16623_v29  ;;  %v16627_v62 = vpack.c.bf16 %v16625_v53, %v16626_v60  ;;  %v16643_v29 = vld [vmem:[#allocation106_spill] sm:$0xff]  ;;  %v16646_v60 = vld [vmem:[#allocation160_spill] sm:$0xff] }
 0x90c   : > { %9263 = vmatmul.mubr.bf16.gmra.mrb[212].mxu0 %v14597_v5 }
 0x90d   : > { %9355 = vmatpush1.bf16.msra.mxu1 %v16610_v39  ;;  %9453 = vmatpush1.bf16.msra.mxu0 %v16613_v61  ;;  %v16628_v39 = vld [vmem:[#allocation157_spill] sm:$0xff]  ;;  %v16633_v61 = vpack.c.bf16 %v16631_v42, %v16632_v47  ;;  %v16652_v47 = vld [vmem:[#allocation158_spill] sm:$0xff] }
 0x90e   : > { %9356 = vmatprep.subr.bf16.mxu1 %v16614_v1  ;;  %9454 = vmatprep.subr.bf16.mxu0 %v16617_v24  ;;  %v16630_v63 = vpack.c.bf16 %v16628_v39, %v16629_v11  ;;  %v16634_v1 = vld [vmem:[#allocation167_spill] sm:$0xff]  ;;  %v16637_v24 = vld [vmem:[#allocation108_spill] sm:$0xff]  ;;  %v16649_v11 = vld [vmem:[#allocation101_spill] sm:$0xff] }
 0x90f   : > { %10532 = vmatprep.mubr.msk.bf16.mxu0 %vm8752_vm2, %v14613_v45  ;;  %v16636_v59 = vpack.c.bf16 %v16634_v1, %v16635_v3  ;;  %v16655_v3 = vld [vmem:[#allocation99_spill] sm:$0xff] }
 0x911   : > { %9357 = vmatpush1.bf16.msra.mxu1 %v16618_v8  ;;  %9455 = vmatpush1.bf16.msra.mxu0 %v16621_v35  ;;  %v16638_v8 = vld [vmem:[#allocation104_spill] sm:$0xff]  ;;  %v16641_v35 = vld [vmem:[#allocation161_spill] sm:$0xff] }
 0x912   : > { %9456 = vmatprep.subr.bf16.mxu0 %v16624_v19  ;;  %9562 = vmatprep.subr.bf16.mxu1 %v16627_v62  ;;  %v16639_v15 = vpack.c.bf16 %v16637_v24, %v16638_v8  ;;  %v16642_v25 = vpack.c.bf16 %v16640_v0, %v16641_v35  ;;  %v16644_v19 = vld [vmem:[#allocation102_spill] sm:$0xff]  ;;  %v16647_v62 = vld [vmem:[#allocation156_spill] sm:$0xff]  ;;  %v16661_v35 = vld [vmem:[#allocation109_spill] sm:$0xff] }
 0x913   : > { %v16645_v53 = vpack.c.bf16 %v16643_v29, %v16644_v19  ;;  %v16648_v39 = vpack.c.bf16 %v16646_v60, %v16647_v62  ;;  %v16658_v8 = vld [vmem:[#allocation168_spill] sm:$0xff]  ;;  %v11631_v19 = vld [vmem:[#allocation21 + $0x4] ss:$8 sps:$4 sm:$0xff]  }
 0x914   : > { %9367 = vmatmul.mubr.bf16.vlgmr.msra.gmra.mrb[208].mxu1 %v14581_v10  ;;  %9273 = vmatmul.mubr.bf16.gmra.mrb[216].mxu0 %v14640_v46  ;;  %v16665_v60 = vld [vmem:[#allocation162_spill] sm:$0xff] }
 0x915   : > { %9457 = vmatpush1.bf16.msra.mxu0 %v16630_v63  ;;  %9563 = vmatpush1.bf16.msra.mxu1 %v16633_v61  ;;  %v16650_v63 = vld [vmem:[#allocation97_spill] sm:$0xff]  ;;  %v16653_v61 = vld [vmem:[#allocation154_spill] sm:$0xff] }
 0x916   : > { %9458 = vmatprep.subr.bf16.mxu0 %v16636_v59  ;;  %9564 = vmatprep.subr.bf16.mxu1 %v16639_v15  ;;  %v16651_v42 = vpack.c.bf16 %v16649_v11, %v16650_v63  ;;  %v16654_v1 = vpack.c.bf16 %v16652_v47, %v16653_v61  ;;  %v16656_v59 = vld [vmem:[#allocation95_spill] sm:$0xff]  ;;  %v16659_v15 = vld [vmem:[#allocation164_spill] sm:$0xff] }
 0x917   : > { %10551 = vmatprep.mubr.msk.bf16.mxu1 %vm8752_vm2, %v14583_v2  ;;  %10533 = vmatprep.mubr.msk.bf16.mxu0 %vm8752_vm2, %v14659_v14  ;;  %v16657_v24 = vpack.c.bf16 %v16655_v3, %v16656_v59  ;;  %v16660_v0 = vpack.c.bf16 %v16658_v8, %v16659_v15  ;;  %v16668_v11 = vld [vmem:[#allocation103_spill] sm:$0xff]  ;;  %v16674_v3 = vld [vmem:[#allocation173_spill] sm:$0xff]  ;;  %v16677_v8 = vpack.c.bf16 %v15057_v56, %v15046_v49  ;;  %v16686_v49 = vld [vmem:[#allocation176_spill] sm:$0xff] }
 0x918   : > { %v16671_v47 = vld [vmem:[#allocation171_spill] sm:$0xff]  ;;  %v16675_v59 = vld [vmem:[#allocation169_spill] sm:$0xff]  ;;  %v16681_v15 = vpack.c.bf16 %v15050_v50, %v15036_v27  ;;  %v16687_v56 = vld [vmem:[#allocation172_spill] sm:$0xff] }
 0x919   : > { %9459 = vmatpush1.bf16.msra.mxu0 %v16642_v25  ;;  %9565 = vmatpush1.bf16.msra.mxu1 %v16645_v53  ;;  %v16662_v25 = vld [vmem:[#allocation105_spill] sm:$0xff]  ;;  %v16664_v53 = vld [vmem:[#allocation166_spill] sm:$0xff] }
 0x91a   : > { %9460 = vmatprep.subr.bf16.mxu0 %v16648_v39  ;;  %9566 = vmatprep.subr.bf16.mxu1 %v16651_v42  ;;  %v16663_v29 = vpack.c.bf16 %v16661_v35, %v16662_v25  ;;  %v16666_v62 = vpack.c.bf16 %v16664_v53, %v16665_v60  ;;  %v16667_v39 = vld [vmem:[#allocation107_spill] sm:$0xff]  ;;  %v16685_v35 = vpack.c.bf16 %v15008_v40, %v14994_v6  ;;  %v16690_v27 = vld [vmem:[#allocation174_spill] sm:$0xff]  ;;  %v16694_v6 = vld [vmem:[#allocation184_spill] sm:$0xff] }
 0x91b   : > { %v16669_v63 = vpack.c.bf16 %v16667_v39, %v16668_v11  ;;  %v16670_v42 = vld [vmem:[#allocation175_spill] sm:$0xff]  ;;  %v16688_v25 = vpack.c.bf16 %v16686_v49, %v16687_v56  ;;  %v16691_v50 = vld [vmem:[#allocation170_spill] sm:$0xff]  ;;  %v16693_v60 = vpack.c.bf16 %v15069_v48, %v15048_v37  ;;  %v16695_v40 = vld [vmem:[#allocation180_spill] sm:$0xff]  ;;  %v16697_v39 = vpack.c.bf16 %v15055_v43, %v15044_v12 }
 0x91c   : > { %9377 = vmatmul.mubr.bf16.gmra.mrb[212].mxu1 %v14597_v5  ;;  %9283 = vmatmul.mubr.bf16.gmra.mrb[220].mxu0 %v14692_v23  ;;  %v16672_v61 = vpack.c.bf16 %v16670_v42, %v16671_v47  ;;  %v16692_v53 = vpack.c.bf16 %v16690_v27, %v16691_v50  ;;  %v16701_v37 = vpack.c.bf16 %v15101_v55, %v15087_v4 }
 0x91d   : > { %9461 = vmatpush1.bf16.msra.mxu0 %v16654_v1  ;;  %9567 = vmatpush1.bf16.msra.mxu1 %v16657_v24  ;;  %v16673_v1 = vpack.c.bf16 %v14996_v18, %v14982_v22  ;;  %v16676_v24 = vpack.c.bf16 %v16674_v3, %v16675_v59  ;;  %v16682_v22 = vld [vmem:[#allocation181_spill] sm:$0xff]  ;;  %v16702_v12 = vpack.c.bf16 %v15152_v54, %v15138_v34 }
 0x91e   : > { %9462 = vmatprep.subr.bf16.mxu0 %v16660_v0  ;;  %9568 = vmatprep.subr.bf16.mxu1 %v16663_v29  ;;  %v16683_v18 = vld [vmem:[#allocation177_spill] sm:$0xff]  ;;  %v16689_v29 = vpack.c.bf16 %v14998_v17, %v14984_v26  ;;  %v16698_v26 = vld [vmem:[#allocation182_spill] sm:$0xff]  ;;  %v16703_v43 = vpack.c.bf16 %v15120_v36, %v15099_v44 }
 0x91f   : > { %10552 = vmatprep.mubr.msk.bf16.mxu1 %vm8752_vm2, %v14613_v45  ;;  %10570 = vmatprep.mubr.msk.bf16.mxu0 %vm8752_vm2, %v11631_v19  ;;  %v16684_v0 = vpack.c.bf16 %v16682_v22, %v16683_v18  ;;  %v16699_v17 = vld [vmem:[#allocation178_spill] sm:$0xff] }
 0x920   : > { %v16700_v11 = vpack.c.bf16 %v16698_v26, %v16699_v17 }
 0x921   : > { %9463 = vmatpush1.bf16.msra.mxu0 %v16666_v62  ;;  %9569 = vmatpush1.bf16.msra.mxu1 %v16669_v63  ;;  %v16696_v62 = vpack.c.bf16 %v16694_v6, %v16695_v40 }
 0x922   : > { %9464 = vmatprep.subr.bf16.mxu0 %v8183_v13  ;;  %9570 = vmatprep.subr.bf16.mxu1 %v16672_v61  ;;  %v16679_v13 = vld [vmem:[#allocation179_spill] sm:$0xff] }
 0x923   : > { %v16680_v21 = vpack.c.bf16 %v16678_v31, %v16679_v13 }
 0x924   : > { %9387 = vmatmul.mubr.bf16.gmra.mrb[216].mxu1 %v14640_v46 }
 0x925   : > { %9465 = vmatpush1.bf16.msra.mxu0 %v16673_v1  ;;  %9571 = vmatpush1.bf16.msra.mxu1 %v16676_v24 }
 0x926   : > { %9466 = vmatprep.subr.bf16.mxu0 %v16677_v8  ;;  %9572 = vmatprep.subr.bf16.mxu1 %v16680_v21 }
 0x927   : > { %10553 = vmatprep.mubr.msk.bf16.mxu1 %vm8752_vm2, %v14659_v14 }
 0x929   : > { %9467 = vmatpush1.bf16.msra.mxu0 %v16681_v15  ;;  %9573 = vmatpush1.bf16.msra.mxu1 %v16684_v0 }
 0x92a   : > { %9468 = vmatprep.subr.bf16.mxu0 %v16685_v35  ;;  %9574 = vmatprep.subr.bf16.mxu1 %v16688_v25 }
 0x92c   : > { %9397 = vmatmul.mubr.bf16.gmra.mrb[220].mxu1 %v14692_v23 }
 0x92d   : > { %9469 = vmatpush1.bf16.msra.mxu0 %v16689_v29  ;;  %9575 = vmatpush1.bf16.msra.mxu1 %v16692_v53 }
 0x92e   : > { %9470 = vmatprep.subr.bf16.mxu0 %v16693_v60  ;;  %9576 = vmatprep.subr.bf16.mxu1 %v16696_v62 }
 0x92f   : > { %10590 = vmatprep.mubr.msk.bf16.mxu1 %vm8752_vm2, %v11631_v19 }
 0x931   : > { %9471 = vmatpush1.bf16.msra.mxu0 %v16697_v39  ;;  %9577 = vmatpush1.bf16.msra.mxu1 %v16700_v11 }
 0x932   : > { %9578 = vmatprep.subr.bf16.mxu1 %v8187_v57 }
 0x934   : > { %9481 = vmatmul.mubr.bf16.vlgmr.msra.gmra.mrb[224].mxu0 %v14581_v10 }
 0x935   : > { %9579 = vmatpush1.bf16.msra.mxu1 %v16701_v37  ;;  %10571 = vmatprep.mubr.msk.bf16.mxu0 %vm8752_vm2, %v14583_v2 }
 0x936   : > { %9580 = vmatprep.subr.bf16.mxu1 %v8189_v51 }
 0x939   : > { %9581 = vmatpush1.bf16.msra.mxu1 %v16702_v12 }
 0x93a   : > { %9582 = vmatprep.subr.bf16.mxu1 %v16703_v43 }
 0x93c   : > { %9491 = vmatmul.mubr.bf16.gmra.mrb[228].mxu0 %v14597_v5 }
 0x93d   : > { %9583 = vmatpush1.bf16.msra.mxu1 %v16704_v28  ;;  %10572 = vmatprep.mubr.msk.bf16.mxu0 %vm8752_vm2, %v14613_v45 }
 0x93e   : > { %9584 = vmatprep.subr.bf16.mxu1 %v8639_v30 }
 0x941   : > { %9585 = vmatpush1.bf16.msra.mxu1 %v8638_v38 }
 0x944   : > { %9595 = vmatmul.mubr.bf16.vlgmr.msra.gmra.mrb[224].mxu1 %v14581_v10  ;;  %9501 = vmatmul.mubr.bf16.gmra.mrb[232].mxu0 %v14640_v46  ;;  %v8680_v10 = vld [vmem:[#allocation22] sm:$0x3] }
 0x945   : > { %10591 = vmatprep.mubr.msk.bf16.mxu1 %vm8752_vm2, %v14583_v2  ;;  %10573 = vmatprep.mubr.msk.bf16.mxu0 %vm8752_vm2, %v14659_v14  ;;  %v16705_v2 = vld [vmem:[#allocation53_spill] sm:$0xff] }
 0x946   : > { %v15374_v48 = vrot.slane %v8680_v10, %v16705_v2 }
 0x94c   : > { %9605 = vmatmul.mubr.bf16.gmra.mrb[228].mxu1 %v14597_v5  ;;  %9511 = vmatmul.mubr.bf16.gmra.mrb[236].mxu0 %v14692_v23  ;;  %v16706_v5 = vld [vmem:[#allocation51_spill] sm:$0xff] }
 0x94d   : > { %10592 = vmatprep.mubr.msk.bf16.mxu1 %vm8752_vm2, %v14613_v45  ;;  %v15377_v4 = vrot.slane %v8680_v10, %v16706_v5 }
 0x954   : > { %9615 = vmatmul.mubr.bf16.gmra.mrb[232].mxu1 %v14640_v46 }
 0x955   : > { %10593 = vmatprep.mubr.msk.bf16.mxu1 %vm8752_vm2, %v14659_v14 }
 0x95c   : > { %9625 = vmatmul.mubr.bf16.gmra.mrb[236].mxu1 %v14692_v23 }
 0x977   : > { %v8799_v45 = vpop.f32.mrb[176].mxu0 }
 0x978   : > { %v8800_v46 = vadd.f32 %v8799_v45, %v15374_v48  ;;  %v8801_v14 = vpop.f32.mrb[177].mxu0 }
 0x979   : > { %v8802_v23 = vadd.f32 %v8801_v14, %v15377_v4  ;;  %v8803_v7 = vpop.f32.mrb[178].mxu0 }
 0x97a   : > { %8838 = vst [vmem:[%s15382_s16] sm:$0xff] %v8800_v46  ;;  %v8804_v44 = vadd.f32 %v8803_v7, %v15374_v48  ;;  %v8805_v55 = vpop.f32.mrb[179].mxu0 }
 0x97b   : > { %8839 = vst [vmem:[%s15382_s16 + $0x8] sm:$0xff] %v8802_v23  ;;  %v8806_v20 = vadd.f32 %v8805_v55, %v15377_v4 }
 0x97c   : > { %8840 = vst [vmem:[%s15382_s16 + $0x10] sm:$0xff] %v8804_v44 }
 0x97d   : > { %8841 = vst [vmem:[%s15382_s16 + $0x18] sm:$0xff] %v8806_v20 }
 0x97f   : > { %v8809_v16 = vpop.f32.mrb[180].mxu0 }
 0x980   : > { %v8810_v57 = vadd.f32 %v8809_v16, %v15374_v48  ;;  %v8811_v36 = vpop.f32.mrb[181].mxu0 }
 0x981   : > { %v8812_v34 = vadd.f32 %v8811_v36, %v15377_v4  ;;  %v8813_v33 = vpop.f32.mrb[182].mxu0 }
 0x982   : > { %8842 = vst [vmem:[%s15382_s16 + $0x20] sm:$0xff] %v8810_v57  ;;  %v8814_v32 = vadd.f32 %v8813_v33, %v15374_v48  ;;  %v8815_v58 = vpop.f32.mrb[183].mxu0 }
 0x983   : > { %8843 = vst [vmem:[%s15382_s16 + $0x28] sm:$0xff] %v8812_v34  ;;  %v8816_v54 = vadd.f32 %v8815_v58, %v15377_v4 }
 0x984   : > { %8844 = vst [vmem:[%s15382_s16 + $0x30] sm:$0xff] %v8814_v32 }
 0x985   : > { %8845 = vst [vmem:[%s15382_s16 + $0x38] sm:$0xff] %v8816_v54 }
 0x987   : > { %v8912_v41 = vpop.f32.mrb[176].mxu1  ;;  %v8819_v9 = vpop.f32.mrb[184].mxu0 }
 0x988   : > { %v8913_v38 = vadd.f32 %v8912_v41, %v15374_v48  ;;  %v8914_v51 = vpop.f32.mrb[177].mxu1  ;;  %v8820_v52 = vadd.f32 %v8819_v9, %v15374_v48  ;;  %v8821_v30 = vpop.f32.mrb[185].mxu0 }
 0x989   : > { %v8915_v19 = vadd.f32 %v8914_v51, %v15377_v4  ;;  %v8916_v63 = vpop.f32.mrb[178].mxu1  ;;  %v8822_v42 = vadd.f32 %v8821_v30, %v15377_v4  ;;  %v8823_v47 = vpop.f32.mrb[186].mxu0 }
 0x98a   : > { %10474 = vst [vmem:[%s15382_s16 + $0x80] sm:$0xff] %v8913_v38  ;;  %v8917_v61 = vadd.f32 %v8916_v63, %v15374_v48  ;;  %v8918_v1 = vpop.f32.mrb[179].mxu1  ;;  %8846 = vst [vmem:[%s15382_s16 + $0x40] sm:$0xff] %v8820_v52  ;;  %v8824_v3 = vadd.f32 %v8823_v47, %v15374_v48  ;;  %v8825_v59 = vpop.f32.mrb[187].mxu0 }
 0x98b   : > { %10475 = vst [vmem:[%s15382_s16 + $0x88] sm:$0xff] %v8915_v19  ;;  %v8919_v24 = vadd.f32 %v8918_v1, %v15377_v4  ;;  %8847 = vst [vmem:[%s15382_s16 + $0x48] sm:$0xff] %v8822_v42  ;;  %v8826_v8 = vadd.f32 %v8825_v59, %v15377_v4 }
 0x98c   : > { %10476 = vst [vmem:[%s15382_s16 + $0x90] sm:$0xff] %v8917_v61  ;;  %8848 = vst [vmem:[%s15382_s16 + $0x50] sm:$0xff] %v8824_v3 }
 0x98d   : > { %10477 = vst [vmem:[%s15382_s16 + $0x98] sm:$0xff] %v8919_v24  ;;  %8849 = vst [vmem:[%s15382_s16 + $0x58] sm:$0xff] %v8826_v8 }
 0x98f   : > { %v8922_v31 = vpop.f32.mrb[180].mxu1  ;;  %v8829_v13 = vpop.f32.mrb[188].mxu0 }
 0x990   : > { %v8923_v21 = vadd.f32 %v8922_v31, %v15374_v48  ;;  %v8924_v15 = vpop.f32.mrb[181].mxu1  ;;  %v8830_v22 = vadd.f32 %v8829_v13, %v15374_v48  ;;  %v8831_v18 = vpop.f32.mrb[189].mxu0 }
 0x991   : > { %v8925_v0 = vadd.f32 %v8924_v15, %v15377_v4  ;;  %v8926_v35 = vpop.f32.mrb[182].mxu1  ;;  %v8832_v49 = vadd.f32 %v8831_v18, %v15377_v4  ;;  %v8833_v56 = vpop.f32.mrb[190].mxu0 }
 0x992   : > { %10478 = vst [vmem:[%s15382_s16 + $0xa0] sm:$0xff] %v8923_v21  ;;  %v8927_v25 = vadd.f32 %v8926_v35, %v15374_v48  ;;  %v8928_v29 = vpop.f32.mrb[183].mxu1  ;;  %8850 = vst [vmem:[%s15382_s16 + $0x60] sm:$0xff] %v8830_v22  ;;  %v8834_v27 = vadd.f32 %v8833_v56, %v15374_v48  ;;  %v8835_v50 = vpop.f32.mrb[191].mxu0 }
 0x993   : > { %10479 = vst [vmem:[%s15382_s16 + $0xa8] sm:$0xff] %v8925_v0  ;;  %v8929_v53 = vadd.f32 %v8928_v29, %v15377_v4  ;;  %8851 = vst [vmem:[%s15382_s16 + $0x68] sm:$0xff] %v8832_v49  ;;  %v8836_v60 = vadd.f32 %v8835_v50, %v15377_v4 }
 0x994   : > { %10480 = vst [vmem:[%s15382_s16 + $0xb0] sm:$0xff] %v8927_v25  ;;  %8852 = vst [vmem:[%s15382_s16 + $0x70] sm:$0xff] %v8834_v27 }
 0x995   : > { %10481 = vst [vmem:[%s15382_s16 + $0xb8] sm:$0xff] %v8929_v53  ;;  %8853 = vst [vmem:[%s15382_s16 + $0x78] sm:$0xff] %v8836_v60 }
 0x997   : > { %v8932_v6 = vpop.f32.mrb[184].mxu1 }
 0x998   : > { %v8933_v40 = vadd.f32 %v8932_v6, %v15374_v48  ;;  %v8934_v62 = vpop.f32.mrb[185].mxu1 }
 0x999   : > { %v8935_v39 = vadd.f32 %v8934_v62, %v15377_v4  ;;  %v8936_v26 = vpop.f32.mrb[186].mxu1 }
 0x99a   : > { %10482 = vst [vmem:[%s15382_s16 + $0xc0] sm:$0xff] %v8933_v40  ;;  %v8937_v17 = vadd.f32 %v8936_v26, %v15374_v48  ;;  %v8938_v11 = vpop.f32.mrb[187].mxu1 }
 0x99b   : > { %10483 = vst [vmem:[%s15382_s16 + $0xc8] sm:$0xff] %v8935_v39  ;;  %v8939_v37 = vadd.f32 %v8938_v11, %v15377_v4 }
 0x99c   : > { %10484 = vst [vmem:[%s15382_s16 + $0xd0] sm:$0xff] %v8937_v17 }
 0x99d   : > { %10485 = vst [vmem:[%s15382_s16 + $0xd8] sm:$0xff] %v8939_v37 }
 0x99f   : > { %v8942_v12 = vpop.f32.mrb[188].mxu1 }
 0x9a0   : > { %v8943_v43 = vadd.f32 %v8942_v12, %v15374_v48  ;;  %v8944_v28 = vpop.f32.mrb[189].mxu1 }
 0x9a1   : > { %v8945_v10 = vadd.f32 %v8944_v28, %v15377_v4  ;;  %v8946_v2 = vpop.f32.mrb[190].mxu1 }
 0x9a2   : > { %10486 = vst [vmem:[%s15382_s16 + $0xe0] sm:$0xff] %v8943_v43  ;;  %v8947_v5 = vadd.f32 %v8946_v2, %v15374_v48  ;;  %v8948_v45 = vpop.f32.mrb[191].mxu1 }
 0x9a3   : > { %10487 = vst [vmem:[%s15382_s16 + $0xe8] sm:$0xff] %v8945_v10  ;;  %v8949_v46 = vadd.f32 %v8948_v45, %v15377_v4 }
 0x9a4   : > { %10488 = vst [vmem:[%s15382_s16 + $0xf0] sm:$0xff] %v8947_v5 }
 0x9a5   : > { %10489 = vst [vmem:[%s15382_s16 + $0xf8] sm:$0xff] %v8949_v46 }
 0x9a7   : > { %v9026_v14 = vpop.f32.mrb[192].mxu0 }
 0x9a8   : > { %v9027_v23 = vadd.f32 %v9026_v14, %v15374_v48  ;;  %v9028_v7 = vpop.f32.mrb[193].mxu0 }
 0x9a9   : > { %v9029_v44 = vadd.f32 %v9028_v7, %v15377_v4  ;;  %v9030_v55 = vpop.f32.mrb[194].mxu0 }
 0x9aa   : > { %10494 = vst [vmem:[%s15382_s16 + $0x100] sm:$0xff] %v9027_v23  ;;  %v9031_v20 = vadd.f32 %v9030_v55, %v15374_v48  ;;  %v9032_v16 = vpop.f32.mrb[195].mxu0 }
 0x9ab   : > { %10495 = vst [vmem:[%s15382_s16 + $0x108] sm:$0xff] %v9029_v44  ;;  %v9033_v57 = vadd.f32 %v9032_v16, %v15377_v4 }
 0x9ac   : > { %10496 = vst [vmem:[%s15382_s16 + $0x110] sm:$0xff] %v9031_v20 }
 0x9ad   : > { %10497 = vst [vmem:[%s15382_s16 + $0x118] sm:$0xff] %v9033_v57 }
 0x9af   : > { %v9036_v36 = vpop.f32.mrb[196].mxu0 }
 0x9b0   : > { %v9037_v34 = vadd.f32 %v9036_v36, %v15374_v48  ;;  %v9038_v33 = vpop.f32.mrb[197].mxu0 }
 0x9b1   : > { %v9039_v32 = vadd.f32 %v9038_v33, %v15377_v4  ;;  %v9040_v58 = vpop.f32.mrb[198].mxu0 }
 0x9b2   : > { %10498 = vst [vmem:[%s15382_s16 + $0x120] sm:$0xff] %v9037_v34  ;;  %v9041_v54 = vadd.f32 %v9040_v58, %v15374_v48  ;;  %v9042_v41 = vpop.f32.mrb[199].mxu0 }
 0x9b3   : > { %10499 = vst [vmem:[%s15382_s16 + $0x128] sm:$0xff] %v9039_v32  ;;  %v9043_v9 = vadd.f32 %v9042_v41, %v15377_v4 }
 0x9b4   : > { %10500 = vst [vmem:[%s15382_s16 + $0x130] sm:$0xff] %v9041_v54 }
 0x9b5   : > { %10501 = vst [vmem:[%s15382_s16 + $0x138] sm:$0xff] %v9043_v9 }
 0x9b7   : > { %v9140_v38 = vpop.f32.mrb[192].mxu1  ;;  %v9046_v51 = vpop.f32.mrb[200].mxu0 }
 0x9b8   : > { %v9141_v52 = vadd.f32 %v9140_v38, %v15374_v48  ;;  %v9142_v30 = vpop.f32.mrb[193].mxu1  ;;  %v9047_v19 = vadd.f32 %v9046_v51, %v15374_v48  ;;  %v9048_v63 = vpop.f32.mrb[201].mxu0 }
 0x9b9   : > { %v9143_v42 = vadd.f32 %v9142_v30, %v15377_v4  ;;  %v9144_v47 = vpop.f32.mrb[194].mxu1  ;;  %v9049_v61 = vadd.f32 %v9048_v63, %v15377_v4  ;;  %v9050_v1 = vpop.f32.mrb[202].mxu0 }
 0x9ba   : > { %10514 = vst [vmem:[%s15382_s16 + $0x180] sm:$0xff] %v9141_v52  ;;  %v9145_v3 = vadd.f32 %v9144_v47, %v15374_v48  ;;  %v9146_v59 = vpop.f32.mrb[195].mxu1  ;;  %10502 = vst [vmem:[%s15382_s16 + $0x140] sm:$0xff] %v9047_v19  ;;  %v9051_v24 = vadd.f32 %v9050_v1, %v15374_v48  ;;  %v9052_v8 = vpop.f32.mrb[203].mxu0 }
 0x9bb   : > { %10515 = vst [vmem:[%s15382_s16 + $0x188] sm:$0xff] %v9143_v42  ;;  %v9147_v31 = vadd.f32 %v9146_v59, %v15377_v4  ;;  %10503 = vst [vmem:[%s15382_s16 + $0x148] sm:$0xff] %v9049_v61  ;;  %v9053_v13 = vadd.f32 %v9052_v8, %v15377_v4 }
 0x9bc   : > { %10516 = vst [vmem:[%s15382_s16 + $0x190] sm:$0xff] %v9145_v3  ;;  %10504 = vst [vmem:[%s15382_s16 + $0x150] sm:$0xff] %v9051_v24 }
 0x9bd   : > { %10517 = vst [vmem:[%s15382_s16 + $0x198] sm:$0xff] %v9147_v31  ;;  %10505 = vst [vmem:[%s15382_s16 + $0x158] sm:$0xff] %v9053_v13 }
 0x9bf   : > { %v9150_v21 = vpop.f32.mrb[196].mxu1  ;;  %v9056_v15 = vpop.f32.mrb[204].mxu0 }
 0x9c0   : > { %v9151_v22 = vadd.f32 %v9150_v21, %v15374_v48  ;;  %v9152_v18 = vpop.f32.mrb[197].mxu1  ;;  %v9057_v0 = vadd.f32 %v9056_v15, %v15374_v48  ;;  %v9058_v35 = vpop.f32.mrb[205].mxu0 }
 0x9c1   : > { %v9153_v49 = vadd.f32 %v9152_v18, %v15377_v4  ;;  %v9154_v56 = vpop.f32.mrb[198].mxu1  ;;  %v9059_v25 = vadd.f32 %v9058_v35, %v15377_v4  ;;  %v9060_v29 = vpop.f32.mrb[206].mxu0 }
 0x9c2   : > { %10518 = vst [vmem:[%s15382_s16 + $0x1a0] sm:$0xff] %v9151_v22  ;;  %v9155_v27 = vadd.f32 %v9154_v56, %v15374_v48  ;;  %v9156_v50 = vpop.f32.mrb[199].mxu1  ;;  %10506 = vst [vmem:[%s15382_s16 + $0x160] sm:$0xff] %v9057_v0  ;;  %v9061_v53 = vadd.f32 %v9060_v29, %v15374_v48  ;;  %v9062_v60 = vpop.f32.mrb[207].mxu0 }
 0x9c3   : > { %10519 = vst [vmem:[%s15382_s16 + $0x1a8] sm:$0xff] %v9153_v49  ;;  %v9157_v6 = vadd.f32 %v9156_v50, %v15377_v4  ;;  %10507 = vst [vmem:[%s15382_s16 + $0x168] sm:$0xff] %v9059_v25  ;;  %v9063_v40 = vadd.f32 %v9062_v60, %v15377_v4 }
 0x9c4   : > { %10520 = vst [vmem:[%s15382_s16 + $0x1b0] sm:$0xff] %v9155_v27  ;;  %10508 = vst [vmem:[%s15382_s16 + $0x170] sm:$0xff] %v9061_v53 }
 0x9c5   : > { %10521 = vst [vmem:[%s15382_s16 + $0x1b8] sm:$0xff] %v9157_v6  ;;  %10509 = vst [vmem:[%s15382_s16 + $0x178] sm:$0xff] %v9063_v40 }
 0x9c7   : > { %v9160_v62 = vpop.f32.mrb[200].mxu1 }
 0x9c8   : > { %v9161_v39 = vadd.f32 %v9160_v62, %v15374_v48  ;;  %v9162_v26 = vpop.f32.mrb[201].mxu1 }
 0x9c9   : > { %v9163_v17 = vadd.f32 %v9162_v26, %v15377_v4  ;;  %v9164_v11 = vpop.f32.mrb[202].mxu1 }
 0x9ca   : > { %10522 = vst [vmem:[%s15382_s16 + $0x1c0] sm:$0xff] %v9161_v39  ;;  %v9165_v37 = vadd.f32 %v9164_v11, %v15374_v48  ;;  %v9166_v12 = vpop.f32.mrb[203].mxu1 }
 0x9cb   : > { %10523 = vst [vmem:[%s15382_s16 + $0x1c8] sm:$0xff] %v9163_v17  ;;  %v9167_v43 = vadd.f32 %v9166_v12, %v15377_v4 }
 0x9cc   : > { %10524 = vst [vmem:[%s15382_s16 + $0x1d0] sm:$0xff] %v9165_v37 }
 0x9cd   : > { %10525 = vst [vmem:[%s15382_s16 + $0x1d8] sm:$0xff] %v9167_v43 }
 0x9cf   : > { %v9170_v28 = vpop.f32.mrb[204].mxu1 }
 0x9d0   : > { %v9171_v10 = vadd.f32 %v9170_v28, %v15374_v48  ;;  %v9172_v2 = vpop.f32.mrb[205].mxu1 }
 0x9d1   : > { %v9173_v5 = vadd.f32 %v9172_v2, %v15377_v4  ;;  %v9174_v45 = vpop.f32.mrb[206].mxu1 }
 0x9d2   : > { %10526 = vst [vmem:[%s15382_s16 + $0x1e0] sm:$0xff] %v9171_v10  ;;  %v9175_v46 = vadd.f32 %v9174_v45, %v15374_v48  ;;  %v9176_v14 = vpop.f32.mrb[207].mxu1 }
 0x9d3   : > { %10527 = vst [vmem:[%s15382_s16 + $0x1e8] sm:$0xff] %v9173_v5  ;;  %v9177_v23 = vadd.f32 %v9176_v14, %v15377_v4 }
 0x9d4   : > { %10528 = vst [vmem:[%s15382_s16 + $0x1f0] sm:$0xff] %v9175_v46 }
 0x9d5   : > { %10529 = vst [vmem:[%s15382_s16 + $0x1f8] sm:$0xff] %v9177_v23 }
 0x9d7   : > { %v9254_v7 = vpop.f32.mrb[208].mxu0 }
 0x9d8   : > { %v9255_v44 = vadd.f32 %v9254_v7, %v15374_v48  ;;  %v9256_v55 = vpop.f32.mrb[209].mxu0 }
 0x9d9   : > { %v9257_v20 = vadd.f32 %v9256_v55, %v15377_v4  ;;  %v9258_v16 = vpop.f32.mrb[210].mxu0 }
 0x9da   : > { %10534 = vst [vmem:[%s15382_s16 + $0x200] sm:$0xff] %v9255_v44  ;;  %v9259_v57 = vadd.f32 %v9258_v16, %v15374_v48  ;;  %v9260_v36 = vpop.f32.mrb[211].mxu0 }
 0x9db   : > { %10535 = vst [vmem:[%s15382_s16 + $0x208] sm:$0xff] %v9257_v20  ;;  %v9261_v34 = vadd.f32 %v9260_v36, %v15377_v4 }
 0x9dc   : > { %10536 = vst [vmem:[%s15382_s16 + $0x210] sm:$0xff] %v9259_v57 }
 0x9dd   : > { %10537 = vst [vmem:[%s15382_s16 + $0x218] sm:$0xff] %v9261_v34 }
 0x9df   : > { %v9264_v33 = vpop.f32.mrb[212].mxu0 }
 0x9e0   : > { %v9265_v32 = vadd.f32 %v9264_v33, %v15374_v48  ;;  %v9266_v58 = vpop.f32.mrb[213].mxu0 }
 0x9e1   : > { %v9267_v54 = vadd.f32 %v9266_v58, %v15377_v4  ;;  %v9268_v41 = vpop.f32.mrb[214].mxu0 }
 0x9e2   : > { %10538 = vst [vmem:[%s15382_s16 + $0x220] sm:$0xff] %v9265_v32  ;;  %v9269_v9 = vadd.f32 %v9268_v41, %v15374_v48  ;;  %v9270_v38 = vpop.f32.mrb[215].mxu0 }
 0x9e3   : > { %10539 = vst [vmem:[%s15382_s16 + $0x228] sm:$0xff] %v9267_v54  ;;  %v9271_v51 = vadd.f32 %v9270_v38, %v15377_v4 }
 0x9e4   : > { %10540 = vst [vmem:[%s15382_s16 + $0x230] sm:$0xff] %v9269_v9 }
 0x9e5   : > { %10541 = vst [vmem:[%s15382_s16 + $0x238] sm:$0xff] %v9271_v51 }
 0x9e7   : > { %v9368_v52 = vpop.f32.mrb[208].mxu1  ;;  %v9274_v30 = vpop.f32.mrb[216].mxu0 }
 0x9e8   : > { %v9369_v19 = vadd.f32 %v9368_v52, %v15374_v48  ;;  %v9370_v63 = vpop.f32.mrb[209].mxu1  ;;  %v9275_v42 = vadd.f32 %v9274_v30, %v15374_v48  ;;  %v9276_v47 = vpop.f32.mrb[217].mxu0 }
 0x9e9   : > { %v9371_v61 = vadd.f32 %v9370_v63, %v15377_v4  ;;  %v9372_v1 = vpop.f32.mrb[210].mxu1  ;;  %v9277_v3 = vadd.f32 %v9276_v47, %v15377_v4  ;;  %v9278_v59 = vpop.f32.mrb[218].mxu0 }
 0x9ea   : > { %10554 = vst [vmem:[%s15382_s16 + $0x280] sm:$0xff] %v9369_v19  ;;  %v9373_v24 = vadd.f32 %v9372_v1, %v15374_v48  ;;  %v9374_v8 = vpop.f32.mrb[211].mxu1  ;;  %10542 = vst [vmem:[%s15382_s16 + $0x240] sm:$0xff] %v9275_v42  ;;  %v9279_v31 = vadd.f32 %v9278_v59, %v15374_v48  ;;  %v9280_v13 = vpop.f32.mrb[219].mxu0 }
 0x9eb   : > { %10555 = vst [vmem:[%s15382_s16 + $0x288] sm:$0xff] %v9371_v61  ;;  %v9375_v21 = vadd.f32 %v9374_v8, %v15377_v4  ;;  %10543 = vst [vmem:[%s15382_s16 + $0x248] sm:$0xff] %v9277_v3  ;;  %v9281_v15 = vadd.f32 %v9280_v13, %v15377_v4 }
 0x9ec   : > { %10556 = vst [vmem:[%s15382_s16 + $0x290] sm:$0xff] %v9373_v24  ;;  %10544 = vst [vmem:[%s15382_s16 + $0x250] sm:$0xff] %v9279_v31 }
 0x9ed   : > { %10557 = vst [vmem:[%s15382_s16 + $0x298] sm:$0xff] %v9375_v21  ;;  %10545 = vst [vmem:[%s15382_s16 + $0x258] sm:$0xff] %v9281_v15 }
 0x9ef   : > { %v9378_v22 = vpop.f32.mrb[212].mxu1  ;;  %v9284_v18 = vpop.f32.mrb[220].mxu0 }
 0x9f0   : > { %v9379_v0 = vadd.f32 %v9378_v22, %v15374_v48  ;;  %v9380_v35 = vpop.f32.mrb[213].mxu1  ;;  %v9285_v49 = vadd.f32 %v9284_v18, %v15374_v48  ;;  %v9286_v56 = vpop.f32.mrb[221].mxu0 }
 0x9f1   : > { %v9381_v25 = vadd.f32 %v9380_v35, %v15377_v4  ;;  %v9382_v29 = vpop.f32.mrb[214].mxu1  ;;  %v9287_v27 = vadd.f32 %v9286_v56, %v15377_v4  ;;  %v9288_v50 = vpop.f32.mrb[222].mxu0 }
 0x9f2   : > { %10558 = vst [vmem:[%s15382_s16 + $0x2a0] sm:$0xff] %v9379_v0  ;;  %v9383_v53 = vadd.f32 %v9382_v29, %v15374_v48  ;;  %v9384_v60 = vpop.f32.mrb[215].mxu1  ;;  %10546 = vst [vmem:[%s15382_s16 + $0x260] sm:$0xff] %v9285_v49  ;;  %v9289_v6 = vadd.f32 %v9288_v50, %v15374_v48  ;;  %v9290_v40 = vpop.f32.mrb[223].mxu0 }
 0x9f3   : > { %10559 = vst [vmem:[%s15382_s16 + $0x2a8] sm:$0xff] %v9381_v25  ;;  %v9385_v62 = vadd.f32 %v9384_v60, %v15377_v4  ;;  %10547 = vst [vmem:[%s15382_s16 + $0x268] sm:$0xff] %v9287_v27  ;;  %v9291_v39 = vadd.f32 %v9290_v40, %v15377_v4 }
 0x9f4   : > { %10560 = vst [vmem:[%s15382_s16 + $0x2b0] sm:$0xff] %v9383_v53  ;;  %10548 = vst [vmem:[%s15382_s16 + $0x270] sm:$0xff] %v9289_v6 }
 0x9f5   : > { %10561 = vst [vmem:[%s15382_s16 + $0x2b8] sm:$0xff] %v9385_v62  ;;  %10549 = vst [vmem:[%s15382_s16 + $0x278] sm:$0xff] %v9291_v39 }
 0x9f7   : > { %v9388_v26 = vpop.f32.mrb[216].mxu1 }
 0x9f8   : > { %v9389_v17 = vadd.f32 %v9388_v26, %v15374_v48  ;;  %v9390_v11 = vpop.f32.mrb[217].mxu1 }
 0x9f9   : > { %v9391_v37 = vadd.f32 %v9390_v11, %v15377_v4  ;;  %v9392_v12 = vpop.f32.mrb[218].mxu1 }
 0x9fa   : > { %10562 = vst [vmem:[%s15382_s16 + $0x2c0] sm:$0xff] %v9389_v17  ;;  %v9393_v43 = vadd.f32 %v9392_v12, %v15374_v48  ;;  %v9394_v28 = vpop.f32.mrb[219].mxu1 }
 0x9fb   : > { %10563 = vst [vmem:[%s15382_s16 + $0x2c8] sm:$0xff] %v9391_v37  ;;  %v9395_v10 = vadd.f32 %v9394_v28, %v15377_v4 }
 0x9fc   : > { %10564 = vst [vmem:[%s15382_s16 + $0x2d0] sm:$0xff] %v9393_v43 }
 0x9fd   : > { %10565 = vst [vmem:[%s15382_s16 + $0x2d8] sm:$0xff] %v9395_v10 }
 0x9ff   : > { %v9398_v2 = vpop.f32.mrb[220].mxu1 }
 0xa00   : > { %v9399_v5 = vadd.f32 %v9398_v2, %v15374_v48  ;;  %v9400_v45 = vpop.f32.mrb[221].mxu1 }
 0xa01   : > { %v9401_v46 = vadd.f32 %v9400_v45, %v15377_v4  ;;  %v9402_v14 = vpop.f32.mrb[222].mxu1 }
 0xa02   : > { %10566 = vst [vmem:[%s15382_s16 + $0x2e0] sm:$0xff] %v9399_v5  ;;  %v9403_v23 = vadd.f32 %v9402_v14, %v15374_v48  ;;  %v9404_v7 = vpop.f32.mrb[223].mxu1 }
 0xa03   : > { %10567 = vst [vmem:[%s15382_s16 + $0x2e8] sm:$0xff] %v9401_v46  ;;  %v9405_v44 = vadd.f32 %v9404_v7, %v15377_v4 }
 0xa04   : > { %10568 = vst [vmem:[%s15382_s16 + $0x2f0] sm:$0xff] %v9403_v23 }
 0xa05   : > { %10569 = vst [vmem:[%s15382_s16 + $0x2f8] sm:$0xff] %v9405_v44 }
 0xa07   : > { %v9482_v55 = vpop.f32.mrb[224].mxu0 }
 0xa08   : > { %v9483_v20 = vadd.f32 %v9482_v55, %v15374_v48  ;;  %v9484_v16 = vpop.f32.mrb[225].mxu0 }
 0xa09   : > { %v9485_v57 = vadd.f32 %v9484_v16, %v15377_v4  ;;  %v9486_v36 = vpop.f32.mrb[226].mxu0 }
 0xa0a   : > { %10574 = vst [vmem:[%s15382_s16 + $0x300] sm:$0xff] %v9483_v20  ;;  %v9487_v34 = vadd.f32 %v9486_v36, %v15374_v48  ;;  %v9488_v33 = vpop.f32.mrb[227].mxu0 }
 0xa0b   : > { %10575 = vst [vmem:[%s15382_s16 + $0x308] sm:$0xff] %v9485_v57  ;;  %v9489_v32 = vadd.f32 %v9488_v33, %v15377_v4 }
 0xa0c   : > { %10576 = vst [vmem:[%s15382_s16 + $0x310] sm:$0xff] %v9487_v34 }
 0xa0d   : > { %10577 = vst [vmem:[%s15382_s16 + $0x318] sm:$0xff] %v9489_v32 }
 0xa0f   : > { %v9492_v58 = vpop.f32.mrb[228].mxu0 }
 0xa10   : > { %v9493_v54 = vadd.f32 %v9492_v58, %v15374_v48  ;;  %v9494_v41 = vpop.f32.mrb[229].mxu0 }
 0xa11   : > { %v9495_v9 = vadd.f32 %v9494_v41, %v15377_v4  ;;  %v9496_v38 = vpop.f32.mrb[230].mxu0 }
 0xa12   : > { %10578 = vst [vmem:[%s15382_s16 + $0x320] sm:$0xff] %v9493_v54  ;;  %v9497_v51 = vadd.f32 %v9496_v38, %v15374_v48  ;;  %v9498_v52 = vpop.f32.mrb[231].mxu0 }
 0xa13   : > { %10579 = vst [vmem:[%s15382_s16 + $0x328] sm:$0xff] %v9495_v9  ;;  %v9499_v30 = vadd.f32 %v9498_v52, %v15377_v4 }
 0xa14   : > { %10580 = vst [vmem:[%s15382_s16 + $0x330] sm:$0xff] %v9497_v51 }
 0xa15   : > { %10581 = vst [vmem:[%s15382_s16 + $0x338] sm:$0xff] %v9499_v30 }
 0xa17   : > { %v9596_v19 = vpop.f32.mrb[224].mxu1  ;;  %v9502_v63 = vpop.f32.mrb[232].mxu0 }
 0xa18   : > { %v9597_v42 = vadd.f32 %v9596_v19, %v15374_v48  ;;  %v9598_v47 = vpop.f32.mrb[225].mxu1  ;;  %v9503_v61 = vadd.f32 %v9502_v63, %v15374_v48  ;;  %v9504_v1 = vpop.f32.mrb[233].mxu0 }
 0xa19   : > { %v9599_v3 = vadd.f32 %v9598_v47, %v15377_v4  ;;  %v9600_v59 = vpop.f32.mrb[226].mxu1  ;;  %v9505_v24 = vadd.f32 %v9504_v1, %v15377_v4  ;;  %v9506_v8 = vpop.f32.mrb[234].mxu0 }
 0xa1a   : > { %10594 = vst [vmem:[%s15382_s16 + $0x380] sm:$0xff] %v9597_v42  ;;  %v9601_v31 = vadd.f32 %v9600_v59, %v15374_v48  ;;  %v9602_v13 = vpop.f32.mrb[227].mxu1  ;;  %10582 = vst [vmem:[%s15382_s16 + $0x340] sm:$0xff] %v9503_v61  ;;  %v9507_v21 = vadd.f32 %v9506_v8, %v15374_v48  ;;  %v9508_v15 = vpop.f32.mrb[235].mxu0 }
 0xa1b   : > { %10595 = vst [vmem:[%s15382_s16 + $0x388] sm:$0xff] %v9599_v3  ;;  %v9603_v22 = vadd.f32 %v9602_v13, %v15377_v4  ;;  %10583 = vst [vmem:[%s15382_s16 + $0x348] sm:$0xff] %v9505_v24  ;;  %v9509_v18 = vadd.f32 %v9508_v15, %v15377_v4 }
 0xa1c   : > { %10596 = vst [vmem:[%s15382_s16 + $0x390] sm:$0xff] %v9601_v31  ;;  %10584 = vst [vmem:[%s15382_s16 + $0x350] sm:$0xff] %v9507_v21 }
 0xa1d   : > { %10597 = vst [vmem:[%s15382_s16 + $0x398] sm:$0xff] %v9603_v22  ;;  %10585 = vst [vmem:[%s15382_s16 + $0x358] sm:$0xff] %v9509_v18 }
 0xa1f   : > { %v9606_v0 = vpop.f32.mrb[228].mxu1  ;;  %v9512_v35 = vpop.f32.mrb[236].mxu0 }
 0xa20   : > { %v9607_v49 = vadd.f32 %v9606_v0, %v15374_v48  ;;  %v9608_v56 = vpop.f32.mrb[229].mxu1  ;;  %v9513_v25 = vadd.f32 %v9512_v35, %v15374_v48  ;;  %v9514_v29 = vpop.f32.mrb[237].mxu0 }
 0xa21   : > { %v9609_v27 = vadd.f32 %v9608_v56, %v15377_v4  ;;  %v9610_v50 = vpop.f32.mrb[230].mxu1  ;;  %v9515_v53 = vadd.f32 %v9514_v29, %v15377_v4  ;;  %v9516_v60 = vpop.f32.mrb[238].mxu0 }
 0xa22   : > { %10598 = vst [vmem:[%s15382_s16 + $0x3a0] sm:$0xff] %v9607_v49  ;;  %v9611_v6 = vadd.f32 %v9610_v50, %v15374_v48  ;;  %v9612_v40 = vpop.f32.mrb[231].mxu1  ;;  %10586 = vst [vmem:[%s15382_s16 + $0x360] sm:$0xff] %v9513_v25  ;;  %v9517_v62 = vadd.f32 %v9516_v60, %v15374_v48  ;;  %v9518_v39 = vpop.f32.mrb[239].mxu0 }
 0xa23   : > { %10599 = vst [vmem:[%s15382_s16 + $0x3a8] sm:$0xff] %v9609_v27  ;;  %v9613_v26 = vadd.f32 %v9612_v40, %v15377_v4  ;;  %10587 = vst [vmem:[%s15382_s16 + $0x368] sm:$0xff] %v9515_v53  ;;  %v9519_v17 = vadd.f32 %v9518_v39, %v15377_v4 }
 0xa24   : > { %10600 = vst [vmem:[%s15382_s16 + $0x3b0] sm:$0xff] %v9611_v6  ;;  %10588 = vst [vmem:[%s15382_s16 + $0x370] sm:$0xff] %v9517_v62 }
 0xa25   : > { %10601 = vst [vmem:[%s15382_s16 + $0x3b8] sm:$0xff] %v9613_v26  ;;  %10589 = vst [vmem:[%s15382_s16 + $0x378] sm:$0xff] %v9519_v17 }
 0xa27   : > { %v9616_v11 = vpop.f32.mrb[232].mxu1 }
 0xa28   : > { %v9617_v37 = vadd.f32 %v9616_v11, %v15374_v48  ;;  %v9618_v12 = vpop.f32.mrb[233].mxu1 }
 0xa29   : > { %v9619_v43 = vadd.f32 %v9618_v12, %v15377_v4  ;;  %v9620_v28 = vpop.f32.mrb[234].mxu1 }
 0xa2a   : > { %10602 = vst [vmem:[%s15382_s16 + $0x3c0] sm:$0xff] %v9617_v37  ;;  %v9621_v10 = vadd.f32 %v9620_v28, %v15374_v48  ;;  %v9622_v2 = vpop.f32.mrb[235].mxu1 }
 0xa2b   : > { %10603 = vst [vmem:[%s15382_s16 + $0x3c8] sm:$0xff] %v9619_v43  ;;  %v9623_v5 = vadd.f32 %v9622_v2, %v15377_v4 }
 0xa2c   : > { %10604 = vst [vmem:[%s15382_s16 + $0x3d0] sm:$0xff] %v9621_v10 }
 0xa2d   : > { %10605 = vst [vmem:[%s15382_s16 + $0x3d8] sm:$0xff] %v9623_v5 }
 0xa2f   : > { %v9626_v45 = vpop.f32.mrb[236].mxu1 }
 0xa30   : > { %v9627_v46 = vadd.f32 %v9626_v45, %v15374_v48  ;;  %v9628_v14 = vpop.f32.mrb[237].mxu1 }
 0xa31   : > { %v9629_v23 = vadd.f32 %v9628_v14, %v15377_v4  ;;  %v9630_v7 = vpop.f32.mrb[238].mxu1 }
 0xa32   : > { %10606 = vst [vmem:[%s15382_s16 + $0x3e0] sm:$0xff] %v9627_v46  ;;  %v9631_v44 = vadd.f32 %v9630_v7, %v15374_v48  ;;  %v9632_v55 = vpop.f32.mrb[239].mxu1 }
 0xa33   : > { %10607 = vst [vmem:[%s15382_s16 + $0x3e8] sm:$0xff] %v9629_v23  ;;  %v9633_v20 = vadd.f32 %v9632_v55, %v15377_v4 }
 0xa34   : > { %10608 = vst [vmem:[%s15382_s16 + $0x3f0] sm:$0xff] %v9631_v44 }
 0xa35   : > { %10609 = vst [vmem:[%s15382_s16 + $0x3f8] sm:$0xff] %v9633_v20 }
 0xa36 PF: > { %s27_s17 = sadd.s32 1, %s11942_s17  }
 0xa37   : > { %p24_p3 = scmp.ge.s32.totalorder %s27_s17, 4  }
 0xa39   :  { %26 = sbr.rel (!%p24_p3) target bundleno = 9 (0x9), region = 156 }
 0xa40   :  { %9676 = vsyncpa [#allocation9], 1 }
 0xa41   :  { %9678 = vsyncpa [#allocation9 + $0x1], 1 }
 0xa42   :  { %9679 = vsyncpa [#allocation11], 1 }
 0xa43   :  { %9680 = vsyncpa [#allocation14], 1 }
 0xa44   :  { %9681 = vsyncpa [#allocation17], 1 }
 0xa45   :  { %9682 = vsyncpa [#allocation20], 1 }
 0xa46   :  { %9683 = vsyncpa [#allocation23], 1 }

</bundles_post_ra>
